<compile_context>
chip_gen: v7x
topology: tpu7x:2x2x1
jax: 0.10.0
libtpu: 0.0.40
codegen_flags: <defaults>
</compile_context>

<pallas_src>
import math

import jax
import jax.numpy as jnp
from jax.experimental import pallas as pl
from jax.experimental.pallas import tpu as pltpu

C1P = 32            # conv1 out-channels padded (real 20); also conv1 im2col K pad (real 25)
C2P = 128           # conv2 out-channels padded (real 50)
FC1P = 512          # fc1 out padded (real 500)
NLOGIT = 128        # fc2 out padded (real 10)
FEAT = 4 * 4 * C2P  # 2048 flattened features per image


# ----------------------------- Pallas kernels ------------------------------ #

def _features_kernel(cols_ref, w1_ref, b1_ref, w2_ref, b2_ref, o_ref, p1_ref):
    """conv1+ReLU+pool and conv2+ReLU+pool+flatten for ONE image, all in VMEM.

    cols_ref: (1, 4, 144, 32)  conv1 im2col, one slab per 2x2-pool phase
    w1_ref:   (32, 32)         conv1 weights (tap, cout), normalize folded, zero-padded
    b1_ref:   (1, 32)
    w2_ref:   (25, 32, 128)    conv2 weights (tap, cin, cout), zero-padded
    b2_ref:   (1, 128)
    o_ref:    (1, 1, 2048)     flattened features, index = (h*4 + w)*128 + c
    p1_ref:   VMEM scratch (12, 12, 32) -- pooled conv1 activation
    """
    # ---- conv1: one matmul per pool phase; the 2x2 maxpool == max over phases.
    w1 = w1_ref[...]
    m = None
    for ph in range(4):
        a = jnp.dot(cols_ref[0, ph], w1, preferred_element_type=jnp.float32)
        m = a if m is None else jnp.maximum(m, a)
    pooled1 = jnp.maximum(m + b1_ref[...], 0.0)          # (144, 32), row = h*12 + w
    for h in range(12):                                  # stash as (12,12,32) for windowing
        p1_ref[h] = pooled1[h * 12:(h + 1) * 12, :]

    # ---- conv2: 25 shifted matmuls accumulated in registers (no HBM im2col).
    acc = jnp.zeros((64, C2P), jnp.float32)
    for i in range(5):
        for j in range(5):
            lhs = p1_ref[i:i + 8, j:j + 8, :].reshape(64, C1P)   # (64, 32)
            acc = acc + jnp.dot(lhs, w2_ref[i * 5 + j],
                                preferred_element_type=jnp.float32)
    acc = jnp.maximum(acc + b2_ref[...], 0.0)            # (64, 128), row = h*8 + w
    # TODO(synk): conv2_drop (Dropout2d) is identity in eval mode; training-mode
    # stochastic channel dropout is not implemented.

    # ---- 2x2 max pool + flatten straight into the (h, w, c) feature layout.
    for hh in range(4):
        for ww in range(4):
            r = 16 * hh + 2 * ww
            v = jnp.maximum(jnp.maximum(acc[r], acc[r + 1]),
                            jnp.maximum(acc[r + 8], acc[r + 9]))
            base = (hh * 4 + ww) * C2P
            o_ref[0, 0, base:base + C2P] = v


def _head_kernel(f_ref, w1_ref, b1_ref, w2_ref, b2_ref, o_ref):
    """Fused fc1 + ReLU + fc2 on one M tile; the (M, 512) intermediate stays in VMEM."""
    h = jnp.dot(f_ref[...], w1_ref[...], preferred_element_type=jnp.float32)
    h = jnp.maximum(h + b1_ref[...], 0.0)
    o_ref[...] = jnp.dot(h, w2_ref[...],
                         preferred_element_type=jnp.float32) + b2_ref[...]


# ---------------------------- pallas_call wrappers -------------------------- #

def _features(cols, pp):
    B = cols.shape[0]
    return pl.pallas_call(
        _features_kernel,
        out_shape=jax.ShapeDtypeStruct((B, 1, FEAT), jnp.float32),
        grid_spec=pltpu.PrefetchScalarGridSpec(
            num_scalar_prefetch=0,
            grid=(B,),
            in_specs=[
                pl.BlockSpec((1, 4, 144, C1P), lambda b: (b, 0, 0, 0)),
                pl.BlockSpec((C1P, C1P), lambda b: (0, 0)),
                pl.BlockSpec((1, C1P), lambda b: (0, 0)),
                pl.BlockSpec((25, C1P, C2P), lambda b: (0, 0, 0)),
                pl.BlockSpec((1, C2P), lambda b: (0, 0)),
            ],
            out_specs=pl.BlockSpec((1, 1, FEAT), lambda b: (b, 0, 0)),
            scratch_shapes=[pltpu.VMEM((12, 12, C1P), jnp.float32)],
        ),
        compiler_params=pltpu.CompilerParams(dimension_semantics=("parallel",)),
    )(cols, pp["conv1_w"], pp["conv1_b"], pp["conv2_w"], pp["conv2_b"])


def _head(feats, pp):
    Bp = feats.shape[0]
    tile_m = 128 if Bp >= 128 else 8
    assert Bp % tile_m == 0
    return pl.pallas_call(
        _head_kernel,
        out_shape=jax.ShapeDtypeStruct((Bp, NLOGIT), jnp.float32),
        grid_spec=pltpu.PrefetchScalarGridSpec(
            num_scalar_prefetch=0,
            grid=(Bp // tile_m,),
            in_specs=[
                pl.BlockSpec((tile_m, FEAT), lambda i: (i, 0)),
                pl.BlockSpec((FEAT, FC1P), lambda i: (0, 0)),
                pl.BlockSpec((1, FC1P), lambda i: (0, 0)),
                pl.BlockSpec((FC1P, NLOGIT), lambda i: (0, 0)),
                pl.BlockSpec((1, NLOGIT), lambda i: (0, 0)),
            ],
            out_specs=pl.BlockSpec((tile_m, NLOGIT), lambda i: (i, 0)),
        ),
        compiler_params=pltpu.CompilerParams(dimension_semantics=("parallel",)),
    )(feats, pp["fc1_w"], pp["fc1_b"], pp["fc2_w"], pp["fc2_b"])


# ------------------------------- JAX glue ----------------------------------- #

def _conv1_phase_im2col(img):
    """img: (B, 28, 28) -> (B, 4, 144, 32).

    Slab p*2+q holds, for 2x2-pool phase (p, q), the 25-tap im2col matrix whose
    row h*12+w is the conv1 receptive field of output position (2h+p, 2w+q);
    the tap (K) axis is zero-padded 25 -> 32.  (conv1 has a single input channel,
    so this stays tiny: ~73 KB per image.)
    """
    B = img.shape[0]
    phases = []
    for p in range(2):
        for q in range(2):
            taps = [img[:, p + i:p + i + 23:2, q + j:q + j + 23:2]
                    for i in range(5) for j in range(5)]        # 25 x (B,12,12)
            phases.append(jnp.stack(taps, axis=-1).reshape(B, 144, 25))
    cols = jnp.stack(phases, axis=1)                            # (B, 4, 144, 25)
    return jnp.pad(cols, ((0, 0), (0, 0), (0, 0), (0, C1P - 25)))


def init_params(key):
    """PyTorch-default-style init (uniform +-1/sqrt(fan_in)), torch layouts."""
    ks = jax.random.split(key, 8)

    def u(k, shape, fan_in):
        bound = 1.0 / math.sqrt(fan_in)
        return jax.random.uniform(k, shape, jnp.float32, -bound, bound)

    return {
        "conv1_w": u(ks[0], (20, 1, 5, 5), 1 * 5 * 5),
        "conv1_b": u(ks[1], (20,), 1 * 5 * 5),
        "conv2_w": u(ks[2], (50, 20, 5, 5), 20 * 5 * 5),
        "conv2_b": u(ks[3], (50,), 20 * 5 * 5),
        "fc1_w": u(ks[4], (500, 800), 800),   # PyTorch Linear: (out, in)
        "fc1_b": u(ks[5], (500,), 800),
        "fc2_w": u(ks[6], (10, 500), 500),
        "fc2_b": u(ks[7], (10,), 500),
    }


def prepare_params(p):
    """One-time prep: fold Normalize into conv1 and put every weight into the
    pre-transposed, zero-padded, lane-dense layouts the kernels expect."""
    # conv1: (x - 0.5) / 0.5 == 2x - 1  =>  w' = 2w, b' = b - sum(w)
    w1 = 2.0 * p["conv1_w"]                                      # (20,1,5,5)
    b1 = p["conv1_b"] - jnp.sum(p["conv1_w"], axis=(1, 2, 3))
    w1p = jnp.transpose(w1, (2, 3, 1, 0)).reshape(25, 20)        # (tap, cout)
    w1p = jnp.pad(w1p, ((0, C1P - 25), (0, C1P - 20)))           # (32, 32)
    b1p = jnp.pad(b1, (0, C1P - 20)).reshape(1, C1P)

    w2 = jnp.transpose(p["conv2_w"], (2, 3, 1, 0)).reshape(25, 20, 50)
    w2p = jnp.pad(w2, ((0, 0), (0, C1P - 20), (0, C2P - 50)))    # (25, 32, 128)
    b2p = jnp.pad(p["conv2_b"], (0, C2P - 50)).reshape(1, C2P)

    # fc1: torch input index c*16 + h*4 + w  ->  kernel feature index (h*4+w)*128 + c
    f1 = p["fc1_w"].reshape(500, 50, 4, 4)                       # (out, c, h, w)
    f1 = jnp.transpose(f1, (2, 3, 1, 0))                         # (h, w, c, out)
    f1 = jnp.pad(f1, ((0, 0), (0, 0), (0, C2P - 50), (0, FC1P - 500)))
    fc1w = f1.reshape(FEAT, FC1P)                                # (2048, 512)
    fc1b = jnp.pad(p["fc1_b"], (0, FC1P - 500)).reshape(1, FC1P)

    fc2w = jnp.pad(p["fc2_w"].T, ((0, FC1P - 500), (0, NLOGIT - 10)))  # (512, 128)
    fc2b = jnp.pad(p["fc2_b"], (0, NLOGIT - 10)).reshape(1, NLOGIT)

    return {"conv1_w": w1p, "conv1_b": b1p, "conv2_w": w2p, "conv2_b": b2p,
            "fc1_w": fc1w, "fc1_b": fc1b, "fc2_w": fc2w, "fc2_b": fc2b}


def cnn_mnist_forward(x, pp):
    """x: (B, 1, 28, 28) float32, NCHW (PyTorch convention). Returns (B, 10) logits."""
    B = x.shape[0]
    cols = _conv1_phase_im2col(x.reshape(B, 28, 28))
    feats = _features(cols, pp).reshape(B, FEAT)                 # (B, 2048)
    tile_m = 128 if B >= 128 else 8
    Bp = ((B + tile_m - 1) // tile_m) * tile_m
    if Bp != B:                                                  # pad M to full sublanes
        feats = jnp.pad(feats, ((0, Bp - B), (0, 0)))
    logits = _head(feats, pp)                                    # (Bp, 128)
    return logits[:B, :10]


# ------------------------------ reference ----------------------------------- #

def _reference_forward(x, p):
    """Pure-XLA reference mirroring the PyTorch module (eval mode)."""
    B = x.shape[0]
    h = (x.reshape(B, 1, 28, 28) - 0.5) / 0.5
    h = jnp.transpose(h, (0, 2, 3, 1))                           # NHWC
    h = jax.lax.conv_general_dilated(
        h, p["conv1_w"], (1, 1), "VALID",
        dimension_numbers=("NHWC", "OIHW", "NHWC")) + p["conv1_b"]
    h = jax.nn.relu(h)
    h = h.reshape(B, 12, 2, 12, 2, 20).max(axis=(2, 4))
    h = jax.lax.conv_general_dilated(
        h, p["conv2_w"], (1, 1), "VALID",
        dimension_numbers=("NHWC", "OIHW", "NHWC")) + p["conv2_b"]
    h = jax.nn.relu(h)
    h = h.reshape(B, 4, 2, 4, 2, 50).max(axis=(2, 4))
    h = jnp.transpose(h, (0, 3, 1, 2)).reshape(B, 800)           # torch (C,H,W) flatten
    h = jax.nn.relu(h @ p["fc1_w"].T + p["fc1_b"])
    return h @ p["fc2_w"].T + p["fc2_b"]


if __name__ == "__main__":
    key = jax.random.PRNGKey(0)
    k_x, k_p = jax.random.split(key)
    B = 2
    x = jax.random.uniform(k_x, (B, 1, 28, 28), dtype=jnp.float32)  # MNIST-like input
    params = init_params(k_p)
    pp = prepare_params(params)

    out = jax.jit(cnn_mnist_forward)(x, pp)
    out = jax.block_until_ready(out)
    assert out.shape == (B, 10) and out.dtype == jnp.float32

    ref = _reference_forward(x, params)
    assert jnp.allclose(out, ref, atol=1e-3, rtol=1e-3), float(
        jnp.max(jnp.abs(out - ref)))

    print("KERNEL_OK")
</pallas_src>

<mosaic_0001>
module attributes {stable_mosaic.version = 11 : i64} {
  func.func @_features_kernel(%arg0: i32, %arg1: memref<1x4x144x32xf32, #tpu.memory_space<vmem>>, %arg2: memref<32x32xf32, #tpu.memory_space<vmem>>, %arg3: memref<1x32xf32, #tpu.memory_space<vmem>>, %arg4: memref<25x32x128xf32, #tpu.memory_space<vmem>>, %arg5: memref<1x128xf32, #tpu.memory_space<vmem>>, %arg6: memref<1x1x2048xf32, #tpu.memory_space<vmem>>, %arg7: memref<12x12x32xf32, #tpu.memory_space<vmem>>) attributes {dimension_semantics = [#tpu.dimension_semantics<parallel>], iteration_bounds = array<i64: 2>, scalar_prefetch = 0 : i64, scratch_operands = 1 : i64, tpu.core_type = #tpu.core_type<tc>, window_params = [{transform_indices = @transform_0, window_bounds = array<i64: 1, 4, 144, 32>}, {pipeline_mode = #tpu.pipeline_mode<synchronous>, transform_indices = @transform_1, window_bounds = array<i64: 32, 32>}, {pipeline_mode = #tpu.pipeline_mode<synchronous>, transform_indices = @transform_2, window_bounds = array<i64: 1, 32>}, {pipeline_mode = #tpu.pipeline_mode<synchronous>, transform_indices = @transform_3, window_bounds = array<i64: 25, 32, 128>}, {pipeline_mode = #tpu.pipeline_mode<synchronous>, transform_indices = @transform_4, window_bounds = array<i64: 1, 128>}, {transform_indices = @transform_5, window_bounds = array<i64: 1, 1, 2048>}]} {
    %c0 = arith.constant 0 : index
    %c0_0 = arith.constant 0 : index
    %0 = vector.load %arg2[%c0, %c0_0] : memref<32x32xf32, #tpu.memory_space<vmem>>, vector<32x32xf32>
    %c0_1 = arith.constant 0 : index
    %c0_2 = arith.constant 0 : index
    %c0_3 = arith.constant 0 : index
    %c0_4 = arith.constant 0 : index
    %1 = vector.load %arg1[%c0_1, %c0_2, %c0_3, %c0_4] : memref<1x4x144x32xf32, #tpu.memory_space<vmem>>, vector<1x1x144x32xf32>
    %2 = vector.shape_cast %1 : vector<1x1x144x32xf32> to vector<144x32xf32>
    %cst = arith.constant dense<0.000000e+00> : vector<144x32xf32>
    %3 = tpu.matmul %2, %0, %cst {dimension_numbers = #tpu.dot_dimension_numbers<[1], [0], [0], [1], [0, 0, 1, 1], [], []>} : vector<144x32xf32>, vector<32x32xf32>, vector<144x32xf32> -> vector<144x32xf32>
    %c0_5 = arith.constant 0 : index
    %c1 = arith.constant 1 : index
    %c0_6 = arith.constant 0 : index
    %c0_7 = arith.constant 0 : index
    %4 = vector.load %arg1[%c0_5, %c1, %c0_6, %c0_7] : memref<1x4x144x32xf32, #tpu.memory_space<vmem>>, vector<1x1x144x32xf32>
    %5 = vector.shape_cast %4 : vector<1x1x144x32xf32> to vector<144x32xf32>
    %cst_8 = arith.constant dense<0.000000e+00> : vector<144x32xf32>
    %6 = tpu.matmul %5, %0, %cst_8 {dimension_numbers = #tpu.dot_dimension_numbers<[1], [0], [0], [1], [0, 0, 1, 1], [], []>} : vector<144x32xf32>, vector<32x32xf32>, vector<144x32xf32> -> vector<144x32xf32>
    %7 = arith.maximumf %3, %6 : vector<144x32xf32>
    %c0_9 = arith.constant 0 : index
    %c2 = arith.constant 2 : index
    %c0_10 = arith.constant 0 : index
    %c0_11 = arith.constant 0 : index
    %8 = vector.load %arg1[%c0_9, %c2, %c0_10, %c0_11] : memref<1x4x144x32xf32, #tpu.memory_space<vmem>>, vector<1x1x144x32xf32>
    %9 = vector.shape_cast %8 : vector<1x1x144x32xf32> to vector<144x32xf32>
    %cst_12 = arith.constant dense<0.000000e+00> : vector<144x32xf32>
    %10 = tpu.matmul %9, %0, %cst_12 {dimension_numbers = #tpu.dot_dimension_numbers<[1], [0], [0], [1], [0, 0, 1, 1], [], []>} : vector<144x32xf32>, vector<32x32xf32>, vector<144x32xf32> -> vector<144x32xf32>
    %11 = arith.maximumf %7, %10 : vector<144x32xf32>
    %c0_13 = arith.constant 0 : index
    %c3 = arith.constant 3 : index
    %c0_14 = arith.constant 0 : index
    %c0_15 = arith.constant 0 : index
    %12 = vector.load %arg1[%c0_13, %c3, %c0_14, %c0_15] : memref<1x4x144x32xf32, #tpu.memory_space<vmem>>, vector<1x1x144x32xf32>
    %13 = vector.shape_cast %12 : vector<1x1x144x32xf32> to vector<144x32xf32>
    %cst_16 = arith.constant dense<0.000000e+00> : vector<144x32xf32>
    %14 = tpu.matmul %13, %0, %cst_16 {dimension_numbers = #tpu.dot_dimension_numbers<[1], [0], [0], [1], [0, 0, 1, 1], [], []>} : vector<144x32xf32>, vector<32x32xf32>, vector<144x32xf32> -> vector<144x32xf32>
    %15 = arith.maximumf %11, %14 : vector<144x32xf32>
    %c0_17 = arith.constant 0 : index
    %c0_18 = arith.constant 0 : index
    %16 = vector.load %arg3[%c0_17, %c0_18] : memref<1x32xf32, #tpu.memory_space<vmem>>, vector<1x32xf32>
    %17 = vector.broadcast %16 : vector<1x32xf32> to vector<144x32xf32>
    %18 = arith.addf %15, %17 : vector<144x32xf32>
    %cst_19 = arith.constant 0.000000e+00 : f32
    %19 = vector.broadcast %cst_19 : f32 to vector<144x32xf32>
    %20 = arith.maximumf %18, %19 : vector<144x32xf32>
    %21 = vector.extract_strided_slice %20 {offsets = [0, 0], sizes = [12, 32], strides = [1, 1]} : vector<144x32xf32> to vector<12x32xf32>
    %c0_20 = arith.constant 0 : index
    %c0_21 = arith.constant 0 : index
    %c0_22 = arith.constant 0 : index
    %22 = vector.load %arg7[%c0_20, %c0_21, %c0_22] : memref<12x12x32xf32, #tpu.memory_space<vmem>>, vector<1x12x32xf32>
    %23 = vector.shape_cast %22 : vector<1x12x32xf32> to vector<12x32xf32>
    %24 = vector.shape_cast %21 : vector<12x32xf32> to vector<1x12x32xf32>
    tpu.vector_store %arg7[%c0_20, %c0_21, %c0_22], %24 {strides = array<i32>} : memref<12x12x32xf32, #tpu.memory_space<vmem>>, vector<1x12x32xf32>,
    %25 = vector.extract_strided_slice %20 {offsets = [12, 0], sizes = [12, 32], strides = [1, 1]} : vector<144x32xf32> to vector<12x32xf32>
    %c1_23 = arith.constant 1 : index
    %c0_24 = arith.constant 0 : index
    %c0_25 = arith.constant 0 : index
    %26 = vector.load %arg7[%c1_23, %c0_24, %c0_25] : memref<12x12x32xf32, #tpu.memory_space<vmem>>, vector<1x12x32xf32>
    %27 = vector.shape_cast %26 : vector<1x12x32xf32> to vector<12x32xf32>
    %28 = vector.shape_cast %25 : vector<12x32xf32> to vector<1x12x32xf32>
    tpu.vector_store %arg7[%c1_23, %c0_24, %c0_25], %28 {strides = array<i32>} : memref<12x12x32xf32, #tpu.memory_space<vmem>>, vector<1x12x32xf32>,
    %29 = vector.extract_strided_slice %20 {offsets = [24, 0], sizes = [12, 32], strides = [1, 1]} : vector<144x32xf32> to vector<12x32xf32>
    %c2_26 = arith.constant 2 : index
    %c0_27 = arith.constant 0 : index
    %c0_28 = arith.constant 0 : index
    %30 = vector.load %arg7[%c2_26, %c0_27, %c0_28] : memref<12x12x32xf32, #tpu.memory_space<vmem>>, vector<1x12x32xf32>
    %31 = vector.shape_cast %30 : vector<1x12x32xf32> to vector<12x32xf32>
    %32 = vector.shape_cast %29 : vector<12x32xf32> to vector<1x12x32xf32>
    tpu.vector_store %arg7[%c2_26, %c0_27, %c0_28], %32 {strides = array<i32>} : memref<12x12x32xf32, #tpu.memory_space<vmem>>, vector<1x12x32xf32>,
    %33 = vector.extract_strided_slice %20 {offsets = [36, 0], sizes = [12, 32], strides = [1, 1]} : vector<144x32xf32> to vector<12x32xf32>
    %c3_29 = arith.constant 3 : index
    %c0_30 = arith.constant 0 : index
    %c0_31 = arith.constant 0 : index
    %34 = vector.load %arg7[%c3_29, %c0_30, %c0_31] : memref<12x12x32xf32, #tpu.memory_space<vmem>>, vector<1x12x32xf32>
    %35 = vector.shape_cast %34 : vector<1x12x32xf32> to vector<12x32xf32>
    %36 = vector.shape_cast %33 : vector<12x32xf32> to vector<1x12x32xf32>
    tpu.vector_store %arg7[%c3_29, %c0_30, %c0_31], %36 {strides = array<i32>} : memref<12x12x32xf32, #tpu.memory_space<vmem>>, vector<1x12x32xf32>,
    %37 = vector.extract_strided_slice %20 {offsets = [48, 0], sizes = [12, 32], strides = [1, 1]} : vector<144x32xf32> to vector<12x32xf32>
    %c4 = arith.constant 4 : index
    %c0_32 = arith.constant 0 : index
    %c0_33 = arith.constant 0 : index
    %38 = vector.load %arg7[%c4, %c0_32, %c0_33] : memref<12x12x32xf32, #tpu.memory_space<vmem>>, vector<1x12x32xf32>
    %39 = vector.shape_cast %38 : vector<1x12x32xf32> to vector<12x32xf32>
    %40 = vector.shape_cast %37 : vector<12x32xf32> to vector<1x12x32xf32>
    tpu.vector_store %arg7[%c4, %c0_32, %c0_33], %40 {strides = array<i32>} : memref<12x12x32xf32, #tpu.memory_space<vmem>>, vector<1x12x32xf32>,
    %41 = vector.extract_strided_slice %20 {offsets = [60, 0], sizes = [12, 32], strides = [1, 1]} : vector<144x32xf32> to vector<12x32xf32>
    %c5 = arith.constant 5 : index
    %c0_34 = arith.constant 0 : index
    %c0_35 = arith.constant 0 : index
    %42 = vector.load %arg7[%c5, %c0_34, %c0_35] : memref<12x12x32xf32, #tpu.memory_space<vmem>>, vector<1x12x32xf32>
    %43 = vector.shape_cast %42 : vector<1x12x32xf32> to vector<12x32xf32>
    %44 = vector.shape_cast %41 : vector<12x32xf32> to vector<1x12x32xf32>
    tpu.vector_store %arg7[%c5, %c0_34, %c0_35], %44 {strides = array<i32>} : memref<12x12x32xf32, #tpu.memory_space<vmem>>, vector<1x12x32xf32>,
    %45 = vector.extract_strided_slice %20 {offsets = [72, 0], sizes = [12, 32], strides = [1, 1]} : vector<144x32xf32> to vector<12x32xf32>
    %c6 = arith.constant 6 : index
    %c0_36 = arith.constant 0 : index
    %c0_37 = arith.constant 0 : index
    %46 = vector.load %arg7[%c6, %c0_36, %c0_37] : memref<12x12x32xf32, #tpu.memory_space<vmem>>, vector<1x12x32xf32>
    %47 = vector.shape_cast %46 : vector<1x12x32xf32> to vector<12x32xf32>
    %48 = vector.shape_cast %45 : vector<12x32xf32> to vector<1x12x32xf32>
    tpu.vector_store %arg7[%c6, %c0_36, %c0_37], %48 {strides = array<i32>} : memref<12x12x32xf32, #tpu.memory_space<vmem>>, vector<1x12x32xf32>,
    %49 = vector.extract_strided_slice %20 {offsets = [84, 0], sizes = [12, 32], strides = [1, 1]} : vector<144x32xf32> to vector<12x32xf32>
    %c7 = arith.constant 7 : index
    %c0_38 = arith.constant 0 : index
    %c0_39 = arith.constant 0 : index
    %50 = vector.load %arg7[%c7, %c0_38, %c0_39] : memref<12x12x32xf32, #tpu.memory_space<vmem>>, vector<1x12x32xf32>
    %51 = vector.shape_cast %50 : vector<1x12x32xf32> to vector<12x32xf32>
    %52 = vector.shape_cast %49 : vector<12x32xf32> to vector<1x12x32xf32>
    tpu.vector_store %arg7[%c7, %c0_38, %c0_39], %52 {strides = array<i32>} : memref<12x12x32xf32, #tpu.memory_space<vmem>>, vector<1x12x32xf32>,
    %53 = vector.extract_strided_slice %20 {offsets = [96, 0], sizes = [12, 32], strides = [1, 1]} : vector<144x32xf32> to vector<12x32xf32>
    %c8 = arith.constant 8 : index
    %c0_40 = arith.constant 0 : index
    %c0_41 = arith.constant 0 : index
    %54 = vector.load %arg7[%c8, %c0_40, %c0_41] : memref<12x12x32xf32, #tpu.memory_space<vmem>>, vector<1x12x32xf32>
    %55 = vector.shape_cast %54 : vector<1x12x32xf32> to vector<12x32xf32>
    %56 = vector.shape_cast %53 : vector<12x32xf32> to vector<1x12x32xf32>
    tpu.vector_store %arg7[%c8, %c0_40, %c0_41], %56 {strides = array<i32>} : memref<12x12x32xf32, #tpu.memory_space<vmem>>, vector<1x12x32xf32>,
    %57 = vector.extract_strided_slice %20 {offsets = [108, 0], sizes = [12, 32], strides = [1, 1]} : vector<144x32xf32> to vector<12x32xf32>
    %c9 = arith.constant 9 : index
    %c0_42 = arith.constant 0 : index
    %c0_43 = arith.constant 0 : index
    %58 = vector.load %arg7[%c9, %c0_42, %c0_43] : memref<12x12x32xf32, #tpu.memory_space<vmem>>, vector<1x12x32xf32>
    %59 = vector.shape_cast %58 : vector<1x12x32xf32> to vector<12x32xf32>
    %60 = vector.shape_cast %57 : vector<12x32xf32> to vector<1x12x32xf32>
    tpu.vector_store %arg7[%c9, %c0_42, %c0_43], %60 {strides = array<i32>} : memref<12x12x32xf32, #tpu.memory_space<vmem>>, vector<1x12x32xf32>,
    %61 = vector.extract_strided_slice %20 {offsets = [120, 0], sizes = [12, 32], strides = [1, 1]} : vector<144x32xf32> to vector<12x32xf32>
    %c10 = arith.constant 10 : index
    %c0_44 = arith.constant 0 : index
    %c0_45 = arith.constant 0 : index
    %62 = vector.load %arg7[%c10, %c0_44, %c0_45] : memref<12x12x32xf32, #tpu.memory_space<vmem>>, vector<1x12x32xf32>
    %63 = vector.shape_cast %62 : vector<1x12x32xf32> to vector<12x32xf32>
    %64 = vector.shape_cast %61 : vector<12x32xf32> to vector<1x12x32xf32>
    tpu.vector_store %arg7[%c10, %c0_44, %c0_45], %64 {strides = array<i32>} : memref<12x12x32xf32, #tpu.memory_space<vmem>>, vector<1x12x32xf32>,
    %65 = vector.extract_strided_slice %20 {offsets = [132, 0], sizes = [12, 32], strides = [1, 1]} : vector<144x32xf32> to vector<12x32xf32>
    %c11 = arith.constant 11 : index
    %c0_46 = arith.constant 0 : index
    %c0_47 = arith.constant 0 : index
    %66 = vector.load %arg7[%c11, %c0_46, %c0_47] : memref<12x12x32xf32, #tpu.memory_space<vmem>>, vector<1x12x32xf32>
    %67 = vector.shape_cast %66 : vector<1x12x32xf32> to vector<12x32xf32>
    %68 = vector.shape_cast %65 : vector<12x32xf32> to vector<1x12x32xf32>
    tpu.vector_store %arg7[%c11, %c0_46, %c0_47], %68 {strides = array<i32>} : memref<12x12x32xf32, #tpu.memory_space<vmem>>, vector<1x12x32xf32>,
    %cst_48 = arith.constant 0.000000e+00 : f32
    %69 = vector.broadcast %cst_48 : f32 to vector<64x128xf32>
    %c0_49 = arith.constant 0 : index
    %c0_50 = arith.constant 0 : index
    %c0_51 = arith.constant 0 : index
    %70 = vector.load %arg7[%c0_49, %c0_50, %c0_51] : memref<12x12x32xf32, #tpu.memory_space<vmem>>, vector<8x8x32xf32>
    %71 = vector.shape_cast %70 : vector<8x8x32xf32> to vector<64x32xf32>
    %c0_52 = arith.constant 0 : index
    %c0_53 = arith.constant 0 : index
    %c0_54 = arith.constant 0 : index
    %72 = vector.load %arg4[%c0_52, %c0_53, %c0_54] : memref<25x32x128xf32, #tpu.memory_space<vmem>>, vector<1x32x128xf32>
    %73 = vector.shape_cast %72 : vector<1x32x128xf32> to vector<32x128xf32>
    %cst_55 = arith.constant dense<0.000000e+00> : vector<64x128xf32>
    %74 = tpu.matmul %71, %73, %cst_55 {dimension_numbers = #tpu.dot_dimension_numbers<[1], [0], [0], [1], [0, 0, 1, 1], [], []>} : vector<64x32xf32>, vector<32x128xf32>, vector<64x128xf32> -> vector<64x128xf32>
    %75 = arith.addf %69, %74 : vector<64x128xf32>
    %c0_56 = arith.constant 0 : index
    %c1_57 = arith.constant 1 : index
    %c0_58 = arith.constant 0 : index
    %76 = vector.load %arg7[%c0_56, %c1_57, %c0_58] : memref<12x12x32xf32, #tpu.memory_space<vmem>>, vector<8x8x32xf32>
    %77 = vector.shape_cast %76 : vector<8x8x32xf32> to vector<64x32xf32>
    %c1_59 = arith.constant 1 : index
    %c0_60 = arith.constant 0 : index
    %c0_61 = arith.constant 0 : index
    %78 = vector.load %arg4[%c1_59, %c0_60, %c0_61] : memref<25x32x128xf32, #tpu.memory_space<vmem>>, vector<1x32x128xf32>
    %79 = vector.shape_cast %78 : vector<1x32x128xf32> to vector<32x128xf32>
    %cst_62 = arith.constant dense<0.000000e+00> : vector<64x128xf32>
    %80 = tpu.matmul %77, %79, %cst_62 {dimension_numbers = #tpu.dot_dimension_numbers<[1], [0], [0], [1], [0, 0, 1, 1], [], []>} : vector<64x32xf32>, vector<32x128xf32>, vector<64x128xf32> -> vector<64x128xf32>
    %81 = arith.addf %75, %80 : vector<64x128xf32>
    %c0_63 = arith.constant 0 : index
    %c2_64 = arith.constant 2 : index
    %c0_65 = arith.constant 0 : index
    %82 = vector.load %arg7[%c0_63, %c2_64, %c0_65] : memref<12x12x32xf32, #tpu.memory_space<vmem>>, vector<8x8x32xf32>
    %83 = vector.shape_cast %82 : vector<8x8x32xf32> to vector<64x32xf32>
    %c2_66 = arith.constant 2 : index
    %c0_67 = arith.constant 0 : index
    %c0_68 = arith.constant 0 : index
    %84 = vector.load %arg4[%c2_66, %c0_67, %c0_68] : memref<25x32x128xf32, #tpu.memory_space<vmem>>, vector<1x32x128xf32>
    %85 = vector.shape_cast %84 : vector<1x32x128xf32> to vector<32x128xf32>
    %cst_69 = arith.constant dense<0.000000e+00> : vector<64x128xf32>
    %86 = tpu.matmul %83, %85, %cst_69 {dimension_numbers = #tpu.dot_dimension_numbers<[1], [0], [0], [1], [0, 0, 1, 1], [], []>} : vector<64x32xf32>, vector<32x128xf32>, vector<64x128xf32> -> vector<64x128xf32>
    %87 = arith.addf %81, %86 : vector<64x128xf32>
    %c0_70 = arith.constant 0 : index
    %c3_71 = arith.constant 3 : index
    %c0_72 = arith.constant 0 : index
    %88 = vector.load %arg7[%c0_70, %c3_71, %c0_72] : memref<12x12x32xf32, #tpu.memory_space<vmem>>, vector<8x8x32xf32>
    %89 = vector.shape_cast %88 : vector<8x8x32xf32> to vector<64x32xf32>
    %c3_73 = arith.constant 3 : index
    %c0_74 = arith.constant 0 : index
    %c0_75 = arith.constant 0 : index
    %90 = vector.load %arg4[%c3_73, %c0_74, %c0_75] : memref<25x32x128xf32, #tpu.memory_space<vmem>>, vector<1x32x128xf32>
    %91 = vector.shape_cast %90 : vector<1x32x128xf32> to vector<32x128xf32>
    %cst_76 = arith.constant dense<0.000000e+00> : vector<64x128xf32>
    %92 = tpu.matmul %89, %91, %cst_76 {dimension_numbers = #tpu.dot_dimension_numbers<[1], [0], [0], [1], [0, 0, 1, 1], [], []>} : vector<64x32xf32>, vector<32x128xf32>, vector<64x128xf32> -> vector<64x128xf32>
    %93 = arith.addf %87, %92 : vector<64x128xf32>
    %c0_77 = arith.constant 0 : index
    %c4_78 = arith.constant 4 : index
    %c0_79 = arith.constant 0 : index
    %94 = vector.load %arg7[%c0_77, %c4_78, %c0_79] : memref<12x12x32xf32, #tpu.memory_space<vmem>>, vector<8x8x32xf32>
    %95 = vector.shape_cast %94 : vector<8x8x32xf32> to vector<64x32xf32>
    %c4_80 = arith.constant 4 : index
    %c0_81 = arith.constant 0 : index
    %c0_82 = arith.constant 0 : index
    %96 = vector.load %arg4[%c4_80, %c0_81, %c0_82] : memref<25x32x128xf32, #tpu.memory_space<vmem>>, vector<1x32x128xf32>
    %97 = vector.shape_cast %96 : vector<1x32x128xf32> to vector<32x128xf32>
    %cst_83 = arith.constant dense<0.000000e+00> : vector<64x128xf32>
    %98 = tpu.matmul %95, %97, %cst_83 {dimension_numbers = #tpu.dot_dimension_numbers<[1], [0], [0], [1], [0, 0, 1, 1], [], []>} : vector<64x32xf32>, vector<32x128xf32>, vector<64x128xf32> -> vector<64x128xf32>
    %99 = arith.addf %93, %98 : vector<64x128xf32>
    %c1_84 = arith.constant 1 : index
    %c0_85 = arith.constant 0 : index
    %c0_86 = arith.constant 0 : index
    %100 = vector.load %arg7[%c1_84, %c0_85, %c0_86] : memref<12x12x32xf32, #tpu.memory_space<vmem>>, vector<8x8x32xf32>
    %101 = vector.shape_cast %100 : vector<8x8x32xf32> to vector<64x32xf32>
    %c5_87 = arith.constant 5 : index
    %c0_88 = arith.constant 0 : index
    %c0_89 = arith.constant 0 : index
    %102 = vector.load %arg4[%c5_87, %c0_88, %c0_89] : memref<25x32x128xf32, #tpu.memory_space<vmem>>, vector<1x32x128xf32>
    %103 = vector.shape_cast %102 : vector<1x32x128xf32> to vector<32x128xf32>
    %cst_90 = arith.constant dense<0.000000e+00> : vector<64x128xf32>
    %104 = tpu.matmul %101, %103, %cst_90 {dimension_numbers = #tpu.dot_dimension_numbers<[1], [0], [0], [1], [0, 0, 1, 1], [], []>} : vector<64x32xf32>, vector<32x128xf32>, vector<64x128xf32> -> vector<64x128xf32>
    %105 = arith.addf %99, %104 : vector<64x128xf32>
    %c1_91 = arith.constant 1 : index
    %c1_92 = arith.constant 1 : index
    %c0_93 = arith.constant 0 : index
    %106 = vector.load %arg7[%c1_91, %c1_92, %c0_93] : memref<12x12x32xf32, #tpu.memory_space<vmem>>, vector<8x8x32xf32>
    %107 = vector.shape_cast %106 : vector<8x8x32xf32> to vector<64x32xf32>
    %c6_94 = arith.constant 6 : index
    %c0_95 = arith.constant 0 : index
    %c0_96 = arith.constant 0 : index
    %108 = vector.load %arg4[%c6_94, %c0_95, %c0_96] : memref<25x32x128xf32, #tpu.memory_space<vmem>>, vector<1x32x128xf32>
    %109 = vector.shape_cast %108 : vector<1x32x128xf32> to vector<32x128xf32>
    %cst_97 = arith.constant dense<0.000000e+00> : vector<64x128xf32>
    %110 = tpu.matmul %107, %109, %cst_97 {dimension_numbers = #tpu.dot_dimension_numbers<[1], [0], [0], [1], [0, 0, 1, 1], [], []>} : vector<64x32xf32>, vector<32x128xf32>, vector<64x128xf32> -> vector<64x128xf32>
    %111 = arith.addf %105, %110 : vector<64x128xf32>
    %c1_98 = arith.constant 1 : index
    %c2_99 = arith.constant 2 : index
    %c0_100 = arith.constant 0 : index
    %112 = vector.load %arg7[%c1_98, %c2_99, %c0_100] : memref<12x12x32xf32, #tpu.memory_space<vmem>>, vector<8x8x32xf32>
    %113 = vector.shape_cast %112 : vector<8x8x32xf32> to vector<64x32xf32>
    %c7_101 = arith.constant 7 : index
    %c0_102 = arith.constant 0 : index
    %c0_103 = arith.constant 0 : index
    %114 = vector.load %arg4[%c7_101, %c0_102, %c0_103] : memref<25x32x128xf32, #tpu.memory_space<vmem>>, vector<1x32x128xf32>
    %115 = vector.shape_cast %114 : vector<1x32x128xf32> to vector<32x128xf32>
    %cst_104 = arith.constant dense<0.000000e+00> : vector<64x128xf32>
    %116 = tpu.matmul %113, %115, %cst_104 {dimension_numbers = #tpu.dot_dimension_numbers<[1], [0], [0], [1], [0, 0, 1, 1], [], []>} : vector<64x32xf32>, vector<32x128xf32>, vector<64x128xf32> -> vector<64x128xf32>
    %117 = arith.addf %111, %116 : vector<64x128xf32>
    %c1_105 = arith.constant 1 : index
    %c3_106 = arith.constant 3 : index
    %c0_107 = arith.constant 0 : index
    %118 = vector.load %arg7[%c1_105, %c3_106, %c0_107] : memref<12x12x32xf32, #tpu.memory_space<vmem>>, vector<8x8x32xf32>
    %119 = vector.shape_cast %118 : vector<8x8x32xf32> to vector<64x32xf32>
    %c8_108 = arith.constant 8 : index
    %c0_109 = arith.constant 0 : index
    %c0_110 = arith.constant 0 : index
    %120 = vector.load %arg4[%c8_108, %c0_109, %c0_110] : memref<25x32x128xf32, #tpu.memory_space<vmem>>, vector<1x32x128xf32>
    %121 = vector.shape_cast %120 : vector<1x32x128xf32> to vector<32x128xf32>
    %cst_111 = arith.constant dense<0.000000e+00> : vector<64x128xf32>
    %122 = tpu.matmul %119, %121, %cst_111 {dimension_numbers = #tpu.dot_dimension_numbers<[1], [0], [0], [1], [0, 0, 1, 1], [], []>} : vector<64x32xf32>, vector<32x128xf32>, vector<64x128xf32> -> vector<64x128xf32>
    %123 = arith.addf %117, %122 : vector<64x128xf32>
    %c1_112 = arith.constant 1 : index
    %c4_113 = arith.constant 4 : index
    %c0_114 = arith.constant 0 : index
    %124 = vector.load %arg7[%c1_112, %c4_113, %c0_114] : memref<12x12x32xf32, #tpu.memory_space<vmem>>, vector<8x8x32xf32>
    %125 = vector.shape_cast %124 : vector<8x8x32xf32> to vector<64x32xf32>
    %c9_115 = arith.constant 9 : index
    %c0_116 = arith.constant 0 : index
    %c0_117 = arith.constant 0 : index
    %126 = vector.load %arg4[%c9_115, %c0_116, %c0_117] : memref<25x32x128xf32, #tpu.memory_space<vmem>>, vector<1x32x128xf32>
    %127 = vector.shape_cast %126 : vector<1x32x128xf32> to vector<32x128xf32>
    %cst_118 = arith.constant dense<0.000000e+00> : vector<64x128xf32>
    %128 = tpu.matmul %125, %127, %cst_118 {dimension_numbers = #tpu.dot_dimension_numbers<[1], [0], [0], [1], [0, 0, 1, 1], [], []>} : vector<64x32xf32>, vector<32x128xf32>, vector<64x128xf32> -> vector<64x128xf32>
    %129 = arith.addf %123, %128 : vector<64x128xf32>
    %c2_119 = arith.constant 2 : index
    %c0_120 = arith.constant 0 : index
    %c0_121 = arith.constant 0 : index
    %130 = vector.load %arg7[%c2_119, %c0_120, %c0_121] : memref<12x12x32xf32, #tpu.memory_space<vmem>>, vector<8x8x32xf32>
    %131 = vector.shape_cast %130 : vector<8x8x32xf32> to vector<64x32xf32>
    %c10_122 = arith.constant 10 : index
    %c0_123 = arith.constant 0 : index
    %c0_124 = arith.constant 0 : index
    %132 = vector.load %arg4[%c10_122, %c0_123, %c0_124] : memref<25x32x128xf32, #tpu.memory_space<vmem>>, vector<1x32x128xf32>
    %133 = vector.shape_cast %132 : vector<1x32x128xf32> to vector<32x128xf32>
    %cst_125 = arith.constant dense<0.000000e+00> : vector<64x128xf32>
    %134 = tpu.matmul %131, %133, %cst_125 {dimension_numbers = #tpu.dot_dimension_numbers<[1], [0], [0], [1], [0, 0, 1, 1], [], []>} : vector<64x32xf32>, vector<32x128xf32>, vector<64x128xf32> -> vector<64x128xf32>
    %135 = arith.addf %129, %134 : vector<64x128xf32>
    %c2_126 = arith.constant 2 : index
    %c1_127 = arith.constant 1 : index
    %c0_128 = arith.constant 0 : index
    %136 = vector.load %arg7[%c2_126, %c1_127, %c0_128] : memref<12x12x32xf32, #tpu.memory_space<vmem>>, vector<8x8x32xf32>
    %137 = vector.shape_cast %136 : vector<8x8x32xf32> to vector<64x32xf32>
    %c11_129 = arith.constant 11 : index
    %c0_130 = arith.constant 0 : index
    %c0_131 = arith.constant 0 : index
    %138 = vector.load %arg4[%c11_129, %c0_130, %c0_131] : memref<25x32x128xf32, #tpu.memory_space<vmem>>, vector<1x32x128xf32>
    %139 = vector.shape_cast %138 : vector<1x32x128xf32> to vector<32x128xf32>
    %cst_132 = arith.constant dense<0.000000e+00> : vector<64x128xf32>
    %140 = tpu.matmul %137, %139, %cst_132 {dimension_numbers = #tpu.dot_dimension_numbers<[1], [0], [0], [1], [0, 0, 1, 1], [], []>} : vector<64x32xf32>, vector<32x128xf32>, vector<64x128xf32> -> vector<64x128xf32>
    %141 = arith.addf %135, %140 : vector<64x128xf32>
    %c2_133 = arith.constant 2 : index
    %c2_134 = arith.constant 2 : index
    %c0_135 = arith.constant 0 : index
    %142 = vector.load %arg7[%c2_133, %c2_134, %c0_135] : memref<12x12x32xf32, #tpu.memory_space<vmem>>, vector<8x8x32xf32>
    %143 = vector.shape_cast %142 : vector<8x8x32xf32> to vector<64x32xf32>
    %c12 = arith.constant 12 : index
    %c0_136 = arith.constant 0 : index
    %c0_137 = arith.constant 0 : index
    %144 = vector.load %arg4[%c12, %c0_136, %c0_137] : memref<25x32x128xf32, #tpu.memory_space<vmem>>, vector<1x32x128xf32>
    %145 = vector.shape_cast %144 : vector<1x32x128xf32> to vector<32x128xf32>
    %cst_138 = arith.constant dense<0.000000e+00> : vector<64x128xf32>
    %146 = tpu.matmul %143, %145, %cst_138 {dimension_numbers = #tpu.dot_dimension_numbers<[1], [0], [0], [1], [0, 0, 1, 1], [], []>} : vector<64x32xf32>, vector<32x128xf32>, vector<64x128xf32> -> vector<64x128xf32>
    %147 = arith.addf %141, %146 : vector<64x128xf32>
    %c2_139 = arith.constant 2 : index
    %c3_140 = arith.constant 3 : index
    %c0_141 = arith.constant 0 : index
    %148 = vector.load %arg7[%c2_139, %c3_140, %c0_141] : memref<12x12x32xf32, #tpu.memory_space<vmem>>, vector<8x8x32xf32>
    %149 = vector.shape_cast %148 : vector<8x8x32xf32> to vector<64x32xf32>
    %c13 = arith.constant 13 : index
    %c0_142 = arith.constant 0 : index
    %c0_143 = arith.constant 0 : index
    %150 = vector.load %arg4[%c13, %c0_142, %c0_143] : memref<25x32x128xf32, #tpu.memory_space<vmem>>, vector<1x32x128xf32>
    %151 = vector.shape_cast %150 : vector<1x32x128xf32> to vector<32x128xf32>
    %cst_144 = arith.constant dense<0.000000e+00> : vector<64x128xf32>
    %152 = tpu.matmul %149, %151, %cst_144 {dimension_numbers = #tpu.dot_dimension_numbers<[1], [0], [0], [1], [0, 0, 1, 1], [], []>} : vector<64x32xf32>, vector<32x128xf32>, vector<64x128xf32> -> vector<64x128xf32>
    %153 = arith.addf %147, %152 : vector<64x128xf32>
    %c2_145 = arith.constant 2 : index
    %c4_146 = arith.constant 4 : index
    %c0_147 = arith.constant 0 : index
    %154 = vector.load %arg7[%c2_145, %c4_146, %c0_147] : memref<12x12x32xf32, #tpu.memory_space<vmem>>, vector<8x8x32xf32>
    %155 = vector.shape_cast %154 : vector<8x8x32xf32> to vector<64x32xf32>
    %c14 = arith.constant 14 : index
    %c0_148 = arith.constant 0 : index
    %c0_149 = arith.constant 0 : index
    %156 = vector.load %arg4[%c14, %c0_148, %c0_149] : memref<25x32x128xf32, #tpu.memory_space<vmem>>, vector<1x32x128xf32>
    %157 = vector.shape_cast %156 : vector<1x32x128xf32> to vector<32x128xf32>
    %cst_150 = arith.constant dense<0.000000e+00> : vector<64x128xf32>
    %158 = tpu.matmul %155, %157, %cst_150 {dimension_numbers = #tpu.dot_dimension_numbers<[1], [0], [0], [1], [0, 0, 1, 1], [], []>} : vector<64x32xf32>, vector<32x128xf32>, vector<64x128xf32> -> vector<64x128xf32>
    %159 = arith.addf %153, %158 : vector<64x128xf32>
    %c3_151 = arith.constant 3 : index
    %c0_152 = arith.constant 0 : index
    %c0_153 = arith.constant 0 : index
    %160 = vector.load %arg7[%c3_151, %c0_152, %c0_153] : memref<12x12x32xf32, #tpu.memory_space<vmem>>, vector<8x8x32xf32>
    %161 = vector.shape_cast %160 : vector<8x8x32xf32> to vector<64x32xf32>
    %c15 = arith.constant 15 : index
    %c0_154 = arith.constant 0 : index
    %c0_155 = arith.constant 0 : index
    %162 = vector.load %arg4[%c15, %c0_154, %c0_155] : memref<25x32x128xf32, #tpu.memory_space<vmem>>, vector<1x32x128xf32>
    %163 = vector.shape_cast %162 : vector<1x32x128xf32> to vector<32x128xf32>
    %cst_156 = arith.constant dense<0.000000e+00> : vector<64x128xf32>
    %164 = tpu.matmul %161, %163, %cst_156 {dimension_numbers = #tpu.dot_dimension_numbers<[1], [0], [0], [1], [0, 0, 1, 1], [], []>} : vector<64x32xf32>, vector<32x128xf32>, vector<64x128xf32> -> vector<64x128xf32>
    %165 = arith.addf %159, %164 : vector<64x128xf32>
    %c3_157 = arith.constant 3 : index
    %c1_158 = arith.constant 1 : index
    %c0_159 = arith.constant 0 : index
    %166 = vector.load %arg7[%c3_157, %c1_158, %c0_159] : memref<12x12x32xf32, #tpu.memory_space<vmem>>, vector<8x8x32xf32>
    %167 = vector.shape_cast %166 : vector<8x8x32xf32> to vector<64x32xf32>
    %c16 = arith.constant 16 : index
    %c0_160 = arith.constant 0 : index
    %c0_161 = arith.constant 0 : index
    %168 = vector.load %arg4[%c16, %c0_160, %c0_161] : memref<25x32x128xf32, #tpu.memory_space<vmem>>, vector<1x32x128xf32>
    %169 = vector.shape_cast %168 : vector<1x32x128xf32> to vector<32x128xf32>
    %cst_162 = arith.constant dense<0.000000e+00> : vector<64x128xf32>
    %170 = tpu.matmul %167, %169, %cst_162 {dimension_numbers = #tpu.dot_dimension_numbers<[1], [0], [0], [1], [0, 0, 1, 1], [], []>} : vector<64x32xf32>, vector<32x128xf32>, vector<64x128xf32> -> vector<64x128xf32>
    %171 = arith.addf %165, %170 : vector<64x128xf32>
    %c3_163 = arith.constant 3 : index
    %c2_164 = arith.constant 2 : index
    %c0_165 = arith.constant 0 : index
    %172 = vector.load %arg7[%c3_163, %c2_164, %c0_165] : memref<12x12x32xf32, #tpu.memory_space<vmem>>, vector<8x8x32xf32>
    %173 = vector.shape_cast %172 : vector<8x8x32xf32> to vector<64x32xf32>
    %c17 = arith.constant 17 : index
    %c0_166 = arith.constant 0 : index
    %c0_167 = arith.constant 0 : index
    %174 = vector.load %arg4[%c17, %c0_166, %c0_167] : memref<25x32x128xf32, #tpu.memory_space<vmem>>, vector<1x32x128xf32>
    %175 = vector.shape_cast %174 : vector<1x32x128xf32> to vector<32x128xf32>
    %cst_168 = arith.constant dense<0.000000e+00> : vector<64x128xf32>
    %176 = tpu.matmul %173, %175, %cst_168 {dimension_numbers = #tpu.dot_dimension_numbers<[1], [0], [0], [1], [0, 0, 1, 1], [], []>} : vector<64x32xf32>, vector<32x128xf32>, vector<64x128xf32> -> vector<64x128xf32>
    %177 = arith.addf %171, %176 : vector<64x128xf32>
    %c3_169 = arith.constant 3 : index
    %c3_170 = arith.constant 3 : index
    %c0_171 = arith.constant 0 : index
    %178 = vector.load %arg7[%c3_169, %c3_170, %c0_171] : memref<12x12x32xf32, #tpu.memory_space<vmem>>, vector<8x8x32xf32>
    %179 = vector.shape_cast %178 : vector<8x8x32xf32> to vector<64x32xf32>
    %c18 = arith.constant 18 : index
    %c0_172 = arith.constant 0 : index
    %c0_173 = arith.constant 0 : index
    %180 = vector.load %arg4[%c18, %c0_172, %c0_173] : memref<25x32x128xf32, #tpu.memory_space<vmem>>, vector<1x32x128xf32>
    %181 = vector.shape_cast %180 : vector<1x32x128xf32> to vector<32x128xf32>
    %cst_174 = arith.constant dense<0.000000e+00> : vector<64x128xf32>
    %182 = tpu.matmul %179, %181, %cst_174 {dimension_numbers = #tpu.dot_dimension_numbers<[1], [0], [0], [1], [0, 0, 1, 1], [], []>} : vector<64x32xf32>, vector<32x128xf32>, vector<64x128xf32> -> vector<64x128xf32>
    %183 = arith.addf %177, %182 : vector<64x128xf32>
    %c3_175 = arith.constant 3 : index
    %c4_176 = arith.constant 4 : index
    %c0_177 = arith.constant 0 : index
    %184 = vector.load %arg7[%c3_175, %c4_176, %c0_177] : memref<12x12x32xf32, #tpu.memory_space<vmem>>, vector<8x8x32xf32>
    %185 = vector.shape_cast %184 : vector<8x8x32xf32> to vector<64x32xf32>
    %c19 = arith.constant 19 : index
    %c0_178 = arith.constant 0 : index
    %c0_179 = arith.constant 0 : index
    %186 = vector.load %arg4[%c19, %c0_178, %c0_179] : memref<25x32x128xf32, #tpu.memory_space<vmem>>, vector<1x32x128xf32>
    %187 = vector.shape_cast %186 : vector<1x32x128xf32> to vector<32x128xf32>
    %cst_180 = arith.constant dense<0.000000e+00> : vector<64x128xf32>
    %188 = tpu.matmul %185, %187, %cst_180 {dimension_numbers = #tpu.dot_dimension_numbers<[1], [0], [0], [1], [0, 0, 1, 1], [], []>} : vector<64x32xf32>, vector<32x128xf32>, vector<64x128xf32> -> vector<64x128xf32>
    %189 = arith.addf %183, %188 : vector<64x128xf32>
    %c4_181 = arith.constant 4 : index
    %c0_182 = arith.constant 0 : index
    %c0_183 = arith.constant 0 : index
    %190 = vector.load %arg7[%c4_181, %c0_182, %c0_183] : memref<12x12x32xf32, #tpu.memory_space<vmem>>, vector<8x8x32xf32>
    %191 = vector.shape_cast %190 : vector<8x8x32xf32> to vector<64x32xf32>
    %c20 = arith.constant 20 : index
    %c0_184 = arith.constant 0 : index
    %c0_185 = arith.constant 0 : index
    %192 = vector.load %arg4[%c20, %c0_184, %c0_185] : memref<25x32x128xf32, #tpu.memory_space<vmem>>, vector<1x32x128xf32>
    %193 = vector.shape_cast %192 : vector<1x32x128xf32> to vector<32x128xf32>
    %cst_186 = arith.constant dense<0.000000e+00> : vector<64x128xf32>
    %194 = tpu.matmul %191, %193, %cst_186 {dimension_numbers = #tpu.dot_dimension_numbers<[1], [0], [0], [1], [0, 0, 1, 1], [], []>} : vector<64x32xf32>, vector<32x128xf32>, vector<64x128xf32> -> vector<64x128xf32>
    %195 = arith.addf %189, %194 : vector<64x128xf32>
    %c4_187 = arith.constant 4 : index
    %c1_188 = arith.constant 1 : index
    %c0_189 = arith.constant 0 : index
    %196 = vector.load %arg7[%c4_187, %c1_188, %c0_189] : memref<12x12x32xf32, #tpu.memory_space<vmem>>, vector<8x8x32xf32>
    %197 = vector.shape_cast %196 : vector<8x8x32xf32> to vector<64x32xf32>
    %c21 = arith.constant 21 : index
    %c0_190 = arith.constant 0 : index
    %c0_191 = arith.constant 0 : index
    %198 = vector.load %arg4[%c21, %c0_190, %c0_191] : memref<25x32x128xf32, #tpu.memory_space<vmem>>, vector<1x32x128xf32>
    %199 = vector.shape_cast %198 : vector<1x32x128xf32> to vector<32x128xf32>
    %cst_192 = arith.constant dense<0.000000e+00> : vector<64x128xf32>
    %200 = tpu.matmul %197, %199, %cst_192 {dimension_numbers = #tpu.dot_dimension_numbers<[1], [0], [0], [1], [0, 0, 1, 1], [], []>} : vector<64x32xf32>, vector<32x128xf32>, vector<64x128xf32> -> vector<64x128xf32>
    %201 = arith.addf %195, %200 : vector<64x128xf32>
    %c4_193 = arith.constant 4 : index
    %c2_194 = arith.constant 2 : index
    %c0_195 = arith.constant 0 : index
    %202 = vector.load %arg7[%c4_193, %c2_194, %c0_195] : memref<12x12x32xf32, #tpu.memory_space<vmem>>, vector<8x8x32xf32>
    %203 = vector.shape_cast %202 : vector<8x8x32xf32> to vector<64x32xf32>
    %c22 = arith.constant 22 : index
    %c0_196 = arith.constant 0 : index
    %c0_197 = arith.constant 0 : index
    %204 = vector.load %arg4[%c22, %c0_196, %c0_197] : memref<25x32x128xf32, #tpu.memory_space<vmem>>, vector<1x32x128xf32>
    %205 = vector.shape_cast %204 : vector<1x32x128xf32> to vector<32x128xf32>
    %cst_198 = arith.constant dense<0.000000e+00> : vector<64x128xf32>
    %206 = tpu.matmul %203, %205, %cst_198 {dimension_numbers = #tpu.dot_dimension_numbers<[1], [0], [0], [1], [0, 0, 1, 1], [], []>} : vector<64x32xf32>, vector<32x128xf32>, vector<64x128xf32> -> vector<64x128xf32>
    %207 = arith.addf %201, %206 : vector<64x128xf32>
    %c4_199 = arith.constant 4 : index
    %c3_200 = arith.constant 3 : index
    %c0_201 = arith.constant 0 : index
    %208 = vector.load %arg7[%c4_199, %c3_200, %c0_201] : memref<12x12x32xf32, #tpu.memory_space<vmem>>, vector<8x8x32xf32>
    %209 = vector.shape_cast %208 : vector<8x8x32xf32> to vector<64x32xf32>
    %c23 = arith.constant 23 : index
    %c0_202 = arith.constant 0 : index
    %c0_203 = arith.constant 0 : index
    %210 = vector.load %arg4[%c23, %c0_202, %c0_203] : memref<25x32x128xf32, #tpu.memory_space<vmem>>, vector<1x32x128xf32>
    %211 = vector.shape_cast %210 : vector<1x32x128xf32> to vector<32x128xf32>
    %cst_204 = arith.constant dense<0.000000e+00> : vector<64x128xf32>
    %212 = tpu.matmul %209, %211, %cst_204 {dimension_numbers = #tpu.dot_dimension_numbers<[1], [0], [0], [1], [0, 0, 1, 1], [], []>} : vector<64x32xf32>, vector<32x128xf32>, vector<64x128xf32> -> vector<64x128xf32>
    %213 = arith.addf %207, %212 : vector<64x128xf32>
    %c4_205 = arith.constant 4 : index
    %c4_206 = arith.constant 4 : index
    %c0_207 = arith.constant 0 : index
    %214 = vector.load %arg7[%c4_205, %c4_206, %c0_207] : memref<12x12x32xf32, #tpu.memory_space<vmem>>, vector<8x8x32xf32>
    %215 = vector.shape_cast %214 : vector<8x8x32xf32> to vector<64x32xf32>
    %c24 = arith.constant 24 : index
    %c0_208 = arith.constant 0 : index
    %c0_209 = arith.constant 0 : index
    %216 = vector.load %arg4[%c24, %c0_208, %c0_209] : memref<25x32x128xf32, #tpu.memory_space<vmem>>, vector<1x32x128xf32>
    %217 = vector.shape_cast %216 : vector<1x32x128xf32> to vector<32x128xf32>
    %cst_210 = arith.constant dense<0.000000e+00> : vector<64x128xf32>
    %218 = tpu.matmul %215, %217, %cst_210 {dimension_numbers = #tpu.dot_dimension_numbers<[1], [0], [0], [1], [0, 0, 1, 1], [], []>} : vector<64x32xf32>, vector<32x128xf32>, vector<64x128xf32> -> vector<64x128xf32>
    %219 = arith.addf %213, %218 : vector<64x128xf32>
    %c0_211 = arith.constant 0 : index
    %c0_212 = arith.constant 0 : index
    %220 = vector.load %arg5[%c0_211, %c0_212] : memref<1x128xf32, #tpu.memory_space<vmem>>, vector<1x128xf32>
    %221 = vector.broadcast %220 : vector<1x128xf32> to vector<64x128xf32>
    %222 = arith.addf %219, %221 : vector<64x128xf32>
    %cst_213 = arith.constant 0.000000e+00 : f32
    %223 = vector.broadcast %cst_213 : f32 to vector<64x128xf32>
    %224 = arith.maximumf %222, %223 : vector<64x128xf32>
    %225 = vector.extract_strided_slice %224 {offsets = [0, 0], sizes = [1, 128], strides = [1, 1]} : vector<64x128xf32> to vector<1x128xf32>
    %226 = vector.shape_cast %225 : vector<1x128xf32> to vector<128xf32>
    %227 = vector.extract_strided_slice %224 {offsets = [1, 0], sizes = [1, 128], strides = [1, 1]} : vector<64x128xf32> to vector<1x128xf32>
    %228 = vector.shape_cast %227 : vector<1x128xf32> to vector<128xf32>
    %229 = arith.maximumf %226, %228 : vector<128xf32>
    %230 = vector.extract_strided_slice %224 {offsets = [8, 0], sizes = [1, 128], strides = [1, 1]} : vector<64x128xf32> to vector<1x128xf32>
    %231 = vector.shape_cast %230 : vector<1x128xf32> to vector<128xf32>
    %232 = vector.extract_strided_slice %224 {offsets = [9, 0], sizes = [1, 128], strides = [1, 1]} : vector<64x128xf32> to vector<1x128xf32>
    %233 = vector.shape_cast %232 : vector<1x128xf32> to vector<128xf32>
    %234 = arith.maximumf %231, %233 : vector<128xf32>
    %235 = arith.maximumf %229, %234 : vector<128xf32>
    %c0_214 = arith.constant 0 : index
    %c0_215 = arith.constant 0 : index
    %c0_216 = arith.constant 0 : index
    %236 = vector.load %arg6[%c0_214, %c0_215, %c0_216] : memref<1x1x2048xf32, #tpu.memory_space<vmem>>, vector<1x1x128xf32>
    %237 = vector.shape_cast %236 : vector<1x1x128xf32> to vector<128xf32>
    %238 = vector.shape_cast %235 : vector<128xf32> to vector<1x1x128xf32>
    tpu.vector_store %arg6[%c0_214, %c0_215, %c0_216], %238 {strides = array<i32>} : memref<1x1x2048xf32, #tpu.memory_space<vmem>>, vector<1x1x128xf32>,
    %239 = vector.extract_strided_slice %224 {offsets = [2, 0], sizes = [1, 128], strides = [1, 1]} : vector<64x128xf32> to vector<1x128xf32>
    %240 = vector.shape_cast %239 : vector<1x128xf32> to vector<128xf32>
    %241 = vector.extract_strided_slice %224 {offsets = [3, 0], sizes = [1, 128], strides = [1, 1]} : vector<64x128xf32> to vector<1x128xf32>
    %242 = vector.shape_cast %241 : vector<1x128xf32> to vector<128xf32>
    %243 = arith.maximumf %240, %242 : vector<128xf32>
    %244 = vector.extract_strided_slice %224 {offsets = [10, 0], sizes = [1, 128], strides = [1, 1]} : vector<64x128xf32> to vector<1x128xf32>
    %245 = vector.shape_cast %244 : vector<1x128xf32> to vector<128xf32>
    %246 = vector.extract_strided_slice %224 {offsets = [11, 0], sizes = [1, 128], strides = [1, 1]} : vector<64x128xf32> to vector<1x128xf32>
    %247 = vector.shape_cast %246 : vector<1x128xf32> to vector<128xf32>
    %248 = arith.maximumf %245, %247 : vector<128xf32>
    %249 = arith.maximumf %243, %248 : vector<128xf32>
    %c0_217 = arith.constant 0 : index
    %c0_218 = arith.constant 0 : index
    %c128 = arith.constant 128 : index
    %250 = vector.load %arg6[%c0_217, %c0_218, %c128] : memref<1x1x2048xf32, #tpu.memory_space<vmem>>, vector<1x1x128xf32>
    %251 = vector.shape_cast %250 : vector<1x1x128xf32> to vector<128xf32>
    %252 = vector.shape_cast %249 : vector<128xf32> to vector<1x1x128xf32>
    tpu.vector_store %arg6[%c0_217, %c0_218, %c128], %252 {strides = array<i32>} : memref<1x1x2048xf32, #tpu.memory_space<vmem>>, vector<1x1x128xf32>,
    %253 = vector.extract_strided_slice %224 {offsets = [4, 0], sizes = [1, 128], strides = [1, 1]} : vector<64x128xf32> to vector<1x128xf32>
    %254 = vector.shape_cast %253 : vector<1x128xf32> to vector<128xf32>
    %255 = vector.extract_strided_slice %224 {offsets = [5, 0], sizes = [1, 128], strides = [1, 1]} : vector<64x128xf32> to vector<1x128xf32>
    %256 = vector.shape_cast %255 : vector<1x128xf32> to vector<128xf32>
    %257 = arith.maximumf %254, %256 : vector<128xf32>
    %258 = vector.extract_strided_slice %224 {offsets = [12, 0], sizes = [1, 128], strides = [1, 1]} : vector<64x128xf32> to vector<1x128xf32>
    %259 = vector.shape_cast %258 : vector<1x128xf32> to vector<128xf32>
    %260 = vector.extract_strided_slice %224 {offsets = [13, 0], sizes = [1, 128], strides = [1, 1]} : vector<64x128xf32> to vector<1x128xf32>
    %261 = vector.shape_cast %260 : vector<1x128xf32> to vector<128xf32>
    %262 = arith.maximumf %259, %261 : vector<128xf32>
    %263 = arith.maximumf %257, %262 : vector<128xf32>
    %c0_219 = arith.constant 0 : index
    %c0_220 = arith.constant 0 : index
    %c256 = arith.constant 256 : index
    %264 = vector.load %arg6[%c0_219, %c0_220, %c256] : memref<1x1x2048xf32, #tpu.memory_space<vmem>>, vector<1x1x128xf32>
    %265 = vector.shape_cast %264 : vector<1x1x128xf32> to vector<128xf32>
    %266 = vector.shape_cast %263 : vector<128xf32> to vector<1x1x128xf32>
    tpu.vector_store %arg6[%c0_219, %c0_220, %c256], %266 {strides = array<i32>} : memref<1x1x2048xf32, #tpu.memory_space<vmem>>, vector<1x1x128xf32>,
    %267 = vector.extract_strided_slice %224 {offsets = [6, 0], sizes = [1, 128], strides = [1, 1]} : vector<64x128xf32> to vector<1x128xf32>
    %268 = vector.shape_cast %267 : vector<1x128xf32> to vector<128xf32>
    %269 = vector.extract_strided_slice %224 {offsets = [7, 0], sizes = [1, 128], strides = [1, 1]} : vector<64x128xf32> to vector<1x128xf32>
    %270 = vector.shape_cast %269 : vector<1x128xf32> to vector<128xf32>
    %271 = arith.maximumf %268, %270 : vector<128xf32>
    %272 = vector.extract_strided_slice %224 {offsets = [14, 0], sizes = [1, 128], strides = [1, 1]} : vector<64x128xf32> to vector<1x128xf32>
    %273 = vector.shape_cast %272 : vector<1x128xf32> to vector<128xf32>
    %274 = vector.extract_strided_slice %224 {offsets = [15, 0], sizes = [1, 128], strides = [1, 1]} : vector<64x128xf32> to vector<1x128xf32>
    %275 = vector.shape_cast %274 : vector<1x128xf32> to vector<128xf32>
    %276 = arith.maximumf %273, %275 : vector<128xf32>
    %277 = arith.maximumf %271, %276 : vector<128xf32>
    %c0_221 = arith.constant 0 : index
    %c0_222 = arith.constant 0 : index
    %c384 = arith.constant 384 : index
    %278 = vector.load %arg6[%c0_221, %c0_222, %c384] : memref<1x1x2048xf32, #tpu.memory_space<vmem>>, vector<1x1x128xf32>
    %279 = vector.shape_cast %278 : vector<1x1x128xf32> to vector<128xf32>
    %280 = vector.shape_cast %277 : vector<128xf32> to vector<1x1x128xf32>
    tpu.vector_store %arg6[%c0_221, %c0_222, %c384], %280 {strides = array<i32>} : memref<1x1x2048xf32, #tpu.memory_space<vmem>>, vector<1x1x128xf32>,
    %281 = vector.extract_strided_slice %224 {offsets = [16, 0], sizes = [1, 128], strides = [1, 1]} : vector<64x128xf32> to vector<1x128xf32>
    %282 = vector.shape_cast %281 : vector<1x128xf32> to vector<128xf32>
    %283 = vector.extract_strided_slice %224 {offsets = [17, 0], sizes = [1, 128], strides = [1, 1]} : vector<64x128xf32> to vector<1x128xf32>
    %284 = vector.shape_cast %283 : vector<1x128xf32> to vector<128xf32>
    %285 = arith.maximumf %282, %284 : vector<128xf32>
    %286 = vector.extract_strided_slice %224 {offsets = [24, 0], sizes = [1, 128], strides = [1, 1]} : vector<64x128xf32> to vector<1x128xf32>
    %287 = vector.shape_cast %286 : vector<1x128xf32> to vector<128xf32>
    %288 = vector.extract_strided_slice %224 {offsets = [25, 0], sizes = [1, 128], strides = [1, 1]} : vector<64x128xf32> to vector<1x128xf32>
    %289 = vector.shape_cast %288 : vector<1x128xf32> to vector<128xf32>
    %290 = arith.maximumf %287, %289 : vector<128xf32>
    %291 = arith.maximumf %285, %290 : vector<128xf32>
    %c0_223 = arith.constant 0 : index
    %c0_224 = arith.constant 0 : index
    %c512 = arith.constant 512 : index
    %292 = vector.load %arg6[%c0_223, %c0_224, %c512] : memref<1x1x2048xf32, #tpu.memory_space<vmem>>, vector<1x1x128xf32>
    %293 = vector.shape_cast %292 : vector<1x1x128xf32> to vector<128xf32>
    %294 = vector.shape_cast %291 : vector<128xf32> to vector<1x1x128xf32>
    tpu.vector_store %arg6[%c0_223, %c0_224, %c512], %294 {strides = array<i32>} : memref<1x1x2048xf32, #tpu.memory_space<vmem>>, vector<1x1x128xf32>,
    %295 = vector.extract_strided_slice %224 {offsets = [18, 0], sizes = [1, 128], strides = [1, 1]} : vector<64x128xf32> to vector<1x128xf32>
    %296 = vector.shape_cast %295 : vector<1x128xf32> to vector<128xf32>
    %297 = vector.extract_strided_slice %224 {offsets = [19, 0], sizes = [1, 128], strides = [1, 1]} : vector<64x128xf32> to vector<1x128xf32>
    %298 = vector.shape_cast %297 : vector<1x128xf32> to vector<128xf32>
    %299 = arith.maximumf %296, %298 : vector<128xf32>
    %300 = vector.extract_strided_slice %224 {offsets = [26, 0], sizes = [1, 128], strides = [1, 1]} : vector<64x128xf32> to vector<1x128xf32>
    %301 = vector.shape_cast %300 : vector<1x128xf32> to vector<128xf32>
    %302 = vector.extract_strided_slice %224 {offsets = [27, 0], sizes = [1, 128], strides = [1, 1]} : vector<64x128xf32> to vector<1x128xf32>
    %303 = vector.shape_cast %302 : vector<1x128xf32> to vector<128xf32>
    %304 = arith.maximumf %301, %303 : vector<128xf32>
    %305 = arith.maximumf %299, %304 : vector<128xf32>
    %c0_225 = arith.constant 0 : index
    %c0_226 = arith.constant 0 : index
    %c640 = arith.constant 640 : index
    %306 = vector.load %arg6[%c0_225, %c0_226, %c640] : memref<1x1x2048xf32, #tpu.memory_space<vmem>>, vector<1x1x128xf32>
    %307 = vector.shape_cast %306 : vector<1x1x128xf32> to vector<128xf32>
    %308 = vector.shape_cast %305 : vector<128xf32> to vector<1x1x128xf32>
    tpu.vector_store %arg6[%c0_225, %c0_226, %c640], %308 {strides = array<i32>} : memref<1x1x2048xf32, #tpu.memory_space<vmem>>, vector<1x1x128xf32>,
    %309 = vector.extract_strided_slice %224 {offsets = [20, 0], sizes = [1, 128], strides = [1, 1]} : vector<64x128xf32> to vector<1x128xf32>
    %310 = vector.shape_cast %309 : vector<1x128xf32> to vector<128xf32>
    %311 = vector.extract_strided_slice %224 {offsets = [21, 0], sizes = [1, 128], strides = [1, 1]} : vector<64x128xf32> to vector<1x128xf32>
    %312 = vector.shape_cast %311 : vector<1x128xf32> to vector<128xf32>
    %313 = arith.maximumf %310, %312 : vector<128xf32>
    %314 = vector.extract_strided_slice %224 {offsets = [28, 0], sizes = [1, 128], strides = [1, 1]} : vector<64x128xf32> to vector<1x128xf32>
    %315 = vector.shape_cast %314 : vector<1x128xf32> to vector<128xf32>
    %316 = vector.extract_strided_slice %224 {offsets = [29, 0], sizes = [1, 128], strides = [1, 1]} : vector<64x128xf32> to vector<1x128xf32>
    %317 = vector.shape_cast %316 : vector<1x128xf32> to vector<128xf32>
    %318 = arith.maximumf %315, %317 : vector<128xf32>
    %319 = arith.maximumf %313, %318 : vector<128xf32>
    %c0_227 = arith.constant 0 : index
    %c0_228 = arith.constant 0 : index
    %c768 = arith.constant 768 : index
    %320 = vector.load %arg6[%c0_227, %c0_228, %c768] : memref<1x1x2048xf32, #tpu.memory_space<vmem>>, vector<1x1x128xf32>
    %321 = vector.shape_cast %320 : vector<1x1x128xf32> to vector<128xf32>
    %322 = vector.shape_cast %319 : vector<128xf32> to vector<1x1x128xf32>
    tpu.vector_store %arg6[%c0_227, %c0_228, %c768], %322 {strides = array<i32>} : memref<1x1x2048xf32, #tpu.memory_space<vmem>>, vector<1x1x128xf32>,
    %323 = vector.extract_strided_slice %224 {offsets = [22, 0], sizes = [1, 128], strides = [1, 1]} : vector<64x128xf32> to vector<1x128xf32>
    %324 = vector.shape_cast %323 : vector<1x128xf32> to vector<128xf32>
    %325 = vector.extract_strided_slice %224 {offsets = [23, 0], sizes = [1, 128], strides = [1, 1]} : vector<64x128xf32> to vector<1x128xf32>
    %326 = vector.shape_cast %325 : vector<1x128xf32> to vector<128xf32>
    %327 = arith.maximumf %324, %326 : vector<128xf32>
    %328 = vector.extract_strided_slice %224 {offsets = [30, 0], sizes = [1, 128], strides = [1, 1]} : vector<64x128xf32> to vector<1x128xf32>
    %329 = vector.shape_cast %328 : vector<1x128xf32> to vector<128xf32>
    %330 = vector.extract_strided_slice %224 {offsets = [31, 0], sizes = [1, 128], strides = [1, 1]} : vector<64x128xf32> to vector<1x128xf32>
    %331 = vector.shape_cast %330 : vector<1x128xf32> to vector<128xf32>
    %332 = arith.maximumf %329, %331 : vector<128xf32>
    %333 = arith.maximumf %327, %332 : vector<128xf32>
    %c0_229 = arith.constant 0 : index
    %c0_230 = arith.constant 0 : index
    %c896 = arith.constant 896 : index
    %334 = vector.load %arg6[%c0_229, %c0_230, %c896] : memref<1x1x2048xf32, #tpu.memory_space<vmem>>, vector<1x1x128xf32>
    %335 = vector.shape_cast %334 : vector<1x1x128xf32> to vector<128xf32>
    %336 = vector.shape_cast %333 : vector<128xf32> to vector<1x1x128xf32>
    tpu.vector_store %arg6[%c0_229, %c0_230, %c896], %336 {strides = array<i32>} : memref<1x1x2048xf32, #tpu.memory_space<vmem>>, vector<1x1x128xf32>,
    %337 = vector.extract_strided_slice %224 {offsets = [32, 0], sizes = [1, 128], strides = [1, 1]} : vector<64x128xf32> to vector<1x128xf32>
    %338 = vector.shape_cast %337 : vector<1x128xf32> to vector<128xf32>
    %339 = vector.extract_strided_slice %224 {offsets = [33, 0], sizes = [1, 128], strides = [1, 1]} : vector<64x128xf32> to vector<1x128xf32>
    %340 = vector.shape_cast %339 : vector<1x128xf32> to vector<128xf32>
    %341 = arith.maximumf %338, %340 : vector<128xf32>
    %342 = vector.extract_strided_slice %224 {offsets = [40, 0], sizes = [1, 128], strides = [1, 1]} : vector<64x128xf32> to vector<1x128xf32>
    %343 = vector.shape_cast %342 : vector<1x128xf32> to vector<128xf32>
    %344 = vector.extract_strided_slice %224 {offsets = [41, 0], sizes = [1, 128], strides = [1, 1]} : vector<64x128xf32> to vector<1x128xf32>
    %345 = vector.shape_cast %344 : vector<1x128xf32> to vector<128xf32>
    %346 = arith.maximumf %343, %345 : vector<128xf32>
    %347 = arith.maximumf %341, %346 : vector<128xf32>
    %c0_231 = arith.constant 0 : index
    %c0_232 = arith.constant 0 : index
    %c1024 = arith.constant 1024 : index
    %348 = vector.load %arg6[%c0_231, %c0_232, %c1024] : memref<1x1x2048xf32, #tpu.memory_space<vmem>>, vector<1x1x128xf32>
    %349 = vector.shape_cast %348 : vector<1x1x128xf32> to vector<128xf32>
    %350 = vector.shape_cast %347 : vector<128xf32> to vector<1x1x128xf32>
    tpu.vector_store %arg6[%c0_231, %c0_232, %c1024], %350 {strides = array<i32>} : memref<1x1x2048xf32, #tpu.memory_space<vmem>>, vector<1x1x128xf32>,
    %351 = vector.extract_strided_slice %224 {offsets = [34, 0], sizes = [1, 128], strides = [1, 1]} : vector<64x128xf32> to vector<1x128xf32>
    %352 = vector.shape_cast %351 : vector<1x128xf32> to vector<128xf32>
    %353 = vector.extract_strided_slice %224 {offsets = [35, 0], sizes = [1, 128], strides = [1, 1]} : vector<64x128xf32> to vector<1x128xf32>
    %354 = vector.shape_cast %353 : vector<1x128xf32> to vector<128xf32>
    %355 = arith.maximumf %352, %354 : vector<128xf32>
    %356 = vector.extract_strided_slice %224 {offsets = [42, 0], sizes = [1, 128], strides = [1, 1]} : vector<64x128xf32> to vector<1x128xf32>
    %357 = vector.shape_cast %356 : vector<1x128xf32> to vector<128xf32>
    %358 = vector.extract_strided_slice %224 {offsets = [43, 0], sizes = [1, 128], strides = [1, 1]} : vector<64x128xf32> to vector<1x128xf32>
    %359 = vector.shape_cast %358 : vector<1x128xf32> to vector<128xf32>
    %360 = arith.maximumf %357, %359 : vector<128xf32>
    %361 = arith.maximumf %355, %360 : vector<128xf32>
    %c0_233 = arith.constant 0 : index
    %c0_234 = arith.constant 0 : index
    %c1152 = arith.constant 1152 : index
    %362 = vector.load %arg6[%c0_233, %c0_234, %c1152] : memref<1x1x2048xf32, #tpu.memory_space<vmem>>, vector<1x1x128xf32>
    %363 = vector.shape_cast %362 : vector<1x1x128xf32> to vector<128xf32>
    %364 = vector.shape_cast %361 : vector<128xf32> to vector<1x1x128xf32>
    tpu.vector_store %arg6[%c0_233, %c0_234, %c1152], %364 {strides = array<i32>} : memref<1x1x2048xf32, #tpu.memory_space<vmem>>, vector<1x1x128xf32>,
    %365 = vector.extract_strided_slice %224 {offsets = [36, 0], sizes = [1, 128], strides = [1, 1]} : vector<64x128xf32> to vector<1x128xf32>
    %366 = vector.shape_cast %365 : vector<1x128xf32> to vector<128xf32>
    %367 = vector.extract_strided_slice %224 {offsets = [37, 0], sizes = [1, 128], strides = [1, 1]} : vector<64x128xf32> to vector<1x128xf32>
    %368 = vector.shape_cast %367 : vector<1x128xf32> to vector<128xf32>
    %369 = arith.maximumf %366, %368 : vector<128xf32>
    %370 = vector.extract_strided_slice %224 {offsets = [44, 0], sizes = [1, 128], strides = [1, 1]} : vector<64x128xf32> to vector<1x128xf32>
    %371 = vector.shape_cast %370 : vector<1x128xf32> to vector<128xf32>
    %372 = vector.extract_strided_slice %224 {offsets = [45, 0], sizes = [1, 128], strides = [1, 1]} : vector<64x128xf32> to vector<1x128xf32>
    %373 = vector.shape_cast %372 : vector<1x128xf32> to vector<128xf32>
    %374 = arith.maximumf %371, %373 : vector<128xf32>
    %375 = arith.maximumf %369, %374 : vector<128xf32>
    %c0_235 = arith.constant 0 : index
    %c0_236 = arith.constant 0 : index
    %c1280 = arith.constant 1280 : index
    %376 = vector.load %arg6[%c0_235, %c0_236, %c1280] : memref<1x1x2048xf32, #tpu.memory_space<vmem>>, vector<1x1x128xf32>
    %377 = vector.shape_cast %376 : vector<1x1x128xf32> to vector<128xf32>
    %378 = vector.shape_cast %375 : vector<128xf32> to vector<1x1x128xf32>
    tpu.vector_store %arg6[%c0_235, %c0_236, %c1280], %378 {strides = array<i32>} : memref<1x1x2048xf32, #tpu.memory_space<vmem>>, vector<1x1x128xf32>,
    %379 = vector.extract_strided_slice %224 {offsets = [38, 0], sizes = [1, 128], strides = [1, 1]} : vector<64x128xf32> to vector<1x128xf32>
    %380 = vector.shape_cast %379 : vector<1x128xf32> to vector<128xf32>
    %381 = vector.extract_strided_slice %224 {offsets = [39, 0], sizes = [1, 128], strides = [1, 1]} : vector<64x128xf32> to vector<1x128xf32>
    %382 = vector.shape_cast %381 : vector<1x128xf32> to vector<128xf32>
    %383 = arith.maximumf %380, %382 : vector<128xf32>
    %384 = vector.extract_strided_slice %224 {offsets = [46, 0], sizes = [1, 128], strides = [1, 1]} : vector<64x128xf32> to vector<1x128xf32>
    %385 = vector.shape_cast %384 : vector<1x128xf32> to vector<128xf32>
    %386 = vector.extract_strided_slice %224 {offsets = [47, 0], sizes = [1, 128], strides = [1, 1]} : vector<64x128xf32> to vector<1x128xf32>
    %387 = vector.shape_cast %386 : vector<1x128xf32> to vector<128xf32>
    %388 = arith.maximumf %385, %387 : vector<128xf32>
    %389 = arith.maximumf %383, %388 : vector<128xf32>
    %c0_237 = arith.constant 0 : index
    %c0_238 = arith.constant 0 : index
    %c1408 = arith.constant 1408 : index
    %390 = vector.load %arg6[%c0_237, %c0_238, %c1408] : memref<1x1x2048xf32, #tpu.memory_space<vmem>>, vector<1x1x128xf32>
    %391 = vector.shape_cast %390 : vector<1x1x128xf32> to vector<128xf32>
    %392 = vector.shape_cast %389 : vector<128xf32> to vector<1x1x128xf32>
    tpu.vector_store %arg6[%c0_237, %c0_238, %c1408], %392 {strides = array<i32>} : memref<1x1x2048xf32, #tpu.memory_space<vmem>>, vector<1x1x128xf32>,
    %393 = vector.extract_strided_slice %224 {offsets = [48, 0], sizes = [1, 128], strides = [1, 1]} : vector<64x128xf32> to vector<1x128xf32>
    %394 = vector.shape_cast %393 : vector<1x128xf32> to vector<128xf32>
    %395 = vector.extract_strided_slice %224 {offsets = [49, 0], sizes = [1, 128], strides = [1, 1]} : vector<64x128xf32> to vector<1x128xf32>
    %396 = vector.shape_cast %395 : vector<1x128xf32> to vector<128xf32>
    %397 = arith.maximumf %394, %396 : vector<128xf32>
    %398 = vector.extract_strided_slice %224 {offsets = [56, 0], sizes = [1, 128], strides = [1, 1]} : vector<64x128xf32> to vector<1x128xf32>
    %399 = vector.shape_cast %398 : vector<1x128xf32> to vector<128xf32>
    %400 = vector.extract_strided_slice %224 {offsets = [57, 0], sizes = [1, 128], strides = [1, 1]} : vector<64x128xf32> to vector<1x128xf32>
    %401 = vector.shape_cast %400 : vector<1x128xf32> to vector<128xf32>
    %402 = arith.maximumf %399, %401 : vector<128xf32>
    %403 = arith.maximumf %397, %402 : vector<128xf32>
    %c0_239 = arith.constant 0 : index
    %c0_240 = arith.constant 0 : index
    %c1536 = arith.constant 1536 : index
    %404 = vector.load %arg6[%c0_239, %c0_240, %c1536] : memref<1x1x2048xf32, #tpu.memory_space<vmem>>, vector<1x1x128xf32>
    %405 = vector.shape_cast %404 : vector<1x1x128xf32> to vector<128xf32>
    %406 = vector.shape_cast %403 : vector<128xf32> to vector<1x1x128xf32>
    tpu.vector_store %arg6[%c0_239, %c0_240, %c1536], %406 {strides = array<i32>} : memref<1x1x2048xf32, #tpu.memory_space<vmem>>, vector<1x1x128xf32>,
    %407 = vector.extract_strided_slice %224 {offsets = [50, 0], sizes = [1, 128], strides = [1, 1]} : vector<64x128xf32> to vector<1x128xf32>
    %408 = vector.shape_cast %407 : vector<1x128xf32> to vector<128xf32>
    %409 = vector.extract_strided_slice %224 {offsets = [51, 0], sizes = [1, 128], strides = [1, 1]} : vector<64x128xf32> to vector<1x128xf32>
    %410 = vector.shape_cast %409 : vector<1x128xf32> to vector<128xf32>
    %411 = arith.maximumf %408, %410 : vector<128xf32>
    %412 = vector.extract_strided_slice %224 {offsets = [58, 0], sizes = [1, 128], strides = [1, 1]} : vector<64x128xf32> to vector<1x128xf32>
    %413 = vector.shape_cast %412 : vector<1x128xf32> to vector<128xf32>
    %414 = vector.extract_strided_slice %224 {offsets = [59, 0], sizes = [1, 128], strides = [1, 1]} : vector<64x128xf32> to vector<1x128xf32>
    %415 = vector.shape_cast %414 : vector<1x128xf32> to vector<128xf32>
    %416 = arith.maximumf %413, %415 : vector<128xf32>
    %417 = arith.maximumf %411, %416 : vector<128xf32>
    %c0_241 = arith.constant 0 : index
    %c0_242 = arith.constant 0 : index
    %c1664 = arith.constant 1664 : index
    %418 = vector.load %arg6[%c0_241, %c0_242, %c1664] : memref<1x1x2048xf32, #tpu.memory_space<vmem>>, vector<1x1x128xf32>
    %419 = vector.shape_cast %418 : vector<1x1x128xf32> to vector<128xf32>
    %420 = vector.shape_cast %417 : vector<128xf32> to vector<1x1x128xf32>
    tpu.vector_store %arg6[%c0_241, %c0_242, %c1664], %420 {strides = array<i32>} : memref<1x1x2048xf32, #tpu.memory_space<vmem>>, vector<1x1x128xf32>,
    %421 = vector.extract_strided_slice %224 {offsets = [52, 0], sizes = [1, 128], strides = [1, 1]} : vector<64x128xf32> to vector<1x128xf32>
    %422 = vector.shape_cast %421 : vector<1x128xf32> to vector<128xf32>
    %423 = vector.extract_strided_slice %224 {offsets = [53, 0], sizes = [1, 128], strides = [1, 1]} : vector<64x128xf32> to vector<1x128xf32>
    %424 = vector.shape_cast %423 : vector<1x128xf32> to vector<128xf32>
    %425 = arith.maximumf %422, %424 : vector<128xf32>
    %426 = vector.extract_strided_slice %224 {offsets = [60, 0], sizes = [1, 128], strides = [1, 1]} : vector<64x128xf32> to vector<1x128xf32>
    %427 = vector.shape_cast %426 : vector<1x128xf32> to vector<128xf32>
    %428 = vector.extract_strided_slice %224 {offsets = [61, 0], sizes = [1, 128], strides = [1, 1]} : vector<64x128xf32> to vector<1x128xf32>
    %429 = vector.shape_cast %428 : vector<1x128xf32> to vector<128xf32>
    %430 = arith.maximumf %427, %429 : vector<128xf32>
    %431 = arith.maximumf %425, %430 : vector<128xf32>
    %c0_243 = arith.constant 0 : index
    %c0_244 = arith.constant 0 : index
    %c1792 = arith.constant 1792 : index
    %432 = vector.load %arg6[%c0_243, %c0_244, %c1792] : memref<1x1x2048xf32, #tpu.memory_space<vmem>>, vector<1x1x128xf32>
    %433 = vector.shape_cast %432 : vector<1x1x128xf32> to vector<128xf32>
    %434 = vector.shape_cast %431 : vector<128xf32> to vector<1x1x128xf32>
    tpu.vector_store %arg6[%c0_243, %c0_244, %c1792], %434 {strides = array<i32>} : memref<1x1x2048xf32, #tpu.memory_space<vmem>>, vector<1x1x128xf32>,
    %435 = vector.extract_strided_slice %224 {offsets = [54, 0], sizes = [1, 128], strides = [1, 1]} : vector<64x128xf32> to vector<1x128xf32>
    %436 = vector.shape_cast %435 : vector<1x128xf32> to vector<128xf32>
    %437 = vector.extract_strided_slice %224 {offsets = [55, 0], sizes = [1, 128], strides = [1, 1]} : vector<64x128xf32> to vector<1x128xf32>
    %438 = vector.shape_cast %437 : vector<1x128xf32> to vector<128xf32>
    %439 = arith.maximumf %436, %438 : vector<128xf32>
    %440 = vector.extract_strided_slice %224 {offsets = [62, 0], sizes = [1, 128], strides = [1, 1]} : vector<64x128xf32> to vector<1x128xf32>
    %441 = vector.shape_cast %440 : vector<1x128xf32> to vector<128xf32>
    %442 = vector.extract_strided_slice %224 {offsets = [63, 0], sizes = [1, 128], strides = [1, 1]} : vector<64x128xf32> to vector<1x128xf32>
    %443 = vector.shape_cast %442 : vector<1x128xf32> to vector<128xf32>
    %444 = arith.maximumf %441, %443 : vector<128xf32>
    %445 = arith.maximumf %439, %444 : vector<128xf32>
    %c0_245 = arith.constant 0 : index
    %c0_246 = arith.constant 0 : index
    %c1920 = arith.constant 1920 : index
    %446 = vector.load %arg6[%c0_245, %c0_246, %c1920] : memref<1x1x2048xf32, #tpu.memory_space<vmem>>, vector<1x1x128xf32>
    %447 = vector.shape_cast %446 : vector<1x1x128xf32> to vector<128xf32>
    %448 = vector.shape_cast %445 : vector<128xf32> to vector<1x1x128xf32>
    tpu.vector_store %arg6[%c0_245, %c0_246, %c1920], %448 {strides = array<i32>} : memref<1x1x2048xf32, #tpu.memory_space<vmem>>, vector<1x1x128xf32>,
    return
  }
  func.func @transform_0(%arg0: i32) -> (i32, i32, i32, i32) {
    %c0_i32 = arith.constant 0 : i32
    %c0_i32_0 = arith.constant 0 : i32
    %c0_i32_1 = arith.constant 0 : i32
    %c0_i32_2 = arith.constant 0 : i32
    return %arg0, %c0_i32, %c0_i32_0, %c0_i32_1 : i32, i32, i32, i32
  }
  func.func @transform_1(%arg0: i32) -> (i32, i32) {
    %c0_i32 = arith.constant 0 : i32
    %c0_i32_0 = arith.constant 0 : i32
    %c0_i32_1 = arith.constant 0 : i32
    return %c0_i32, %c0_i32_0 : i32, i32
  }
  func.func @transform_2(%arg0: i32) -> (i32, i32) {
    %c0_i32 = arith.constant 0 : i32
    %c0_i32_0 = arith.constant 0 : i32
    %c0_i32_1 = arith.constant 0 : i32
    return %c0_i32, %c0_i32_0 : i32, i32
  }
  func.func @transform_3(%arg0: i32) -> (i32, i32, i32) {
    %c0_i32 = arith.constant 0 : i32
    %c0_i32_0 = arith.constant 0 : i32
    %c0_i32_1 = arith.constant 0 : i32
    %c0_i32_2 = arith.constant 0 : i32
    return %c0_i32, %c0_i32_0, %c0_i32_1 : i32, i32, i32
  }
  func.func @transform_4(%arg0: i32) -> (i32, i32) {
    %c0_i32 = arith.constant 0 : i32
    %c0_i32_0 = arith.constant 0 : i32
    %c0_i32_1 = arith.constant 0 : i32
    return %c0_i32, %c0_i32_0 : i32, i32
  }
  func.func @transform_5(%arg0: i32) -> (i32, i32, i32) {
    %c0_i32 = arith.constant 0 : i32
    %c0_i32_0 = arith.constant 0 : i32
    %c0_i32_1 = arith.constant 0 : i32
    return %arg0, %c0_i32, %c0_i32_0 : i32, i32, i32
  }
}

module attributes {stable_mosaic.version = 11 : i64} {
  func.func @_head_kernel(%arg0: i32, %arg1: memref<8x2048xf32, #tpu.memory_space<vmem>>, %arg2: memref<2048x512xf32, #tpu.memory_space<vmem>>, %arg3: memref<1x512xf32, #tpu.memory_space<vmem>>, %arg4: memref<512x128xf32, #tpu.memory_space<vmem>>, %arg5: memref<1x128xf32, #tpu.memory_space<vmem>>, %arg6: memref<8x128xf32, #tpu.memory_space<vmem>>) attributes {dimension_semantics = [#tpu.dimension_semantics<parallel>], iteration_bounds = array<i64: 1>, scalar_prefetch = 0 : i64, scratch_operands = 0 : i64, tpu.core_type = #tpu.core_type<tc>, window_params = [{transform_indices = @transform_0, window_bounds = array<i64: 8, 2048>}, {pipeline_mode = #tpu.pipeline_mode<synchronous>, transform_indices = @transform_1, window_bounds = array<i64: 2048, 512>}, {pipeline_mode = #tpu.pipeline_mode<synchronous>, transform_indices = @transform_2, window_bounds = array<i64: 1, 512>}, {pipeline_mode = #tpu.pipeline_mode<synchronous>, transform_indices = @transform_3, window_bounds = array<i64: 512, 128>}, {pipeline_mode = #tpu.pipeline_mode<synchronous>, transform_indices = @transform_4, window_bounds = array<i64: 1, 128>}, {transform_indices = @transform_5, window_bounds = array<i64: 8, 128>}]} {
    %c0 = arith.constant 0 : index
    %c0_0 = arith.constant 0 : index
    %0 = vector.load %arg1[%c0, %c0_0] : memref<8x2048xf32, #tpu.memory_space<vmem>>, vector<8x2048xf32>
    %c0_1 = arith.constant 0 : index
    %c0_2 = arith.constant 0 : index
    %1 = vector.load %arg2[%c0_1, %c0_2] : memref<2048x512xf32, #tpu.memory_space<vmem>>, vector<2048x512xf32>
    %cst = arith.constant dense<0.000000e+00> : vector<8x512xf32>
    %2 = tpu.matmul %0, %1, %cst {dimension_numbers = #tpu.dot_dimension_numbers<[1], [0], [0], [1], [0, 0, 1, 1], [], []>} : vector<8x2048xf32>, vector<2048x512xf32>, vector<8x512xf32> -> vector<8x512xf32>
    %c0_3 = arith.constant 0 : index
    %c0_4 = arith.constant 0 : index
    %3 = vector.load %arg3[%c0_3, %c0_4] : memref<1x512xf32, #tpu.memory_space<vmem>>, vector<1x512xf32>
    %4 = vector.broadcast %3 : vector<1x512xf32> to vector<8x512xf32>
    %5 = arith.addf %2, %4 : vector<8x512xf32>
    %cst_5 = arith.constant 0.000000e+00 : f32
    %6 = vector.broadcast %cst_5 : f32 to vector<8x512xf32>
    %7 = arith.maximumf %5, %6 : vector<8x512xf32>
    %c0_6 = arith.constant 0 : index
    %c0_7 = arith.constant 0 : index
    %8 = vector.load %arg4[%c0_6, %c0_7] : memref<512x128xf32, #tpu.memory_space<vmem>>, vector<512x128xf32>
    %cst_8 = arith.constant dense<0.000000e+00> : vector<8x128xf32>
    %9 = tpu.matmul %7, %8, %cst_8 {dimension_numbers = #tpu.dot_dimension_numbers<[1], [0], [0], [1], [0, 0, 1, 1], [], []>} : vector<8x512xf32>, vector<512x128xf32>, vector<8x128xf32> -> vector<8x128xf32>
    %c0_9 = arith.constant 0 : index
    %c0_10 = arith.constant 0 : index
    %10 = vector.load %arg5[%c0_9, %c0_10] : memref<1x128xf32, #tpu.memory_space<vmem>>, vector<1x128xf32>
    %11 = vector.broadcast %10 : vector<1x128xf32> to vector<8x128xf32>
    %12 = arith.addf %9, %11 : vector<8x128xf32>
    %c0_11 = arith.constant 0 : index
    %c0_12 = arith.constant 0 : index
    %13 = vector.load %arg6[%c0_11, %c0_12] : memref<8x128xf32, #tpu.memory_space<vmem>>, vector<8x128xf32>
    tpu.vector_store %arg6[%c0_11, %c0_12], %12 {strides = array<i32>} : memref<8x128xf32, #tpu.memory_space<vmem>>, vector<8x128xf32>,
    return
  }
  func.func @transform_0(%arg0: i32) -> (i32, i32) {
    %c0_i32 = arith.constant 0 : i32
    %c0_i32_0 = arith.constant 0 : i32
    return %arg0, %c0_i32 : i32, i32
  }
  func.func @transform_1(%arg0: i32) -> (i32, i32) {
    %c0_i32 = arith.constant 0 : i32
    %c0_i32_0 = arith.constant 0 : i32
    %c0_i32_1 = arith.constant 0 : i32
    return %c0_i32, %c0_i32_0 : i32, i32
  }
  func.func @transform_2(%arg0: i32) -> (i32, i32) {
    %c0_i32 = arith.constant 0 : i32
    %c0_i32_0 = arith.constant 0 : i32
    %c0_i32_1 = arith.constant 0 : i32
    return %c0_i32, %c0_i32_0 : i32, i32
  }
  func.func @transform_3(%arg0: i32) -> (i32, i32) {
    %c0_i32 = arith.constant 0 : i32
    %c0_i32_0 = arith.constant 0 : i32
    %c0_i32_1 = arith.constant 0 : i32
    return %c0_i32, %c0_i32_0 : i32, i32
  }
  func.func @transform_4(%arg0: i32) -> (i32, i32) {
    %c0_i32 = arith.constant 0 : i32
    %c0_i32_0 = arith.constant 0 : i32
    %c0_i32_1 = arith.constant 0 : i32
    return %c0_i32, %c0_i32_0 : i32, i32
  }
  func.func @transform_5(%arg0: i32) -> (i32, i32) {
    %c0_i32 = arith.constant 0 : i32
    %c0_i32_0 = arith.constant 0 : i32
    return %arg0, %c0_i32 : i32, i32
  }
}

</mosaic_0001>

<bundles_post_ra>
// kernel: cnn_mnist_forward.2
= control target key start
LH: loop header
LB: loop body
LE: loop exit
PB: predicated region body
PF: predicated region fallthrough
CT: control target
= control target key end

     0   :  { %s7212_s18 = smov 0   ;;  %s8414_s0 = inlined_call_operand.vmem [shape: f32[2,4,144,32], index: 0, kind: input, shape index: {}]   ;;  %s8415_s1 = inlined_call_operand.vmem [shape: f32[32,32], index: 1, kind: input, shape index: {}]   ;;  %s8416_s2 = inlined_call_operand.vmem [shape: f32[1,32], index: 2, kind: input, shape index: {}]   ;;  %s8417_s3 = inlined_call_operand.vmem [shape: f32[25,32,128], index: 3, kind: input, shape index: {}]   ;;  %s8418_s4 = inlined_call_operand.vmem [shape: f32[1,128], index: 4, kind: input, shape index: {}]   ;;  %s8419_s5 = inlined_call_operand.vmem [shape: f32[2,1,2048], index: 5, kind: output, shape index: {}]  }
   0x1 LB: > { %s5278_s19 = sadd.s32 4294967295, %s7179_s18   ;;  %p5282_p0 = scmp.ge.s32.totalorder %s7179_s18, 1  ;;  %s7179_s18 = sphi %s7212_s18, %s15_s18  }
   0x2   : > { %p187_p1 = scmp.lt.s32.totalorder %s7179_s18, 3 }
   0x4   : > { %p188_p2 = pnand %p5282_p0, %p187_p1 }
   0x5   : > { %v223_v0 = vld [vmem:[%s8415_s1] sm:$0xff] (!%p188_p2)  ;;  %v224_v1 = vld [vmem:[%s8415_s1 + $0x8] sm:$0xff] (!%p188_p2)  ;;  %v225_v2 = vld [vmem:[%s8415_s1 + $0x10] sm:$0xff] (!%p188_p2)  ;;  %p214_p3 = scmp.lt.s32.totalorder (!%p188_p2), %s5278_s19, 1  ;;  %vm245_vm0 = vcmask (!%p188_p2), 261120   ;;  %vm1237_vm1 = vcmask (!%p188_p2), 257024  }
   0x6   : > { %191 = sbr.rel (%p188_p2) target bundleno = 870 (0x366), region = 40  ;;  %v7229_v3 = vpack.c.bf16 (!%p188_p2), %v224_v1, %v223_v0  ;;  %v226_v4 = vld [vmem:[%s8415_s1 + $0x18] sm:$0xff] (!%p188_p2)  ;;  %vm1240_vm2 = vcmask (!%p188_p2), 261124  }
   0x7   : > { %v7234_v5 = vpack.c.bf16 (!%p188_p2), %v226_v4, %v225_v2 }
   0x8   : > { %6740 = vmatprep.subr.bf16.mxu1 (!%p188_p2), %v7229_v3 }
   0x9   : > { %6742 = vmatpush3.bf16.msra.mxu1 (!%p188_p2), %v7229_v3 }
   0xa   : > { %6744 = vmatprep.subr.bf16.mxu1 (!%p188_p2), %v7234_v5 }
   0xd   : > { %s8423_s19 = smov (!%p214_p3, %s5278_s19), 1  ;;  %6746 = vmatpush3.bf16.msra.mxu1 %v7234_v5 }
   0xe   : > { %s7163_s28 = smul.u32 576, %s8423_s19  ;;  %6748 = vmatprep.subr.bf16.mxu1 %v7229_v3  ;;  %s5284_s29 = sshll.u32 %s8423_s19, 4 }
   0xf   : > { %s8341_s7 = scalar_lea.vmem %s8419_s5, %s5284_s29 }
  0x10   : > { %s7245_s6 = scalar_lea.vmem %s8414_s0, %s7163_s28 }
  0x11   : > { %v227_v6 = vld [vmem:[%s7245_s6] sm:$0xff]  ;;  %v228_v7 = vld [vmem:[%s7245_s6 + $0x8] sm:$0xff]  ;;  %v229_v8 = vld [vmem:[%s7245_s6 + $0x10] sm:$0xff] }
  0x12   : > { %6107 = vmatprep.mubr.msk.f32.mxu1 %vm245_vm0, %v227_v6  ;;  %v230_v9 = vld [vmem:[%s7245_s6 + $0x18] sm:$0xff]  ;;  %v231_v10 = vld [vmem:[%s7245_s6 + $0x20] sm:$0xff]  ;;  %v232_v11 = vld [vmem:[%s7245_s6 + $0x28] sm:$0xff] }
  0x13   : > { %6108 = vmatmul.mubr.msk.f32.vlgmr.msra.gmra.mrb[0].mxu1 %vm245_vm0, %v228_v7  ;;  %v233_v12 = vld [vmem:[%s7245_s6 + $0x30] sm:$0xff]  ;;  %v234_v13 = vld [vmem:[%s7245_s6 + $0x38] sm:$0xff]  ;;  %v235_v14 = vld [vmem:[%s7245_s6 + $0x40] sm:$0xff] }
  0x14   : > { %6750 = vmatpush3.bf16.msra.mxu1 %v7229_v3  ;;  %6110 = vmatprep.mubr.msk.f32.mxu1 %vm245_vm0, %v229_v8  ;;  %v236_v15 = vld [vmem:[%s7245_s6 + $0x48] sm:$0xff]  ;;  %v237_v16 = vld [vmem:[%s7245_s6 + $0x50] sm:$0xff]  ;;  %v238_v17 = vld [vmem:[%s7245_s6 + $0x58] sm:$0xff] }
  0x15   : > { %6752 = vmatprep.subr.bf16.mxu1 %v7234_v5  ;;  %v239_v18 = vld [vmem:[%s7245_s6 + $0x60] sm:$0xff]  ;;  %v240_v19 = vld [vmem:[%s7245_s6 + $0x68] sm:$0xff]  ;;  %v241_v20 = vld [vmem:[%s7245_s6 + $0x70] sm:$0xff] }
  0x16   : > { %v242_v21 = vld [vmem:[%s7245_s6 + $0x78] sm:$0xff]  ;;  %v243_v22 = vld [vmem:[%s7245_s6 + $0x80] sm:$0xff]  ;;  %v244_v23 = vld [vmem:[%s7245_s6 + $0x88] sm:$0xff] }
  0x17   : > { %6111 = vmatmul.mubr.msk.f32.gmra.mrb[2].mxu1 %vm245_vm0, %v230_v9  ;;  %v5303_v24 = vld [vmem:[%s7245_s6 + $0x90] sm:$0xff]  ;;  %v5304_v25 = vld [vmem:[%s7245_s6 + $0x98] sm:$0xff]  ;;  %v5305_v26 = vld [vmem:[%s7245_s6 + $0xa0] sm:$0xff] }
  0x18   : > { %6113 = vmatprep.mubr.msk.f32.mxu1 %vm245_vm0, %v231_v10  ;;  %6754 = vmatpush3.bf16.msra.mxu1 %v7234_v5  ;;  %v5306_v27 = vld [vmem:[%s7245_s6 + $0xa8] sm:$0xff]  ;;  %v5307_v28 = vld [vmem:[%s7245_s6 + $0xb0] sm:$0xff]  ;;  %v5308_v29 = vld [vmem:[%s7245_s6 + $0xb8] sm:$0xff] }
  0x19   : > { %6756 = vmatprep.subr.bf16.mxu1 %v7229_v3  ;;  %v5309_v30 = vld [vmem:[%s7245_s6 + $0xc0] sm:$0xff]  ;;  %v5310_v31 = vld [vmem:[%s7245_s6 + $0xc8] sm:$0xff]  ;;  %v5311_v32 = vld [vmem:[%s7245_s6 + $0xd0] sm:$0xff] }
  0x1a   : > { %v5312_v33 = vld [vmem:[%s7245_s6 + $0xd8] sm:$0xff]  ;;  %v5313_v34 = vld [vmem:[%s7245_s6 + $0xe0] sm:$0xff]  ;;  %v5314_v35 = vld [vmem:[%s7245_s6 + $0xe8] sm:$0xff] }
  0x1b   : > { %6114 = vmatmul.mubr.msk.f32.gmra.mrb[4].mxu1 %vm245_vm0, %v232_v11  ;;  %v5315_v36 = vld [vmem:[%s7245_s6 + $0xf0] sm:$0xff]  ;;  %v5316_v37 = vld [vmem:[%s7245_s6 + $0xf8] sm:$0xff]  ;;  %v5317_v38 = vld [vmem:[%s7245_s6 + $0x100] sm:$0xff] }
  0x1c   : > { %6116 = vmatprep.mubr.msk.f32.mxu1 %vm245_vm0, %v233_v12  ;;  %v5318_v39 = vld [vmem:[%s7245_s6 + $0x108] sm:$0xff]  ;;  %v5319_v40 = vld [vmem:[%s7245_s6 + $0x110] sm:$0xff]  ;;  %v5320_v41 = vld [vmem:[%s7245_s6 + $0x118] sm:$0xff] }
  0x1d   : > { %v5339_v42 = vld [vmem:[%s7245_s6 + $0x120] sm:$0xff]  ;;  %v5340_v43 = vld [vmem:[%s7245_s6 + $0x128] sm:$0xff]  ;;  %v5341_v44 = vld [vmem:[%s7245_s6 + $0x130] sm:$0xff] }
  0x1e   : > { %v5342_v45 = vld [vmem:[%s7245_s6 + $0x138] sm:$0xff]  ;;  %v5343_v46 = vld [vmem:[%s7245_s6 + $0x140] sm:$0xff]  ;;  %v5344_v47 = vld [vmem:[%s7245_s6 + $0x148] sm:$0xff] }
  0x1f   : > { %6117 = vmatmul.mubr.msk.f32.gmra.mrb[6].mxu1 %vm245_vm0, %v234_v13  ;;  %v5345_v48 = vld [vmem:[%s7245_s6 + $0x150] sm:$0xff]  ;;  %v5346_v49 = vld [vmem:[%s7245_s6 + $0x158] sm:$0xff]  ;;  %v5347_v50 = vld [vmem:[%s7245_s6 + $0x160] sm:$0xff] }
  0x20   : > { %6119 = vmatprep.mubr.msk.f32.mxu1 %vm245_vm0, %v235_v14  ;;  %v5348_v51 = vld [vmem:[%s7245_s6 + $0x168] sm:$0xff]  ;;  %v5349_v52 = vld [vmem:[%s7245_s6 + $0x170] sm:$0xff]  ;;  %v5350_v53 = vld [vmem:[%s7245_s6 + $0x178] sm:$0xff] }
  0x21   : > { %v5351_v54 = vld [vmem:[%s7245_s6 + $0x180] sm:$0xff]  ;;  %v5352_v55 = vld [vmem:[%s7245_s6 + $0x188] sm:$0xff]  ;;  %v5353_v56 = vld [vmem:[%s7245_s6 + $0x190] sm:$0xff] }
  0x22   : > { %v5354_v57 = vld [vmem:[%s7245_s6 + $0x198] sm:$0xff]  ;;  %v5355_v58 = vld [vmem:[%s7245_s6 + $0x1a0] sm:$0xff]  ;;  %v5356_v59 = vld [vmem:[%s7245_s6 + $0x1a8] sm:$0xff] }
  0x23   : > { %6120 = vmatmul.mubr.msk.f32.gmra.mrb[8].mxu1 %vm245_vm0, %v236_v15  ;;  %v5375_v60 = vld [vmem:[%s7245_s6 + $0x1b0] sm:$0xff]  ;;  %v5376_v61 = vld [vmem:[%s7245_s6 + $0x1b8] sm:$0xff]  ;;  %v5377_v62 = vld [vmem:[%s7245_s6 + $0x1c0] sm:$0xff] }
  0x24   : > { %6122 = vmatprep.mubr.msk.f32.mxu1 %vm245_vm0, %v237_v16  ;;  %v5378_v63 = vld [vmem:[%s7245_s6 + $0x1c8] sm:$0xff]  ;;  %v5379_v0 = vld [vmem:[%s7245_s6 + $0x1d0] sm:$0xff]  ;;  %v5380_v1 = vld [vmem:[%s7245_s6 + $0x1d8] sm:$0xff] }
  0x25   : > { %v5381_v2 = vld [vmem:[%s7245_s6 + $0x1e0] sm:$0xff]  ;;  %v5383_v4 = vld [vmem:[%s7245_s6 + $0x1f0] sm:$0xff]  ;;  %v5386_v7 = vld [vmem:[%s7245_s6 + $0x208] sm:$0xff] }
  0x26   : > { %v5385_v6 = vld [vmem:[%s7245_s6 + $0x200] sm:$0xff]  ;;  %v5387_v8 = vld [vmem:[%s7245_s6 + $0x210] sm:$0xff]  ;;  %v5388_v9 = vld [vmem:[%s7245_s6 + $0x218] sm:$0xff] }
  0x27   : > { %6123 = vmatmul.mubr.msk.f32.gmra.mrb[10].mxu1 %vm245_vm0, %v238_v17  ;;  %v5389_v10 = vld [vmem:[%s7245_s6 + $0x220] sm:$0xff]  ;;  %v5390_v11 = vld [vmem:[%s7245_s6 + $0x228] sm:$0xff]  ;;  %v5391_v12 = vld [vmem:[%s7245_s6 + $0x230] sm:$0xff] }
  0x28   : > { %6125 = vmatprep.mubr.msk.f32.mxu1 %vm245_vm0, %v239_v18  ;;  %v5392_v13 = vld [vmem:[%s7245_s6 + $0x238] sm:$0xff]  ;;  %v5412_v14 = vld [vmem:[%s8417_s3 + $0x20] sm:$0xff]  ;;  %v5413_v15 = vld [vmem:[%s8417_s3 + $0x28] sm:$0xff] }
  0x29   : > { %v6771_v16 = vpack.c.bf16 %v5413_v15, %v5412_v14  ;;  %v5414_v17 = vld [vmem:[%s8417_s3 + $0x30] sm:$0xff]  ;;  %v5415_v18 = vld [vmem:[%s8417_s3 + $0x38] sm:$0xff] }
  0x2b   : > { %6126 = vmatmul.mubr.msk.f32.gmra.mrb[12].mxu1 %vm245_vm0, %v240_v19  ;;  %v5504_v19 = vld [vmem:[%s8417_s3 + $0x100] sm:$0xff] }
  0x2c   : > { %6128 = vmatprep.mubr.msk.f32.mxu1 %vm245_vm0, %v241_v20  ;;  %v6775_v20 = vpack.c.bf16 %v5415_v18, %v5414_v17 }
  0x2f   : > { %6129 = vmatmul.mubr.msk.f32.gmra.mrb[14].mxu1 %vm245_vm0, %v242_v21  ;;  %v5505_v21 = vld [vmem:[%s8417_s3 + $0x108] sm:$0xff] }
  0x30   : > { %6131 = vmatprep.mubr.msk.f32.mxu1 %vm245_vm0, %v243_v22  ;;  %v6835_v22 = vpack.c.bf16 %v5505_v21, %v5504_v19 }
  0x32   : > { %6836 = vmatprep.subr.bf16.mxu0 %v6835_v22 }
  0x33   : > { %6132 = vmatmul.mubr.msk.f32.gmra.mrb[16].mxu1 %vm245_vm0, %v244_v23  ;;  %v5506_v23 = vld [vmem:[%s8417_s3 + $0x110] sm:$0xff]  ;;  %6838 = vmatpush3.bf16.msra.mxu0 %v6835_v22 }
  0x34   : > { %6142 = vmatprep.mubr.msk.f32.mxu1 %vm245_vm0, %v5303_v24  ;;  %v5507_v24 = vld [vmem:[%s8417_s3 + $0x118] sm:$0xff] }
  0x37   : > { %6143 = vmatmul.mubr.msk.f32.vlgmr.msra.gmra.mrb[18].mxu1 %vm245_vm0, %v5304_v25  ;;  %v6839_v25 = vpack.c.bf16 %v5507_v24, %v5506_v23 }
  0x38   : > { %6758 = vmatpush3.bf16.msra.mxu1 %v7229_v3  ;;  %6145 = vmatprep.mubr.msk.f32.mxu1 %vm245_vm0, %v5305_v26 }
  0x39   : > { %6760 = vmatprep.subr.bf16.mxu1 %v7234_v5  ;;  %6840 = vmatprep.subr.bf16.mxu0 %v6839_v25 }
  0x3a   : > { %6842 = vmatpush3.bf16.msra.mxu0 %v6839_v25 }
  0x3b   : > { %6146 = vmatmul.mubr.msk.f32.gmra.mrb[20].mxu1 %vm245_vm0, %v5306_v27 }
  0x3c   : > { %6148 = vmatprep.mubr.msk.f32.mxu1 %vm245_vm0, %v5307_v28  ;;  %6762 = vmatpush3.bf16.msra.mxu1 %v7234_v5 }
  0x3d   : > { %6764 = vmatprep.subr.bf16.mxu1 %v7229_v3 }
  0x3f   : > { %6149 = vmatmul.mubr.msk.f32.gmra.mrb[22].mxu1 %vm245_vm0, %v5308_v29 }
  0x40   : > { %6151 = vmatprep.mubr.msk.f32.mxu1 %vm245_vm0, %v5309_v30 }
  0x43   : > { %6152 = vmatmul.mubr.msk.f32.gmra.mrb[24].mxu1 %vm245_vm0, %v5310_v31 }
  0x44   : > { %6154 = vmatprep.mubr.msk.f32.mxu1 %vm245_vm0, %v5311_v32  ;;  %v1281_v32 = vld [vmem:[%s8417_s3] sm:$0xff] }
  0x47   : > { %6155 = vmatmul.mubr.msk.f32.gmra.mrb[26].mxu1 %vm245_vm0, %v5312_v33  ;;  %v1282_v33 = vld [vmem:[%s8417_s3 + $0x8] sm:$0xff] }
  0x48   : > { %6157 = vmatprep.mubr.msk.f32.mxu1 %vm245_vm0, %v5313_v34 }
  0x4b   : > { %6158 = vmatmul.mubr.msk.f32.gmra.mrb[28].mxu1 %vm245_vm0, %v5314_v35  ;;  %v7448_v35 = vpack.c.bf16 %v1282_v33, %v1281_v32 }
  0x4c   : > { %6160 = vmatprep.mubr.msk.f32.mxu1 %vm245_vm0, %v5315_v36 }
  0x4f   : > { %6161 = vmatmul.mubr.msk.f32.gmra.mrb[30].mxu1 %vm245_vm0, %v5316_v37  ;;  %v5516_v37 = vld [vmem:[%s8417_s3 + $0x120] sm:$0xff] }
  0x50   : > { %6163 = vmatprep.mubr.msk.f32.mxu1 %vm245_vm0, %v5317_v38  ;;  %v5517_v38 = vld [vmem:[%s8417_s3 + $0x128] sm:$0xff] }
  0x53   : > { %6164 = vmatmul.mubr.msk.f32.gmra.mrb[32].mxu1 %vm245_vm0, %v5318_v39  ;;  %v7459_v39 = vpack.c.bf16 %v5517_v38, %v5516_v37 }
  0x54   : > { %6166 = vmatprep.mubr.msk.f32.mxu1 %vm245_vm0, %v5319_v40 }
  0x55   : > { %6844 = vmatprep.subr.bf16.mxu0 %v7459_v39 }
  0x57   : > { %6167 = vmatmul.mubr.msk.f32.gmra.mrb[34].mxu1 %vm245_vm0, %v5320_v41 }
  0x58   : > { %6177 = vmatprep.mubr.msk.f32.mxu1 %vm245_vm0, %v5339_v42 }
  0x5b   : > { %6178 = vmatmul.mubr.msk.f32.vlgmr.msra.gmra.mrb[36].mxu1 %vm245_vm0, %v5340_v43 }
  0x5c   : > { %6766 = vmatpush3.bf16.msra.mxu1 %v7229_v3  ;;  %6180 = vmatprep.mubr.msk.f32.mxu1 %vm245_vm0, %v5341_v44  ;;  %v5382_v3 = vld [vmem:[%s7245_s6 + $0x1e8] sm:$0xff] }
  0x5d   : > { %6768 = vmatprep.subr.bf16.mxu1 %v7234_v5 }
  0x5f   : > { %6181 = vmatmul.mubr.msk.f32.gmra.mrb[38].mxu1 %vm245_vm0, %v5342_v45 }
  0x60   : > { %6183 = vmatprep.mubr.msk.f32.mxu1 %vm245_vm0, %v5343_v46  ;;  %6770 = vmatpush3.bf16.msra.mxu1 %v7234_v5  ;;  %v5384_v5 = vld [vmem:[%s7245_s6 + $0x1f8] sm:$0xff] }
  0x61   : > { %6772 = vmatprep.subr.bf16.mxu1 %v6771_v16 }
  0x63   : > { %6184 = vmatmul.mubr.msk.f32.gmra.mrb[40].mxu1 %vm245_vm0, %v5344_v47 }
  0x64   : > { %6186 = vmatprep.mubr.msk.f32.mxu1 %vm245_vm0, %v5345_v48 }
  0x67   : > { %6187 = vmatmul.mubr.msk.f32.gmra.mrb[42].mxu1 %vm245_vm0, %v5346_v49 }
  0x68   : > { %6189 = vmatprep.mubr.msk.f32.mxu1 %vm245_vm0, %v5347_v50 }
  0x6b   : > { %6190 = vmatmul.mubr.msk.f32.gmra.mrb[44].mxu1 %vm245_vm0, %v5348_v51 }
  0x6c   : > { %6192 = vmatprep.mubr.msk.f32.mxu1 %vm245_vm0, %v5349_v52 }
  0x6f   : > { %6193 = vmatmul.mubr.msk.f32.gmra.mrb[46].mxu1 %vm245_vm0, %v5350_v53 }
  0x70   : > { %6195 = vmatprep.mubr.msk.f32.mxu1 %vm245_vm0, %v5351_v54 }
  0x73   : > { %6196 = vmatmul.mubr.msk.f32.gmra.mrb[48].mxu1 %vm245_vm0, %v5352_v55 }
  0x74   : > { %6198 = vmatprep.mubr.msk.f32.mxu1 %vm245_vm0, %v5353_v56 }
  0x77   : > { %6199 = vmatmul.mubr.msk.f32.gmra.mrb[50].mxu1 %vm245_vm0, %v5354_v57 }
  0x78   : > { %6201 = vmatprep.mubr.msk.f32.mxu1 %vm245_vm0, %v5355_v58 }
  0x7b   : > { %6202 = vmatmul.mubr.msk.f32.gmra.mrb[52].mxu1 %vm245_vm0, %v5356_v59 }
  0x7c   : > { %6212 = vmatprep.mubr.msk.f32.mxu1 %vm245_vm0, %v5375_v60 }
  0x7f   : > { %6213 = vmatmul.mubr.msk.f32.vlgmr.msra.gmra.mrb[54].mxu1 %vm245_vm0, %v5376_v61 }
  0x80   : > { %6215 = vmatprep.mubr.msk.f32.mxu1 %vm245_vm0, %v5377_v62  ;;  %6774 = vmatpush3.bf16.msra.mxu1 %v6771_v16 }
  0x81   : > { %6776 = vmatprep.subr.bf16.mxu1 %v6775_v20 }
  0x83   : > { %6216 = vmatmul.mubr.msk.f32.gmra.mrb[56].mxu1 %vm245_vm0, %v5378_v63 }
  0x84   : > { %6218 = vmatprep.mubr.msk.f32.mxu1 %vm245_vm0, %v5379_v0  ;;  %6778 = vmatpush3.bf16.msra.mxu1 %v6775_v20 }
  0x85   : > { %6780 = vmatprep.subr.bf16.mxu1 %v7448_v35 }
  0x87   : > { %6219 = vmatmul.mubr.msk.f32.gmra.mrb[58].mxu1 %vm245_vm0, %v5380_v1 }
  0x88   : > { %6221 = vmatprep.mubr.msk.f32.mxu1 %vm245_vm0, %v5381_v2 }
  0x8b   : > { %6222 = vmatmul.mubr.msk.f32.gmra.mrb[60].mxu1 %vm245_vm0, %v5382_v3 }
  0x8c   : > { %6224 = vmatprep.mubr.msk.f32.mxu1 %vm245_vm0, %v5383_v4 }
  0x8f   : > { %6225 = vmatmul.mubr.msk.f32.gmra.mrb[62].mxu1 %vm245_vm0, %v5384_v5 }
  0x90   : > { %6227 = vmatprep.mubr.msk.f32.mxu1 %vm245_vm0, %v5385_v6 }
  0x93   : > { %6228 = vmatmul.mubr.msk.f32.gmra.mrb[64].mxu1 %vm245_vm0, %v5386_v7 }
  0x94   : > { %6230 = vmatprep.mubr.msk.f32.mxu1 %vm245_vm0, %v5387_v8 }
  0x97   : > { %6231 = vmatmul.mubr.msk.f32.gmra.mrb[66].mxu1 %vm245_vm0, %v5388_v9 }
  0x98   : > { %6233 = vmatprep.mubr.msk.f32.mxu1 %vm245_vm0, %v5389_v10 }
  0x9b   : > { %6234 = vmatmul.mubr.msk.f32.gmra.mrb[68].mxu1 %vm245_vm0, %v5390_v11 }
  0x9c   : > { %6236 = vmatprep.mubr.msk.f32.mxu1 %vm245_vm0, %v5391_v12 }
  0x9f   : > { %6237 = vmatmul.mubr.msk.f32.gmra.mrb[70].mxu1 %vm245_vm0, %v5392_v13 }
  0xe6   : > { %v7428_v26 = vpop.f32.mrb[0].mxu1 }
  0xe7   : > { %v7430_v27 = vpop.f32.mrb[1].mxu1 }
  0xea   : > { %v7432_v28 = vpop.f32.mrb[2].mxu1 }
  0xeb   : > { %v7434_v29 = vpop.f32.mrb[3].mxu1 }
  0xee   : > { %v7436_v30 = vpop.f32.mrb[4].mxu1 }
  0xef   : > { %v7438_v31 = vpop.f32.mrb[5].mxu1 }
  0xf2   : > { %v7446_v34 = vpop.f32.mrb[6].mxu1 }
  0xf3   : > { %v7450_v36 = vpop.f32.mrb[7].mxu1 }
  0xf6   : > { %v7461_v40 = vpop.f32.mrb[8].mxu1 }
  0xf7   : > { %v7463_v41 = vpop.f32.mrb[9].mxu1 }
  0xfa   : > { %v7466_v42 = vpop.f32.mrb[10].mxu1 }
  0xfb   : > { %v7468_v43 = vpop.f32.mrb[11].mxu1 }
  0xfe   : > { %v7470_v44 = vpop.f32.mrb[12].mxu1 }
  0xff   : > { %v7472_v45 = vpop.f32.mrb[13].mxu1 }
 0x102   : > { %v7474_v46 = vpop.f32.mrb[14].mxu1 }
 0x103   : > { %v7476_v47 = vpop.f32.mrb[15].mxu1 }
 0x106   : > { %v7478_v48 = vpop.f32.mrb[16].mxu1 }
 0x107   : > { %v7480_v49 = vpop.f32.mrb[17].mxu1 }
 0x10a   : > { %v6144_v50 = vpop.f32.mrb[18].mxu1 }
 0x10b   : > { %v684_v51 = vmax.f32 %v7428_v26, %v6144_v50  ;;  %v594_v52 = vpop.f32.mrb[19].mxu1 }
 0x10c   : > { %v683_v53 = vmax.f32 %v7430_v27, %v594_v52 }
 0x10e   : > { %v6147_v54 = vpop.f32.mrb[20].mxu1 }
 0x10f   : > { %v686_v55 = vmax.f32 %v7432_v28, %v6147_v54  ;;  %v604_v56 = vpop.f32.mrb[21].mxu1 }
 0x110   : > { %v685_v57 = vmax.f32 %v7434_v29, %v604_v56 }
 0x112   : > { %v6150_v58 = vpop.f32.mrb[22].mxu1 }
 0x113   : > { %v688_v59 = vmax.f32 %v7436_v30, %v6150_v58  ;;  %v614_v60 = vpop.f32.mrb[23].mxu1 }
 0x114   : > { %v687_v61 = vmax.f32 %v7438_v31, %v614_v60 }
 0x116   : > { %v6153_v62 = vpop.f32.mrb[24].mxu1 }
 0x117   : > { %v690_v63 = vmax.f32 %v7446_v34, %v6153_v62  ;;  %v624_v0 = vpop.f32.mrb[25].mxu1 }
 0x118   : > { %v689_v1 = vmax.f32 %v7450_v36, %v624_v0 }
 0x11a   : > { %v6156_v2 = vpop.f32.mrb[26].mxu1 }
 0x11b   : > { %v692_v3 = vmax.f32 %v7461_v40, %v6156_v2  ;;  %v634_v4 = vpop.f32.mrb[27].mxu1 }
 0x11c   : > { %v691_v5 = vmax.f32 %v7463_v41, %v634_v4 }
 0x11e   : > { %v6159_v6 = vpop.f32.mrb[28].mxu1 }
 0x11f   : > { %v694_v7 = vmax.f32 %v7466_v42, %v6159_v6  ;;  %v644_v8 = vpop.f32.mrb[29].mxu1 }
 0x120   : > { %v693_v9 = vmax.f32 %v7468_v43, %v644_v8 }
 0x122   : > { %v6162_v10 = vpop.f32.mrb[30].mxu1 }
 0x123   : > { %v696_v11 = vmax.f32 %v7470_v44, %v6162_v10  ;;  %v654_v12 = vpop.f32.mrb[31].mxu1 }
 0x124   : > { %v695_v13 = vmax.f32 %v7472_v45, %v654_v12 }
 0x126   : > { %v6165_v14 = vpop.f32.mrb[32].mxu1 }
 0x127   : > { %v698_v15 = vmax.f32 %v7474_v46, %v6165_v14  ;;  %v664_v16 = vpop.f32.mrb[33].mxu1 }
 0x128   : > { %v697_v17 = vmax.f32 %v7476_v47, %v664_v16 }
 0x12a   : > { %v6168_v18 = vpop.f32.mrb[34].mxu1 }
 0x12b   : > { %v700_v19 = vmax.f32 %v7478_v48, %v6168_v18  ;;  %v674_v20 = vpop.f32.mrb[35].mxu1 }
 0x12c   : > { %v699_v21 = vmax.f32 %v7480_v49, %v674_v20 }
 0x12e   : > { %v6179_v22 = vpop.f32.mrb[36].mxu1 }
 0x12f   : > { %v930_v23 = vmax.f32 %v684_v51, %v6179_v22  ;;  %v840_v24 = vpop.f32.mrb[37].mxu1 }
 0x130   : > { %v929_v25 = vmax.f32 %v683_v53, %v840_v24 }
 0x132   : > { %v6182_v26 = vpop.f32.mrb[38].mxu1 }
 0x133   : > { %v932_v27 = vmax.f32 %v686_v55, %v6182_v26  ;;  %v850_v28 = vpop.f32.mrb[39].mxu1 }
 0x134   : > { %v931_v29 = vmax.f32 %v685_v57, %v850_v28  ;;  %v1284_v28 = vld [vmem:[%s8417_s3 + $0x18] sm:$0xff] }
 0x136   : > { %v6185_v30 = vpop.f32.mrb[40].mxu1 }
 0x137   : > { %v934_v31 = vmax.f32 %v688_v59, %v6185_v30  ;;  %v860_v32 = vpop.f32.mrb[41].mxu1 }
 0x138   : > { %v933_v33 = vmax.f32 %v687_v61, %v860_v32  ;;  %v7525_v61 = vld [vmem:[%s8416_s2] ss:$0 sm:$0xff] }
 0x13a   : > { %v6188_v34 = vpop.f32.mrb[42].mxu1 }
 0x13b   : > { %v936_v36 = vmax.f32 %v690_v63, %v6188_v34  ;;  %v870_v37 = vpop.f32.mrb[43].mxu1 }
 0x13c   : > { %v7500_v38 = vmax.f32 %v689_v1, %v870_v37 }
 0x13e   : > { %v6191_v40 = vpop.f32.mrb[44].mxu1 }
 0x13f   : > { %v7502_v41 = vmax.f32 %v692_v3, %v6191_v40  ;;  %v880_v42 = vpop.f32.mrb[45].mxu1 }
 0x140   : > { %v7504_v43 = vmax.f32 %v691_v5, %v880_v42 }
 0x142   : > { %v6194_v44 = vpop.f32.mrb[46].mxu1 }
 0x143   : > { %v7506_v45 = vmax.f32 %v694_v7, %v6194_v44  ;;  %v890_v46 = vpop.f32.mrb[47].mxu1  ;;  %v5518_v44 = vld [vmem:[%s8417_s3 + $0x130] sm:$0xff] }
 0x144   : > { %v7508_v47 = vmax.f32 %v693_v9, %v890_v46  ;;  %v5519_v46 = vld [vmem:[%s8417_s3 + $0x138] sm:$0xff] }
 0x146   : > { %v6197_v48 = vpop.f32.mrb[48].mxu1 }
 0x147   : > { %v7510_v49 = vmax.f32 %v696_v11, %v6197_v48  ;;  %v900_v50 = vpop.f32.mrb[49].mxu1  ;;  %v5432_v48 = vld [vmem:[%s8417_s3 + $0x40] sm:$0xff] }
 0x148   : > { %v7512_v51 = vmax.f32 %v695_v13, %v900_v50  ;;  %v5433_v50 = vld [vmem:[%s8417_s3 + $0x48] sm:$0xff] }
 0x14a   : > { %v6200_v52 = vpop.f32.mrb[50].mxu1 }
 0x14b   : > { %v7514_v53 = vmax.f32 %v698_v15, %v6200_v52  ;;  %v910_v54 = vpop.f32.mrb[51].mxu1 }
 0x14c   : > { %v7516_v55 = vmax.f32 %v697_v17, %v910_v54 }
 0x14e   : > { %v6203_v56 = vpop.f32.mrb[52].mxu1 }
 0x14f   : > { %v7518_v57 = vmax.f32 %v700_v19, %v6203_v56  ;;  %v920_v58 = vpop.f32.mrb[53].mxu1 }
 0x150   : > { %v7520_v59 = vmax.f32 %v699_v21, %v920_v58 }
 0x152   : > { %v6214_v60 = vpop.f32.mrb[54].mxu1 }
 0x153   : > { %v1176_v62 = vmax.f32 %v930_v23, %v6214_v60  ;;  %v1086_v63 = vpop.f32.mrb[55].mxu1 }
 0x154   : > { %v1175_v0 = vmax.f32 %v929_v25, %v1086_v63 }
 0x155   : > { %v1201_v1 = vadd.f32 %v7525_v61, %v1176_v62 }
 0x156   : > { %v1200_v2 = vadd.f32 %v7525_v61, %v1175_v0  ;;  %v6217_v3 = vpop.f32.mrb[56].mxu1 }
 0x157   : > { %v1219_v4 = vmax.f32 %v1201_v1, 0.0  ;;  %v1178_v5 = vmax.f32 %v932_v27, %v6217_v3  ;;  %v1096_v6 = vpop.f32.mrb[57].mxu1  ;;  %v1283_v27 = vld [vmem:[%s8417_s3 + $0x10] sm:$0xff]  ;;  %v7589_v3 = vpack.c.bf16 %v5433_v50, %v5432_v48  ;;  %v5444_v48 = vld [vmem:[%s8417_s3 + $0x60] sm:$0xff]  ;;  %v5445_v50 = vld [vmem:[%s8417_s3 + $0x68] sm:$0xff] }
 0x158   : > { %v1218_v7 = vmax.f32 %v1200_v2, 0.0  ;;  %v1177_v8 = vmax.f32 %v931_v29, %v1096_v6  ;;  %v6783_v37 = vpack.c.bf16 %v1284_v28, %v1283_v27  ;;  %v6847_v2 = vpack.c.bf16 %v5519_v46, %v5518_v44 }
 0x159   : > { %1238 = vst.msk [vmem:[#allocation2 + $0x8] sm:$0xf] %vm1237_vm1, %v1219_v4  ;;  %v1203_v9 = vadd.f32 %v7525_v61, %v1178_v5  ;;  %v5529_v5 = vld [vmem:[%s8417_s3 + $0x148] sm:$0xff] }
 0x15a   : > { %1241 = vst.msk [vmem:[#allocation2 + $0xc] sm:$0xf0] %vm1240_vm2, %v1219_v4  ;;  %v1202_v10 = vadd.f32 %v7525_v61, %v1177_v8  ;;  %v6220_v11 = vpop.f32.mrb[58].mxu1  ;;  %v5528_v4 = vld [vmem:[%s8417_s3 + $0x140] sm:$0xff] }
 0x15b   : > { %1236 = vst.msk [vmem:[#allocation2] sm:$0xff] %vm245_vm0, %v1218_v7  ;;  %v1221_v12 = vmax.f32 %v1203_v9, 0.0  ;;  %v1180_v13 = vmax.f32 %v934_v31, %v6220_v11  ;;  %v1106_v14 = vpop.f32.mrb[59].mxu1 }
 0x15c   : > { %v1220_v15 = vmax.f32 %v1202_v10, 0.0  ;;  %v1179_v16 = vmax.f32 %v933_v33, %v1106_v14 }
 0x15d   : > { %1244 = vst.msk [vmem:[#allocation2 + $0x20] sm:$0xff] %vm245_vm0, %v1221_v12  ;;  %v1205_v17 = vadd.f32 %v7525_v61, %v1180_v13  ;;  %v7618_v13 = vpack.c.bf16 %v5529_v5, %v5528_v4 }
 0x15e   : > { %1242 = vst.msk [vmem:[#allocation2 + $0x14] sm:$0xff] %vm245_vm0, %v1220_v15  ;;  %v1204_v18 = vadd.f32 %v7525_v61, %v1179_v16  ;;  %v6223_v19 = vpop.f32.mrb[60].mxu1 }
 0x15f   : > { %v1223_v20 = vmax.f32 %v1205_v17, 0.0  ;;  %v1182_v21 = vmax.f32 %v936_v36, %v6223_v19  ;;  %v1116_v22 = vpop.f32.mrb[61].mxu1 }
 0x160   : > { %v1222_v23 = vmax.f32 %v1204_v18, 0.0  ;;  %v1181_v24 = vmax.f32 %v7500_v38, %v1116_v22 }
 0x161   : > { %1248 = vst.msk [vmem:[#allocation2 + $0x34] sm:$0xff] %vm245_vm0, %v1223_v20  ;;  %v1207_v25 = vadd.f32 %v7525_v61, %v1182_v21 }
 0x162   : > { %v1285_v26 = vld [vmem:[#allocation2 + $0x1] sm:$0xff]  ;;  %1245 = vst.msk [vmem:[#allocation2 + $0x28] sm:$0xf] %vm1237_vm1, %v1222_v23  ;;  %v1206_v29 = vadd.f32 %v7525_v61, %v1181_v24  ;;  %v6226_v30 = vpop.f32.mrb[62].mxu1 }
 0x163   : > { %1247 = vst.msk [vmem:[#allocation2 + $0x2c] sm:$0xf0] %vm1240_vm2, %v1222_v23  ;;  %6247 = vmatprep.mubr.msk.f32.mxu1 %vm245_vm0, %v1285_v26  ;;  %v1225_v31 = vmax.f32 %v1207_v25, 0.0  ;;  %v1184_v32 = vmax.f32 %v7502_v41, %v6226_v30  ;;  %v1126_v33 = vpop.f32.mrb[63].mxu1 }
 0x164   : > { %v1224_v34 = vmax.f32 %v1206_v29, 0.0  ;;  %v1183_v36 = vmax.f32 %v7504_v43, %v1126_v33  ;;  %v7694_v46 = vld [vmem:[#allocation2 + $0x20] sm:$0xff] }
 0x165   : > { %1251 = vst.msk [vmem:[#allocation2 + $0x48] sm:$0xf] %vm1237_vm1, %v1225_v31  ;;  %v1209_v38 = vadd.f32 %v7525_v61, %v1184_v32  ;;  %v7556_v40 = vld [vmem:[#allocation2 + $0x11] sm:$0xff] }
 0x166   : > { %1253 = vst.msk [vmem:[#allocation2 + $0x4c] sm:$0xf0] %vm1240_vm2, %v1225_v31  ;;  %v7558_v42 = vld [vmem:[#allocation2 + $0x13] sm:$0xff]  ;;  %v1208_v41 = vadd.f32 %v7525_v61, %v1183_v36  ;;  %v6229_v43 = vpop.f32.mrb[64].mxu1  ;;  %6248 = vmatmul.mubr.msk.f32.vlgmr.msra.gmra.mrb[72].mxu1 %vm245_vm0, %v7556_v40 }
 0x167   : > { %1250 = vst.msk [vmem:[#allocation2 + $0x40] sm:$0xff] %vm245_vm0, %v1224_v34  ;;  %6407 = vmatprep.mubr.msk.f32.mxu0 %vm245_vm0, %v7558_v42  ;;  %v1227_v52 = vmax.f32 %v1209_v38, 0.0  ;;  %v1186_v54 = vmax.f32 %v7506_v45, %v6229_v43  ;;  %v1136_v56 = vpop.f32.mrb[65].mxu1  ;;  %6782 = vmatpush3.bf16.msra.mxu1 %v7448_v35  ;;  %v5435_v32 = vld [vmem:[%s8417_s3 + $0x58] sm:$0xff]  ;;  %v7683_v44 = vld [vmem:[#allocation2 + $0x10] sm:$0xff] }
 0x168   : > { %v1226_v58 = vmax.f32 %v1208_v41, 0.0  ;;  %v1185_v60 = vmax.f32 %v7508_v47, %v1136_v56  ;;  %6784 = vmatprep.subr.bf16.mxu1 %v6783_v37  ;;  %v7685_v41 = vld [vmem:[#allocation2 + $0x14] sm:$0xff]  ;;  %v5540_v56 = vld [vmem:[%s8417_s3 + $0x160] sm:$0xff] }
 0x169   : > { %1256 = vst.msk [vmem:[#allocation2 + $0x60] sm:$0xff] %vm245_vm0, %v1227_v52  ;;  %v1211_v62 = vadd.f32 %v7525_v61, %v1186_v54  ;;  %v7583_v63 = vld [vmem:[#allocation2 + $0x21] sm:$0xff]  ;;  %v5531_v43 = vld [vmem:[%s8417_s3 + $0x158] sm:$0xff] }
 0x16a   : > { %v7585_v0 = vld [vmem:[#allocation2 + $0x23] sm:$0xff]  ;;  %v7587_v1 = vld [vmem:[#allocation2 + $0x31] sm:$0xff]  ;;  %1254 = vst.msk [vmem:[#allocation2 + $0x54] sm:$0xff] %vm245_vm0, %v1226_v58  ;;  %v1210_v35 = vadd.f32 %v7525_v61, %v1185_v60  ;;  %v6232_v45 = vpop.f32.mrb[66].mxu1  ;;  %6250 = vmatprep.mubr.msk.f32.mxu1 %vm245_vm0, %v7583_v63 }
 0x16b   : > { %6408 = vmatmul.mubr.msk.f32.vlgmr.msra.gmra.mrb[0].mxu0 %vm245_vm0, %v7585_v0  ;;  %v7597_v47 = vld [vmem:[#allocation2 + $0x33] sm:$0xff]  ;;  %v1229_v6 = vmax.f32 %v1211_v62, 0.0  ;;  %v1188_v7 = vmax.f32 %v7510_v49, %v6232_v45  ;;  %v1146_v8 = vpop.f32.mrb[67].mxu1  ;;  %6251 = vmatmul.mubr.msk.f32.gmra.mrb[74].mxu1 %vm245_vm0, %v7587_v1  ;;  %v7705_v52 = vld [vmem:[#allocation2 + $0x24] sm:$0xff] }
 0x16c   : > { %6410 = vmatprep.mubr.msk.f32.mxu0 %vm245_vm0, %v7597_v47  ;;  %v1228_v9 = vmax.f32 %v1210_v35, 0.0  ;;  %v1187_v10 = vmax.f32 %v7512_v51, %v1146_v8  ;;  %6846 = vmatpush3.bf16.msra.mxu0 %v7459_v39  ;;  %v7712_v58 = vld [vmem:[#allocation2 + $0x30] sm:$0xff]  ;;  %v5541_v62 = vld [vmem:[%s8417_s3 + $0x168] sm:$0xff] }
 0x16d   : > { %6786 = vmatpush3.bf16.msra.mxu1 %v6783_v37  ;;  %1260 = vst.msk [vmem:[#allocation2 + $0x74] sm:$0xff] %vm245_vm0, %v1229_v6  ;;  %v1213_v11 = vadd.f32 %v7525_v61, %v1188_v7  ;;  %6848 = vmatprep.subr.bf16.mxu0 %v6847_v2  ;;  %v5530_v37 = vld [vmem:[%s8417_s3 + $0x150] sm:$0xff]  ;;  %v6859_v45 = vpack.c.bf16 %v5541_v62, %v5540_v56  ;;  %v5565_v62 = vld [vmem:[%s8417_s3 + $0x1a8] sm:$0xff] }
 0x16e   : > { %v7614_v12 = vld [vmem:[#allocation2 + $0x41] sm:$0xff]  ;;  %6788 = vmatprep.subr.bf16.mxu1 %v7589_v3  ;;  %1257 = vst.msk [vmem:[#allocation2 + $0x68] sm:$0xf] %vm1237_vm1, %v1228_v9  ;;  %v1212_v39 = vadd.f32 %v7525_v61, %v1187_v10  ;;  %v6235_v51 = vpop.f32.mrb[68].mxu1  ;;  %v6855_v54 = vpack.c.bf16 %v5531_v43, %v5530_v37  ;;  %v7714_v60 = vld [vmem:[#allocation2 + $0x34] sm:$0xff] }
 0x16f   : > { %v7616_v49 = vld [vmem:[#allocation2 + $0x43] sm:$0xff]  ;;  %1259 = vst.msk [vmem:[#allocation2 + $0x6c] sm:$0xf0] %vm1240_vm2, %v1228_v9  ;;  %6253 = vmatprep.mubr.msk.f32.mxu1 %vm245_vm0, %v7614_v12  ;;  %v1231_v14 = vmax.f32 %v1213_v11, 0.0  ;;  %v1190_v15 = vmax.f32 %v7514_v53, %v6235_v51  ;;  %v1156_v16 = vpop.f32.mrb[69].mxu1  ;;  %v5446_v8 = vld [vmem:[%s8417_s3 + $0x70] sm:$0xff] }
 0x170   : > { %6411 = vmatmul.mubr.msk.f32.gmra.mrb[2].mxu0 %vm245_vm0, %v7616_v49  ;;  %v1230_v17 = vmax.f32 %v1212_v39, 0.0  ;;  %v1189_v18 = vmax.f32 %v7516_v55, %v1156_v16  ;;  %v7728_v35 = vld [vmem:[#allocation2 + $0x44] sm:$0xff]  ;;  %v5447_v11 = vld [vmem:[%s8417_s3 + $0x78] sm:$0xff]  ;;  %v5554_v43 = vld [vmem:[%s8417_s3 + $0x190] sm:$0xff] }
 0x171   : > { %6850 = vmatpush3.bf16.msra.mxu0 %v6847_v2  ;;  %1263 = vst.msk [vmem:[#allocation2 + $0x88] sm:$0xf] %vm1237_vm1, %v1231_v14  ;;  %v1215_v19 = vadd.f32 %v7525_v61, %v1190_v15  ;;  %v7633_v20 = vld [vmem:[#allocation2 + $0x51] sm:$0xff]  ;;  %v6795_v2 = vpack.c.bf16 %v5445_v50, %v5444_v48  ;;  %v7740_v6 = vld [vmem:[#allocation2 + $0x60] sm:$0xff]  ;;  %v6799_v51 = vpack.c.bf16 %v5447_v11, %v5446_v8 }
 0x172   : > { %1265 = vst.msk [vmem:[#allocation2 + $0x8c] sm:$0xf0] %vm1240_vm2, %v1231_v14  ;;  %v7635_v21 = vld [vmem:[#allocation2 + $0x53] sm:$0xff]  ;;  %6852 = vmatprep.subr.bf16.mxu0 %v7618_v13  ;;  %v1214_v53 = vadd.f32 %v7525_v61, %v1189_v18  ;;  %v6238_v22 = vpop.f32.mrb[70].mxu1  ;;  %6254 = vmatmul.mubr.msk.f32.gmra.mrb[76].mxu1 %vm245_vm0, %v7633_v20  ;;  %v5456_v18 = vld [vmem:[%s8417_s3 + $0x80] sm:$0xff] }
 0x173   : > { %1262 = vst.msk [vmem:[#allocation2 + $0x80] sm:$0xff] %vm245_vm0, %v1230_v17  ;;  %6413 = vmatprep.mubr.msk.f32.mxu0 %vm245_vm0, %v7635_v21  ;;  %v1233_v55 = vmax.f32 %v1215_v19, 0.0  ;;  %v1192_v23 = vmax.f32 %v7518_v57, %v6238_v22  ;;  %v1166_v24 = vpop.f32.mrb[71].mxu1  ;;  %v7732_v4 = vld [vmem:[#allocation2 + $0x50] sm:$0xff]  ;;  %v5543_v16 = vld [vmem:[%s8417_s3 + $0x178] sm:$0xff]  ;;  %v7779_v17 = vld [vmem:[#allocation2 + $0x22] sm:$0xff] }
 0x174   : > { %v1232_v25 = vmax.f32 %v1214_v53, 0.0  ;;  %v1191_v26 = vmax.f32 %v7520_v59, %v1166_v24  ;;  %v5434_v59 = vld [vmem:[%s8417_s3 + $0x50] sm:$0xff]  ;;  %v5457_v19 = vld [vmem:[%s8417_s3 + $0x88] sm:$0xff]  ;;  %v5555_v48 = vld [vmem:[%s8417_s3 + $0x198] sm:$0xff] }
 0x175   : > { %1268 = vst.msk [vmem:[#allocation2 + $0xa0] sm:$0xff] %vm245_vm0, %v1233_v55  ;;  %v1217_v27 = vadd.f32 %v7525_v61, %v1192_v23  ;;  %v7648_v28 = vld [vmem:[#allocation2 + $0x61] sm:$0xff]  ;;  %v6791_v38 = vpack.c.bf16 %v5435_v32, %v5434_v59  ;;  %v7734_v5 = vld [vmem:[#allocation2 + $0x54] sm:$0xff]  ;;  %v6803_v24 = vpack.c.bf16 %v5457_v19, %v5456_v18  ;;  %v6871_v56 = vpack.c.bf16 %v5555_v48, %v5554_v43 }
 0x176   : > { %v7650_v29 = vld [vmem:[#allocation2 + $0x63] sm:$0xff]  ;;  %v7652_v30 = vld [vmem:[#allocation2 + $0x71] sm:$0xff]  ;;  %1266 = vst.msk [vmem:[#allocation2 + $0x94] sm:$0xff] %vm245_vm0, %v1232_v25  ;;  %v1216_v31 = vadd.f32 %v7525_v61, %v1191_v26  ;;  %6256 = vmatprep.mubr.msk.f32.mxu1 %vm245_vm0, %v7648_v28 }
 0x177   : > { %6414 = vmatmul.mubr.msk.f32.gmra.mrb[4].mxu0 %vm245_vm0, %v7650_v29  ;;  %v7660_v57 = vld [vmem:[#allocation2 + $0x73] sm:$0xff]  ;;  %v1235_v33 = vmax.f32 %v1217_v27, 0.0  ;;  %6257 = vmatmul.mubr.msk.f32.gmra.mrb[78].mxu1 %vm245_vm0, %v7652_v30  ;;  %v1273_v61 = vld [vmem:[#allocation2] sm:$0xff]  ;;  %v5553_v23 = vld [vmem:[%s8417_s3 + $0x188] sm:$0xff] }
 0x178   : > { %6416 = vmatprep.mubr.msk.f32.mxu0 %vm245_vm0, %v7660_v57  ;;  %v1234_v34 = vmax.f32 %v1216_v31, 0.0  ;;  %6267 = vmatprep.mubr.msk.f32.mxu1 %vm245_vm0, %v1273_v61  ;;  %v7744_v7 = vld [vmem:[#allocation2 + $0x64] sm:$0xff]  ;;  %v7751_v9 = vld [vmem:[#allocation2 + $0x70] sm:$0xff]  ;;  %v5459_v61 = vld [vmem:[%s8417_s3 + $0x98] sm:$0xff] }
 0x179   : > { %1272 = vst.msk [vmem:[#allocation2 + $0xb4] sm:$0xff] %vm245_vm0, %v1235_v33  ;;  %v7753_v10 = vld [vmem:[#allocation2 + $0x74] sm:$0xff]  ;;  %v5552_v55 = vld [vmem:[%s8417_s3 + $0x180] sm:$0xff] }
 0x17a   : > { %v7674_v36 = vld [vmem:[#allocation2 + $0x83] sm:$0xff]  ;;  %1269 = vst.msk [vmem:[#allocation2 + $0xa8] sm:$0xf] %vm1237_vm1, %v1234_v34  ;;  %v7767_v14 = vld [vmem:[#allocation2 + $0x12] sm:$0xff]  ;;  %v6867_v26 = vpack.c.bf16 %v5553_v23, %v5552_v55 }
 0x17b   : > { %1271 = vst.msk [vmem:[#allocation2 + $0xac] sm:$0xf0] %vm1240_vm2, %v1234_v34  ;;  %6417 = vmatmul.mubr.msk.f32.gmra.mrb[6].mxu0 %vm245_vm0, %v7674_v36  ;;  %6268 = vmatmul.mubr.msk.f32.vlgmr.msra.gmra.mrb[72].mxu1 %vm245_vm0, %v7683_v44  ;;  %v7763_v39 = vld [vmem:[#allocation2 + $0x84] sm:$0xff]  ;;  %v5542_v15 = vld [vmem:[%s8417_s3 + $0x170] sm:$0xff]  ;;  %v5567_v19 = vld [vmem:[%s8417_s3 + $0x1b8] sm:$0xff] }
 0x17c   : > { %6427 = vmatprep.mubr.msk.f32.mxu0 %vm245_vm0, %v7685_v41  ;;  %6270 = vmatprep.mubr.msk.f32.mxu1 %vm245_vm0, %v7694_v46  ;;  %v6863_v53 = vpack.c.bf16 %v5543_v16, %v5542_v15  ;;  %v7791_v22 = vld [vmem:[#allocation2 + $0x32] sm:$0xff]  ;;  %v7803_v25 = vld [vmem:[#allocation2 + $0x42] sm:$0xff] }
 0x17d   : > { %6790 = vmatpush3.bf16.msra.mxu1 %v7589_v3  ;;  %v7723_v3 = vld [vmem:[#allocation2 + $0x40] sm:$0xff]  ;;  %v7809_v27 = vld [vmem:[#allocation2 + $0x52] sm:$0xff]  ;;  %v5481_v55 = vld [vmem:[%s8417_s3 + $0xc8] sm:$0xff] }
 0x17e   : > { %6792 = vmatprep.subr.bf16.mxu1 %v6791_v38  ;;  %v7815_v31 = vld [vmem:[#allocation2 + $0x62] sm:$0xff]  ;;  %v5458_v59 = vld [vmem:[%s8417_s3 + $0x90] sm:$0xff] }
 0x17f   : > { %6428 = vmatmul.mubr.msk.f32.vlgmr.msra.gmra.mrb[0].mxu0 %vm245_vm0, %v7705_v52  ;;  %6271 = vmatmul.mubr.msk.f32.gmra.mrb[74].mxu1 %vm245_vm0, %v7712_v58  ;;  %v7824_v32 = vld [vmem:[#allocation2 + $0x72] sm:$0xff]  ;;  %v7826_v33 = vld [vmem:[#allocation2 + $0x80] sm:$0xff] }
 0x180   : > { %6430 = vmatprep.mubr.msk.f32.mxu0 %vm245_vm0, %v7714_v60  ;;  %6854 = vmatpush3.bf16.msra.mxu0 %v7618_v13  ;;  %v1556_v13 = vld [vmem:[#allocation2 + $0x2] sm:$0xff]  ;;  %v7836_v37 = vld [vmem:[#allocation2 + $0x90] sm:$0xff] }
 0x181   : > { %6273 = vmatprep.mubr.msk.f32.mxu1 %vm245_vm0, %v7723_v3  ;;  %6856 = vmatprep.subr.bf16.mxu0 %v6855_v54  ;;  %v1706_v34 = vld [vmem:[#allocation2 + $0x3] sm:$0xff]  ;;  %v5470_v11 = vld [vmem:[%s8417_s3 + $0xb0] sm:$0xff] }
 0x182   : > { %6794 = vmatpush3.bf16.msra.mxu1 %v6791_v38  ;;  %v6807_v38 = vpack.c.bf16 %v5459_v61, %v5458_v59  ;;  %v5468_v50 = vld [vmem:[%s8417_s3 + $0xa0] sm:$0xff]  ;;  %v7895_v15 = vld [vmem:[#allocation2 + $0x91] sm:$0xff] }
 0x183   : > { %6431 = vmatmul.mubr.msk.f32.gmra.mrb[2].mxu0 %vm245_vm0, %v7728_v35  ;;  %6796 = vmatprep.subr.bf16.mxu1 %v6795_v2  ;;  %v7882_v8 = vld [vmem:[#allocation2 + $0x81] sm:$0xff]  ;;  %v5566_v18 = vld [vmem:[%s8417_s3 + $0x1b0] sm:$0xff] }
 0x184   : > { %6274 = vmatmul.mubr.msk.f32.gmra.mrb[76].mxu1 %vm245_vm0, %v7732_v4  ;;  %6433 = vmatprep.mubr.msk.f32.mxu0 %vm245_vm0, %v7734_v5  ;;  %v6879_v23 = vpack.c.bf16 %v5567_v19, %v5566_v18  ;;  %v7941_v61 = vld [vmem:[#allocation2 + $0x82] sm:$0xff]  ;;  %v7955_v43 = vld [vmem:[#allocation2 + $0x92] sm:$0xff] }
 0x185   : > { %6276 = vmatprep.mubr.msk.f32.mxu1 %vm245_vm0, %v7740_v6  ;;  %6858 = vmatpush3.bf16.msra.mxu0 %v6855_v54  ;;  %v5469_v54 = vld [vmem:[%s8417_s3 + $0xa8] sm:$0xff]  ;;  %v5591_v18 = vld [vmem:[%s8417_s3 + $0x1f8] sm:$0xff]  ;;  %v5600_v19 = vld [vmem:[%s8417_s3 + $0x200] sm:$0xff] }
 0x186   : > { %6860 = vmatprep.subr.bf16.mxu0 %v6859_v45 }
 0x187   : > { %6434 = vmatmul.mubr.msk.f32.gmra.mrb[4].mxu0 %vm245_vm0, %v7744_v7 }
 0x188   : > { %6277 = vmatmul.mubr.msk.f32.gmra.mrb[78].mxu1 %vm245_vm0, %v7751_v9  ;;  %6436 = vmatprep.mubr.msk.f32.mxu0 %vm245_vm0, %v7753_v10 }
 0x189   : > { %6287 = vmatprep.mubr.msk.f32.mxu1 %vm245_vm0, %v1556_v13  ;;  %v5471_v13 = vld [vmem:[%s8417_s3 + $0xb8] sm:$0xff] }
 0x18a   : > { %v6815_v16 = vpack.c.bf16 %v5471_v13, %v5470_v11  ;;  %v5495_v11 = vld [vmem:[%s8417_s3 + $0xf8] sm:$0xff] }
 0x18b   : > { %6437 = vmatmul.mubr.msk.f32.gmra.mrb[6].mxu0 %vm245_vm0, %v7763_v39  ;;  %v8013_v13 = vld [vmem:[#allocation2 + $0x93] sm:$0xff] }
 0x18c   : > { %6288 = vmatmul.mubr.msk.f32.vlgmr.msra.gmra.mrb[72].mxu1 %vm245_vm0, %v7767_v14  ;;  %6447 = vmatprep.mubr.msk.f32.mxu0 %vm245_vm0, %v7694_v46 }
 0x18d   : > { %6290 = vmatprep.mubr.msk.f32.mxu1 %vm245_vm0, %v7779_v17  ;;  %6798 = vmatpush3.bf16.msra.mxu1 %v6795_v2  ;;  %v6811_v2 = vpack.c.bf16 %v5469_v54, %v5468_v50  ;;  %v5578_v50 = vld [vmem:[%s8417_s3 + $0x1d0] sm:$0xff]  ;;  %v5579_v54 = vld [vmem:[%s8417_s3 + $0x1d8] sm:$0xff] }
 0x18e   : > { %6800 = vmatprep.subr.bf16.mxu1 %v6799_v51 }
 0x18f   : > { %6448 = vmatmul.mubr.msk.f32.vlgmr.msra.gmra.mrb[0].mxu0 %vm245_vm0, %v7712_v58 }
 0x190   : > { %6291 = vmatmul.mubr.msk.f32.gmra.mrb[74].mxu1 %vm245_vm0, %v7791_v22  ;;  %6450 = vmatprep.mubr.msk.f32.mxu0 %vm245_vm0, %v7723_v3 }
 0x191   : > { %6862 = vmatpush3.bf16.msra.mxu0 %v6859_v45  ;;  %6293 = vmatprep.mubr.msk.f32.mxu1 %vm245_vm0, %v7803_v25 }
 0x192   : > { %6864 = vmatprep.subr.bf16.mxu0 %v6863_v53  ;;  %6802 = vmatpush3.bf16.msra.mxu1 %v6799_v51  ;;  %v1856_v51 = vld [vmem:[#allocation2 + $0x4] sm:$0xff] }
 0x193   : > { %6451 = vmatmul.mubr.msk.f32.gmra.mrb[2].mxu0 %vm245_vm0, %v7732_v4  ;;  %6804 = vmatprep.subr.bf16.mxu1 %v6803_v24 }
 0x194   : > { %6294 = vmatmul.mubr.msk.f32.gmra.mrb[76].mxu1 %vm245_vm0, %v7809_v27  ;;  %6453 = vmatprep.mubr.msk.f32.mxu0 %vm245_vm0, %v7740_v6 }
 0x195   : > { %6296 = vmatprep.mubr.msk.f32.mxu1 %vm245_vm0, %v7815_v31  ;;  %6866 = vmatpush3.bf16.msra.mxu0 %v6863_v53  ;;  %v5480_v53 = vld [vmem:[%s8417_s3 + $0xc0] sm:$0xff] }
 0x196   : > { %6868 = vmatprep.subr.bf16.mxu0 %v6867_v26 }
 0x197   : > { %6454 = vmatmul.mubr.msk.f32.gmra.mrb[4].mxu0 %vm245_vm0, %v7751_v9 }
 0x198   : > { %6297 = vmatmul.mubr.msk.f32.gmra.mrb[78].mxu1 %vm245_vm0, %v7824_v32  ;;  %6456 = vmatprep.mubr.msk.f32.mxu0 %vm245_vm0, %v7826_v33 }
 0x199   : > { %6307 = vmatprep.mubr.msk.f32.mxu1 %vm245_vm0, %v1706_v34  ;;  %v5482_v34 = vld [vmem:[%s8417_s3 + $0xd0] sm:$0xff] }
 0x19b   : > { %6457 = vmatmul.mubr.msk.f32.gmra.mrb[6].mxu0 %vm245_vm0, %v7836_v37 }
 0x19c   : > { %6308 = vmatmul.mubr.msk.f32.vlgmr.msra.gmra.mrb[72].mxu1 %vm245_vm0, %v7558_v42  ;;  %6467 = vmatprep.mubr.msk.f32.mxu0 %vm245_vm0, %v7583_v63  ;;  %v5564_v42 = vld [vmem:[%s8417_s3 + $0x1a0] sm:$0xff] }
 0x19d   : > { %6310 = vmatprep.mubr.msk.f32.mxu1 %vm245_vm0, %v7585_v0  ;;  %6806 = vmatpush3.bf16.msra.mxu1 %v6803_v24  ;;  %v6875_v45 = vpack.c.bf16 %v5565_v62, %v5564_v42  ;;  %v5577_v24 = vld [vmem:[%s8417_s3 + $0x1c8] sm:$0xff]  ;;  %v6887_v42 = vpack.c.bf16 %v5579_v54, %v5578_v50 }
 0x19e   : > { %6808 = vmatprep.subr.bf16.mxu1 %v6807_v38 }
 0x19f   : > { %6468 = vmatmul.mubr.msk.f32.vlgmr.msra.gmra.mrb[0].mxu0 %vm245_vm0, %v7587_v1 }
 0x1a0   : > { %6311 = vmatmul.mubr.msk.f32.gmra.mrb[74].mxu1 %vm245_vm0, %v7597_v47  ;;  %6470 = vmatprep.mubr.msk.f32.mxu0 %vm245_vm0, %v7614_v12 }
 0x1a1   : > { %6870 = vmatpush3.bf16.msra.mxu0 %v6867_v26  ;;  %6313 = vmatprep.mubr.msk.f32.mxu1 %vm245_vm0, %v7616_v49  ;;  %v6819_v26 = vpack.c.bf16 %v5481_v55, %v5480_v53  ;;  %v8059_v53 = vld [vmem:[#allocation2 + $0x94] sm:$0xff] }
 0x1a2   : > { %6872 = vmatprep.subr.bf16.mxu0 %v6871_v56  ;;  %6810 = vmatpush3.bf16.msra.mxu1 %v6807_v38  ;;  %v5483_v38 = vld [vmem:[%s8417_s3 + $0xd8] sm:$0xff]  ;;  %v5602_v55 = vld [vmem:[%s8417_s3 + $0x210] sm:$0xff] }
 0x1a3   : > { %6471 = vmatmul.mubr.msk.f32.gmra.mrb[2].mxu0 %vm245_vm0, %v7633_v20  ;;  %6812 = vmatprep.subr.bf16.mxu1 %v6811_v2  ;;  %v6823_v48 = vpack.c.bf16 %v5483_v38, %v5482_v34  ;;  %v5624_v38 = vld [vmem:[%s8417_s3 + $0x240] sm:$0xff] }
 0x1a4   : > { %6314 = vmatmul.mubr.msk.f32.gmra.mrb[76].mxu1 %vm245_vm0, %v7635_v21  ;;  %6473 = vmatprep.mubr.msk.f32.mxu0 %vm245_vm0, %v7648_v28 }
 0x1a5   : > { %6316 = vmatprep.mubr.msk.f32.mxu1 %vm245_vm0, %v7650_v29  ;;  %6874 = vmatpush3.bf16.msra.mxu0 %v6871_v56  ;;  %v5493_v56 = vld [vmem:[%s8417_s3 + $0xe8] sm:$0xff] }
 0x1a6   : > { %6876 = vmatprep.subr.bf16.mxu0 %v6875_v45 }
 0x1a7   : > { %6474 = vmatmul.mubr.msk.f32.gmra.mrb[4].mxu0 %vm245_vm0, %v7652_v30 }
 0x1a8   : > { %6317 = vmatmul.mubr.msk.f32.gmra.mrb[78].mxu1 %vm245_vm0, %v7660_v57  ;;  %6476 = vmatprep.mubr.msk.f32.mxu0 %vm245_vm0, %v7882_v8 }
 0x1a9   : > { %6327 = vmatprep.mubr.msk.f32.mxu1 %vm245_vm0, %v1856_v51 }
 0x1ab   : > { %6477 = vmatmul.mubr.msk.f32.gmra.mrb[6].mxu0 %vm245_vm0, %v7895_v15 }
 0x1ac   : > { %6328 = vmatmul.mubr.msk.f32.vlgmr.msra.gmra.mrb[72].mxu1 %vm245_vm0, %v7685_v41  ;;  %6487 = vmatprep.mubr.msk.f32.mxu0 %vm245_vm0, %v7779_v17  ;;  %v5576_v41 = vld [vmem:[%s8417_s3 + $0x1c0] sm:$0xff] }
 0x1ad   : > { %6330 = vmatprep.mubr.msk.f32.mxu1 %vm245_vm0, %v7705_v52  ;;  %6814 = vmatpush3.bf16.msra.mxu1 %v6811_v2  ;;  %v6883_v59 = vpack.c.bf16 %v5577_v24, %v5576_v41  ;;  %v5612_v41 = vld [vmem:[%s8417_s3 + $0x220] sm:$0xff]  ;;  %v5613_v24 = vld [vmem:[%s8417_s3 + $0x228] sm:$0xff] }
 0x1ae   : > { %6816 = vmatprep.subr.bf16.mxu1 %v6815_v16 }
 0x1af   : > { %6488 = vmatmul.mubr.msk.f32.vlgmr.msra.gmra.mrb[0].mxu0 %vm245_vm0, %v7791_v22 }
 0x1b0   : > { %6331 = vmatmul.mubr.msk.f32.gmra.mrb[74].mxu1 %vm245_vm0, %v7714_v60  ;;  %6490 = vmatprep.mubr.msk.f32.mxu0 %vm245_vm0, %v7803_v25 }
 0x1b1   : > { %6878 = vmatpush3.bf16.msra.mxu0 %v6875_v45  ;;  %6333 = vmatprep.mubr.msk.f32.mxu1 %vm245_vm0, %v7728_v35  ;;  %v5494_v45 = vld [vmem:[%s8417_s3 + $0xf0] sm:$0xff] }
 0x1b2   : > { %6880 = vmatprep.subr.bf16.mxu0 %v6879_v23  ;;  %6818 = vmatpush3.bf16.msra.mxu1 %v6815_v16  ;;  %v6831_v51 = vpack.c.bf16 %v5495_v11, %v5494_v45  ;;  %v5590_v16 = vld [vmem:[%s8417_s3 + $0x1f0] sm:$0xff]  ;;  %v5649_v45 = vld [vmem:[%s8417_s3 + $0x288] sm:$0xff] }
 0x1b3   : > { %6491 = vmatmul.mubr.msk.f32.gmra.mrb[2].mxu0 %vm245_vm0, %v7809_v27  ;;  %6820 = vmatprep.subr.bf16.mxu1 %v6819_v26 }
 0x1b4   : > { %6334 = vmatmul.mubr.msk.f32.gmra.mrb[76].mxu1 %vm245_vm0, %v7734_v5  ;;  %6493 = vmatprep.mubr.msk.f32.mxu0 %vm245_vm0, %v7815_v31 }
 0x1b5   : > { %6336 = vmatprep.mubr.msk.f32.mxu1 %vm245_vm0, %v7744_v7  ;;  %6882 = vmatpush3.bf16.msra.mxu0 %v6879_v23  ;;  %v5603_v23 = vld [vmem:[%s8417_s3 + $0x218] sm:$0xff] }
 0x1b6   : > { %6884 = vmatprep.subr.bf16.mxu0 %v6883_v59 }
 0x1b7   : > { %6494 = vmatmul.mubr.msk.f32.gmra.mrb[4].mxu0 %vm245_vm0, %v7824_v32 }
 0x1b8   : > { %6337 = vmatmul.mubr.msk.f32.gmra.mrb[78].mxu1 %vm245_vm0, %v7753_v10  ;;  %6496 = vmatprep.mubr.msk.f32.mxu0 %vm245_vm0, %v7941_v61 }
 0x1b9   : > { %6347 = vmatprep.mubr.msk.f32.mxu1 %vm245_vm0, %v7683_v44  ;;  %v5492_v44 = vld [vmem:[%s8417_s3 + $0xe0] sm:$0xff] }
 0x1ba   : > { %v6827_v62 = vpack.c.bf16 %v5493_v56, %v5492_v44  ;;  %v5636_v44 = vld [vmem:[%s8417_s3 + $0x260] sm:$0xff]  ;;  %v5637_v56 = vld [vmem:[%s8417_s3 + $0x268] sm:$0xff] }
 0x1bb   : > { %6497 = vmatmul.mubr.msk.f32.gmra.mrb[6].mxu0 %vm245_vm0, %v7955_v43 }
 0x1bc   : > { %6348 = vmatmul.mubr.msk.f32.vlgmr.msra.gmra.mrb[72].mxu1 %vm245_vm0, %v7694_v46  ;;  %6507 = vmatprep.mubr.msk.f32.mxu0 %vm245_vm0, %v7585_v0  ;;  %v5588_v0 = vld [vmem:[%s8417_s3 + $0x1e0] sm:$0xff]  ;;  %v5589_v46 = vld [vmem:[%s8417_s3 + $0x1e8] sm:$0xff] }
 0x1bd   : > { %6350 = vmatprep.mubr.msk.f32.mxu1 %vm245_vm0, %v7712_v58  ;;  %6822 = vmatpush3.bf16.msra.mxu1 %v6819_v26  ;;  %v6891_v2 = vpack.c.bf16 %v5589_v46, %v5588_v0  ;;  %v5614_v26 = vld [vmem:[%s8417_s3 + $0x230] sm:$0xff]  ;;  %v5639_v46 = vld [vmem:[%s8417_s3 + $0x278] sm:$0xff] }
 0x1be   : > { %6824 = vmatprep.subr.bf16.mxu1 %v6823_v48  ;;  %v5638_v0 = vld [vmem:[%s8417_s3 + $0x270] sm:$0xff] }
 0x1bf   : > { %6508 = vmatmul.mubr.msk.f32.vlgmr.msra.gmra.mrb[0].mxu0 %vm245_vm0, %v7597_v47 }
 0x1c0   : > { %6351 = vmatmul.mubr.msk.f32.gmra.mrb[74].mxu1 %vm245_vm0, %v7723_v3  ;;  %6510 = vmatprep.mubr.msk.f32.mxu0 %vm245_vm0, %v7616_v49 }
 0x1c1   : > { %6886 = vmatpush3.bf16.msra.mxu0 %v6883_v59  ;;  %6353 = vmatprep.mubr.msk.f32.mxu1 %vm245_vm0, %v7732_v4  ;;  %v5615_v59 = vld [vmem:[%s8417_s3 + $0x238] sm:$0xff] }
 0x1c2   : > { %6888 = vmatprep.subr.bf16.mxu0 %v6887_v42  ;;  %6826 = vmatpush3.bf16.msra.mxu1 %v6823_v48  ;;  %v6911_v34 = vpack.c.bf16 %v5615_v59, %v5614_v26  ;;  %v5625_v48 = vld [vmem:[%s8417_s3 + $0x248] sm:$0xff]  ;;  %v4859_v59 = vld [vmem:[#allocation2 + $0x74] sm:$0xff] }
 0x1c3   : > { %6511 = vmatmul.mubr.msk.f32.gmra.mrb[2].mxu0 %vm245_vm0, %v7635_v21  ;;  %6828 = vmatprep.subr.bf16.mxu1 %v6827_v62  ;;  %v6915_v50 = vpack.c.bf16 %v5625_v48, %v5624_v38  ;;  %v4858_v26 = vld [vmem:[#allocation2 + $0x64] sm:$0xff] }
 0x1c4   : > { %6354 = vmatmul.mubr.msk.f32.gmra.mrb[76].mxu1 %vm245_vm0, %v7740_v6  ;;  %6513 = vmatprep.mubr.msk.f32.mxu0 %vm245_vm0, %v7650_v29 }
 0x1c5   : > { %6356 = vmatprep.mubr.msk.f32.mxu1 %vm245_vm0, %v7751_v9  ;;  %6890 = vmatpush3.bf16.msra.mxu0 %v6887_v42  ;;  %v6923_v42 = vpack.c.bf16 %v5637_v56, %v5636_v44 }
 0x1c6   : > { %6892 = vmatprep.subr.bf16.mxu0 %v6891_v2 }
 0x1c7   : > { %6514 = vmatmul.mubr.msk.f32.gmra.mrb[4].mxu0 %vm245_vm0, %v7660_v57 }
 0x1c8   : > { %6357 = vmatmul.mubr.msk.f32.gmra.mrb[78].mxu1 %vm245_vm0, %v7826_v33  ;;  %6516 = vmatprep.mubr.msk.f32.mxu0 %vm245_vm0, %v7674_v36 }
 0x1c9   : > { %6367 = vmatprep.mubr.msk.f32.mxu1 %vm245_vm0, %v7556_v40  ;;  %v6895_v40 = vpack.c.bf16 %v5591_v18, %v5590_v16  ;;  %v4407_v18 = vld [vmem:[#allocation2 + $0x51] sm:$0xff] }
 0x1cb   : > { %6517 = vmatmul.mubr.msk.f32.gmra.mrb[6].mxu0 %vm245_vm0, %v8013_v13 }
 0x1cc   : > { %6368 = vmatmul.mubr.msk.f32.vlgmr.msra.gmra.mrb[72].mxu1 %vm245_vm0, %v7583_v63  ;;  %6527 = vmatprep.mubr.msk.f32.mxu0 %vm245_vm0, %v7705_v52  ;;  %v5601_v63 = vld [vmem:[%s8417_s3 + $0x208] sm:$0xff] }
 0x1cd   : > { %6370 = vmatprep.mubr.msk.f32.mxu1 %vm245_vm0, %v7587_v1  ;;  %6830 = vmatpush3.bf16.msra.mxu1 %v6827_v62  ;;  %v6899_v52 = vpack.c.bf16 %v5601_v63, %v5600_v19  ;;  %v6927_v62 = vpack.c.bf16 %v5639_v46, %v5638_v0  ;;  %v4413_v63 = vld [vmem:[#allocation2 + $0xb1] sm:$0xff]  ;;  %v5038_v46 = vlaneseq }
 0x1ce   : > { %6832 = vmatprep.subr.bf16.mxu1 %v6831_v51 }
 0x1cf   : > { %6528 = vmatmul.mubr.msk.f32.vlgmr.msra.gmra.mrb[0].mxu0 %vm245_vm0, %v7714_v60  ;;  %vm8343_vm3 = vcmp.lt.s32.totalorder %v5038_v46, 128 }
 0x1d0   : > { %6371 = vmatmul.mubr.msk.f32.gmra.mrb[74].mxu1 %vm245_vm0, %v7614_v12  ;;  %6530 = vmatprep.mubr.msk.f32.mxu0 %vm245_vm0, %v7728_v35 }
 0x1d1   : > { %6894 = vmatpush3.bf16.msra.mxu0 %v6891_v2  ;;  %6373 = vmatprep.mubr.msk.f32.mxu1 %vm245_vm0, %v7633_v20  ;;  %v5648_v2 = vld [vmem:[%s8417_s3 + $0x280] sm:$0xff] }
 0x1d2   : > { %6896 = vmatprep.subr.bf16.mxu0 %v6895_v40  ;;  %6834 = vmatpush3.bf16.msra.mxu1 %v6831_v51  ;;  %v6931_v11 = vpack.c.bf16 %v5649_v45, %v5648_v2 }
 0x1d3   : > { %6531 = vmatmul.mubr.msk.f32.gmra.mrb[2].mxu0 %vm245_vm0, %v7734_v5 }
 0x1d4   : > { %6374 = vmatmul.mubr.msk.f32.gmra.mrb[76].mxu1 %vm245_vm0, %v7648_v28  ;;  %6533 = vmatprep.mubr.msk.f32.mxu0 %vm245_vm0, %v7744_v7 }
 0x1d5   : > { %6376 = vmatprep.mubr.msk.f32.mxu1 %vm245_vm0, %v7652_v30  ;;  %6898 = vmatpush3.bf16.msra.mxu0 %v6895_v40  ;;  %v5685_v40 = vld [vmem:[%s8417_s3 + $0x2e8] sm:$0xff] }
 0x1d6   : > { %6900 = vmatprep.subr.bf16.mxu0 %v6899_v52 }
 0x1d7   : > { %6534 = vmatmul.mubr.msk.f32.gmra.mrb[4].mxu0 %vm245_vm0, %v7753_v10 }
 0x1d8   : > { %6377 = vmatmul.mubr.msk.f32.gmra.mrb[78].mxu1 %vm245_vm0, %v7882_v8  ;;  %6536 = vmatprep.mubr.msk.f32.mxu0 %vm245_vm0, %v7763_v39 }
 0x1d9   : > { %6387 = vmatprep.mubr.msk.f32.mxu1 %vm245_vm0, %v7767_v14  ;;  %v6903_v14 = vpack.c.bf16 %v5603_v23, %v5602_v55  ;;  %v4707_v23 = vld [vmem:[#allocation2 + $0x53] sm:$0xff] }
 0x1db   : > { %6537 = vmatmul.mubr.msk.f32.gmra.mrb[6].mxu0 %vm245_vm0, %v8059_v53 }
 0x1dc   : > { %6388 = vmatmul.mubr.msk.f32.vlgmr.msra.gmra.mrb[72].mxu1 %vm245_vm0, %v7779_v17  ;;  %6547 = vmatprep.mubr.msk.f32.mxu0 %vm245_vm0, %v7712_v58  ;;  %v6907_v58 = vpack.c.bf16 %v5613_v24, %v5612_v41  ;;  %v8103_v17 = vld [vmem:[#allocation2 + $0xa0] sm:$0xff]  ;;  %v4713_v24 = vld [vmem:[#allocation2 + $0xb3] sm:$0xff] }
 0x1dd   : > { %6390 = vmatprep.mubr.msk.f32.mxu1 %vm245_vm0, %v7791_v22  ;;  %v4710_v41 = vld [vmem:[#allocation2 + $0x83] sm:$0xff] }
 0x1df   : > { %6548 = vmatmul.mubr.msk.f32.vlgmr.msra.gmra.mrb[0].mxu0 %vm245_vm0, %v7723_v3 }
 0x1e0   : > { %6391 = vmatmul.mubr.msk.f32.gmra.mrb[74].mxu1 %vm245_vm0, %v7803_v25  ;;  %6550 = vmatprep.mubr.msk.f32.mxu0 %vm245_vm0, %v7732_v4 }
 0x1e1   : > { %6902 = vmatpush3.bf16.msra.mxu0 %v6899_v52  ;;  %6393 = vmatprep.mubr.msk.f32.mxu1 %vm245_vm0, %v7809_v27  ;;  %v5697_v52 = vld [vmem:[%s8417_s3 + $0x308] sm:$0xff] }
 0x1e2   : > { %6904 = vmatprep.subr.bf16.mxu0 %v6903_v14 }
 0x1e3   : > { %6551 = vmatmul.mubr.msk.f32.gmra.mrb[2].mxu0 %vm245_vm0, %v7740_v6 }
 0x1e4   : > { %6394 = vmatmul.mubr.msk.f32.gmra.mrb[76].mxu1 %vm245_vm0, %v7815_v31  ;;  %6553 = vmatprep.mubr.msk.f32.mxu0 %vm245_vm0, %v7751_v9 }
 0x1e5   : > { %6396 = vmatprep.mubr.msk.f32.mxu1 %vm245_vm0, %v7824_v32  ;;  %6906 = vmatpush3.bf16.msra.mxu0 %v6903_v14  ;;  %v4709_v14 = vld [vmem:[#allocation2 + $0x73] sm:$0xff] }
 0x1e6   : > { %6908 = vmatprep.subr.bf16.mxu0 %v6907_v58 }
 0x1e7   : > { %6554 = vmatmul.mubr.msk.f32.gmra.mrb[4].mxu0 %vm245_vm0, %v7826_v33 }
 0x1e8   : > { %6397 = vmatmul.mubr.msk.f32.gmra.mrb[78].mxu1 %vm245_vm0, %v7941_v61  ;;  %6556 = vmatprep.mubr.msk.f32.mxu0 %vm245_vm0, %v7836_v37 }
 0x1eb   : > { %6557 = vmatmul.mubr.msk.f32.gmra.mrb[6].mxu0 %vm245_vm0, %v8103_v17 }
 0x1ec   : > { %6567 = vmatprep.mubr.msk.f32.mxu0 %vm245_vm0, %v7587_v1  ;;  %v8133_v1 = vld [vmem:[#allocation2 + $0xa1] sm:$0xff] }
 0x1ef   : > { %6568 = vmatmul.mubr.msk.f32.vlgmr.msra.gmra.mrb[0].mxu0 %vm245_vm0, %v7614_v12  ;;  %v5626_v12 = vld [vmem:[%s8417_s3 + $0x250] sm:$0xff] }
 0x1f0   : > { %6570 = vmatprep.mubr.msk.f32.mxu0 %vm245_vm0, %v7633_v20  ;;  %6910 = vmatpush3.bf16.msra.mxu0 %v6907_v58  ;;  %v5627_v20 = vld [vmem:[%s8417_s3 + $0x258] sm:$0xff]  ;;  %v4856_v58 = vld [vmem:[#allocation2 + $0x44] sm:$0xff] }
 0x1f1   : > { %6912 = vmatprep.subr.bf16.mxu0 %v6911_v34  ;;  %v6919_v54 = vpack.c.bf16 %v5627_v20, %v5626_v12 }
 0x1f3   : > { %6571 = vmatmul.mubr.msk.f32.gmra.mrb[2].mxu0 %vm245_vm0, %v7648_v28 }
 0x1f4   : > { %6573 = vmatprep.mubr.msk.f32.mxu0 %vm245_vm0, %v7652_v30  ;;  %6914 = vmatpush3.bf16.msra.mxu0 %v6911_v34  ;;  %v4860_v34 = vld [vmem:[#allocation2 + $0x84] sm:$0xff] }
 0x1f5   : > { %6916 = vmatprep.subr.bf16.mxu0 %v6915_v50 }
 0x1f7   : > { %6574 = vmatmul.mubr.msk.f32.gmra.mrb[4].mxu0 %vm245_vm0, %v7882_v8 }
 0x1f8   : > { %6576 = vmatprep.mubr.msk.f32.mxu0 %vm245_vm0, %v7895_v15 }
 0x1fb   : > { %6577 = vmatmul.mubr.msk.f32.gmra.mrb[6].mxu0 %vm245_vm0, %v8133_v1 }
 0x1fc   : > { %6587 = vmatprep.mubr.msk.f32.mxu0 %vm245_vm0, %v7791_v22  ;;  %v8163_v22 = vld [vmem:[#allocation2 + $0xa2] sm:$0xff] }
 0x1ff   : > { %6588 = vmatmul.mubr.msk.f32.vlgmr.msra.gmra.mrb[0].mxu0 %vm245_vm0, %v7803_v25 }
 0x200   : > { %6590 = vmatprep.mubr.msk.f32.mxu0 %vm245_vm0, %v7809_v27  ;;  %6918 = vmatpush3.bf16.msra.mxu0 %v6915_v50 }
 0x201   : > { %6920 = vmatprep.subr.bf16.mxu0 %v6919_v54 }
 0x203   : > { %6591 = vmatmul.mubr.msk.f32.gmra.mrb[2].mxu0 %vm245_vm0, %v7815_v31 }
 0x204   : > { %6593 = vmatprep.mubr.msk.f32.mxu0 %vm245_vm0, %v7824_v32  ;;  %6922 = vmatpush3.bf16.msra.mxu0 %v6919_v54 }
 0x205   : > { %6924 = vmatprep.subr.bf16.mxu0 %v6923_v42 }
 0x207   : > { %6594 = vmatmul.mubr.msk.f32.gmra.mrb[4].mxu0 %vm245_vm0, %v7941_v61 }
 0x208   : > { %6596 = vmatprep.mubr.msk.f32.mxu0 %vm245_vm0, %v7955_v43 }
 0x20b   : > { %6597 = vmatmul.mubr.msk.f32.gmra.mrb[6].mxu0 %vm245_vm0, %v8163_v22 }
 0x20c   : > { %6607 = vmatprep.mubr.msk.f32.mxu0 %vm245_vm0, %v7597_v47  ;;  %v8193_v47 = vld [vmem:[#allocation2 + $0xa3] sm:$0xff] }
 0x20f   : > { %6608 = vmatmul.mubr.msk.f32.vlgmr.msra.gmra.mrb[0].mxu0 %vm245_vm0, %v7616_v49  ;;  %v5650_v49 = vld [vmem:[%s8417_s3 + $0x290] sm:$0xff] }
 0x210   : > { %6610 = vmatprep.mubr.msk.f32.mxu0 %vm245_vm0, %v7635_v21  ;;  %6926 = vmatpush3.bf16.msra.mxu0 %v6923_v42  ;;  %v5651_v21 = vld [vmem:[%s8417_s3 + $0x298] sm:$0xff]  ;;  %v5708_v42 = vld [vmem:[%s8418_s4] ss:$0 sm:$0xff] }
 0x211   : > { %6928 = vmatprep.subr.bf16.mxu0 %v6927_v62 }
 0x213   : > { %6611 = vmatmul.mubr.msk.f32.gmra.mrb[2].mxu0 %vm245_vm0, %v7650_v29  ;;  %v6935_v29 = vpack.c.bf16 %v5651_v21, %v5650_v49 }
 0x214   : > { %6613 = vmatprep.mubr.msk.f32.mxu0 %vm245_vm0, %v7660_v57  ;;  %6930 = vmatpush3.bf16.msra.mxu0 %v6927_v62  ;;  %v5660_v57 = vld [vmem:[%s8417_s3 + $0x2a0] sm:$0xff]  ;;  %v7181_v62 = vmov 1966171168  }
 0x215   : > { %6932 = vmatprep.subr.bf16.mxu0 %v6931_v11  ;;  %v5045_v2 = vunpack.c.l.s4 %v7181_v62 }
 0x217   : > { %6614 = vmatmul.mubr.msk.f32.gmra.mrb[4].mxu0 %vm245_vm0, %v7674_v36  ;;  %v5661_v36 = vld [vmem:[%s8417_s3 + $0x2a8] sm:$0xff] }
 0x218   : > { %6616 = vmatprep.mubr.msk.f32.mxu0 %vm245_vm0, %v8013_v13  ;;  %v6939_v51 = vpack.c.bf16 %v5661_v36, %v5660_v57  ;;  %v5046_v36 = vunpack.c.0.s8 %v5045_v2 }
 0x21b   : > { %6617 = vmatmul.mubr.msk.f32.gmra.mrb[6].mxu0 %vm245_vm0, %v8193_v47 }
 0x21c   : > { %6627 = vmatprep.mubr.msk.f32.mxu0 %vm245_vm0, %v7714_v60  ;;  %v8223_v60 = vld [vmem:[#allocation2 + $0xa4] sm:$0xff] }
 0x21f   : > { %6628 = vmatmul.mubr.msk.f32.vlgmr.msra.gmra.mrb[0].mxu0 %vm245_vm0, %v7728_v35  ;;  %v5662_v35 = vld [vmem:[%s8417_s3 + $0x2b0] sm:$0xff] }
 0x220   : > { %6630 = vmatprep.mubr.msk.f32.mxu0 %vm245_vm0, %v7734_v5  ;;  %6934 = vmatpush3.bf16.msra.mxu0 %v6931_v11  ;;  %v5663_v5 = vld [vmem:[%s8417_s3 + $0x2b8] sm:$0xff] }
 0x221   : > { %6936 = vmatprep.subr.bf16.mxu0 %v6935_v29 }
 0x223   : > { %6631 = vmatmul.mubr.msk.f32.gmra.mrb[2].mxu0 %vm245_vm0, %v7744_v7  ;;  %v6943_v7 = vpack.c.bf16 %v5663_v5, %v5662_v35 }
 0x224   : > { %6633 = vmatprep.mubr.msk.f32.mxu0 %vm245_vm0, %v7753_v10  ;;  %6938 = vmatpush3.bf16.msra.mxu0 %v6935_v29  ;;  %v5672_v10 = vld [vmem:[%s8417_s3 + $0x2c0] sm:$0xff] }
 0x225   : > { %6940 = vmatprep.subr.bf16.mxu0 %v6939_v51 }
 0x227   : > { %6634 = vmatmul.mubr.msk.f32.gmra.mrb[4].mxu0 %vm245_vm0, %v7763_v39  ;;  %v5673_v39 = vld [vmem:[%s8417_s3 + $0x2c8] sm:$0xff] }
 0x228   : > { %6636 = vmatprep.mubr.msk.f32.mxu0 %vm245_vm0, %v8059_v53  ;;  %v6947_v16 = vpack.c.bf16 %v5673_v39, %v5672_v10 }
 0x22b   : > { %6637 = vmatmul.mubr.msk.f32.gmra.mrb[6].mxu0 %vm245_vm0, %v8223_v60 }
 0x22c   : > { %6647 = vmatprep.mubr.msk.f32.mxu0 %vm245_vm0, %v7723_v3  ;;  %v4263_v3 = vld [vmem:[#allocation2 + $0xb0] sm:$0xff] }
 0x22f   : > { %6648 = vmatmul.mubr.msk.f32.vlgmr.msra.gmra.mrb[0].mxu0 %vm245_vm0, %v7732_v4  ;;  %v5674_v4 = vld [vmem:[%s8417_s3 + $0x2d0] sm:$0xff] }
 0x230   : > { %6650 = vmatprep.mubr.msk.f32.mxu0 %vm245_vm0, %v7740_v6  ;;  %6942 = vmatpush3.bf16.msra.mxu0 %v6939_v51  ;;  %v5675_v6 = vld [vmem:[%s8417_s3 + $0x2d8] sm:$0xff]  ;;  %v5048_v51 = vshrl.u32 %v5038_v46, 7 }
 0x231   : > { %6944 = vmatprep.subr.bf16.mxu0 %v6943_v7 }
 0x233   : > { %6651 = vmatmul.mubr.msk.f32.gmra.mrb[2].mxu0 %vm245_vm0, %v7751_v9  ;;  %v4406_v9 = vld [vmem:[#allocation2 + $0x41] sm:$0xff] }
 0x234   : > { %6653 = vmatprep.mubr.msk.f32.mxu0 %vm245_vm0, %v7826_v33  ;;  %6946 = vmatpush3.bf16.msra.mxu0 %v6943_v7  ;;  %v6951_v33 = vpack.c.bf16 %v5675_v6, %v5674_v4 }
 0x235   : > { %6948 = vmatprep.subr.bf16.mxu0 %v6947_v16 }
 0x237   : > { %6654 = vmatmul.mubr.msk.f32.gmra.mrb[4].mxu0 %vm245_vm0, %v7836_v37  ;;  %v5684_v37 = vld [vmem:[%s8417_s3 + $0x2e0] sm:$0xff] }
 0x238   : > { %6656 = vmatprep.mubr.msk.f32.mxu0 %vm245_vm0, %v8103_v17  ;;  %v6955_v19 = vpack.c.bf16 %v5685_v40, %v5684_v37  ;;  %v4857_v17 = vld [vmem:[#allocation2 + $0x54] sm:$0xff] }
 0x23b   : > { %6657 = vmatmul.mubr.msk.f32.gmra.mrb[6].mxu0 %vm245_vm0, %v4263_v3 }
 0x23c   : > { %6667 = vmatprep.mubr.msk.f32.mxu0 %vm245_vm0, %v4406_v9 }
 0x23f   : > { %6668 = vmatmul.mubr.msk.f32.vlgmr.msra.gmra.mrb[0].mxu0 %vm245_vm0, %v4407_v18 }
 0x240   : > { %6670 = vmatprep.mubr.msk.f32.mxu0 %vm245_vm0, %v7648_v28  ;;  %6950 = vmatpush3.bf16.msra.mxu0 %v6947_v16  ;;  %v5686_v28 = vld [vmem:[%s8417_s3 + $0x2f0] sm:$0xff] }
 0x241   : > { %6952 = vmatprep.subr.bf16.mxu0 %v6951_v33 }
 0x243   : > { %6671 = vmatmul.mubr.msk.f32.gmra.mrb[2].mxu0 %vm245_vm0, %v7652_v30  ;;  %v5687_v30 = vld [vmem:[%s8417_s3 + $0x2f8] sm:$0xff] }
 0x244   : > { %6673 = vmatprep.mubr.msk.f32.mxu0 %vm245_vm0, %v7882_v8  ;;  %6954 = vmatpush3.bf16.msra.mxu0 %v6951_v33  ;;  %v6959_v8 = vpack.c.bf16 %v5687_v30, %v5686_v28  ;;  %v8336_v33 = vsub.s32 %v5046_v36, %v5048_v51 }
 0x245   : > { %6956 = vmatprep.subr.bf16.mxu0 %v6955_v19 }
 0x247   : > { %6674 = vmatmul.mubr.msk.f32.gmra.mrb[4].mxu0 %vm245_vm0, %v7895_v15  ;;  %v5696_v15 = vld [vmem:[%s8417_s3 + $0x300] sm:$0xff] }
 0x248   : > { %6676 = vmatprep.mubr.msk.f32.mxu0 %vm245_vm0, %v8133_v1  ;;  %v6963_v55 = vpack.c.bf16 %v5697_v52, %v5696_v15 }
 0x24b   : > { %6677 = vmatmul.mubr.msk.f32.gmra.mrb[6].mxu0 %vm245_vm0, %v4413_v63 }
 0x24c   : > { %6687 = vmatprep.mubr.msk.f32.mxu0 %vm245_vm0, %v7803_v25  ;;  %v4563_v25 = vld [vmem:[#allocation2 + $0xb2] sm:$0xff] }
 0x24f   : > { %6688 = vmatmul.mubr.msk.f32.vlgmr.msra.gmra.mrb[0].mxu0 %vm245_vm0, %v7809_v27  ;;  %v5698_v27 = vld [vmem:[%s8417_s3 + $0x310] sm:$0xff] }
 0x250   : > { %6690 = vmatprep.mubr.msk.f32.mxu0 %vm245_vm0, %v7815_v31  ;;  %6958 = vmatpush3.bf16.msra.mxu0 %v6955_v19  ;;  %v5699_v31 = vld [vmem:[%s8417_s3 + $0x318] sm:$0xff] }
 0x251   : > { %6960 = vmatprep.subr.bf16.mxu0 %v6959_v8 }
 0x253   : > { %6691 = vmatmul.mubr.msk.f32.gmra.mrb[2].mxu0 %vm245_vm0, %v7824_v32  ;;  %v4706_v32 = vld [vmem:[#allocation2 + $0x43] sm:$0xff] }
 0x254   : > { %6693 = vmatprep.mubr.msk.f32.mxu0 %vm245_vm0, %v7941_v61  ;;  %6962 = vmatpush3.bf16.msra.mxu0 %v6959_v8  ;;  %v6967_v61 = vpack.c.bf16 %v5699_v31, %v5698_v27 }
 0x255   : > { %6964 = vmatprep.subr.bf16.mxu0 %v6963_v55 }
 0x257   : > { %6694 = vmatmul.mubr.msk.f32.gmra.mrb[4].mxu0 %vm245_vm0, %v7955_v43  ;;  %v4708_v43 = vld [vmem:[#allocation2 + $0x63] sm:$0xff] }
 0x258   : > { %6696 = vmatprep.mubr.msk.f32.mxu0 %vm245_vm0, %v8163_v22 }
 0x25b   : > { %6697 = vmatmul.mubr.msk.f32.gmra.mrb[6].mxu0 %vm245_vm0, %v4563_v25 }
 0x25c   : > { %6707 = vmatprep.mubr.msk.f32.mxu0 %vm245_vm0, %v4706_v32 }
 0x25f   : > { %6708 = vmatmul.mubr.msk.f32.vlgmr.msra.gmra.mrb[0].mxu0 %vm245_vm0, %v4707_v23 }
 0x260   : > { %6710 = vmatprep.mubr.msk.f32.mxu0 %vm245_vm0, %v4708_v43  ;;  %6966 = vmatpush3.bf16.msra.mxu0 %v6963_v55 }
 0x261   : > { %6968 = vmatprep.subr.bf16.mxu0 %v6967_v61 }
 0x263   : > { %6711 = vmatmul.mubr.msk.f32.gmra.mrb[2].mxu0 %vm245_vm0, %v4709_v14 }
 0x264   : > { %6713 = vmatprep.mubr.msk.f32.mxu0 %vm245_vm0, %v4710_v41  ;;  %6970 = vmatpush3.bf16.msra.mxu0 %v6967_v61 }
 0x267   : > { %6714 = vmatmul.mubr.msk.f32.gmra.mrb[4].mxu0 %vm245_vm0, %v8013_v13  ;;  %v4863_v13 = vld [vmem:[#allocation2 + $0xb4] sm:$0xff] }
 0x268   : > { %6716 = vmatprep.mubr.msk.f32.mxu0 %vm245_vm0, %v8193_v47 }
 0x26b   : > { %6717 = vmatmul.mubr.msk.f32.gmra.mrb[6].mxu0 %vm245_vm0, %v4713_v24 }
 0x26c   : > { %6727 = vmatprep.mubr.msk.f32.mxu0 %vm245_vm0, %v4856_v58 }
 0x26f   : > { %6728 = vmatmul.mubr.msk.f32.vlgmr.msra.gmra.mrb[0].mxu0 %vm245_vm0, %v4857_v17 }
 0x270   : > { %6730 = vmatprep.mubr.msk.f32.mxu0 %vm245_vm0, %v4858_v26 }
 0x273   : > { %6731 = vmatmul.mubr.msk.f32.gmra.mrb[2].mxu0 %vm245_vm0, %v4859_v59 }
 0x274   : > { %6733 = vmatprep.mubr.msk.f32.mxu0 %vm245_vm0, %v4860_v34 }
 0x277   : > { %6734 = vmatmul.mubr.msk.f32.gmra.mrb[4].mxu0 %vm245_vm0, %v8059_v53 }
 0x278   : > { %6736 = vmatprep.mubr.msk.f32.mxu0 %vm245_vm0, %v8223_v60 }
 0x27b   : > { %6737 = vmatmul.mubr.msk.f32.gmra.mrb[6].mxu0 %vm245_vm0, %v4863_v13 }
 0x2af   : > { %v6389_v38 = vpop.f32.mrb[72].mxu1 }
 0x2b0   : > { %v2409_v48 = vpop.f32.mrb[73].mxu1 }
 0x2b3   : > { %v6392_v50 = vpop.f32.mrb[74].mxu1 }
 0x2b4   : > { %v2419_v1 = vpop.f32.mrb[75].mxu1 }
 0x2b7   : > { %v6395_v12 = vpop.f32.mrb[76].mxu1 }
 0x2b8   : > { %v2429_v20 = vpop.f32.mrb[77].mxu1 }
 0x2bb   : > { %v6398_v54 = vpop.f32.mrb[78].mxu1 }
 0x2bc   : > { %v2439_v44 = vpop.f32.mrb[79].mxu1 }
 0x342   : > { %v6729_v56 = vpop.f32.mrb[0].mxu0 }
 0x343   : > { %v6971_v53 = vadd.f32 %v6729_v56, %v6389_v38  ;;  %v4959_v22 = vpop.f32.mrb[1].mxu0 }
 0x344   : > { %v6972_v0 = vadd.f32 %v4959_v22, %v2409_v48 }
 0x345   : > { %v5014_v45 = vadd.f32 %v6971_v53, %v5708_v42 }
 0x346   : > { %v5013_v11 = vadd.f32 %v6972_v0, %v5708_v42  ;;  %v6732_v47 = vpop.f32.mrb[2].mxu0 }
 0x347   : > { %v5022_v49 = vmax.f32 %v5014_v45, 0.0  ;;  %v6973_v21 = vadd.f32 %v6732_v47, %v6392_v50  ;;  %v4969_v29 = vpop.f32.mrb[3].mxu0 }
 0x348   : > { %v5021_v57 = vmax.f32 %v5013_v11, 0.0  ;;  %v6974_v60 = vadd.f32 %v4969_v29, %v2419_v1 }
 0x349   : > { %v5034_v35 = vrot.slane %v5022_v49, 1  ;;  %v5016_v5 = vadd.f32 %v6973_v21, %v5708_v42 }
 0x34a   : > { %v5030_v7 = vrot.slane %v5021_v57, 1  ;;  %v5015_v10 = vadd.f32 %v6974_v60, %v5708_v42  ;;  %v6735_v39 = vpop.f32.mrb[4].mxu0 }
 0x34b   : > { %v5036_v16 = vmax.f32 %v5022_v49, %v5034_v35  ;;  %v5024_v3 = vmax.f32 %v5016_v5, 0.0  ;;  %v6975_v4 = vadd.f32 %v6735_v39, %v6395_v12  ;;  %v4979_v6 = vpop.f32.mrb[5].mxu0 }
 0x34c   : > { %v5032_v9 = vmax.f32 %v5021_v57, %v5030_v7  ;;  %v5023_v18 = vmax.f32 %v5015_v10, 0.0  ;;  %v6976_v37 = vadd.f32 %v4979_v6, %v2429_v20 }
 0x34d   : > { %v5086_v19 = vrot.slane %v5024_v3, 1  ;;  %v5018_v63 = vadd.f32 %v6975_v4, %v5708_v42 }
 0x34e   : > { %v5037_v28 = vmax.f32 %v5032_v9, %v5036_v16  ;;  %v5082_v30 = vrot.slane %v5023_v18, 1  ;;  %v5017_v8 = vadd.f32 %v6976_v37, %v5708_v42  ;;  %v6738_v15 = vpop.f32.mrb[6].mxu0 }
 0x34f   : > { %v5088_v52 = vmax.f32 %v5024_v3, %v5086_v19  ;;  %v5026_v55 = vmax.f32 %v5018_v63, 0.0  ;;  %v6977_v25 = vadd.f32 %v6738_v15, %v6398_v54  ;;  %v4989_v27 = vpop.f32.mrb[7].mxu0 }
 0x350   : > { %5042 = vst.msk [vmem:[%s8341_s7] sm:$0x1] %vm8343_vm3, %v5037_v28  ;;  %v5050_v31 = vrot.slane %v5037_v28, %v8336_v33  ;;  %v5061_v32 = vcombine.high %v5037_v28, %v5037_v28  ;;  %v5084_v61 = vmax.f32 %v5023_v18, %v5082_v30  ;;  %v5025_v23 = vmax.f32 %v5017_v8, 0.0 }
 0x351   : > { %v5134_v43 = vrot.slane %v5026_v55, 1  ;;  %v5020_v14 = vadd.f32 %v6977_v25, %v5708_v42  ;;  %v6978_v41 = vadd.f32 %v4989_v27, %v2439_v44 }
 0x352   : > { %v5057_v24 = vrot.slane %v5050_v31, %v8336_v33  ;;  %v5068_v58 = vrot.slane %v5061_v32, %v8336_v33  ;;  %v5089_v17 = vmax.f32 %v5084_v61, %v5088_v52  ;;  %v5130_v26 = vrot.slane %v5025_v23, 1 }
 0x353   : > { %v5136_v59 = vmax.f32 %v5026_v55, %v5134_v43  ;;  %v5028_v34 = vmax.f32 %v5020_v14, 0.0  ;;  %v5019_v13 = vadd.f32 %v6978_v41, %v5708_v42 }
 0x354   : > { %v5058_v38 = vcombine.high %v5057_v24, %v5057_v24  ;;  %v5075_v48 = vrot.slane %v5068_v58, %v8336_v33  ;;  %5090 = vst.msk [vmem:[%s8341_s7 + $0x4] sm:$0x1] %vm8343_vm3, %v5089_v17  ;;  %v5098_v50 = vrot.slane %v5089_v17, %v8336_v33  ;;  %v5109_v1 = vcombine.high %v5089_v17, %v5089_v17 }
 0x355   : > { %v5132_v12 = vmax.f32 %v5025_v23, %v5130_v26  ;;  %v5182_v20 = vrot.slane %v5028_v34, 1  ;;  %v5027_v54 = vmax.f32 %v5019_v13, 0.0 }
 0x356   : > { %5060 = vst.msk [vmem:[%s8341_s7 + $0x1] sm:$0x1] %vm8343_vm3, %v5058_v38  ;;  %5077 = vst.msk [vmem:[%s8341_s7 + $0x2] sm:$0x1] %vm8343_vm3, %v5075_v48  ;;  %v5078_v44 = vcombine.high %v5075_v48, %v5075_v48  ;;  %v5105_v56 = vrot.slane %v5098_v50, %v8336_v33  ;;  %v5116_v42 = vrot.slane %v5109_v1, %v8336_v33 }
 0x357   : > { %v5137_v53 = vmax.f32 %v5132_v12, %v5136_v59  ;;  %v5184_v22 = vmax.f32 %v5028_v34, %v5182_v20  ;;  %v5178_v0 = vrot.slane %v5027_v54, 1 }
 0x358   : > { %5080 = vst.msk [vmem:[%s8341_s7 + $0x3] sm:$0x1] %vm8343_vm3, %v5078_v44  ;;  %v5106_v46 = vcombine.high %v5105_v56, %v5105_v56  ;;  %v5123_v62 = vrot.slane %v5116_v42, %v8336_v33 }
 0x359   : > { %5138 = vst.msk [vmem:[%s8341_s7 + $0x8] sm:$0x1] %vm8343_vm3, %v5137_v53  ;;  %v5146_v2 = vrot.slane %v5137_v53, %v8336_v33  ;;  %v5157_v45 = vcombine.high %v5137_v53, %v5137_v53  ;;  %v5180_v11 = vmax.f32 %v5027_v54, %v5178_v0 }
 0x35a   : > { %5108 = vst.msk [vmem:[%s8341_s7 + $0x5] sm:$0x1] %vm8343_vm3, %v5106_v46  ;;  %5125 = vst.msk [vmem:[%s8341_s7 + $0x6] sm:$0x1] %vm8343_vm3, %v5123_v62  ;;  %v5126_v47 = vcombine.high %v5123_v62, %v5123_v62 }
 0x35b   : > { %v5153_v49 = vrot.slane %v5146_v2, %v8336_v33  ;;  %v5164_v21 = vrot.slane %v5157_v45, %v8336_v33  ;;  %v5185_v29 = vmax.f32 %v5180_v11, %v5184_v22 }
 0x35c   : > { %5128 = vst.msk [vmem:[%s8341_s7 + $0x7] sm:$0x1] %vm8343_vm3, %v5126_v47 }
 0x35d   : > { %v5154_v57 = vcombine.high %v5153_v49, %v5153_v49  ;;  %v5171_v36 = vrot.slane %v5164_v21, %v8336_v33  ;;  %5186 = vst.msk [vmem:[%s8341_s7 + $0xc] sm:$0x1] %vm8343_vm3, %v5185_v29  ;;  %v5194_v51 = vrot.slane %v5185_v29, %v8336_v33  ;;  %v5205_v60 = vcombine.high %v5185_v29, %v5185_v29 }
 0x35f   : > { %5156 = vst.msk [vmem:[%s8341_s7 + $0x9] sm:$0x1] %vm8343_vm3, %v5154_v57  ;;  %5173 = vst.msk [vmem:[%s8341_s7 + $0xa] sm:$0x1] %vm8343_vm3, %v5171_v36  ;;  %v5174_v35 = vcombine.high %v5171_v36, %v5171_v36  ;;  %v5201_v5 = vrot.slane %v5194_v51, %v8336_v33  ;;  %v5212_v7 = vrot.slane %v5205_v60, %v8336_v33 }
 0x361   : > { %5176 = vst.msk [vmem:[%s8341_s7 + $0xb] sm:$0x1] %vm8343_vm3, %v5174_v35  ;;  %v5202_v10 = vcombine.high %v5201_v5, %v5201_v5  ;;  %v5219_v39 = vrot.slane %v5212_v7, %v8336_v33 }
 0x363   : > { %5204 = vst.msk [vmem:[%s8341_s7 + $0xd] sm:$0x1] %vm8343_vm3, %v5202_v10  ;;  %5221 = vst.msk [vmem:[%s8341_s7 + $0xe] sm:$0x1] %vm8343_vm3, %v5219_v39  ;;  %v5222_v16 = vcombine.high %v5219_v39, %v5219_v39 }
 0x365   : > { %5224 = vst.msk [vmem:[%s8341_s7 + $0xf] sm:$0x1] %vm8343_vm3, %v5222_v16 }
 0x366 PF: > { %s15_s18 = sadd.s32 1, %s7179_s18  }
 0x367   : > { %p12_p4 = scmp.ge.s32.totalorder %s15_s18, 4  }
 0x369   :  { %14 = sbr.rel (!%p12_p4) target bundleno = 1 (0x1), region = 108 }

// kernel: cnn_mnist_forward.3
= control target key start
LH: loop header
LB: loop body
LE: loop exit
PB: predicated region body
PF: predicated region fallthrough
CT: control target
= control target key end

     0   :  { %s6980_s1 = inlined_call_operand.vmem [shape: f32[2048,512], index: 1, kind: input, shape index: {}]   ;;  %s6981_s0 = inlined_call_operand.vmem [shape: f32[8,2048], index: 0, kind: input, shape index: {}]   ;;  %s6982_s3 = inlined_call_operand.vmem [shape: f32[512,128], index: 3, kind: input, shape index: {}]   ;;  %s6983_s2 = inlined_call_operand.vmem [shape: f32[1,512], index: 2, kind: input, shape index: {}]   ;;  %s6984_s4 = inlined_call_operand.vmem [shape: f32[1,128], index: 4, kind: input, shape index: {}]   ;;  %s6985_s5 = inlined_call_operand.vmem [shape: f32[8,128], index: 5, kind: output, shape index: {}]  }
   0x1   :  { %v37_v0 = vld [vmem:[%s6980_s1 + $0x8] sm:$0xff]  ;;  %v39_v2 = vld [vmem:[%s6980_s1 + $0x18] sm:$0xff]  ;;  %v36_v5 = vld [vmem:[%s6980_s1] sm:$0xff] }
   0x2   :  { %v41_v1 = vld [vmem:[%s6980_s1 + $0x28] sm:$0xff]  ;;  %v43_v4 = vld [vmem:[%s6980_s1 + $0x38] sm:$0xff]  ;;  %v40_v6 = vld [vmem:[%s6980_s1 + $0x20] sm:$0xff] }
   0x3   :  { %v2509_v3 = vpack.c.bf16 %v41_v1, %v37_v0  ;;  %v3021_v7 = vpack.c.bf16 %v43_v4, %v39_v2  ;;  %v2511_v8 = vpack.c.bf16 %v40_v6, %v36_v5  ;;  %v38_v9 = vld [vmem:[%s6980_s1 + $0x10] sm:$0xff]  ;;  %v45_v11 = vld [vmem:[%s6980_s1 + $0x48] sm:$0xff]  ;;  %v47_v14 = vld [vmem:[%s6980_s1 + $0x58] sm:$0xff] }
   0x4   :  { %v42_v10 = vld [vmem:[%s6980_s1 + $0x30] sm:$0xff]  ;;  %v49_v13 = vld [vmem:[%s6980_s1 + $0x68] sm:$0xff]  ;;  %v51_v15 = vld [vmem:[%s6980_s1 + $0x78] sm:$0xff] }
   0x5   :  { %2510 = vmatprep.subr.bf16.mxu0 %v2509_v3  ;;  %v3023_v12 = vpack.c.bf16 %v42_v10, %v38_v9  ;;  %3022 = vmatprep.subr.bf16.mxu1 %v3021_v7  ;;  %v2513_v16 = vpack.c.bf16 %v49_v13, %v45_v11  ;;  %v3025_v17 = vpack.c.bf16 %v51_v15, %v47_v14  ;;  %v44_v18 = vld [vmem:[%s6980_s1 + $0x40] sm:$0xff]  ;;  %v46_v20 = vld [vmem:[%s6980_s1 + $0x50] sm:$0xff]  ;;  %v53_v23 = vld [vmem:[%s6980_s1 + $0x88] sm:$0xff] }
   0x6   :  { %2512 = vmatpush1.bf16.msra.mxu0 %v2511_v8  ;;  %v48_v19 = vld [vmem:[%s6980_s1 + $0x60] sm:$0xff]  ;;  %v50_v22 = vld [vmem:[%s6980_s1 + $0x70] sm:$0xff]  ;;  %v57_v24 = vld [vmem:[%s6980_s1 + $0xa8] sm:$0xff] }
   0x7   :  { %3024 = vmatpush1.bf16.msra.mxu1 %v3023_v12  ;;  %v2515_v21 = vpack.c.bf16 %v48_v19, %v44_v18  ;;  %2514 = vmatprep.subr.bf16.mxu0 %v2513_v16  ;;  %v3027_v25 = vpack.c.bf16 %v50_v22, %v46_v20  ;;  %v2517_v26 = vpack.c.bf16 %v57_v24, %v53_v23  ;;  %v55_v27 = vld [vmem:[%s6980_s1 + $0x98] sm:$0xff]  ;;  %v52_v29 = vld [vmem:[%s6980_s1 + $0x80] sm:$0xff]  ;;  %v54_v32 = vld [vmem:[%s6980_s1 + $0x90] sm:$0xff] }
   0x8   :  { %3026 = vmatprep.subr.bf16.mxu1 %v3025_v17  ;;  %v59_v28 = vld [vmem:[%s6980_s1 + $0xb8] sm:$0xff]  ;;  %v56_v31 = vld [vmem:[%s6980_s1 + $0xa0] sm:$0xff]  ;;  %v58_v33 = vld [vmem:[%s6980_s1 + $0xb0] sm:$0xff] }
   0x9   :  { %v3029_v30 = vpack.c.bf16 %v59_v28, %v55_v27  ;;  %v2519_v34 = vpack.c.bf16 %v56_v31, %v52_v29  ;;  %v61_v35 = vld [vmem:[%s6980_s1 + $0xc8] sm:$0xff]  ;;  %v63_v37 = vld [vmem:[%s6980_s1 + $0xd8] sm:$0xff]  ;;  %v3031_v38 = vpack.c.bf16 %v58_v33, %v54_v32  ;;  %v60_v41 = vld [vmem:[%s6980_s1 + $0xc0] sm:$0xff] }
   0xa   :  { %2516 = vmatpush1.bf16.msra.mxu0 %v2515_v21  ;;  %v65_v36 = vld [vmem:[%s6980_s1 + $0xe8] sm:$0xff]  ;;  %v67_v40 = vld [vmem:[%s6980_s1 + $0xf8] sm:$0xff]  ;;  %v64_v42 = vld [vmem:[%s6980_s1 + $0xe0] sm:$0xff] }
   0xb   :  { %3028 = vmatpush1.bf16.msra.mxu1 %v3027_v25  ;;  %2518 = vmatprep.subr.bf16.mxu0 %v2517_v26  ;;  %v2521_v39 = vpack.c.bf16 %v65_v36, %v61_v35  ;;  %v3033_v43 = vpack.c.bf16 %v67_v40, %v63_v37  ;;  %v62_v44 = vld [vmem:[%s6980_s1 + $0xd0] sm:$0xff]  ;;  %v69_v46 = vld [vmem:[%s6980_s1 + $0x108] sm:$0xff]  ;;  %v71_v48 = vld [vmem:[%s6980_s1 + $0x118] sm:$0xff]  ;;  %v2523_v50 = vpack.c.bf16 %v64_v42, %v60_v41 }
   0xc   :  { %3030 = vmatprep.subr.bf16.mxu1 %v3029_v30  ;;  %v66_v45 = vld [vmem:[%s6980_s1 + $0xf0] sm:$0xff]  ;;  %v73_v47 = vld [vmem:[%s6980_s1 + $0x128] sm:$0xff]  ;;  %v75_v49 = vld [vmem:[%s6980_s1 + $0x138] sm:$0xff] }
   0xd   :  { %v3035_v51 = vpack.c.bf16 %v66_v45, %v62_v44  ;;  %v2525_v52 = vpack.c.bf16 %v73_v47, %v69_v46  ;;  %v68_v53 = vld [vmem:[%s6980_s1 + $0x100] sm:$0xff]  ;;  %v70_v55 = vld [vmem:[%s6980_s1 + $0x110] sm:$0xff]  ;;  %v3037_v56 = vpack.c.bf16 %v75_v49, %v71_v48  ;;  %v77_v58 = vld [vmem:[%s6980_s1 + $0x148] sm:$0xff] }
   0xe   :  { %2520 = vmatpush1.bf16.msra.mxu0 %v2519_v34  ;;  %v72_v54 = vld [vmem:[%s6980_s1 + $0x120] sm:$0xff]  ;;  %v74_v57 = vld [vmem:[%s6980_s1 + $0x130] sm:$0xff]  ;;  %v81_v59 = vld [vmem:[%s6980_s1 + $0x168] sm:$0xff] }
   0xf   :  { %3032 = vmatpush1.bf16.msra.mxu1 %v3031_v38  ;;  %2522 = vmatprep.subr.bf16.mxu0 %v2521_v39  ;;  %v79_v60 = vld [vmem:[%s6980_s1 + $0x158] sm:$0xff]  ;;  %v2527_v62 = vpack.c.bf16 %v72_v54, %v68_v53  ;;  %v3039_v63 = vpack.c.bf16 %v74_v57, %v70_v55  ;;  %v2529_v0 = vpack.c.bf16 %v81_v59, %v77_v58  ;;  %v76_v1 = vld [vmem:[%s6980_s1 + $0x140] sm:$0xff]  ;;  %v78_v3 = vld [vmem:[%s6980_s1 + $0x150] sm:$0xff] }
  0x10   :  { %3034 = vmatprep.subr.bf16.mxu1 %v3033_v43  ;;  %v83_v61 = vld [vmem:[%s6980_s1 + $0x178] sm:$0xff]  ;;  %v80_v2 = vld [vmem:[%s6980_s1 + $0x160] sm:$0xff]  ;;  %v82_v5 = vld [vmem:[%s6980_s1 + $0x170] sm:$0xff] }
  0x11   :  { %v3041_v4 = vpack.c.bf16 %v83_v61, %v79_v60  ;;  %v85_v6 = vld [vmem:[%s6980_s1 + $0x188] sm:$0xff]  ;;  %v87_v8 = vld [vmem:[%s6980_s1 + $0x198] sm:$0xff]  ;;  %v2531_v10 = vpack.c.bf16 %v80_v2, %v76_v1  ;;  %v3043_v11 = vpack.c.bf16 %v82_v5, %v78_v3  ;;  %v84_v13 = vld [vmem:[%s6980_s1 + $0x180] sm:$0xff] }
  0x12   :  { %2524 = vmatpush1.bf16.msra.mxu0 %v2523_v50  ;;  %v89_v7 = vld [vmem:[%s6980_s1 + $0x1a8] sm:$0xff]  ;;  %v91_v9 = vld [vmem:[%s6980_s1 + $0x1b8] sm:$0xff]  ;;  %v88_v14 = vld [vmem:[%s6980_s1 + $0x1a0] sm:$0xff] }
  0x13   :  { %3036 = vmatpush1.bf16.msra.mxu1 %v3035_v51  ;;  %2526 = vmatprep.subr.bf16.mxu0 %v2525_v52  ;;  %v2533_v12 = vpack.c.bf16 %v89_v7, %v85_v6  ;;  %v86_v15 = vld [vmem:[%s6980_s1 + $0x190] sm:$0xff]  ;;  %v3045_v16 = vpack.c.bf16 %v91_v9, %v87_v8  ;;  %v93_v18 = vld [vmem:[%s6980_s1 + $0x1c8] sm:$0xff]  ;;  %v95_v20 = vld [vmem:[%s6980_s1 + $0x1d8] sm:$0xff]  ;;  %v2535_v22 = vpack.c.bf16 %v88_v14, %v84_v13 }
  0x14   :  { %3038 = vmatprep.subr.bf16.mxu1 %v3037_v56  ;;  %v90_v17 = vld [vmem:[%s6980_s1 + $0x1b0] sm:$0xff]  ;;  %v97_v19 = vld [vmem:[%s6980_s1 + $0x1e8] sm:$0xff]  ;;  %v99_v21 = vld [vmem:[%s6980_s1 + $0x1f8] sm:$0xff] }
  0x15   :  { %v3047_v23 = vpack.c.bf16 %v90_v17, %v86_v15  ;;  %v2537_v24 = vpack.c.bf16 %v97_v19, %v93_v18  ;;  %v92_v25 = vld [vmem:[%s6980_s1 + $0x1c0] sm:$0xff]  ;;  %v94_v27 = vld [vmem:[%s6980_s1 + $0x1d0] sm:$0xff]  ;;  %v3049_v28 = vpack.c.bf16 %v99_v21, %v95_v20  ;;  %v101_v30 = vld [vmem:[%s6980_s1 + $0x208] sm:$0xff] }
  0x16   :  { %2528 = vmatpush1.bf16.msra.mxu0 %v2527_v62  ;;  %v96_v26 = vld [vmem:[%s6980_s1 + $0x1e0] sm:$0xff]  ;;  %v98_v29 = vld [vmem:[%s6980_s1 + $0x1f0] sm:$0xff]  ;;  %v105_v31 = vld [vmem:[%s6980_s1 + $0x228] sm:$0xff] }
  0x17   :  { %3040 = vmatpush1.bf16.msra.mxu1 %v3039_v63  ;;  %2530 = vmatprep.subr.bf16.mxu0 %v2529_v0  ;;  %v103_v32 = vld [vmem:[%s6980_s1 + $0x218] sm:$0xff]  ;;  %v2539_v34 = vpack.c.bf16 %v96_v26, %v92_v25  ;;  %v3051_v35 = vpack.c.bf16 %v98_v29, %v94_v27  ;;  %v2541_v36 = vpack.c.bf16 %v105_v31, %v101_v30  ;;  %v100_v37 = vld [vmem:[%s6980_s1 + $0x200] sm:$0xff]  ;;  %v102_v39 = vld [vmem:[%s6980_s1 + $0x210] sm:$0xff] }
  0x18   :  { %3042 = vmatprep.subr.bf16.mxu1 %v3041_v4  ;;  %v107_v33 = vld [vmem:[%s6980_s1 + $0x238] sm:$0xff]  ;;  %v104_v38 = vld [vmem:[%s6980_s1 + $0x220] sm:$0xff]  ;;  %v106_v41 = vld [vmem:[%s6980_s1 + $0x230] sm:$0xff] }
  0x19   :  { %v3053_v40 = vpack.c.bf16 %v107_v33, %v103_v32  ;;  %v109_v42 = vld [vmem:[%s6980_s1 + $0x248] sm:$0xff]  ;;  %v111_v44 = vld [vmem:[%s6980_s1 + $0x258] sm:$0xff]  ;;  %v2543_v46 = vpack.c.bf16 %v104_v38, %v100_v37  ;;  %v3055_v47 = vpack.c.bf16 %v106_v41, %v102_v39  ;;  %v108_v49 = vld [vmem:[%s6980_s1 + $0x240] sm:$0xff] }
  0x1a   :  { %2532 = vmatpush1.bf16.msra.mxu0 %v2531_v10  ;;  %v113_v43 = vld [vmem:[%s6980_s1 + $0x268] sm:$0xff]  ;;  %v115_v45 = vld [vmem:[%s6980_s1 + $0x278] sm:$0xff]  ;;  %v112_v50 = vld [vmem:[%s6980_s1 + $0x260] sm:$0xff] }
  0x1b   :  { %3044 = vmatpush1.bf16.msra.mxu1 %v3043_v11  ;;  %2534 = vmatprep.subr.bf16.mxu0 %v2533_v12  ;;  %v2545_v48 = vpack.c.bf16 %v113_v43, %v109_v42  ;;  %v110_v51 = vld [vmem:[%s6980_s1 + $0x250] sm:$0xff]  ;;  %v3057_v52 = vpack.c.bf16 %v115_v45, %v111_v44  ;;  %v117_v54 = vld [vmem:[%s6980_s1 + $0x288] sm:$0xff]  ;;  %v119_v56 = vld [vmem:[%s6980_s1 + $0x298] sm:$0xff]  ;;  %v2547_v58 = vpack.c.bf16 %v112_v50, %v108_v49 }
  0x1c   :  { %3046 = vmatprep.subr.bf16.mxu1 %v3045_v16  ;;  %v114_v53 = vld [vmem:[%s6980_s1 + $0x270] sm:$0xff]  ;;  %v121_v55 = vld [vmem:[%s6980_s1 + $0x2a8] sm:$0xff]  ;;  %v123_v57 = vld [vmem:[%s6980_s1 + $0x2b8] sm:$0xff] }
  0x1d   :  { %v3059_v59 = vpack.c.bf16 %v114_v53, %v110_v51  ;;  %v2549_v60 = vpack.c.bf16 %v121_v55, %v117_v54  ;;  %v116_v61 = vld [vmem:[%s6980_s1 + $0x280] sm:$0xff]  ;;  %v118_v63 = vld [vmem:[%s6980_s1 + $0x290] sm:$0xff]  ;;  %v3061_v0 = vpack.c.bf16 %v123_v57, %v119_v56  ;;  %v125_v2 = vld [vmem:[%s6980_s1 + $0x2c8] sm:$0xff] }
  0x1e   :  { %2536 = vmatpush1.bf16.msra.mxu0 %v2535_v22  ;;  %v120_v62 = vld [vmem:[%s6980_s1 + $0x2a0] sm:$0xff]  ;;  %v122_v1 = vld [vmem:[%s6980_s1 + $0x2b0] sm:$0xff]  ;;  %v129_v3 = vld [vmem:[%s6980_s1 + $0x2e8] sm:$0xff] }
  0x1f   :  { %3048 = vmatpush1.bf16.msra.mxu1 %v3047_v23  ;;  %2538 = vmatprep.subr.bf16.mxu0 %v2537_v24  ;;  %v127_v4 = vld [vmem:[%s6980_s1 + $0x2d8] sm:$0xff]  ;;  %v2551_v6 = vpack.c.bf16 %v120_v62, %v116_v61  ;;  %v124_v7 = vld [vmem:[%s6980_s1 + $0x2c0] sm:$0xff]  ;;  %v3063_v8 = vpack.c.bf16 %v122_v1, %v118_v63  ;;  %v2553_v9 = vpack.c.bf16 %v129_v3, %v125_v2  ;;  %v126_v11 = vld [vmem:[%s6980_s1 + $0x2d0] sm:$0xff] }
  0x20   :  { %3050 = vmatprep.subr.bf16.mxu1 %v3049_v28  ;;  %v131_v5 = vld [vmem:[%s6980_s1 + $0x2f8] sm:$0xff]  ;;  %v128_v10 = vld [vmem:[%s6980_s1 + $0x2e0] sm:$0xff]  ;;  %v130_v12 = vld [vmem:[%s6980_s1 + $0x2f0] sm:$0xff] }
  0x21   :  { %v3065_v13 = vpack.c.bf16 %v131_v5, %v127_v4  ;;  %v133_v14 = vld [vmem:[%s6980_s1 + $0x308] sm:$0xff]  ;;  %v135_v17 = vld [vmem:[%s6980_s1 + $0x318] sm:$0xff]  ;;  %v2555_v19 = vpack.c.bf16 %v128_v10, %v124_v7  ;;  %v3067_v20 = vpack.c.bf16 %v130_v12, %v126_v11  ;;  %v132_v22 = vld [vmem:[%s6980_s1 + $0x300] sm:$0xff] }
  0x22   :  { %2540 = vmatpush1.bf16.msra.mxu0 %v2539_v34  ;;  %v137_v15 = vld [vmem:[%s6980_s1 + $0x328] sm:$0xff]  ;;  %v139_v18 = vld [vmem:[%s6980_s1 + $0x338] sm:$0xff]  ;;  %v136_v23 = vld [vmem:[%s6980_s1 + $0x320] sm:$0xff] }
  0x23   :  { %3052 = vmatpush1.bf16.msra.mxu1 %v3051_v35  ;;  %2542 = vmatprep.subr.bf16.mxu0 %v2541_v36  ;;  %v21_v16 = vld [vmem:[%s6981_s0 + $0x8] sm:$0xff]  ;;  %v2557_v21 = vpack.c.bf16 %v137_v15, %v133_v14  ;;  %v134_v24 = vld [vmem:[%s6980_s1 + $0x310] sm:$0xff]  ;;  %v3069_v25 = vpack.c.bf16 %v139_v18, %v135_v17  ;;  %v143_v29 = vld [vmem:[%s6980_s1 + $0x358] sm:$0xff]  ;;  %v2559_v31 = vpack.c.bf16 %v136_v23, %v132_v22 }
  0x24   :  { %3054 = vmatprep.subr.bf16.mxu1 %v3053_v40  ;;  %1146 = vmatprep.mubr.f32.mxu0 %v21_v16  ;;  %v138_v26 = vld [vmem:[%s6980_s1 + $0x330] sm:$0xff]  ;;  %v141_v27 = vld [vmem:[%s6980_s1 + $0x348] sm:$0xff]  ;;  %v147_v30 = vld [vmem:[%s6980_s1 + $0x378] sm:$0xff] }
  0x25   :  { %1714 = vmatprep.mubr.f32.mxu1 %v21_v16  ;;  %v145_v28 = vld [vmem:[%s6980_s1 + $0x368] sm:$0xff]  ;;  %v3071_v32 = vpack.c.bf16 %v138_v26, %v134_v24  ;;  %v140_v34 = vld [vmem:[%s6980_s1 + $0x340] sm:$0xff]  ;;  %v142_v36 = vld [vmem:[%s6980_s1 + $0x350] sm:$0xff]  ;;  %v3073_v37 = vpack.c.bf16 %v147_v30, %v143_v29 }
  0x26   :  { %2544 = vmatpush1.bf16.msra.mxu0 %v2543_v46  ;;  %v2561_v33 = vpack.c.bf16 %v145_v28, %v141_v27  ;;  %v144_v35 = vld [vmem:[%s6980_s1 + $0x360] sm:$0xff]  ;;  %v146_v38 = vld [vmem:[%s6980_s1 + $0x370] sm:$0xff]  ;;  %v149_v39 = vld [vmem:[%s6980_s1 + $0x388] sm:$0xff] }
  0x27   :  { %3056 = vmatpush1.bf16.msra.mxu1 %v3055_v47  ;;  %2546 = vmatprep.subr.bf16.mxu0 %v2545_v48  ;;  %v153_v40 = vld [vmem:[%s6980_s1 + $0x3a8] sm:$0xff]  ;;  %v151_v41 = vld [vmem:[%s6980_s1 + $0x398] sm:$0xff]  ;;  %v2563_v43 = vpack.c.bf16 %v144_v35, %v140_v34  ;;  %v3075_v44 = vpack.c.bf16 %v146_v38, %v142_v36  ;;  %v148_v46 = vld [vmem:[%s6980_s1 + $0x380] sm:$0xff] }
  0x28   :  { %3058 = vmatprep.subr.bf16.mxu1 %v3057_v52  ;;  %v155_v42 = vld [vmem:[%s6980_s1 + $0x3b8] sm:$0xff]  ;;  %v2565_v45 = vpack.c.bf16 %v153_v40, %v149_v39  ;;  %v152_v47 = vld [vmem:[%s6980_s1 + $0x3a0] sm:$0xff]  ;;  %v150_v48 = vld [vmem:[%s6980_s1 + $0x390] sm:$0xff] }
  0x29   :  { %v3077_v49 = vpack.c.bf16 %v155_v42, %v151_v41  ;;  %v154_v50 = vld [vmem:[%s6980_s1 + $0x3b0] sm:$0xff]  ;;  %v157_v51 = vld [vmem:[%s6980_s1 + $0x3c8] sm:$0xff]  ;;  %v159_v53 = vld [vmem:[%s6980_s1 + $0x3d8] sm:$0xff]  ;;  %v2567_v55 = vpack.c.bf16 %v152_v47, %v148_v46 }
  0x2a   :  { %2548 = vmatpush1.bf16.msra.mxu0 %v2547_v58  ;;  %v161_v52 = vld [vmem:[%s6980_s1 + $0x3e8] sm:$0xff]  ;;  %v163_v54 = vld [vmem:[%s6980_s1 + $0x3f8] sm:$0xff]  ;;  %v3079_v56 = vpack.c.bf16 %v154_v50, %v150_v48  ;;  %v156_v58 = vld [vmem:[%s6980_s1 + $0x3c0] sm:$0xff] }
  0x2b   :  { %3060 = vmatpush1.bf16.msra.mxu1 %v3059_v59  ;;  %2550 = vmatprep.subr.bf16.mxu0 %v2549_v60  ;;  %v2569_v57 = vpack.c.bf16 %v161_v52, %v157_v51  ;;  %v160_v59 = vld [vmem:[%s6980_s1 + $0x3e0] sm:$0xff]  ;;  %v158_v60 = vld [vmem:[%s6980_s1 + $0x3d0] sm:$0xff]  ;;  %v3081_v61 = vpack.c.bf16 %v163_v54, %v159_v53  ;;  %v165_v63 = vld [vmem:[%s6980_s1 + $0x408] sm:$0xff] }
  0x2c   :  { %3062 = vmatprep.subr.bf16.mxu1 %v3061_v0  ;;  %v162_v62 = vld [vmem:[%s6980_s1 + $0x3f0] sm:$0xff]  ;;  %v169_v0 = vld [vmem:[%s6980_s1 + $0x428] sm:$0xff]  ;;  %v167_v1 = vld [vmem:[%s6980_s1 + $0x418] sm:$0xff]  ;;  %v2571_v3 = vpack.c.bf16 %v160_v59, %v156_v58 }
  0x2d   :  { %v171_v2 = vld [vmem:[%s6980_s1 + $0x438] sm:$0xff]  ;;  %v3083_v4 = vpack.c.bf16 %v162_v62, %v158_v60  ;;  %v2573_v5 = vpack.c.bf16 %v169_v0, %v165_v63  ;;  %v168_v7 = vld [vmem:[%s6980_s1 + $0x420] sm:$0xff]  ;;  %v170_v10 = vld [vmem:[%s6980_s1 + $0x430] sm:$0xff] }
  0x2e   :  { %2552 = vmatpush1.bf16.msra.mxu0 %v2551_v6  ;;  %v164_v6 = vld [vmem:[%s6980_s1 + $0x400] sm:$0xff]  ;;  %v173_v11 = vld [vmem:[%s6980_s1 + $0x448] sm:$0xff]  ;;  %v179_v14 = vld [vmem:[%s6980_s1 + $0x478] sm:$0xff] }
  0x2f   :  { %3064 = vmatpush1.bf16.msra.mxu1 %v3063_v8  ;;  %2554 = vmatprep.subr.bf16.mxu0 %v2553_v9  ;;  %v166_v8 = vld [vmem:[%s6980_s1 + $0x410] sm:$0xff]  ;;  %v3085_v9 = vpack.c.bf16 %v171_v2, %v167_v1  ;;  %v177_v12 = vld [vmem:[%s6980_s1 + $0x468] sm:$0xff]  ;;  %v20_v15 = vld [vmem:[%s6981_s0] sm:$0xff]  ;;  %v2575_v16 = vpack.c.bf16 %v168_v7, %v164_v6 }
  0x30   :  { %3066 = vmatprep.subr.bf16.mxu1 %v3065_v13  ;;  %v175_v13 = vld [vmem:[%s6980_s1 + $0x458] sm:$0xff]  ;;  %v3087_v17 = vpack.c.bf16 %v170_v10, %v166_v8  ;;  %v2577_v18 = vpack.c.bf16 %v177_v12, %v173_v11  ;;  %v178_v23 = vld [vmem:[%s6980_s1 + $0x470] sm:$0xff]  ;;  %v181_v24 = vld [vmem:[%s6980_s1 + $0x488] sm:$0xff] }
  0x31   :  { %v3089_v22 = vpack.c.bf16 %v179_v14, %v175_v13  ;;  %v183_v26 = vld [vmem:[%s6980_s1 + $0x498] sm:$0xff]  ;;  %v186_v35 = vld [vmem:[%s6980_s1 + $0x4b0] sm:$0xff]  ;;  %v189_v36 = vld [vmem:[%s6980_s1 + $0x4c8] sm:$0xff] }
  0x32   :  { %2556 = vmatpush1.bf16.msra.mxu0 %v2555_v19  ;;  %v172_v19 = vld [vmem:[%s6980_s1 + $0x440] sm:$0xff]  ;;  %v187_v27 = vld [vmem:[%s6980_s1 + $0x4b8] sm:$0xff]  ;;  %v194_v47 = vld [vmem:[%s6980_s1 + $0x4f0] sm:$0xff] }
  0x33   :  { %3068 = vmatpush1.bf16.msra.mxu1 %v3067_v20  ;;  %2558 = vmatprep.subr.bf16.mxu0 %v2557_v21  ;;  %v176_v20 = vld [vmem:[%s6980_s1 + $0x460] sm:$0xff]  ;;  %v174_v21 = vld [vmem:[%s6980_s1 + $0x450] sm:$0xff]  ;;  %v3093_v34 = vpack.c.bf16 %v187_v27, %v183_v26  ;;  %v191_v38 = vld [vmem:[%s6980_s1 + $0x4d8] sm:$0xff] }
  0x34   :  { %3070 = vmatprep.subr.bf16.mxu1 %v3069_v25  ;;  %v185_v25 = vld [vmem:[%s6980_s1 + $0x4a8] sm:$0xff]  ;;  %v2579_v28 = vpack.c.bf16 %v176_v20, %v172_v19  ;;  %v3091_v29 = vpack.c.bf16 %v178_v23, %v174_v21  ;;  %v195_v39 = vld [vmem:[%s6980_s1 + $0x4f8] sm:$0xff]  ;;  %v202_v59 = vld [vmem:[%s6980_s1 + $0x530] sm:$0xff] }
  0x35   :  { %v2581_v30 = vpack.c.bf16 %v185_v25, %v181_v24  ;;  %v3097_v46 = vpack.c.bf16 %v195_v39, %v191_v38  ;;  %v197_v48 = vld [vmem:[%s6980_s1 + $0x508] sm:$0xff]  ;;  %v199_v50 = vld [vmem:[%s6980_s1 + $0x518] sm:$0xff]  ;;  %v210_v7 = vld [vmem:[%s6980_s1 + $0x570] sm:$0xff] }
  0x36   :  { %2560 = vmatpush1.bf16.msra.mxu0 %v2559_v31  ;;  %v180_v31 = vld [vmem:[%s6980_s1 + $0x480] sm:$0xff]  ;;  %v203_v51 = vld [vmem:[%s6980_s1 + $0x538] sm:$0xff]  ;;  %v205_v60 = vld [vmem:[%s6980_s1 + $0x548] sm:$0xff] }
  0x37   :  { %3072 = vmatpush1.bf16.msra.mxu1 %v3071_v32  ;;  %2562 = vmatprep.subr.bf16.mxu0 %v2561_v33  ;;  %v184_v32 = vld [vmem:[%s6980_s1 + $0x4a0] sm:$0xff]  ;;  %v182_v33 = vld [vmem:[%s6980_s1 + $0x490] sm:$0xff]  ;;  %v3101_v58 = vpack.c.bf16 %v203_v51, %v199_v50  ;;  %v207_v62 = vld [vmem:[%s6980_s1 + $0x558] sm:$0xff] }
  0x38   :  { %3074 = vmatprep.subr.bf16.mxu1 %v3073_v37  ;;  %v193_v37 = vld [vmem:[%s6980_s1 + $0x4e8] sm:$0xff]  ;;  %v2583_v40 = vpack.c.bf16 %v184_v32, %v180_v31  ;;  %v3095_v41 = vpack.c.bf16 %v186_v35, %v182_v33  ;;  %v211_v63 = vld [vmem:[%s6980_s1 + $0x578] sm:$0xff]  ;;  %v212_v13 = vld [vmem:[%s6980_s1 + $0x580] sm:$0xff] }
  0x39   :  { %v2585_v42 = vpack.c.bf16 %v193_v37, %v189_v36  ;;  %v3105_v6 = vpack.c.bf16 %v211_v63, %v207_v62  ;;  %v213_v8 = vld [vmem:[%s6980_s1 + $0x588] sm:$0xff]  ;;  %v215_v10 = vld [vmem:[%s6980_s1 + $0x598] sm:$0xff]  ;;  %v226_v32 = vld [vmem:[%s6980_s1 + $0x5f0] sm:$0xff] }
  0x3a   :  { %2564 = vmatpush1.bf16.msra.mxu0 %v2563_v43  ;;  %v188_v43 = vld [vmem:[%s6980_s1 + $0x4c0] sm:$0xff]  ;;  %v219_v11 = vld [vmem:[%s6980_s1 + $0x5b8] sm:$0xff]  ;;  %v221_v20 = vld [vmem:[%s6980_s1 + $0x5c8] sm:$0xff] }
  0x3b   :  { %3076 = vmatpush1.bf16.msra.mxu1 %v3075_v44  ;;  %2566 = vmatprep.subr.bf16.mxu0 %v2565_v45  ;;  %v192_v44 = vld [vmem:[%s6980_s1 + $0x4e0] sm:$0xff]  ;;  %v190_v45 = vld [vmem:[%s6980_s1 + $0x4d0] sm:$0xff]  ;;  %v3109_v19 = vpack.c.bf16 %v219_v11, %v215_v10  ;;  %v225_v21 = vld [vmem:[%s6980_s1 + $0x5e8] sm:$0xff] }
  0x3c   :  { %3078 = vmatprep.subr.bf16.mxu1 %v3077_v49  ;;  %v201_v49 = vld [vmem:[%s6980_s1 + $0x528] sm:$0xff]  ;;  %v2587_v52 = vpack.c.bf16 %v192_v44, %v188_v43  ;;  %v3099_v53 = vpack.c.bf16 %v194_v47, %v190_v45  ;;  %v223_v23 = vld [vmem:[%s6980_s1 + $0x5d8] sm:$0xff]  ;;  %v2601_v27 = vpack.c.bf16 %v225_v21, %v221_v20  ;;  %v234_v44 = vld [vmem:[%s6980_s1 + $0x630] sm:$0xff] }
  0x3d   :  { %v2589_v54 = vpack.c.bf16 %v201_v49, %v197_v48  ;;  %v227_v24 = vld [vmem:[%s6980_s1 + $0x5f8] sm:$0xff]  ;;  %v229_v33 = vld [vmem:[%s6980_s1 + $0x608] sm:$0xff] }
  0x3e   :  { %2568 = vmatpush1.bf16.msra.mxu0 %v2567_v55  ;;  %v196_v55 = vld [vmem:[%s6980_s1 + $0x500] sm:$0xff]  ;;  %v3113_v31 = vpack.c.bf16 %v227_v24, %v223_v23  ;;  %v231_v35 = vld [vmem:[%s6980_s1 + $0x618] sm:$0xff]  ;;  %v237_v45 = vld [vmem:[%s6980_s1 + $0x648] sm:$0xff] }
  0x3f   :  { %3080 = vmatpush1.bf16.msra.mxu1 %v3079_v56  ;;  %2570 = vmatprep.subr.bf16.mxu0 %v2569_v57  ;;  %v200_v56 = vld [vmem:[%s6980_s1 + $0x520] sm:$0xff]  ;;  %v198_v57 = vld [vmem:[%s6980_s1 + $0x510] sm:$0xff]  ;;  %v235_v36 = vld [vmem:[%s6980_s1 + $0x638] sm:$0xff] }
  0x40   :  { %3082 = vmatprep.subr.bf16.mxu1 %v3081_v61  ;;  %v209_v61 = vld [vmem:[%s6980_s1 + $0x568] sm:$0xff]  ;;  %v2591_v0 = vpack.c.bf16 %v200_v56, %v196_v55  ;;  %v3103_v1 = vpack.c.bf16 %v202_v59, %v198_v57  ;;  %v3117_v43 = vpack.c.bf16 %v235_v36, %v231_v35  ;;  %v239_v47 = vld [vmem:[%s6980_s1 + $0x658] sm:$0xff]  ;;  %v242_v56 = vld [vmem:[%s6980_s1 + $0x670] sm:$0xff] }
  0x41   :  { %v2593_v2 = vpack.c.bf16 %v209_v61, %v205_v60  ;;  %v243_v48 = vld [vmem:[%s6980_s1 + $0x678] sm:$0xff]  ;;  %v245_v57 = vld [vmem:[%s6980_s1 + $0x688] sm:$0xff]  ;;  %v260_v24 = vld [vmem:[%s6980_s1 + $0x700] sm:$0xff] }
  0x42   :  { %2572 = vmatpush1.bf16.msra.mxu0 %v2571_v3  ;;  %v204_v3 = vld [vmem:[%s6980_s1 + $0x540] sm:$0xff]  ;;  %v3121_v55 = vpack.c.bf16 %v243_v48, %v239_v47  ;;  %v247_v59 = vld [vmem:[%s6980_s1 + $0x698] sm:$0xff] }
  0x43   :  { %3084 = vmatpush1.bf16.msra.mxu1 %v3083_v4  ;;  %2574 = vmatprep.subr.bf16.mxu0 %v2573_v5  ;;  %v208_v4 = vld [vmem:[%s6980_s1 + $0x560] sm:$0xff]  ;;  %v206_v5 = vld [vmem:[%s6980_s1 + $0x550] sm:$0xff]  ;;  %v251_v60 = vld [vmem:[%s6980_s1 + $0x6b8] sm:$0xff] }
  0x44   :  { %3086 = vmatprep.subr.bf16.mxu1 %v3085_v9  ;;  %v217_v9 = vld [vmem:[%s6980_s1 + $0x5a8] sm:$0xff]  ;;  %v2595_v12 = vpack.c.bf16 %v208_v4, %v204_v3  ;;  %v3107_v14 = vpack.c.bf16 %v210_v7, %v206_v5  ;;  %v3125_v3 = vpack.c.bf16 %v251_v60, %v247_v59  ;;  %v250_v4 = vld [vmem:[%s6980_s1 + $0x6b0] sm:$0xff]  ;;  %v255_v7 = vld [vmem:[%s6980_s1 + $0x6d8] sm:$0xff] }
  0x45   :  { %1147 = vmatmul.mubr.f32.vlgmr.msra.gmra.mrb[0].mxu0 %v20_v15  ;;  %v253_v5 = vld [vmem:[%s6980_s1 + $0x6c8] sm:$0xff]  ;;  %v267_v20 = vld [vmem:[%s6980_s1 + $0x738] sm:$0xff]  ;;  %v268_v36 = vld [vmem:[%s6980_s1 + $0x740] sm:$0xff] }
  0x46   :  { %2576 = vmatpush1.bf16.msra.mxu0 %v2575_v16  ;;  %1715 = vmatmul.mubr.f32.vlgmr.msra.gmra.mrb[0].mxu1 %v20_v15  ;;  %v2597_v15 = vpack.c.bf16 %v217_v9, %v213_v8  ;;  %v216_v16 = vld [vmem:[%s6980_s1 + $0x5a0] sm:$0xff]  ;;  %v259_v8 = vld [vmem:[%s6980_s1 + $0x6f8] sm:$0xff] }
  0x47   :  { %3088 = vmatpush1.bf16.msra.mxu1 %v3087_v17  ;;  %2578 = vmatprep.subr.bf16.mxu0 %v2577_v18  ;;  %v214_v17 = vld [vmem:[%s6980_s1 + $0x590] sm:$0xff]  ;;  %v2599_v25 = vpack.c.bf16 %v216_v16, %v212_v13  ;;  %v256_v13 = vld [vmem:[%s6980_s1 + $0x6e0] sm:$0xff] }
  0x48   :  { %3090 = vmatprep.subr.bf16.mxu1 %v3089_v22  ;;  %v218_v18 = vld [vmem:[%s6980_s1 + $0x5b0] sm:$0xff]  ;;  %v23_v22 = vld [vmem:[%s6981_s0 + $0x18] sm:$0xff]  ;;  %v276_v48 = vld [vmem:[%s6980_s1 + $0x780] sm:$0xff] }
  0x49   :  { %1217 = vmatprep.mubr.f32.mxu0 %v23_v22  ;;  %1785 = vmatprep.mubr.f32.mxu1 %v23_v22  ;;  %v3111_v26 = vpack.c.bf16 %v218_v18, %v214_v17  ;;  %v258_v16 = vld [vmem:[%s6980_s1 + $0x6f0] sm:$0xff]  ;;  %v261_v17 = vld [vmem:[%s6980_s1 + $0x708] sm:$0xff]  ;;  %v284_v60 = vld [vmem:[%s6980_s1 + $0x7c0] sm:$0xff] }
  0x4a   :  { %2580 = vmatpush1.bf16.msra.mxu0 %v2579_v28  ;;  %v220_v28 = vld [vmem:[%s6980_s1 + $0x5c0] sm:$0xff]  ;;  %v265_v18 = vld [vmem:[%s6980_s1 + $0x728] sm:$0xff] }
  0x4b   :  { %3092 = vmatpush1.bf16.msra.mxu1 %v3091_v29  ;;  %2582 = vmatprep.subr.bf16.mxu0 %v2581_v30  ;;  %v224_v29 = vld [vmem:[%s6980_s1 + $0x5e0] sm:$0xff]  ;;  %v222_v30 = vld [vmem:[%s6980_s1 + $0x5d0] sm:$0xff]  ;;  %v2621_v23 = vpack.c.bf16 %v265_v18, %v261_v17 }
  0x4c   :  { %3094 = vmatprep.subr.bf16.mxu1 %v3093_v34  ;;  %v233_v34 = vld [vmem:[%s6980_s1 + $0x628] sm:$0xff]  ;;  %v2603_v37 = vpack.c.bf16 %v224_v29, %v220_v28  ;;  %v3115_v38 = vpack.c.bf16 %v226_v32, %v222_v30  ;;  %v266_v28 = vld [vmem:[%s6980_s1 + $0x730] sm:$0xff]  ;;  %v275_v32 = vld [vmem:[%s6980_s1 + $0x778] sm:$0xff] }
  0x4d   :  { %v2605_v39 = vpack.c.bf16 %v233_v34, %v229_v33  ;;  %v269_v29 = vld [vmem:[%s6980_s1 + $0x748] sm:$0xff]  ;;  %v22_v17 = vld [vmem:[%s6981_s0 + $0x10] sm:$0xff] }
  0x4e   :  { %2584 = vmatpush1.bf16.msra.mxu0 %v2583_v40  ;;  %v228_v40 = vld [vmem:[%s6980_s1 + $0x600] sm:$0xff]  ;;  %v273_v30 = vld [vmem:[%s6980_s1 + $0x768] sm:$0xff] }
  0x4f   :  { %3096 = vmatpush1.bf16.msra.mxu1 %v3095_v41  ;;  %2586 = vmatprep.subr.bf16.mxu0 %v2585_v42  ;;  %v232_v41 = vld [vmem:[%s6980_s1 + $0x620] sm:$0xff]  ;;  %v230_v42 = vld [vmem:[%s6980_s1 + $0x610] sm:$0xff]  ;;  %v2625_v35 = vpack.c.bf16 %v273_v30, %v269_v29  ;;  %v315_v29 = vld [vmem:[%s6980_s1 + $0x8b8] sm:$0xff] }
  0x50   :  { %3098 = vmatprep.subr.bf16.mxu1 %v3097_v46  ;;  %v241_v46 = vld [vmem:[%s6980_s1 + $0x668] sm:$0xff]  ;;  %v2607_v49 = vpack.c.bf16 %v232_v41, %v228_v40  ;;  %v3119_v50 = vpack.c.bf16 %v234_v44, %v230_v42  ;;  %v274_v40 = vld [vmem:[%s6980_s1 + $0x770] sm:$0xff]  ;;  %v283_v44 = vld [vmem:[%s6980_s1 + $0x7b8] sm:$0xff] }
  0x51   :  { %v2609_v51 = vpack.c.bf16 %v241_v46, %v237_v45  ;;  %v277_v41 = vld [vmem:[%s6980_s1 + $0x788] sm:$0xff] }
  0x52   :  { %2588 = vmatpush1.bf16.msra.mxu0 %v2587_v52  ;;  %v236_v52 = vld [vmem:[%s6980_s1 + $0x640] sm:$0xff]  ;;  %v281_v42 = vld [vmem:[%s6980_s1 + $0x7a8] sm:$0xff] }
  0x53   :  { %3100 = vmatpush1.bf16.msra.mxu1 %v3099_v53  ;;  %2590 = vmatprep.subr.bf16.mxu0 %v2589_v54  ;;  %v240_v53 = vld [vmem:[%s6980_s1 + $0x660] sm:$0xff]  ;;  %v238_v54 = vld [vmem:[%s6980_s1 + $0x650] sm:$0xff]  ;;  %v2629_v47 = vpack.c.bf16 %v281_v42, %v277_v41  ;;  %v25_v30 = vld [vmem:[%s6981_s0 + $0x28] sm:$0xff] }
  0x54   :  { %3102 = vmatprep.subr.bf16.mxu1 %v3101_v58  ;;  %v249_v58 = vld [vmem:[%s6980_s1 + $0x6a8] sm:$0xff]  ;;  %v2611_v61 = vpack.c.bf16 %v240_v53, %v236_v52  ;;  %v3123_v62 = vpack.c.bf16 %v242_v56, %v238_v54  ;;  %v282_v52 = vld [vmem:[%s6980_s1 + $0x7b0] sm:$0xff]  ;;  %v291_v56 = vld [vmem:[%s6980_s1 + $0x7f8] sm:$0xff] }
  0x55   :  { %v2613_v63 = vpack.c.bf16 %v249_v58, %v245_v57  ;;  %v285_v53 = vld [vmem:[%s6980_s1 + $0x7c8] sm:$0xff]  ;;  %v319_v41 = vld [vmem:[%s6980_s1 + $0x8d8] sm:$0xff] }
  0x56   :  { %2592 = vmatpush1.bf16.msra.mxu0 %v2591_v0  ;;  %v244_v0 = vld [vmem:[%s6980_s1 + $0x680] sm:$0xff]  ;;  %v289_v54 = vld [vmem:[%s6980_s1 + $0x7e8] sm:$0xff]  ;;  %v323_v42 = vld [vmem:[%s6980_s1 + $0x8f8] sm:$0xff] }
  0x57   :  { %3104 = vmatpush1.bf16.msra.mxu1 %v3103_v1  ;;  %2594 = vmatprep.subr.bf16.mxu0 %v2593_v2  ;;  %v248_v1 = vld [vmem:[%s6980_s1 + $0x6a0] sm:$0xff]  ;;  %v246_v2 = vld [vmem:[%s6980_s1 + $0x690] sm:$0xff]  ;;  %v2633_v59 = vpack.c.bf16 %v289_v54, %v285_v53  ;;  %v327_v53 = vld [vmem:[%s6980_s1 + $0x918] sm:$0xff] }
  0x58   :  { %3106 = vmatprep.subr.bf16.mxu1 %v3105_v6  ;;  %v257_v6 = vld [vmem:[%s6980_s1 + $0x6e8] sm:$0xff]  ;;  %v2615_v9 = vpack.c.bf16 %v248_v1, %v244_v0  ;;  %v3127_v10 = vpack.c.bf16 %v250_v4, %v246_v2  ;;  %v290_v0 = vld [vmem:[%s6980_s1 + $0x7f0] sm:$0xff]  ;;  %v299_v4 = vld [vmem:[%s6980_s1 + $0x838] sm:$0xff] }
  0x59   :  { %v2617_v11 = vpack.c.bf16 %v257_v6, %v253_v5  ;;  %v293_v1 = vld [vmem:[%s6980_s1 + $0x808] sm:$0xff]  ;;  %v331_v54 = vld [vmem:[%s6980_s1 + $0x938] sm:$0xff] }
  0x5a   :  { %2596 = vmatpush1.bf16.msra.mxu0 %v2595_v12  ;;  %v252_v12 = vld [vmem:[%s6980_s1 + $0x6c0] sm:$0xff]  ;;  %v297_v2 = vld [vmem:[%s6980_s1 + $0x828] sm:$0xff] }
  0x5b   :  { %3108 = vmatpush1.bf16.msra.mxu1 %v3107_v14  ;;  %2598 = vmatprep.subr.bf16.mxu0 %v2597_v15  ;;  %v254_v14 = vld [vmem:[%s6980_s1 + $0x6d0] sm:$0xff]  ;;  %v3129_v15 = vpack.c.bf16 %v259_v8, %v255_v7  ;;  %v2619_v21 = vpack.c.bf16 %v256_v13, %v252_v12  ;;  %v2637_v7 = vpack.c.bf16 %v297_v2, %v293_v1  ;;  %v292_v8 = vld [vmem:[%s6980_s1 + $0x800] sm:$0xff]  ;;  %v301_v13 = vld [vmem:[%s6980_s1 + $0x848] sm:$0xff] }
  0x5c   :  { %3110 = vmatprep.subr.bf16.mxu1 %v3109_v19  ;;  %v263_v19 = vld [vmem:[%s6980_s1 + $0x718] sm:$0xff]  ;;  %v3131_v22 = vpack.c.bf16 %v258_v16, %v254_v14  ;;  %v298_v12 = vld [vmem:[%s6980_s1 + $0x830] sm:$0xff]  ;;  %v305_v14 = vld [vmem:[%s6980_s1 + $0x868] sm:$0xff] }
  0x5d   :  { %v307_v16 = vld [vmem:[%s6980_s1 + $0x878] sm:$0xff] }
  0x5e   :  { %2600 = vmatpush1.bf16.msra.mxu0 %v2599_v25  ;;  %v264_v25 = vld [vmem:[%s6980_s1 + $0x720] sm:$0xff]  ;;  %v335_v1 = vld [vmem:[%s6980_s1 + $0x958] sm:$0xff] }
  0x5f   :  { %3112 = vmatpush1.bf16.msra.mxu1 %v3111_v26  ;;  %2602 = vmatprep.subr.bf16.mxu0 %v2601_v27  ;;  %v262_v26 = vld [vmem:[%s6980_s1 + $0x710] sm:$0xff]  ;;  %v3133_v27 = vpack.c.bf16 %v267_v20, %v263_v19  ;;  %v2623_v33 = vpack.c.bf16 %v264_v25, %v260_v24  ;;  %v2641_v20 = vpack.c.bf16 %v305_v14, %v301_v13  ;;  %v339_v2 = vld [vmem:[%s6980_s1 + $0x978] sm:$0xff] }
  0x60   :  { %3114 = vmatprep.subr.bf16.mxu1 %v3113_v31  ;;  %v271_v31 = vld [vmem:[%s6980_s1 + $0x758] sm:$0xff]  ;;  %v3135_v34 = vpack.c.bf16 %v266_v28, %v262_v26  ;;  %v306_v25 = vld [vmem:[%s6980_s1 + $0x870] sm:$0xff]  ;;  %v309_v26 = vld [vmem:[%s6980_s1 + $0x888] sm:$0xff] }
  0x61   :  { %v311_v28 = vld [vmem:[%s6980_s1 + $0x898] sm:$0xff] }
  0x62   :  { %2604 = vmatpush1.bf16.msra.mxu0 %v2603_v37  ;;  %v272_v37 = vld [vmem:[%s6980_s1 + $0x760] sm:$0xff]  ;;  %v343_v13 = vld [vmem:[%s6980_s1 + $0x998] sm:$0xff] }
  0x63   :  { %3116 = vmatpush1.bf16.msra.mxu1 %v3115_v38  ;;  %2606 = vmatprep.subr.bf16.mxu0 %v2605_v39  ;;  %v270_v38 = vld [vmem:[%s6980_s1 + $0x750] sm:$0xff]  ;;  %v3137_v39 = vpack.c.bf16 %v275_v32, %v271_v31  ;;  %v2627_v45 = vpack.c.bf16 %v272_v37, %v268_v36  ;;  %v3157_v37 = vpack.c.bf16 %v315_v29, %v311_v28  ;;  %v347_v14 = vld [vmem:[%s6980_s1 + $0x9b8] sm:$0xff] }
  0x64   :  { %3118 = vmatprep.subr.bf16.mxu1 %v3117_v43  ;;  %v279_v43 = vld [vmem:[%s6980_s1 + $0x798] sm:$0xff]  ;;  %v3139_v46 = vpack.c.bf16 %v274_v40, %v270_v38  ;;  %v310_v36 = vld [vmem:[%s6980_s1 + $0x890] sm:$0xff]  ;;  %v321_v40 = vld [vmem:[%s6980_s1 + $0x8e8] sm:$0xff] }
  0x65   :  { %v314_v38 = vld [vmem:[%s6980_s1 + $0x8b0] sm:$0xff] }
  0x66   :  { %2608 = vmatpush1.bf16.msra.mxu0 %v2607_v49  ;;  %v280_v49 = vld [vmem:[%s6980_s1 + $0x7a0] sm:$0xff] }
  0x67   :  { %3120 = vmatpush1.bf16.msra.mxu1 %v3119_v50  ;;  %2610 = vmatprep.subr.bf16.mxu0 %v2609_v51  ;;  %v278_v50 = vld [vmem:[%s6980_s1 + $0x790] sm:$0xff]  ;;  %v3141_v51 = vpack.c.bf16 %v283_v44, %v279_v43  ;;  %v2631_v57 = vpack.c.bf16 %v280_v49, %v276_v48  ;;  %v3159_v44 = vpack.c.bf16 %v314_v38, %v310_v36  ;;  %v361_v36 = vld [vmem:[%s6980_s1 + $0xa28] sm:$0xff]  ;;  %v363_v38 = vld [vmem:[%s6980_s1 + $0xa38] sm:$0xff] }
  0x68   :  { %3122 = vmatprep.subr.bf16.mxu1 %v3121_v55  ;;  %v287_v55 = vld [vmem:[%s6980_s1 + $0x7d8] sm:$0xff]  ;;  %v3143_v58 = vpack.c.bf16 %v282_v52, %v278_v50  ;;  %v318_v48 = vld [vmem:[%s6980_s1 + $0x8d0] sm:$0xff]  ;;  %v3161_v49 = vpack.c.bf16 %v323_v42, %v319_v41  ;;  %v329_v52 = vld [vmem:[%s6980_s1 + $0x928] sm:$0xff] }
  0x69   :  { %v322_v50 = vld [vmem:[%s6980_s1 + $0x8f0] sm:$0xff]  ;;  %v356_v42 = vld [vmem:[%s6980_s1 + $0xa00] sm:$0xff] }
  0x6a   :  { %2612 = vmatpush1.bf16.msra.mxu0 %v2611_v61  ;;  %v288_v61 = vld [vmem:[%s6980_s1 + $0x7e0] sm:$0xff] }
  0x6b   :  { %3124 = vmatpush1.bf16.msra.mxu1 %v3123_v62  ;;  %2614 = vmatprep.subr.bf16.mxu0 %v2613_v63  ;;  %v286_v62 = vld [vmem:[%s6980_s1 + $0x7d0] sm:$0xff]  ;;  %v3145_v63 = vpack.c.bf16 %v291_v56, %v287_v55  ;;  %v2635_v5 = vpack.c.bf16 %v288_v61, %v284_v60  ;;  %v3163_v56 = vpack.c.bf16 %v322_v50, %v318_v48  ;;  %v369_v48 = vld [vmem:[%s6980_s1 + $0xa68] sm:$0xff]  ;;  %v371_v50 = vld [vmem:[%s6980_s1 + $0xa78] sm:$0xff] }
  0x6c   :  { %3126 = vmatprep.subr.bf16.mxu1 %v3125_v3  ;;  %v295_v3 = vld [vmem:[%s6980_s1 + $0x818] sm:$0xff]  ;;  %v3147_v6 = vpack.c.bf16 %v290_v0, %v286_v62  ;;  %v326_v60 = vld [vmem:[%s6980_s1 + $0x910] sm:$0xff]  ;;  %v3165_v61 = vpack.c.bf16 %v331_v54, %v327_v53  ;;  %v337_v0 = vld [vmem:[%s6980_s1 + $0x968] sm:$0xff] }
  0x6d   :  { %v330_v62 = vld [vmem:[%s6980_s1 + $0x930] sm:$0xff]  ;;  %v364_v54 = vld [vmem:[%s6980_s1 + $0xa40] sm:$0xff] }
  0x6e   :  { %2616 = vmatpush1.bf16.msra.mxu0 %v2615_v9  ;;  %v296_v9 = vld [vmem:[%s6980_s1 + $0x820] sm:$0xff] }
  0x6f   :  { %3128 = vmatpush1.bf16.msra.mxu1 %v3127_v10  ;;  %2618 = vmatprep.subr.bf16.mxu0 %v2617_v11  ;;  %v294_v10 = vld [vmem:[%s6980_s1 + $0x810] sm:$0xff]  ;;  %v3149_v11 = vpack.c.bf16 %v299_v4, %v295_v3  ;;  %v2639_v18 = vpack.c.bf16 %v296_v9, %v292_v8  ;;  %v3167_v4 = vpack.c.bf16 %v330_v62, %v326_v60  ;;  %v377_v60 = vld [vmem:[%s6980_s1 + $0xaa8] sm:$0xff]  ;;  %v379_v62 = vld [vmem:[%s6980_s1 + $0xab8] sm:$0xff] }
  0x70   :  { %3130 = vmatprep.subr.bf16.mxu1 %v3129_v15  ;;  %v303_v15 = vld [vmem:[%s6980_s1 + $0x858] sm:$0xff]  ;;  %v3151_v19 = vpack.c.bf16 %v298_v12, %v294_v10  ;;  %v334_v8 = vld [vmem:[%s6980_s1 + $0x950] sm:$0xff]  ;;  %v3169_v9 = vpack.c.bf16 %v339_v2, %v335_v1  ;;  %v345_v12 = vld [vmem:[%s6980_s1 + $0x9a8] sm:$0xff] }
  0x71   :  { %v3153_v24 = vpack.c.bf16 %v307_v16, %v303_v15  ;;  %v338_v10 = vld [vmem:[%s6980_s1 + $0x970] sm:$0xff]  ;;  %v372_v2 = vld [vmem:[%s6980_s1 + $0xa80] sm:$0xff] }
  0x72   :  { %2620 = vmatpush1.bf16.msra.mxu0 %v2619_v21  ;;  %v300_v21 = vld [vmem:[%s6980_s1 + $0x840] sm:$0xff]  ;;  %v3171_v16 = vpack.c.bf16 %v338_v10, %v334_v8  ;;  %v385_v8 = vld [vmem:[%s6980_s1 + $0xae8] sm:$0xff]  ;;  %v387_v10 = vld [vmem:[%s6980_s1 + $0xaf8] sm:$0xff] }
  0x73   :  { %3132 = vmatpush1.bf16.msra.mxu1 %v3131_v22  ;;  %2622 = vmatprep.subr.bf16.mxu0 %v2621_v23  ;;  %v304_v22 = vld [vmem:[%s6980_s1 + $0x860] sm:$0xff]  ;;  %v302_v23 = vld [vmem:[%s6980_s1 + $0x850] sm:$0xff] }
  0x74   :  { %3134 = vmatprep.subr.bf16.mxu1 %v3133_v27  ;;  %v313_v27 = vld [vmem:[%s6980_s1 + $0x8a8] sm:$0xff]  ;;  %v2643_v31 = vpack.c.bf16 %v304_v22, %v300_v21  ;;  %v3155_v32 = vpack.c.bf16 %v306_v25, %v302_v23  ;;  %v3173_v21 = vpack.c.bf16 %v347_v14, %v343_v13  ;;  %v346_v22 = vld [vmem:[%s6980_s1 + $0x9b0] sm:$0xff]  ;;  %v351_v25 = vld [vmem:[%s6980_s1 + $0x9d8] sm:$0xff] }
  0x75   :  { %v349_v23 = vld [vmem:[%s6980_s1 + $0x9c8] sm:$0xff]  ;;  %v380_v14 = vld [vmem:[%s6980_s1 + $0xac0] sm:$0xff] }
  0x76   :  { %2624 = vmatpush1.bf16.msra.mxu0 %v2623_v33  ;;  %v2645_v33 = vpack.c.bf16 %v313_v27, %v309_v26  ;;  %v355_v26 = vld [vmem:[%s6980_s1 + $0x9f8] sm:$0xff] }
  0x77   :  { %3136 = vmatpush1.bf16.msra.mxu1 %v3135_v34  ;;  %2626 = vmatprep.subr.bf16.mxu0 %v2625_v35  ;;  %v308_v34 = vld [vmem:[%s6980_s1 + $0x880] sm:$0xff] }
  0x78   :  { %3138 = vmatprep.subr.bf16.mxu1 %v3137_v39  ;;  %v312_v35 = vld [vmem:[%s6980_s1 + $0x8a0] sm:$0xff]  ;;  %v317_v39 = vld [vmem:[%s6980_s1 + $0x8c8] sm:$0xff] }
  0x79   :  { %v2647_v43 = vpack.c.bf16 %v312_v35, %v308_v34  ;;  %v354_v34 = vld [vmem:[%s6980_s1 + $0x9f0] sm:$0xff]  ;;  %v357_v35 = vld [vmem:[%s6980_s1 + $0xa08] sm:$0xff] }
  0x7a   :  { %2628 = vmatpush1.bf16.msra.mxu0 %v2627_v45  ;;  %v2649_v45 = vpack.c.bf16 %v321_v40, %v317_v39  ;;  %v2669_v41 = vpack.c.bf16 %v361_v36, %v357_v35 }
  0x7b   :  { %3140 = vmatpush1.bf16.msra.mxu1 %v3139_v46  ;;  %2630 = vmatprep.subr.bf16.mxu0 %v2629_v47  ;;  %v316_v46 = vld [vmem:[%s6980_s1 + $0x8c0] sm:$0xff] }
  0x7c   :  { %3142 = vmatprep.subr.bf16.mxu1 %v3141_v51  ;;  %v320_v47 = vld [vmem:[%s6980_s1 + $0x8e0] sm:$0xff]  ;;  %v325_v51 = vld [vmem:[%s6980_s1 + $0x908] sm:$0xff] }
  0x7d   :  { %v2651_v55 = vpack.c.bf16 %v320_v47, %v316_v46  ;;  %v362_v46 = vld [vmem:[%s6980_s1 + $0xa30] sm:$0xff]  ;;  %v365_v47 = vld [vmem:[%s6980_s1 + $0xa48] sm:$0xff] }
  0x7e   :  { %2632 = vmatpush1.bf16.msra.mxu0 %v2631_v57  ;;  %v2653_v57 = vpack.c.bf16 %v329_v52, %v325_v51  ;;  %v2673_v53 = vpack.c.bf16 %v369_v48, %v365_v47 }
  0x7f   :  { %3144 = vmatpush1.bf16.msra.mxu1 %v3143_v58  ;;  %2634 = vmatprep.subr.bf16.mxu0 %v2633_v59  ;;  %v324_v58 = vld [vmem:[%s6980_s1 + $0x900] sm:$0xff] }
  0x80   :  { %3146 = vmatprep.subr.bf16.mxu1 %v3145_v63  ;;  %v328_v59 = vld [vmem:[%s6980_s1 + $0x920] sm:$0xff]  ;;  %v333_v63 = vld [vmem:[%s6980_s1 + $0x948] sm:$0xff] }
  0x81   :  { %v2655_v3 = vpack.c.bf16 %v328_v59, %v324_v58  ;;  %v370_v58 = vld [vmem:[%s6980_s1 + $0xa70] sm:$0xff]  ;;  %v373_v59 = vld [vmem:[%s6980_s1 + $0xa88] sm:$0xff] }
  0x82   :  { %2636 = vmatpush1.bf16.msra.mxu0 %v2635_v5  ;;  %v2657_v5 = vpack.c.bf16 %v337_v0, %v333_v63  ;;  %v2677_v1 = vpack.c.bf16 %v377_v60, %v373_v59 }
  0x83   :  { %3148 = vmatpush1.bf16.msra.mxu1 %v3147_v6  ;;  %2638 = vmatprep.subr.bf16.mxu0 %v2637_v7  ;;  %v332_v6 = vld [vmem:[%s6980_s1 + $0x940] sm:$0xff] }
  0x84   :  { %3150 = vmatprep.subr.bf16.mxu1 %v3149_v11  ;;  %v336_v7 = vld [vmem:[%s6980_s1 + $0x960] sm:$0xff]  ;;  %v341_v11 = vld [vmem:[%s6980_s1 + $0x988] sm:$0xff] }
  0x85   :  { %1218 = vmatmul.mubr.f32.vlgmr.msra.gmra.mrb[0].mxu0 %v22_v17  ;;  %v2659_v15 = vpack.c.bf16 %v336_v7, %v332_v6  ;;  %v378_v6 = vld [vmem:[%s6980_s1 + $0xab0] sm:$0xff]  ;;  %v381_v7 = vld [vmem:[%s6980_s1 + $0xac8] sm:$0xff] }
  0x86   :  { %2640 = vmatpush1.bf16.msra.mxu0 %v2639_v18  ;;  %1786 = vmatmul.mubr.f32.vlgmr.msra.gmra.mrb[0].mxu1 %v22_v17  ;;  %v2661_v17 = vpack.c.bf16 %v345_v12, %v341_v11  ;;  %v340_v18 = vld [vmem:[%s6980_s1 + $0x980] sm:$0xff]  ;;  %v2681_v13 = vpack.c.bf16 %v385_v8, %v381_v7 }
  0x87   :  { %3152 = vmatpush1.bf16.msra.mxu1 %v3151_v19  ;;  %2642 = vmatprep.subr.bf16.mxu0 %v2641_v20  ;;  %v344_v19 = vld [vmem:[%s6980_s1 + $0x9a0] sm:$0xff]  ;;  %v342_v20 = vld [vmem:[%s6980_s1 + $0x990] sm:$0xff] }
  0x88   :  { %3154 = vmatprep.subr.bf16.mxu1 %v3153_v24  ;;  %1288 = vmatprep.mubr.f32.mxu0 %v25_v30  ;;  %v353_v24 = vld [vmem:[%s6980_s1 + $0x9e8] sm:$0xff]  ;;  %v2663_v27 = vpack.c.bf16 %v344_v19, %v340_v18  ;;  %v3175_v28 = vpack.c.bf16 %v346_v22, %v342_v20  ;;  %v386_v18 = vld [vmem:[%s6980_s1 + $0xaf0] sm:$0xff]  ;;  %v395_v22 = vld [vmem:[%s6980_s1 + $0xb38] sm:$0xff] }
  0x89   :  { %1856 = vmatprep.mubr.f32.mxu1 %v25_v30  ;;  %v2665_v29 = vpack.c.bf16 %v353_v24, %v349_v23  ;;  %v348_v30 = vld [vmem:[%s6980_s1 + $0x9c0] sm:$0xff]  ;;  %v389_v19 = vld [vmem:[%s6980_s1 + $0xb08] sm:$0xff] }
  0x8a   :  { %2644 = vmatpush1.bf16.msra.mxu0 %v2643_v31  ;;  %v352_v31 = vld [vmem:[%s6980_s1 + $0x9e0] sm:$0xff]  ;;  %v393_v20 = vld [vmem:[%s6980_s1 + $0xb28] sm:$0xff] }
  0x8b   :  { %3156 = vmatpush1.bf16.msra.mxu1 %v3155_v32  ;;  %2646 = vmatprep.subr.bf16.mxu0 %v2645_v33  ;;  %v350_v32 = vld [vmem:[%s6980_s1 + $0x9d0] sm:$0xff]  ;;  %v3177_v33 = vpack.c.bf16 %v355_v26, %v351_v25  ;;  %v2667_v39 = vpack.c.bf16 %v352_v31, %v348_v30  ;;  %v2685_v25 = vpack.c.bf16 %v393_v20, %v389_v19  ;;  %v388_v26 = vld [vmem:[%s6980_s1 + $0xb00] sm:$0xff]  ;;  %v397_v31 = vld [vmem:[%s6980_s1 + $0xb48] sm:$0xff] }
  0x8c   :  { %3158 = vmatprep.subr.bf16.mxu1 %v3157_v37  ;;  %v359_v37 = vld [vmem:[%s6980_s1 + $0xa18] sm:$0xff]  ;;  %v3179_v40 = vpack.c.bf16 %v354_v34, %v350_v32  ;;  %v394_v30 = vld [vmem:[%s6980_s1 + $0xb30] sm:$0xff]  ;;  %v401_v32 = vld [vmem:[%s6980_s1 + $0xb68] sm:$0xff] }
  0x8d   :  { %v403_v34 = vld [vmem:[%s6980_s1 + $0xb78] sm:$0xff]  ;;  %v24_v19 = vld [vmem:[%s6981_s0 + $0x20] sm:$0xff] }
  0x8e   :  { %2648 = vmatpush1.bf16.msra.mxu0 %v2647_v43  ;;  %v360_v43 = vld [vmem:[%s6980_s1 + $0xa20] sm:$0xff] }
  0x8f   :  { %3160 = vmatpush1.bf16.msra.mxu1 %v3159_v44  ;;  %2650 = vmatprep.subr.bf16.mxu0 %v2649_v45  ;;  %v358_v44 = vld [vmem:[%s6980_s1 + $0xa10] sm:$0xff]  ;;  %v3181_v45 = vpack.c.bf16 %v363_v38, %v359_v37  ;;  %v2671_v51 = vpack.c.bf16 %v360_v43, %v356_v42  ;;  %v2689_v37 = vpack.c.bf16 %v401_v32, %v397_v31  ;;  %v396_v38 = vld [vmem:[%s6980_s1 + $0xb40] sm:$0xff]  ;;  %v405_v43 = vld [vmem:[%s6980_s1 + $0xb88] sm:$0xff] }
  0x90   :  { %3162 = vmatprep.subr.bf16.mxu1 %v3161_v49  ;;  %v367_v49 = vld [vmem:[%s6980_s1 + $0xa58] sm:$0xff]  ;;  %v3183_v52 = vpack.c.bf16 %v362_v46, %v358_v44  ;;  %v402_v42 = vld [vmem:[%s6980_s1 + $0xb70] sm:$0xff]  ;;  %v409_v44 = vld [vmem:[%s6980_s1 + $0xba8] sm:$0xff] }
  0x91   :  { %v411_v46 = vld [vmem:[%s6980_s1 + $0xbb8] sm:$0xff] }
  0x92   :  { %2652 = vmatpush1.bf16.msra.mxu0 %v2651_v55  ;;  %v368_v55 = vld [vmem:[%s6980_s1 + $0xa60] sm:$0xff]  ;;  %v443_v31 = vld [vmem:[%s6980_s1 + $0xcb8] sm:$0xff] }
  0x93   :  { %3164 = vmatpush1.bf16.msra.mxu1 %v3163_v56  ;;  %2654 = vmatprep.subr.bf16.mxu0 %v2653_v57  ;;  %v366_v56 = vld [vmem:[%s6980_s1 + $0xa50] sm:$0xff]  ;;  %v3185_v57 = vpack.c.bf16 %v371_v50, %v367_v49  ;;  %v2675_v63 = vpack.c.bf16 %v368_v55, %v364_v54  ;;  %v2693_v49 = vpack.c.bf16 %v409_v44, %v405_v43  ;;  %v404_v50 = vld [vmem:[%s6980_s1 + $0xb80] sm:$0xff]  ;;  %v413_v55 = vld [vmem:[%s6980_s1 + $0xbc8] sm:$0xff] }
  0x94   :  { %3166 = vmatprep.subr.bf16.mxu1 %v3165_v61  ;;  %v375_v61 = vld [vmem:[%s6980_s1 + $0xa98] sm:$0xff]  ;;  %v3187_v0 = vpack.c.bf16 %v370_v58, %v366_v56  ;;  %v410_v54 = vld [vmem:[%s6980_s1 + $0xbb0] sm:$0xff]  ;;  %v417_v56 = vld [vmem:[%s6980_s1 + $0xbe8] sm:$0xff] }
  0x95   :  { %v419_v58 = vld [vmem:[%s6980_s1 + $0xbf8] sm:$0xff] }
  0x96   :  { %2656 = vmatpush1.bf16.msra.mxu0 %v2655_v3  ;;  %v376_v3 = vld [vmem:[%s6980_s1 + $0xaa0] sm:$0xff]  ;;  %v27_v32 = vld [vmem:[%s6981_s0 + $0x38] sm:$0xff] }
  0x97   :  { %3168 = vmatpush1.bf16.msra.mxu1 %v3167_v4  ;;  %2658 = vmatprep.subr.bf16.mxu0 %v2657_v5  ;;  %v374_v4 = vld [vmem:[%s6980_s1 + $0xa90] sm:$0xff]  ;;  %v3189_v5 = vpack.c.bf16 %v379_v62, %v375_v61  ;;  %v2679_v11 = vpack.c.bf16 %v376_v3, %v372_v2  ;;  %v2697_v61 = vpack.c.bf16 %v417_v56, %v413_v55  ;;  %v412_v62 = vld [vmem:[%s6980_s1 + $0xbc0] sm:$0xff]  ;;  %v421_v3 = vld [vmem:[%s6980_s1 + $0xc08] sm:$0xff] }
  0x98   :  { %3170 = vmatprep.subr.bf16.mxu1 %v3169_v9  ;;  %v383_v9 = vld [vmem:[%s6980_s1 + $0xad8] sm:$0xff]  ;;  %v3191_v12 = vpack.c.bf16 %v378_v6, %v374_v4  ;;  %v418_v2 = vld [vmem:[%s6980_s1 + $0xbf0] sm:$0xff]  ;;  %v425_v4 = vld [vmem:[%s6980_s1 + $0xc28] sm:$0xff] }
  0x99   :  { %v427_v6 = vld [vmem:[%s6980_s1 + $0xc38] sm:$0xff] }
  0x9a   :  { %2660 = vmatpush1.bf16.msra.mxu0 %v2659_v15  ;;  %v384_v15 = vld [vmem:[%s6980_s1 + $0xae0] sm:$0xff]  ;;  %v447_v43 = vld [vmem:[%s6980_s1 + $0xcd8] sm:$0xff] }
  0x9b   :  { %3172 = vmatpush1.bf16.msra.mxu1 %v3171_v16  ;;  %2662 = vmatprep.subr.bf16.mxu0 %v2661_v17  ;;  %v382_v16 = vld [vmem:[%s6980_s1 + $0xad0] sm:$0xff]  ;;  %v3193_v17 = vpack.c.bf16 %v387_v10, %v383_v9  ;;  %v2683_v23 = vpack.c.bf16 %v384_v15, %v380_v14  ;;  %v2701_v9 = vpack.c.bf16 %v425_v4, %v421_v3  ;;  %v420_v10 = vld [vmem:[%s6980_s1 + $0xc00] sm:$0xff]  ;;  %v429_v15 = vld [vmem:[%s6980_s1 + $0xc48] sm:$0xff] }
  0x9c   :  { %3174 = vmatprep.subr.bf16.mxu1 %v3173_v21  ;;  %v391_v21 = vld [vmem:[%s6980_s1 + $0xb18] sm:$0xff]  ;;  %v3195_v24 = vpack.c.bf16 %v386_v18, %v382_v16  ;;  %v426_v14 = vld [vmem:[%s6980_s1 + $0xc30] sm:$0xff]  ;;  %v433_v16 = vld [vmem:[%s6980_s1 + $0xc68] sm:$0xff] }
  0x9d   :  { %v435_v18 = vld [vmem:[%s6980_s1 + $0xc78] sm:$0xff] }
  0x9e   :  { %2664 = vmatpush1.bf16.msra.mxu0 %v2663_v27  ;;  %v392_v27 = vld [vmem:[%s6980_s1 + $0xb20] sm:$0xff]  ;;  %v451_v44 = vld [vmem:[%s6980_s1 + $0xcf8] sm:$0xff] }
  0x9f   :  { %3176 = vmatpush1.bf16.msra.mxu1 %v3175_v28  ;;  %2666 = vmatprep.subr.bf16.mxu0 %v2665_v29  ;;  %v390_v28 = vld [vmem:[%s6980_s1 + $0xb10] sm:$0xff]  ;;  %v3197_v29 = vpack.c.bf16 %v395_v22, %v391_v21  ;;  %v2687_v35 = vpack.c.bf16 %v392_v27, %v388_v26  ;;  %v2705_v22 = vpack.c.bf16 %v433_v16, %v429_v15  ;;  %v455_v55 = vld [vmem:[%s6980_s1 + $0xd18] sm:$0xff] }
  0xa0   :  { %3178 = vmatprep.subr.bf16.mxu1 %v3177_v33  ;;  %v399_v33 = vld [vmem:[%s6980_s1 + $0xb58] sm:$0xff]  ;;  %v3199_v36 = vpack.c.bf16 %v394_v30, %v390_v28  ;;  %v434_v27 = vld [vmem:[%s6980_s1 + $0xc70] sm:$0xff]  ;;  %v437_v28 = vld [vmem:[%s6980_s1 + $0xc88] sm:$0xff] }
  0xa1   :  { %v439_v30 = vld [vmem:[%s6980_s1 + $0xc98] sm:$0xff] }
  0xa2   :  { %2668 = vmatpush1.bf16.msra.mxu0 %v2667_v39  ;;  %v400_v39 = vld [vmem:[%s6980_s1 + $0xb60] sm:$0xff]  ;;  %v459_v56 = vld [vmem:[%s6980_s1 + $0xd38] sm:$0xff] }
  0xa3   :  { %3180 = vmatpush1.bf16.msra.mxu1 %v3179_v40  ;;  %2670 = vmatprep.subr.bf16.mxu0 %v2669_v41  ;;  %v398_v40 = vld [vmem:[%s6980_s1 + $0xb50] sm:$0xff]  ;;  %v3201_v41 = vpack.c.bf16 %v403_v34, %v399_v33  ;;  %v2691_v47 = vpack.c.bf16 %v400_v39, %v396_v38  ;;  %v3221_v39 = vpack.c.bf16 %v443_v31, %v439_v30  ;;  %v463_v3 = vld [vmem:[%s6980_s1 + $0xd58] sm:$0xff] }
  0xa4   :  { %3182 = vmatprep.subr.bf16.mxu1 %v3181_v45  ;;  %v407_v45 = vld [vmem:[%s6980_s1 + $0xb98] sm:$0xff]  ;;  %v3203_v48 = vpack.c.bf16 %v402_v42, %v398_v40  ;;  %v438_v38 = vld [vmem:[%s6980_s1 + $0xc90] sm:$0xff]  ;;  %v449_v42 = vld [vmem:[%s6980_s1 + $0xce8] sm:$0xff] }
  0xa5   :  { %v442_v40 = vld [vmem:[%s6980_s1 + $0xcb0] sm:$0xff]  ;;  %v467_v4 = vld [vmem:[%s6980_s1 + $0xd78] sm:$0xff] }
  0xa6   :  { %2672 = vmatpush1.bf16.msra.mxu0 %v2671_v51  ;;  %v408_v51 = vld [vmem:[%s6980_s1 + $0xba0] sm:$0xff]  ;;  %v471_v15 = vld [vmem:[%s6980_s1 + $0xd98] sm:$0xff] }
  0xa7   :  { %3184 = vmatpush1.bf16.msra.mxu1 %v3183_v52  ;;  %2674 = vmatprep.subr.bf16.mxu0 %v2673_v53  ;;  %v406_v52 = vld [vmem:[%s6980_s1 + $0xb90] sm:$0xff]  ;;  %v3205_v53 = vpack.c.bf16 %v411_v46, %v407_v45  ;;  %v2695_v59 = vpack.c.bf16 %v408_v51, %v404_v50  ;;  %v3223_v46 = vpack.c.bf16 %v442_v40, %v438_v38  ;;  %v475_v16 = vld [vmem:[%s6980_s1 + $0xdb8] sm:$0xff]  ;;  %v489_v38 = vld [vmem:[%s6980_s1 + $0xe28] sm:$0xff] }
  0xa8   :  { %3186 = vmatprep.subr.bf16.mxu1 %v3185_v57  ;;  %v415_v57 = vld [vmem:[%s6980_s1 + $0xbd8] sm:$0xff]  ;;  %v3207_v60 = vpack.c.bf16 %v410_v54, %v406_v52  ;;  %v446_v50 = vld [vmem:[%s6980_s1 + $0xcd0] sm:$0xff]  ;;  %v3225_v51 = vpack.c.bf16 %v451_v44, %v447_v43  ;;  %v457_v54 = vld [vmem:[%s6980_s1 + $0xd28] sm:$0xff] }
  0xa9   :  { %v450_v52 = vld [vmem:[%s6980_s1 + $0xcf0] sm:$0xff]  ;;  %v491_v40 = vld [vmem:[%s6980_s1 + $0xe38] sm:$0xff]  ;;  %v484_v44 = vld [vmem:[%s6980_s1 + $0xe00] sm:$0xff] }
  0xaa   :  { %2676 = vmatpush1.bf16.msra.mxu0 %v2675_v63  ;;  %v416_v63 = vld [vmem:[%s6980_s1 + $0xbe0] sm:$0xff] }
  0xab   :  { %3188 = vmatpush1.bf16.msra.mxu1 %v3187_v0  ;;  %2678 = vmatprep.subr.bf16.mxu0 %v2677_v1  ;;  %v414_v0 = vld [vmem:[%s6980_s1 + $0xbd0] sm:$0xff]  ;;  %v3209_v1 = vpack.c.bf16 %v419_v58, %v415_v57  ;;  %v2699_v7 = vpack.c.bf16 %v416_v63, %v412_v62  ;;  %v3227_v58 = vpack.c.bf16 %v450_v52, %v446_v50  ;;  %v497_v50 = vld [vmem:[%s6980_s1 + $0xe68] sm:$0xff]  ;;  %v499_v52 = vld [vmem:[%s6980_s1 + $0xe78] sm:$0xff] }
  0xac   :  { %3190 = vmatprep.subr.bf16.mxu1 %v3189_v5  ;;  %v423_v5 = vld [vmem:[%s6980_s1 + $0xc18] sm:$0xff]  ;;  %v3211_v8 = vpack.c.bf16 %v418_v2, %v414_v0  ;;  %v454_v62 = vld [vmem:[%s6980_s1 + $0xd10] sm:$0xff]  ;;  %v3229_v63 = vpack.c.bf16 %v459_v56, %v455_v55  ;;  %v465_v2 = vld [vmem:[%s6980_s1 + $0xd68] sm:$0xff] }
  0xad   :  { %v458_v0 = vld [vmem:[%s6980_s1 + $0xd30] sm:$0xff]  ;;  %v492_v56 = vld [vmem:[%s6980_s1 + $0xe40] sm:$0xff] }
  0xae   :  { %2680 = vmatpush1.bf16.msra.mxu0 %v2679_v11  ;;  %v424_v11 = vld [vmem:[%s6980_s1 + $0xc20] sm:$0xff] }
  0xaf   :  { %3192 = vmatpush1.bf16.msra.mxu1 %v3191_v12  ;;  %2682 = vmatprep.subr.bf16.mxu0 %v2681_v13  ;;  %v422_v12 = vld [vmem:[%s6980_s1 + $0xc10] sm:$0xff]  ;;  %v3213_v13 = vpack.c.bf16 %v427_v6, %v423_v5  ;;  %v2703_v20 = vpack.c.bf16 %v424_v11, %v420_v10  ;;  %v3231_v6 = vpack.c.bf16 %v458_v0, %v454_v62  ;;  %v505_v62 = vld [vmem:[%s6980_s1 + $0xea8] sm:$0xff]  ;;  %v507_v0 = vld [vmem:[%s6980_s1 + $0xeb8] sm:$0xff] }
  0xb0   :  { %3194 = vmatprep.subr.bf16.mxu1 %v3193_v17  ;;  %v431_v17 = vld [vmem:[%s6980_s1 + $0xc58] sm:$0xff]  ;;  %v3215_v21 = vpack.c.bf16 %v426_v14, %v422_v12  ;;  %v462_v10 = vld [vmem:[%s6980_s1 + $0xd50] sm:$0xff]  ;;  %v3233_v11 = vpack.c.bf16 %v467_v4, %v463_v3  ;;  %v473_v14 = vld [vmem:[%s6980_s1 + $0xda8] sm:$0xff] }
  0xb1   :  { %v3217_v26 = vpack.c.bf16 %v435_v18, %v431_v17  ;;  %v466_v12 = vld [vmem:[%s6980_s1 + $0xd70] sm:$0xff]  ;;  %v500_v4 = vld [vmem:[%s6980_s1 + $0xe80] sm:$0xff] }
  0xb2   :  { %2684 = vmatpush1.bf16.msra.mxu0 %v2683_v23  ;;  %v428_v23 = vld [vmem:[%s6980_s1 + $0xc40] sm:$0xff]  ;;  %v3235_v18 = vpack.c.bf16 %v466_v12, %v462_v10  ;;  %v513_v10 = vld [vmem:[%s6980_s1 + $0xee8] sm:$0xff]  ;;  %v515_v12 = vld [vmem:[%s6980_s1 + $0xef8] sm:$0xff] }
  0xb3   :  { %3196 = vmatpush1.bf16.msra.mxu1 %v3195_v24  ;;  %2686 = vmatprep.subr.bf16.mxu0 %v2685_v25  ;;  %v432_v24 = vld [vmem:[%s6980_s1 + $0xc60] sm:$0xff]  ;;  %v430_v25 = vld [vmem:[%s6980_s1 + $0xc50] sm:$0xff] }
  0xb4   :  { %3198 = vmatprep.subr.bf16.mxu1 %v3197_v29  ;;  %v441_v29 = vld [vmem:[%s6980_s1 + $0xca8] sm:$0xff]  ;;  %v2707_v33 = vpack.c.bf16 %v432_v24, %v428_v23  ;;  %v3219_v34 = vpack.c.bf16 %v434_v27, %v430_v25  ;;  %v3237_v23 = vpack.c.bf16 %v475_v16, %v471_v15  ;;  %v474_v24 = vld [vmem:[%s6980_s1 + $0xdb0] sm:$0xff]  ;;  %v479_v27 = vld [vmem:[%s6980_s1 + $0xdd8] sm:$0xff] }
  0xb5   :  { %v477_v25 = vld [vmem:[%s6980_s1 + $0xdc8] sm:$0xff]  ;;  %v508_v16 = vld [vmem:[%s6980_s1 + $0xec0] sm:$0xff] }
  0xb6   :  { %2688 = vmatpush1.bf16.msra.mxu0 %v2687_v35  ;;  %v2709_v35 = vpack.c.bf16 %v441_v29, %v437_v28  ;;  %v483_v28 = vld [vmem:[%s6980_s1 + $0xdf8] sm:$0xff] }
  0xb7   :  { %3200 = vmatpush1.bf16.msra.mxu1 %v3199_v36  ;;  %2690 = vmatprep.subr.bf16.mxu0 %v2689_v37  ;;  %v436_v36 = vld [vmem:[%s6980_s1 + $0xc80] sm:$0xff] }
  0xb8   :  { %3202 = vmatprep.subr.bf16.mxu1 %v3201_v41  ;;  %v440_v37 = vld [vmem:[%s6980_s1 + $0xca0] sm:$0xff]  ;;  %v445_v41 = vld [vmem:[%s6980_s1 + $0xcc8] sm:$0xff] }
  0xb9   :  { %v2711_v45 = vpack.c.bf16 %v440_v37, %v436_v36  ;;  %v482_v36 = vld [vmem:[%s6980_s1 + $0xdf0] sm:$0xff]  ;;  %v485_v37 = vld [vmem:[%s6980_s1 + $0xe08] sm:$0xff] }
  0xba   :  { %2692 = vmatpush1.bf16.msra.mxu0 %v2691_v47  ;;  %v2713_v47 = vpack.c.bf16 %v449_v42, %v445_v41  ;;  %v2733_v43 = vpack.c.bf16 %v489_v38, %v485_v37 }
  0xbb   :  { %3204 = vmatpush1.bf16.msra.mxu1 %v3203_v48  ;;  %2694 = vmatprep.subr.bf16.mxu0 %v2693_v49  ;;  %v444_v48 = vld [vmem:[%s6980_s1 + $0xcc0] sm:$0xff] }
  0xbc   :  { %3206 = vmatprep.subr.bf16.mxu1 %v3205_v53  ;;  %v448_v49 = vld [vmem:[%s6980_s1 + $0xce0] sm:$0xff]  ;;  %v453_v53 = vld [vmem:[%s6980_s1 + $0xd08] sm:$0xff] }
  0xbd   :  { %v2715_v57 = vpack.c.bf16 %v448_v49, %v444_v48  ;;  %v490_v48 = vld [vmem:[%s6980_s1 + $0xe30] sm:$0xff]  ;;  %v493_v49 = vld [vmem:[%s6980_s1 + $0xe48] sm:$0xff] }
  0xbe   :  { %2696 = vmatpush1.bf16.msra.mxu0 %v2695_v59  ;;  %v2717_v59 = vpack.c.bf16 %v457_v54, %v453_v53  ;;  %v2737_v55 = vpack.c.bf16 %v497_v50, %v493_v49 }
  0xbf   :  { %3208 = vmatpush1.bf16.msra.mxu1 %v3207_v60  ;;  %2698 = vmatprep.subr.bf16.mxu0 %v2697_v61  ;;  %v452_v60 = vld [vmem:[%s6980_s1 + $0xd00] sm:$0xff] }
  0xc0   :  { %3210 = vmatprep.subr.bf16.mxu1 %v3209_v1  ;;  %v456_v61 = vld [vmem:[%s6980_s1 + $0xd20] sm:$0xff]  ;;  %v461_v1 = vld [vmem:[%s6980_s1 + $0xd48] sm:$0xff] }
  0xc1   :  { %v2719_v5 = vpack.c.bf16 %v456_v61, %v452_v60  ;;  %v498_v60 = vld [vmem:[%s6980_s1 + $0xe70] sm:$0xff]  ;;  %v501_v61 = vld [vmem:[%s6980_s1 + $0xe88] sm:$0xff] }
  0xc2   :  { %2700 = vmatpush1.bf16.msra.mxu0 %v2699_v7  ;;  %v2721_v7 = vpack.c.bf16 %v465_v2, %v461_v1  ;;  %v2741_v3 = vpack.c.bf16 %v505_v62, %v501_v61 }
  0xc3   :  { %3212 = vmatpush1.bf16.msra.mxu1 %v3211_v8  ;;  %2702 = vmatprep.subr.bf16.mxu0 %v2701_v9  ;;  %v460_v8 = vld [vmem:[%s6980_s1 + $0xd40] sm:$0xff] }
  0xc4   :  { %3214 = vmatprep.subr.bf16.mxu1 %v3213_v13  ;;  %v464_v9 = vld [vmem:[%s6980_s1 + $0xd60] sm:$0xff]  ;;  %v469_v13 = vld [vmem:[%s6980_s1 + $0xd88] sm:$0xff] }
  0xc5   :  { %1289 = vmatmul.mubr.f32.vlgmr.msra.gmra.mrb[0].mxu0 %v24_v19  ;;  %v2723_v17 = vpack.c.bf16 %v464_v9, %v460_v8  ;;  %v506_v8 = vld [vmem:[%s6980_s1 + $0xeb0] sm:$0xff]  ;;  %v509_v9 = vld [vmem:[%s6980_s1 + $0xec8] sm:$0xff] }
  0xc6   :  { %2704 = vmatpush1.bf16.msra.mxu0 %v2703_v20  ;;  %1857 = vmatmul.mubr.f32.vlgmr.msra.gmra.mrb[0].mxu1 %v24_v19  ;;  %v2725_v19 = vpack.c.bf16 %v473_v14, %v469_v13  ;;  %v468_v20 = vld [vmem:[%s6980_s1 + $0xd80] sm:$0xff]  ;;  %v2745_v15 = vpack.c.bf16 %v513_v10, %v509_v9 }
  0xc7   :  { %3216 = vmatpush1.bf16.msra.mxu1 %v3215_v21  ;;  %2706 = vmatprep.subr.bf16.mxu0 %v2705_v22  ;;  %v472_v21 = vld [vmem:[%s6980_s1 + $0xda0] sm:$0xff]  ;;  %v470_v22 = vld [vmem:[%s6980_s1 + $0xd90] sm:$0xff] }
  0xc8   :  { %3218 = vmatprep.subr.bf16.mxu1 %v3217_v26  ;;  %1359 = vmatprep.mubr.f32.mxu0 %v27_v32  ;;  %v481_v26 = vld [vmem:[%s6980_s1 + $0xde8] sm:$0xff]  ;;  %v2727_v29 = vpack.c.bf16 %v472_v21, %v468_v20  ;;  %v3239_v30 = vpack.c.bf16 %v474_v24, %v470_v22  ;;  %v514_v20 = vld [vmem:[%s6980_s1 + $0xef0] sm:$0xff]  ;;  %v523_v24 = vld [vmem:[%s6980_s1 + $0xf38] sm:$0xff] }
  0xc9   :  { %1927 = vmatprep.mubr.f32.mxu1 %v27_v32  ;;  %v2729_v31 = vpack.c.bf16 %v481_v26, %v477_v25  ;;  %v476_v32 = vld [vmem:[%s6980_s1 + $0xdc0] sm:$0xff]  ;;  %v517_v21 = vld [vmem:[%s6980_s1 + $0xf08] sm:$0xff] }
  0xca   :  { %2708 = vmatpush1.bf16.msra.mxu0 %v2707_v33  ;;  %v480_v33 = vld [vmem:[%s6980_s1 + $0xde0] sm:$0xff]  ;;  %v521_v22 = vld [vmem:[%s6980_s1 + $0xf28] sm:$0xff] }
  0xcb   :  { %3220 = vmatpush1.bf16.msra.mxu1 %v3219_v34  ;;  %2710 = vmatprep.subr.bf16.mxu0 %v2709_v35  ;;  %v478_v34 = vld [vmem:[%s6980_s1 + $0xdd0] sm:$0xff]  ;;  %v3241_v35 = vpack.c.bf16 %v483_v28, %v479_v27  ;;  %v2731_v41 = vpack.c.bf16 %v480_v33, %v476_v32  ;;  %v2749_v27 = vpack.c.bf16 %v521_v22, %v517_v21  ;;  %v516_v28 = vld [vmem:[%s6980_s1 + $0xf00] sm:$0xff]  ;;  %v525_v33 = vld [vmem:[%s6980_s1 + $0xf48] sm:$0xff] }
  0xcc   :  { %3222 = vmatprep.subr.bf16.mxu1 %v3221_v39  ;;  %v487_v39 = vld [vmem:[%s6980_s1 + $0xe18] sm:$0xff]  ;;  %v3243_v42 = vpack.c.bf16 %v482_v36, %v478_v34  ;;  %v522_v32 = vld [vmem:[%s6980_s1 + $0xf30] sm:$0xff]  ;;  %v529_v34 = vld [vmem:[%s6980_s1 + $0xf68] sm:$0xff] }
  0xcd   :  { %v531_v36 = vld [vmem:[%s6980_s1 + $0xf78] sm:$0xff]  ;;  %v26_v21 = vld [vmem:[%s6981_s0 + $0x30] sm:$0xff] }
  0xce   :  { %2712 = vmatpush1.bf16.msra.mxu0 %v2711_v45  ;;  %v488_v45 = vld [vmem:[%s6980_s1 + $0xe20] sm:$0xff] }
  0xcf   :  { %3224 = vmatpush1.bf16.msra.mxu1 %v3223_v46  ;;  %2714 = vmatprep.subr.bf16.mxu0 %v2713_v47  ;;  %v486_v46 = vld [vmem:[%s6980_s1 + $0xe10] sm:$0xff]  ;;  %v3245_v47 = vpack.c.bf16 %v491_v40, %v487_v39  ;;  %v2735_v53 = vpack.c.bf16 %v488_v45, %v484_v44  ;;  %v2753_v39 = vpack.c.bf16 %v529_v34, %v525_v33  ;;  %v524_v40 = vld [vmem:[%s6980_s1 + $0xf40] sm:$0xff]  ;;  %v533_v45 = vld [vmem:[%s6980_s1 + $0xf88] sm:$0xff] }
  0xd0   :  { %3226 = vmatprep.subr.bf16.mxu1 %v3225_v51  ;;  %v495_v51 = vld [vmem:[%s6980_s1 + $0xe58] sm:$0xff]  ;;  %v3247_v54 = vpack.c.bf16 %v490_v48, %v486_v46  ;;  %v530_v44 = vld [vmem:[%s6980_s1 + $0xf70] sm:$0xff]  ;;  %v537_v46 = vld [vmem:[%s6980_s1 + $0xfa8] sm:$0xff] }
  0xd1   :  { %v539_v48 = vld [vmem:[%s6980_s1 + $0xfb8] sm:$0xff]  ;;  %v29_v34 = vld [vmem:[%s6981_s0 + $0x48] sm:$0xff] }
  0xd2   :  { %2716 = vmatpush1.bf16.msra.mxu0 %v2715_v57  ;;  %v496_v57 = vld [vmem:[%s6980_s1 + $0xe60] sm:$0xff]  ;;  %v571_v33 = vld [vmem:[%s6980_s1 + $0x10b8] sm:$0xff] }
  0xd3   :  { %3228 = vmatpush1.bf16.msra.mxu1 %v3227_v58  ;;  %2718 = vmatprep.subr.bf16.mxu0 %v2717_v59  ;;  %v494_v58 = vld [vmem:[%s6980_s1 + $0xe50] sm:$0xff]  ;;  %v3249_v59 = vpack.c.bf16 %v499_v52, %v495_v51  ;;  %v2739_v1 = vpack.c.bf16 %v496_v57, %v492_v56  ;;  %v2757_v51 = vpack.c.bf16 %v537_v46, %v533_v45  ;;  %v532_v52 = vld [vmem:[%s6980_s1 + $0xf80] sm:$0xff]  ;;  %v541_v57 = vld [vmem:[%s6980_s1 + $0xfc8] sm:$0xff] }
  0xd4   :  { %3230 = vmatprep.subr.bf16.mxu1 %v3229_v63  ;;  %v503_v63 = vld [vmem:[%s6980_s1 + $0xe98] sm:$0xff]  ;;  %v3251_v2 = vpack.c.bf16 %v498_v60, %v494_v58  ;;  %v538_v56 = vld [vmem:[%s6980_s1 + $0xfb0] sm:$0xff]  ;;  %v545_v58 = vld [vmem:[%s6980_s1 + $0xfe8] sm:$0xff] }
  0xd5   :  { %v547_v60 = vld [vmem:[%s6980_s1 + $0xff8] sm:$0xff] }
  0xd6   :  { %2720 = vmatpush1.bf16.msra.mxu0 %v2719_v5  ;;  %v504_v5 = vld [vmem:[%s6980_s1 + $0xea0] sm:$0xff]  ;;  %v575_v45 = vld [vmem:[%s6980_s1 + $0x10d8] sm:$0xff] }
  0xd7   :  { %3232 = vmatpush1.bf16.msra.mxu1 %v3231_v6  ;;  %2722 = vmatprep.subr.bf16.mxu0 %v2721_v7  ;;  %v502_v6 = vld [vmem:[%s6980_s1 + $0xe90] sm:$0xff]  ;;  %v3253_v7 = vpack.c.bf16 %v507_v0, %v503_v63  ;;  %v2743_v13 = vpack.c.bf16 %v504_v5, %v500_v4  ;;  %v2761_v63 = vpack.c.bf16 %v545_v58, %v541_v57  ;;  %v540_v0 = vld [vmem:[%s6980_s1 + $0xfc0] sm:$0xff]  ;;  %v549_v5 = vld [vmem:[%s6980_s1 + $0x1008] sm:$0xff] }
  0xd8   :  { %3234 = vmatprep.subr.bf16.mxu1 %v3233_v11  ;;  %v511_v11 = vld [vmem:[%s6980_s1 + $0xed8] sm:$0xff]  ;;  %v3255_v14 = vpack.c.bf16 %v506_v8, %v502_v6  ;;  %v546_v4 = vld [vmem:[%s6980_s1 + $0xff0] sm:$0xff]  ;;  %v553_v6 = vld [vmem:[%s6980_s1 + $0x1028] sm:$0xff] }
  0xd9   :  { %v555_v8 = vld [vmem:[%s6980_s1 + $0x1038] sm:$0xff] }
  0xda   :  { %2724 = vmatpush1.bf16.msra.mxu0 %v2723_v17  ;;  %v512_v17 = vld [vmem:[%s6980_s1 + $0xee0] sm:$0xff]  ;;  %v579_v46 = vld [vmem:[%s6980_s1 + $0x10f8] sm:$0xff] }
  0xdb   :  { %3236 = vmatpush1.bf16.msra.mxu1 %v3235_v18  ;;  %2726 = vmatprep.subr.bf16.mxu0 %v2725_v19  ;;  %v510_v18 = vld [vmem:[%s6980_s1 + $0xed0] sm:$0xff]  ;;  %v3257_v19 = vpack.c.bf16 %v515_v12, %v511_v11  ;;  %v2747_v25 = vpack.c.bf16 %v512_v17, %v508_v16  ;;  %v2765_v11 = vpack.c.bf16 %v553_v6, %v549_v5  ;;  %v548_v12 = vld [vmem:[%s6980_s1 + $0x1000] sm:$0xff]  ;;  %v557_v17 = vld [vmem:[%s6980_s1 + $0x1048] sm:$0xff] }
  0xdc   :  { %3238 = vmatprep.subr.bf16.mxu1 %v3237_v23  ;;  %v519_v23 = vld [vmem:[%s6980_s1 + $0xf18] sm:$0xff]  ;;  %v3259_v26 = vpack.c.bf16 %v514_v20, %v510_v18  ;;  %v554_v16 = vld [vmem:[%s6980_s1 + $0x1030] sm:$0xff]  ;;  %v561_v18 = vld [vmem:[%s6980_s1 + $0x1068] sm:$0xff] }
  0xdd   :  { %v563_v20 = vld [vmem:[%s6980_s1 + $0x1078] sm:$0xff] }
  0xde   :  { %2728 = vmatpush1.bf16.msra.mxu0 %v2727_v29  ;;  %v520_v29 = vld [vmem:[%s6980_s1 + $0xf20] sm:$0xff]  ;;  %v583_v57 = vld [vmem:[%s6980_s1 + $0x1118] sm:$0xff] }
  0xdf   :  { %3240 = vmatpush1.bf16.msra.mxu1 %v3239_v30  ;;  %2730 = vmatprep.subr.bf16.mxu0 %v2729_v31  ;;  %v518_v30 = vld [vmem:[%s6980_s1 + $0xf10] sm:$0xff]  ;;  %v3261_v31 = vpack.c.bf16 %v523_v24, %v519_v23  ;;  %v2751_v37 = vpack.c.bf16 %v520_v29, %v516_v28  ;;  %v2769_v24 = vpack.c.bf16 %v561_v18, %v557_v17  ;;  %v587_v58 = vld [vmem:[%s6980_s1 + $0x1138] sm:$0xff] }
  0xe0   :  { %3242 = vmatprep.subr.bf16.mxu1 %v3241_v35  ;;  %v527_v35 = vld [vmem:[%s6980_s1 + $0xf58] sm:$0xff]  ;;  %v3263_v38 = vpack.c.bf16 %v522_v32, %v518_v30  ;;  %v562_v29 = vld [vmem:[%s6980_s1 + $0x1070] sm:$0xff]  ;;  %v565_v30 = vld [vmem:[%s6980_s1 + $0x1088] sm:$0xff] }
  0xe1   :  { %v567_v32 = vld [vmem:[%s6980_s1 + $0x1098] sm:$0xff] }
  0xe2   :  { %2732 = vmatpush1.bf16.msra.mxu0 %v2731_v41  ;;  %v528_v41 = vld [vmem:[%s6980_s1 + $0xf60] sm:$0xff]  ;;  %v591_v5 = vld [vmem:[%s6980_s1 + $0x1158] sm:$0xff] }
  0xe3   :  { %3244 = vmatpush1.bf16.msra.mxu1 %v3243_v42  ;;  %2734 = vmatprep.subr.bf16.mxu0 %v2733_v43  ;;  %v526_v42 = vld [vmem:[%s6980_s1 + $0xf50] sm:$0xff]  ;;  %v3265_v43 = vpack.c.bf16 %v531_v36, %v527_v35  ;;  %v2755_v49 = vpack.c.bf16 %v528_v41, %v524_v40  ;;  %v3285_v41 = vpack.c.bf16 %v571_v33, %v567_v32  ;;  %v595_v6 = vld [vmem:[%s6980_s1 + $0x1178] sm:$0xff] }
  0xe4   :  { %3246 = vmatprep.subr.bf16.mxu1 %v3245_v47  ;;  %v535_v47 = vld [vmem:[%s6980_s1 + $0xf98] sm:$0xff]  ;;  %v3267_v50 = vpack.c.bf16 %v530_v44, %v526_v42  ;;  %v566_v40 = vld [vmem:[%s6980_s1 + $0x1090] sm:$0xff]  ;;  %v577_v44 = vld [vmem:[%s6980_s1 + $0x10e8] sm:$0xff] }
  0xe5   :  { %v570_v42 = vld [vmem:[%s6980_s1 + $0x10b0] sm:$0xff]  ;;  %v599_v17 = vld [vmem:[%s6980_s1 + $0x1198] sm:$0xff] }
  0xe6   :  { %2736 = vmatpush1.bf16.msra.mxu0 %v2735_v53  ;;  %v536_v53 = vld [vmem:[%s6980_s1 + $0xfa0] sm:$0xff]  ;;  %v603_v18 = vld [vmem:[%s6980_s1 + $0x11b8] sm:$0xff] }
  0xe7   :  { %3248 = vmatpush1.bf16.msra.mxu1 %v3247_v54  ;;  %2738 = vmatprep.subr.bf16.mxu0 %v2737_v55  ;;  %v534_v54 = vld [vmem:[%s6980_s1 + $0xf90] sm:$0xff]  ;;  %v3269_v55 = vpack.c.bf16 %v539_v48, %v535_v47  ;;  %v2759_v61 = vpack.c.bf16 %v536_v53, %v532_v52  ;;  %v3287_v48 = vpack.c.bf16 %v570_v42, %v566_v40  ;;  %v617_v40 = vld [vmem:[%s6980_s1 + $0x1228] sm:$0xff]  ;;  %v619_v42 = vld [vmem:[%s6980_s1 + $0x1238] sm:$0xff] }
  0xe8   :  { %3250 = vmatprep.subr.bf16.mxu1 %v3249_v59  ;;  %v543_v59 = vld [vmem:[%s6980_s1 + $0xfd8] sm:$0xff]  ;;  %v3271_v62 = vpack.c.bf16 %v538_v56, %v534_v54  ;;  %v574_v52 = vld [vmem:[%s6980_s1 + $0x10d0] sm:$0xff]  ;;  %v3289_v53 = vpack.c.bf16 %v579_v46, %v575_v45  ;;  %v585_v56 = vld [vmem:[%s6980_s1 + $0x1128] sm:$0xff] }
  0xe9   :  { %v578_v54 = vld [vmem:[%s6980_s1 + $0x10f0] sm:$0xff]  ;;  %v612_v46 = vld [vmem:[%s6980_s1 + $0x1200] sm:$0xff] }
  0xea   :  { %2740 = vmatpush1.bf16.msra.mxu0 %v2739_v1  ;;  %v544_v1 = vld [vmem:[%s6980_s1 + $0xfe0] sm:$0xff] }
  0xeb   :  { %3252 = vmatpush1.bf16.msra.mxu1 %v3251_v2  ;;  %2742 = vmatprep.subr.bf16.mxu0 %v2741_v3  ;;  %v542_v2 = vld [vmem:[%s6980_s1 + $0xfd0] sm:$0xff]  ;;  %v3273_v3 = vpack.c.bf16 %v547_v60, %v543_v59  ;;  %v2763_v9 = vpack.c.bf16 %v544_v1, %v540_v0  ;;  %v3291_v60 = vpack.c.bf16 %v578_v54, %v574_v52  ;;  %v625_v52 = vld [vmem:[%s6980_s1 + $0x1268] sm:$0xff]  ;;  %v627_v54 = vld [vmem:[%s6980_s1 + $0x1278] sm:$0xff] }
  0xec   :  { %3254 = vmatprep.subr.bf16.mxu1 %v3253_v7  ;;  %v551_v7 = vld [vmem:[%s6980_s1 + $0x1018] sm:$0xff]  ;;  %v3275_v10 = vpack.c.bf16 %v546_v4, %v542_v2  ;;  %v582_v0 = vld [vmem:[%s6980_s1 + $0x1110] sm:$0xff]  ;;  %v3293_v1 = vpack.c.bf16 %v587_v58, %v583_v57  ;;  %v593_v4 = vld [vmem:[%s6980_s1 + $0x1168] sm:$0xff] }
  0xed   :  { %v586_v2 = vld [vmem:[%s6980_s1 + $0x1130] sm:$0xff]  ;;  %v620_v58 = vld [vmem:[%s6980_s1 + $0x1240] sm:$0xff] }
  0xee   :  { %2744 = vmatpush1.bf16.msra.mxu0 %v2743_v13  ;;  %v552_v13 = vld [vmem:[%s6980_s1 + $0x1020] sm:$0xff] }
  0xef   :  { %3256 = vmatpush1.bf16.msra.mxu1 %v3255_v14  ;;  %2746 = vmatprep.subr.bf16.mxu0 %v2745_v15  ;;  %v550_v14 = vld [vmem:[%s6980_s1 + $0x1010] sm:$0xff]  ;;  %v3277_v15 = vpack.c.bf16 %v555_v8, %v551_v7  ;;  %v2767_v22 = vpack.c.bf16 %v552_v13, %v548_v12  ;;  %v3295_v8 = vpack.c.bf16 %v586_v2, %v582_v0  ;;  %v633_v0 = vld [vmem:[%s6980_s1 + $0x12a8] sm:$0xff]  ;;  %v635_v2 = vld [vmem:[%s6980_s1 + $0x12b8] sm:$0xff] }
  0xf0   :  { %3258 = vmatprep.subr.bf16.mxu1 %v3257_v19  ;;  %v559_v19 = vld [vmem:[%s6980_s1 + $0x1058] sm:$0xff]  ;;  %v3279_v23 = vpack.c.bf16 %v554_v16, %v550_v14  ;;  %v590_v12 = vld [vmem:[%s6980_s1 + $0x1150] sm:$0xff]  ;;  %v3297_v13 = vpack.c.bf16 %v595_v6, %v591_v5  ;;  %v601_v16 = vld [vmem:[%s6980_s1 + $0x11a8] sm:$0xff] }
  0xf1   :  { %v3281_v28 = vpack.c.bf16 %v563_v20, %v559_v19  ;;  %v594_v14 = vld [vmem:[%s6980_s1 + $0x1170] sm:$0xff]  ;;  %v628_v6 = vld [vmem:[%s6980_s1 + $0x1280] sm:$0xff] }
  0xf2   :  { %2748 = vmatpush1.bf16.msra.mxu0 %v2747_v25  ;;  %v556_v25 = vld [vmem:[%s6980_s1 + $0x1040] sm:$0xff]  ;;  %v3299_v20 = vpack.c.bf16 %v594_v14, %v590_v12  ;;  %v641_v12 = vld [vmem:[%s6980_s1 + $0x12e8] sm:$0xff]  ;;  %v643_v14 = vld [vmem:[%s6980_s1 + $0x12f8] sm:$0xff] }
  0xf3   :  { %3260 = vmatpush1.bf16.msra.mxu1 %v3259_v26  ;;  %2750 = vmatprep.subr.bf16.mxu0 %v2749_v27  ;;  %v560_v26 = vld [vmem:[%s6980_s1 + $0x1060] sm:$0xff]  ;;  %v558_v27 = vld [vmem:[%s6980_s1 + $0x1050] sm:$0xff] }
  0xf4   :  { %3262 = vmatprep.subr.bf16.mxu1 %v3261_v31  ;;  %v569_v31 = vld [vmem:[%s6980_s1 + $0x10a8] sm:$0xff]  ;;  %v2771_v35 = vpack.c.bf16 %v560_v26, %v556_v25  ;;  %v3283_v36 = vpack.c.bf16 %v562_v29, %v558_v27  ;;  %v3301_v25 = vpack.c.bf16 %v603_v18, %v599_v17  ;;  %v602_v26 = vld [vmem:[%s6980_s1 + $0x11b0] sm:$0xff]  ;;  %v607_v29 = vld [vmem:[%s6980_s1 + $0x11d8] sm:$0xff] }
  0xf5   :  { %v605_v27 = vld [vmem:[%s6980_s1 + $0x11c8] sm:$0xff]  ;;  %v636_v18 = vld [vmem:[%s6980_s1 + $0x12c0] sm:$0xff] }
  0xf6   :  { %2752 = vmatpush1.bf16.msra.mxu0 %v2751_v37  ;;  %v2773_v37 = vpack.c.bf16 %v569_v31, %v565_v30  ;;  %v611_v30 = vld [vmem:[%s6980_s1 + $0x11f8] sm:$0xff] }
  0xf7   :  { %3264 = vmatpush1.bf16.msra.mxu1 %v3263_v38  ;;  %2754 = vmatprep.subr.bf16.mxu0 %v2753_v39  ;;  %v564_v38 = vld [vmem:[%s6980_s1 + $0x1080] sm:$0xff] }
  0xf8   :  { %3266 = vmatprep.subr.bf16.mxu1 %v3265_v43  ;;  %v568_v39 = vld [vmem:[%s6980_s1 + $0x10a0] sm:$0xff]  ;;  %v573_v43 = vld [vmem:[%s6980_s1 + $0x10c8] sm:$0xff] }
  0xf9   :  { %v2775_v47 = vpack.c.bf16 %v568_v39, %v564_v38  ;;  %v610_v38 = vld [vmem:[%s6980_s1 + $0x11f0] sm:$0xff]  ;;  %v613_v39 = vld [vmem:[%s6980_s1 + $0x1208] sm:$0xff] }
  0xfa   :  { %2756 = vmatpush1.bf16.msra.mxu0 %v2755_v49  ;;  %v2777_v49 = vpack.c.bf16 %v577_v44, %v573_v43  ;;  %v2797_v45 = vpack.c.bf16 %v617_v40, %v613_v39 }
  0xfb   :  { %3268 = vmatpush1.bf16.msra.mxu1 %v3267_v50  ;;  %2758 = vmatprep.subr.bf16.mxu0 %v2757_v51  ;;  %v572_v50 = vld [vmem:[%s6980_s1 + $0x10c0] sm:$0xff] }
  0xfc   :  { %3270 = vmatprep.subr.bf16.mxu1 %v3269_v55  ;;  %v576_v51 = vld [vmem:[%s6980_s1 + $0x10e0] sm:$0xff]  ;;  %v581_v55 = vld [vmem:[%s6980_s1 + $0x1108] sm:$0xff] }
  0xfd   :  { %v2779_v59 = vpack.c.bf16 %v576_v51, %v572_v50  ;;  %v618_v50 = vld [vmem:[%s6980_s1 + $0x1230] sm:$0xff]  ;;  %v621_v51 = vld [vmem:[%s6980_s1 + $0x1248] sm:$0xff] }
  0xfe   :  { %2760 = vmatpush1.bf16.msra.mxu0 %v2759_v61  ;;  %v2781_v61 = vpack.c.bf16 %v585_v56, %v581_v55  ;;  %v2801_v57 = vpack.c.bf16 %v625_v52, %v621_v51 }
  0xff   :  { %3272 = vmatpush1.bf16.msra.mxu1 %v3271_v62  ;;  %2762 = vmatprep.subr.bf16.mxu0 %v2761_v63  ;;  %v580_v62 = vld [vmem:[%s6980_s1 + $0x1100] sm:$0xff] }
 0x100   :  { %3274 = vmatprep.subr.bf16.mxu1 %v3273_v3  ;;  %v584_v63 = vld [vmem:[%s6980_s1 + $0x1120] sm:$0xff]  ;;  %v589_v3 = vld [vmem:[%s6980_s1 + $0x1148] sm:$0xff] }
 0x101   :  { %v2783_v7 = vpack.c.bf16 %v584_v63, %v580_v62  ;;  %v626_v62 = vld [vmem:[%s6980_s1 + $0x1270] sm:$0xff]  ;;  %v629_v63 = vld [vmem:[%s6980_s1 + $0x1288] sm:$0xff] }
 0x102   :  { %2764 = vmatpush1.bf16.msra.mxu0 %v2763_v9  ;;  %v2785_v9 = vpack.c.bf16 %v593_v4, %v589_v3  ;;  %v2805_v5 = vpack.c.bf16 %v633_v0, %v629_v63 }
 0x103   :  { %3276 = vmatpush1.bf16.msra.mxu1 %v3275_v10  ;;  %2766 = vmatprep.subr.bf16.mxu0 %v2765_v11  ;;  %v588_v10 = vld [vmem:[%s6980_s1 + $0x1140] sm:$0xff] }
 0x104   :  { %3278 = vmatprep.subr.bf16.mxu1 %v3277_v15  ;;  %v592_v11 = vld [vmem:[%s6980_s1 + $0x1160] sm:$0xff]  ;;  %v597_v15 = vld [vmem:[%s6980_s1 + $0x1188] sm:$0xff] }
 0x105   :  { %1360 = vmatmul.mubr.f32.vlgmr.msra.gmra.mrb[0].mxu0 %v26_v21  ;;  %v2787_v19 = vpack.c.bf16 %v592_v11, %v588_v10  ;;  %v634_v10 = vld [vmem:[%s6980_s1 + $0x12b0] sm:$0xff]  ;;  %v637_v11 = vld [vmem:[%s6980_s1 + $0x12c8] sm:$0xff] }
 0x106   :  { %2768 = vmatpush1.bf16.msra.mxu0 %v2767_v22  ;;  %1928 = vmatmul.mubr.f32.vlgmr.msra.gmra.mrb[0].mxu1 %v26_v21  ;;  %v2789_v21 = vpack.c.bf16 %v601_v16, %v597_v15  ;;  %v596_v22 = vld [vmem:[%s6980_s1 + $0x1180] sm:$0xff]  ;;  %v2809_v17 = vpack.c.bf16 %v641_v12, %v637_v11 }
 0x107   :  { %3280 = vmatpush1.bf16.msra.mxu1 %v3279_v23  ;;  %2770 = vmatprep.subr.bf16.mxu0 %v2769_v24  ;;  %v600_v23 = vld [vmem:[%s6980_s1 + $0x11a0] sm:$0xff]  ;;  %v598_v24 = vld [vmem:[%s6980_s1 + $0x1190] sm:$0xff] }
 0x108   :  { %3282 = vmatprep.subr.bf16.mxu1 %v3281_v28  ;;  %1430 = vmatprep.mubr.f32.mxu0 %v29_v34  ;;  %v609_v28 = vld [vmem:[%s6980_s1 + $0x11e8] sm:$0xff]  ;;  %v2791_v31 = vpack.c.bf16 %v600_v23, %v596_v22  ;;  %v3303_v32 = vpack.c.bf16 %v602_v26, %v598_v24  ;;  %v642_v22 = vld [vmem:[%s6980_s1 + $0x12f0] sm:$0xff]  ;;  %v651_v26 = vld [vmem:[%s6980_s1 + $0x1338] sm:$0xff] }
 0x109   :  { %1998 = vmatprep.mubr.f32.mxu1 %v29_v34  ;;  %v2793_v33 = vpack.c.bf16 %v609_v28, %v605_v27  ;;  %v604_v34 = vld [vmem:[%s6980_s1 + $0x11c0] sm:$0xff]  ;;  %v645_v23 = vld [vmem:[%s6980_s1 + $0x1308] sm:$0xff] }
 0x10a   :  { %2772 = vmatpush1.bf16.msra.mxu0 %v2771_v35  ;;  %v608_v35 = vld [vmem:[%s6980_s1 + $0x11e0] sm:$0xff]  ;;  %v649_v24 = vld [vmem:[%s6980_s1 + $0x1328] sm:$0xff] }
 0x10b   :  { %3284 = vmatpush1.bf16.msra.mxu1 %v3283_v36  ;;  %2774 = vmatprep.subr.bf16.mxu0 %v2773_v37  ;;  %v606_v36 = vld [vmem:[%s6980_s1 + $0x11d0] sm:$0xff]  ;;  %v3305_v37 = vpack.c.bf16 %v611_v30, %v607_v29  ;;  %v2795_v43 = vpack.c.bf16 %v608_v35, %v604_v34  ;;  %v2813_v29 = vpack.c.bf16 %v649_v24, %v645_v23  ;;  %v644_v30 = vld [vmem:[%s6980_s1 + $0x1300] sm:$0xff]  ;;  %v653_v35 = vld [vmem:[%s6980_s1 + $0x1348] sm:$0xff] }
 0x10c   :  { %3286 = vmatprep.subr.bf16.mxu1 %v3285_v41  ;;  %v615_v41 = vld [vmem:[%s6980_s1 + $0x1218] sm:$0xff]  ;;  %v3307_v44 = vpack.c.bf16 %v610_v38, %v606_v36  ;;  %v650_v34 = vld [vmem:[%s6980_s1 + $0x1330] sm:$0xff]  ;;  %v657_v36 = vld [vmem:[%s6980_s1 + $0x1368] sm:$0xff] }
 0x10d   :  { %v659_v38 = vld [vmem:[%s6980_s1 + $0x1378] sm:$0xff]  ;;  %v28_v23 = vld [vmem:[%s6981_s0 + $0x40] sm:$0xff] }
 0x10e   :  { %2776 = vmatpush1.bf16.msra.mxu0 %v2775_v47  ;;  %v616_v47 = vld [vmem:[%s6980_s1 + $0x1220] sm:$0xff] }
 0x10f   :  { %3288 = vmatpush1.bf16.msra.mxu1 %v3287_v48  ;;  %2778 = vmatprep.subr.bf16.mxu0 %v2777_v49  ;;  %v614_v48 = vld [vmem:[%s6980_s1 + $0x1210] sm:$0xff]  ;;  %v3309_v49 = vpack.c.bf16 %v619_v42, %v615_v41  ;;  %v2799_v55 = vpack.c.bf16 %v616_v47, %v612_v46  ;;  %v2817_v41 = vpack.c.bf16 %v657_v36, %v653_v35  ;;  %v652_v42 = vld [vmem:[%s6980_s1 + $0x1340] sm:$0xff]  ;;  %v661_v47 = vld [vmem:[%s6980_s1 + $0x1388] sm:$0xff] }
 0x110   :  { %3290 = vmatprep.subr.bf16.mxu1 %v3289_v53  ;;  %v623_v53 = vld [vmem:[%s6980_s1 + $0x1258] sm:$0xff]  ;;  %v3311_v56 = vpack.c.bf16 %v618_v50, %v614_v48  ;;  %v658_v46 = vld [vmem:[%s6980_s1 + $0x1370] sm:$0xff]  ;;  %v665_v48 = vld [vmem:[%s6980_s1 + $0x13a8] sm:$0xff] }
 0x111   :  { %v667_v50 = vld [vmem:[%s6980_s1 + $0x13b8] sm:$0xff] }
 0x112   :  { %2780 = vmatpush1.bf16.msra.mxu0 %v2779_v59  ;;  %v624_v59 = vld [vmem:[%s6980_s1 + $0x1260] sm:$0xff]  ;;  %v699_v35 = vld [vmem:[%s6980_s1 + $0x14b8] sm:$0xff] }
 0x113   :  { %3292 = vmatpush1.bf16.msra.mxu1 %v3291_v60  ;;  %2782 = vmatprep.subr.bf16.mxu0 %v2781_v61  ;;  %v622_v60 = vld [vmem:[%s6980_s1 + $0x1250] sm:$0xff]  ;;  %v3313_v61 = vpack.c.bf16 %v627_v54, %v623_v53  ;;  %v2803_v3 = vpack.c.bf16 %v624_v59, %v620_v58  ;;  %v2821_v53 = vpack.c.bf16 %v665_v48, %v661_v47  ;;  %v660_v54 = vld [vmem:[%s6980_s1 + $0x1380] sm:$0xff]  ;;  %v669_v59 = vld [vmem:[%s6980_s1 + $0x13c8] sm:$0xff] }
 0x114   :  { %3294 = vmatprep.subr.bf16.mxu1 %v3293_v1  ;;  %v631_v1 = vld [vmem:[%s6980_s1 + $0x1298] sm:$0xff]  ;;  %v3315_v4 = vpack.c.bf16 %v626_v62, %v622_v60  ;;  %v666_v58 = vld [vmem:[%s6980_s1 + $0x13b0] sm:$0xff]  ;;  %v673_v60 = vld [vmem:[%s6980_s1 + $0x13e8] sm:$0xff] }
 0x115   :  { %v675_v62 = vld [vmem:[%s6980_s1 + $0x13f8] sm:$0xff] }
 0x116   :  { %2784 = vmatpush1.bf16.msra.mxu0 %v2783_v7  ;;  %v632_v7 = vld [vmem:[%s6980_s1 + $0x12a0] sm:$0xff]  ;;  %v31_v36 = vld [vmem:[%s6981_s0 + $0x58] sm:$0xff] }
 0x117   :  { %3296 = vmatpush1.bf16.msra.mxu1 %v3295_v8  ;;  %2786 = vmatprep.subr.bf16.mxu0 %v2785_v9  ;;  %v630_v8 = vld [vmem:[%s6980_s1 + $0x1290] sm:$0xff]  ;;  %v3317_v9 = vpack.c.bf16 %v635_v2, %v631_v1  ;;  %v2807_v15 = vpack.c.bf16 %v632_v7, %v628_v6  ;;  %v2825_v1 = vpack.c.bf16 %v673_v60, %v669_v59  ;;  %v668_v2 = vld [vmem:[%s6980_s1 + $0x13c0] sm:$0xff]  ;;  %v677_v7 = vld [vmem:[%s6980_s1 + $0x1408] sm:$0xff] }
 0x118   :  { %3298 = vmatprep.subr.bf16.mxu1 %v3297_v13  ;;  %v639_v13 = vld [vmem:[%s6980_s1 + $0x12d8] sm:$0xff]  ;;  %v3319_v16 = vpack.c.bf16 %v634_v10, %v630_v8  ;;  %v674_v6 = vld [vmem:[%s6980_s1 + $0x13f0] sm:$0xff]  ;;  %v681_v8 = vld [vmem:[%s6980_s1 + $0x1428] sm:$0xff] }
 0x119   :  { %v683_v10 = vld [vmem:[%s6980_s1 + $0x1438] sm:$0xff] }
 0x11a   :  { %2788 = vmatpush1.bf16.msra.mxu0 %v2787_v19  ;;  %v640_v19 = vld [vmem:[%s6980_s1 + $0x12e0] sm:$0xff]  ;;  %v703_v47 = vld [vmem:[%s6980_s1 + $0x14d8] sm:$0xff] }
 0x11b   :  { %3300 = vmatpush1.bf16.msra.mxu1 %v3299_v20  ;;  %2790 = vmatprep.subr.bf16.mxu0 %v2789_v21  ;;  %v638_v20 = vld [vmem:[%s6980_s1 + $0x12d0] sm:$0xff]  ;;  %v3321_v21 = vpack.c.bf16 %v643_v14, %v639_v13  ;;  %v2811_v27 = vpack.c.bf16 %v640_v19, %v636_v18  ;;  %v2829_v13 = vpack.c.bf16 %v681_v8, %v677_v7  ;;  %v676_v14 = vld [vmem:[%s6980_s1 + $0x1400] sm:$0xff]  ;;  %v685_v19 = vld [vmem:[%s6980_s1 + $0x1448] sm:$0xff] }
 0x11c   :  { %3302 = vmatprep.subr.bf16.mxu1 %v3301_v25  ;;  %v647_v25 = vld [vmem:[%s6980_s1 + $0x1318] sm:$0xff]  ;;  %v3323_v28 = vpack.c.bf16 %v642_v22, %v638_v20  ;;  %v682_v18 = vld [vmem:[%s6980_s1 + $0x1430] sm:$0xff]  ;;  %v689_v20 = vld [vmem:[%s6980_s1 + $0x1468] sm:$0xff] }
 0x11d   :  { %v691_v22 = vld [vmem:[%s6980_s1 + $0x1478] sm:$0xff] }
 0x11e   :  { %2792 = vmatpush1.bf16.msra.mxu0 %v2791_v31  ;;  %v648_v31 = vld [vmem:[%s6980_s1 + $0x1320] sm:$0xff]  ;;  %v707_v48 = vld [vmem:[%s6980_s1 + $0x14f8] sm:$0xff] }
 0x11f   :  { %3304 = vmatpush1.bf16.msra.mxu1 %v3303_v32  ;;  %2794 = vmatprep.subr.bf16.mxu0 %v2793_v33  ;;  %v646_v32 = vld [vmem:[%s6980_s1 + $0x1310] sm:$0xff]  ;;  %v3325_v33 = vpack.c.bf16 %v651_v26, %v647_v25  ;;  %v2815_v39 = vpack.c.bf16 %v648_v31, %v644_v30  ;;  %v2833_v26 = vpack.c.bf16 %v689_v20, %v685_v19  ;;  %v711_v59 = vld [vmem:[%s6980_s1 + $0x1518] sm:$0xff] }
 0x120   :  { %3306 = vmatprep.subr.bf16.mxu1 %v3305_v37  ;;  %v655_v37 = vld [vmem:[%s6980_s1 + $0x1358] sm:$0xff]  ;;  %v3327_v40 = vpack.c.bf16 %v650_v34, %v646_v32  ;;  %v690_v31 = vld [vmem:[%s6980_s1 + $0x1470] sm:$0xff]  ;;  %v693_v32 = vld [vmem:[%s6980_s1 + $0x1488] sm:$0xff] }
 0x121   :  { %v695_v34 = vld [vmem:[%s6980_s1 + $0x1498] sm:$0xff] }
 0x122   :  { %2796 = vmatpush1.bf16.msra.mxu0 %v2795_v43  ;;  %v656_v43 = vld [vmem:[%s6980_s1 + $0x1360] sm:$0xff]  ;;  %v715_v60 = vld [vmem:[%s6980_s1 + $0x1538] sm:$0xff] }
 0x123   :  { %3308 = vmatpush1.bf16.msra.mxu1 %v3307_v44  ;;  %2798 = vmatprep.subr.bf16.mxu0 %v2797_v45  ;;  %v654_v44 = vld [vmem:[%s6980_s1 + $0x1350] sm:$0xff]  ;;  %v3329_v45 = vpack.c.bf16 %v659_v38, %v655_v37  ;;  %v2819_v51 = vpack.c.bf16 %v656_v43, %v652_v42  ;;  %v3349_v43 = vpack.c.bf16 %v699_v35, %v695_v34  ;;  %v719_v7 = vld [vmem:[%s6980_s1 + $0x1558] sm:$0xff] }
 0x124   :  { %3310 = vmatprep.subr.bf16.mxu1 %v3309_v49  ;;  %v663_v49 = vld [vmem:[%s6980_s1 + $0x1398] sm:$0xff]  ;;  %v3331_v52 = vpack.c.bf16 %v658_v46, %v654_v44  ;;  %v694_v42 = vld [vmem:[%s6980_s1 + $0x1490] sm:$0xff]  ;;  %v705_v46 = vld [vmem:[%s6980_s1 + $0x14e8] sm:$0xff] }
 0x125   :  { %v698_v44 = vld [vmem:[%s6980_s1 + $0x14b0] sm:$0xff]  ;;  %v723_v8 = vld [vmem:[%s6980_s1 + $0x1578] sm:$0xff] }
 0x126   :  { %2800 = vmatpush1.bf16.msra.mxu0 %v2799_v55  ;;  %v664_v55 = vld [vmem:[%s6980_s1 + $0x13a0] sm:$0xff]  ;;  %v727_v19 = vld [vmem:[%s6980_s1 + $0x1598] sm:$0xff] }
 0x127   :  { %3312 = vmatpush1.bf16.msra.mxu1 %v3311_v56  ;;  %2802 = vmatprep.subr.bf16.mxu0 %v2801_v57  ;;  %v662_v56 = vld [vmem:[%s6980_s1 + $0x1390] sm:$0xff]  ;;  %v3333_v57 = vpack.c.bf16 %v667_v50, %v663_v49  ;;  %v2823_v63 = vpack.c.bf16 %v664_v55, %v660_v54  ;;  %v3351_v50 = vpack.c.bf16 %v698_v44, %v694_v42  ;;  %v731_v20 = vld [vmem:[%s6980_s1 + $0x15b8] sm:$0xff]  ;;  %v745_v42 = vld [vmem:[%s6980_s1 + $0x1628] sm:$0xff] }
 0x128   :  { %3314 = vmatprep.subr.bf16.mxu1 %v3313_v61  ;;  %v671_v61 = vld [vmem:[%s6980_s1 + $0x13d8] sm:$0xff]  ;;  %v3335_v0 = vpack.c.bf16 %v666_v58, %v662_v56  ;;  %v702_v54 = vld [vmem:[%s6980_s1 + $0x14d0] sm:$0xff]  ;;  %v3353_v55 = vpack.c.bf16 %v707_v48, %v703_v47  ;;  %v713_v58 = vld [vmem:[%s6980_s1 + $0x1528] sm:$0xff] }
 0x129   :  { %v706_v56 = vld [vmem:[%s6980_s1 + $0x14f0] sm:$0xff]  ;;  %v747_v44 = vld [vmem:[%s6980_s1 + $0x1638] sm:$0xff]  ;;  %v740_v48 = vld [vmem:[%s6980_s1 + $0x1600] sm:$0xff] }
 0x12a   :  { %2804 = vmatpush1.bf16.msra.mxu0 %v2803_v3  ;;  %v672_v3 = vld [vmem:[%s6980_s1 + $0x13e0] sm:$0xff] }
 0x12b   :  { %3316 = vmatpush1.bf16.msra.mxu1 %v3315_v4  ;;  %2806 = vmatprep.subr.bf16.mxu0 %v2805_v5  ;;  %v670_v4 = vld [vmem:[%s6980_s1 + $0x13d0] sm:$0xff]  ;;  %v3337_v5 = vpack.c.bf16 %v675_v62, %v671_v61  ;;  %v2827_v11 = vpack.c.bf16 %v672_v3, %v668_v2  ;;  %v3355_v62 = vpack.c.bf16 %v706_v56, %v702_v54  ;;  %v753_v54 = vld [vmem:[%s6980_s1 + $0x1668] sm:$0xff]  ;;  %v755_v56 = vld [vmem:[%s6980_s1 + $0x1678] sm:$0xff] }
 0x12c   :  { %3318 = vmatprep.subr.bf16.mxu1 %v3317_v9  ;;  %v679_v9 = vld [vmem:[%s6980_s1 + $0x1418] sm:$0xff]  ;;  %v3339_v12 = vpack.c.bf16 %v674_v6, %v670_v4  ;;  %v710_v2 = vld [vmem:[%s6980_s1 + $0x1510] sm:$0xff]  ;;  %v3357_v3 = vpack.c.bf16 %v715_v60, %v711_v59  ;;  %v721_v6 = vld [vmem:[%s6980_s1 + $0x1568] sm:$0xff] }
 0x12d   :  { %v714_v4 = vld [vmem:[%s6980_s1 + $0x1530] sm:$0xff]  ;;  %v748_v60 = vld [vmem:[%s6980_s1 + $0x1640] sm:$0xff] }
 0x12e   :  { %2808 = vmatpush1.bf16.msra.mxu0 %v2807_v15  ;;  %v680_v15 = vld [vmem:[%s6980_s1 + $0x1420] sm:$0xff] }
 0x12f   :  { %3320 = vmatpush1.bf16.msra.mxu1 %v3319_v16  ;;  %2810 = vmatprep.subr.bf16.mxu0 %v2809_v17  ;;  %v678_v16 = vld [vmem:[%s6980_s1 + $0x1410] sm:$0xff]  ;;  %v3341_v17 = vpack.c.bf16 %v683_v10, %v679_v9  ;;  %v2831_v24 = vpack.c.bf16 %v680_v15, %v676_v14  ;;  %v3359_v10 = vpack.c.bf16 %v714_v4, %v710_v2  ;;  %v761_v2 = vld [vmem:[%s6980_s1 + $0x16a8] sm:$0xff]  ;;  %v763_v4 = vld [vmem:[%s6980_s1 + $0x16b8] sm:$0xff] }
 0x130   :  { %3322 = vmatprep.subr.bf16.mxu1 %v3321_v21  ;;  %v687_v21 = vld [vmem:[%s6980_s1 + $0x1458] sm:$0xff]  ;;  %v3343_v25 = vpack.c.bf16 %v682_v18, %v678_v16  ;;  %v718_v14 = vld [vmem:[%s6980_s1 + $0x1550] sm:$0xff]  ;;  %v3361_v15 = vpack.c.bf16 %v723_v8, %v719_v7  ;;  %v729_v18 = vld [vmem:[%s6980_s1 + $0x15a8] sm:$0xff] }
 0x131   :  { %v3345_v30 = vpack.c.bf16 %v691_v22, %v687_v21  ;;  %v722_v16 = vld [vmem:[%s6980_s1 + $0x1570] sm:$0xff]  ;;  %v756_v8 = vld [vmem:[%s6980_s1 + $0x1680] sm:$0xff] }
 0x132   :  { %2812 = vmatpush1.bf16.msra.mxu0 %v2811_v27  ;;  %v684_v27 = vld [vmem:[%s6980_s1 + $0x1440] sm:$0xff]  ;;  %v3363_v22 = vpack.c.bf16 %v722_v16, %v718_v14  ;;  %v769_v14 = vld [vmem:[%s6980_s1 + $0x16e8] sm:$0xff]  ;;  %v771_v16 = vld [vmem:[%s6980_s1 + $0x16f8] sm:$0xff] }
 0x133   :  { %3324 = vmatpush1.bf16.msra.mxu1 %v3323_v28  ;;  %2814 = vmatprep.subr.bf16.mxu0 %v2813_v29  ;;  %v688_v28 = vld [vmem:[%s6980_s1 + $0x1460] sm:$0xff]  ;;  %v686_v29 = vld [vmem:[%s6980_s1 + $0x1450] sm:$0xff] }
 0x134   :  { %3326 = vmatprep.subr.bf16.mxu1 %v3325_v33  ;;  %v697_v33 = vld [vmem:[%s6980_s1 + $0x14a8] sm:$0xff]  ;;  %v2835_v37 = vpack.c.bf16 %v688_v28, %v684_v27  ;;  %v3347_v38 = vpack.c.bf16 %v690_v31, %v686_v29  ;;  %v3365_v27 = vpack.c.bf16 %v731_v20, %v727_v19  ;;  %v730_v28 = vld [vmem:[%s6980_s1 + $0x15b0] sm:$0xff]  ;;  %v735_v31 = vld [vmem:[%s6980_s1 + $0x15d8] sm:$0xff] }
 0x135   :  { %v733_v29 = vld [vmem:[%s6980_s1 + $0x15c8] sm:$0xff]  ;;  %v764_v20 = vld [vmem:[%s6980_s1 + $0x16c0] sm:$0xff] }
 0x136   :  { %2816 = vmatpush1.bf16.msra.mxu0 %v2815_v39  ;;  %v2837_v39 = vpack.c.bf16 %v697_v33, %v693_v32  ;;  %v739_v32 = vld [vmem:[%s6980_s1 + $0x15f8] sm:$0xff] }
 0x137   :  { %3328 = vmatpush1.bf16.msra.mxu1 %v3327_v40  ;;  %2818 = vmatprep.subr.bf16.mxu0 %v2817_v41  ;;  %v692_v40 = vld [vmem:[%s6980_s1 + $0x1480] sm:$0xff] }
 0x138   :  { %3330 = vmatprep.subr.bf16.mxu1 %v3329_v45  ;;  %v696_v41 = vld [vmem:[%s6980_s1 + $0x14a0] sm:$0xff]  ;;  %v701_v45 = vld [vmem:[%s6980_s1 + $0x14c8] sm:$0xff] }
 0x139   :  { %v2839_v49 = vpack.c.bf16 %v696_v41, %v692_v40  ;;  %v738_v40 = vld [vmem:[%s6980_s1 + $0x15f0] sm:$0xff]  ;;  %v741_v41 = vld [vmem:[%s6980_s1 + $0x1608] sm:$0xff] }
 0x13a   :  { %2820 = vmatpush1.bf16.msra.mxu0 %v2819_v51  ;;  %v2841_v51 = vpack.c.bf16 %v705_v46, %v701_v45  ;;  %v2861_v47 = vpack.c.bf16 %v745_v42, %v741_v41 }
 0x13b   :  { %3332 = vmatpush1.bf16.msra.mxu1 %v3331_v52  ;;  %2822 = vmatprep.subr.bf16.mxu0 %v2821_v53  ;;  %v700_v52 = vld [vmem:[%s6980_s1 + $0x14c0] sm:$0xff] }
 0x13c   :  { %3334 = vmatprep.subr.bf16.mxu1 %v3333_v57  ;;  %v704_v53 = vld [vmem:[%s6980_s1 + $0x14e0] sm:$0xff]  ;;  %v709_v57 = vld [vmem:[%s6980_s1 + $0x1508] sm:$0xff] }
 0x13d   :  { %v2843_v61 = vpack.c.bf16 %v704_v53, %v700_v52  ;;  %v746_v52 = vld [vmem:[%s6980_s1 + $0x1630] sm:$0xff]  ;;  %v749_v53 = vld [vmem:[%s6980_s1 + $0x1648] sm:$0xff] }
 0x13e   :  { %2824 = vmatpush1.bf16.msra.mxu0 %v2823_v63  ;;  %v2845_v63 = vpack.c.bf16 %v713_v58, %v709_v57  ;;  %v2865_v59 = vpack.c.bf16 %v753_v54, %v749_v53 }
 0x13f   :  { %3336 = vmatpush1.bf16.msra.mxu1 %v3335_v0  ;;  %2826 = vmatprep.subr.bf16.mxu0 %v2825_v1  ;;  %v708_v0 = vld [vmem:[%s6980_s1 + $0x1500] sm:$0xff] }
 0x140   :  { %3338 = vmatprep.subr.bf16.mxu1 %v3337_v5  ;;  %v712_v1 = vld [vmem:[%s6980_s1 + $0x1520] sm:$0xff]  ;;  %v717_v5 = vld [vmem:[%s6980_s1 + $0x1548] sm:$0xff] }
 0x141   :  { %v2847_v9 = vpack.c.bf16 %v712_v1, %v708_v0  ;;  %v754_v0 = vld [vmem:[%s6980_s1 + $0x1670] sm:$0xff]  ;;  %v757_v1 = vld [vmem:[%s6980_s1 + $0x1688] sm:$0xff] }
 0x142   :  { %2828 = vmatpush1.bf16.msra.mxu0 %v2827_v11  ;;  %v2849_v11 = vpack.c.bf16 %v721_v6, %v717_v5  ;;  %v2869_v7 = vpack.c.bf16 %v761_v2, %v757_v1 }
 0x143   :  { %3340 = vmatpush1.bf16.msra.mxu1 %v3339_v12  ;;  %2830 = vmatprep.subr.bf16.mxu0 %v2829_v13  ;;  %v716_v12 = vld [vmem:[%s6980_s1 + $0x1540] sm:$0xff] }
 0x144   :  { %3342 = vmatprep.subr.bf16.mxu1 %v3341_v17  ;;  %v720_v13 = vld [vmem:[%s6980_s1 + $0x1560] sm:$0xff]  ;;  %v725_v17 = vld [vmem:[%s6980_s1 + $0x1588] sm:$0xff] }
 0x145   :  { %1431 = vmatmul.mubr.f32.vlgmr.msra.gmra.mrb[0].mxu0 %v28_v23  ;;  %v2851_v21 = vpack.c.bf16 %v720_v13, %v716_v12  ;;  %v762_v12 = vld [vmem:[%s6980_s1 + $0x16b0] sm:$0xff]  ;;  %v765_v13 = vld [vmem:[%s6980_s1 + $0x16c8] sm:$0xff] }
 0x146   :  { %2832 = vmatpush1.bf16.msra.mxu0 %v2831_v24  ;;  %1999 = vmatmul.mubr.f32.vlgmr.msra.gmra.mrb[0].mxu1 %v28_v23  ;;  %v2853_v23 = vpack.c.bf16 %v729_v18, %v725_v17  ;;  %v724_v24 = vld [vmem:[%s6980_s1 + $0x1580] sm:$0xff]  ;;  %v2873_v19 = vpack.c.bf16 %v769_v14, %v765_v13 }
 0x147   :  { %3344 = vmatpush1.bf16.msra.mxu1 %v3343_v25  ;;  %2834 = vmatprep.subr.bf16.mxu0 %v2833_v26  ;;  %v728_v25 = vld [vmem:[%s6980_s1 + $0x15a0] sm:$0xff]  ;;  %v726_v26 = vld [vmem:[%s6980_s1 + $0x1590] sm:$0xff] }
 0x148   :  { %3346 = vmatprep.subr.bf16.mxu1 %v3345_v30  ;;  %1501 = vmatprep.mubr.f32.mxu0 %v31_v36  ;;  %v737_v30 = vld [vmem:[%s6980_s1 + $0x15e8] sm:$0xff]  ;;  %v2855_v33 = vpack.c.bf16 %v728_v25, %v724_v24  ;;  %v3367_v34 = vpack.c.bf16 %v730_v28, %v726_v26  ;;  %v770_v24 = vld [vmem:[%s6980_s1 + $0x16f0] sm:$0xff]  ;;  %v779_v28 = vld [vmem:[%s6980_s1 + $0x1738] sm:$0xff] }
 0x149   :  { %2069 = vmatprep.mubr.f32.mxu1 %v31_v36  ;;  %v2857_v35 = vpack.c.bf16 %v737_v30, %v733_v29  ;;  %v732_v36 = vld [vmem:[%s6980_s1 + $0x15c0] sm:$0xff]  ;;  %v773_v25 = vld [vmem:[%s6980_s1 + $0x1708] sm:$0xff] }
 0x14a   :  { %2836 = vmatpush1.bf16.msra.mxu0 %v2835_v37  ;;  %v736_v37 = vld [vmem:[%s6980_s1 + $0x15e0] sm:$0xff]  ;;  %v777_v26 = vld [vmem:[%s6980_s1 + $0x1728] sm:$0xff] }
 0x14b   :  { %3348 = vmatpush1.bf16.msra.mxu1 %v3347_v38  ;;  %2838 = vmatprep.subr.bf16.mxu0 %v2837_v39  ;;  %v734_v38 = vld [vmem:[%s6980_s1 + $0x15d0] sm:$0xff]  ;;  %v3369_v39 = vpack.c.bf16 %v739_v32, %v735_v31  ;;  %v2859_v45 = vpack.c.bf16 %v736_v37, %v732_v36  ;;  %v2877_v31 = vpack.c.bf16 %v777_v26, %v773_v25  ;;  %v772_v32 = vld [vmem:[%s6980_s1 + $0x1700] sm:$0xff]  ;;  %v781_v37 = vld [vmem:[%s6980_s1 + $0x1748] sm:$0xff] }
 0x14c   :  { %3350 = vmatprep.subr.bf16.mxu1 %v3349_v43  ;;  %v743_v43 = vld [vmem:[%s6980_s1 + $0x1618] sm:$0xff]  ;;  %v3371_v46 = vpack.c.bf16 %v738_v40, %v734_v38  ;;  %v778_v36 = vld [vmem:[%s6980_s1 + $0x1730] sm:$0xff]  ;;  %v785_v38 = vld [vmem:[%s6980_s1 + $0x1768] sm:$0xff] }
 0x14d   :  { %v787_v40 = vld [vmem:[%s6980_s1 + $0x1778] sm:$0xff]  ;;  %v30_v25 = vld [vmem:[%s6981_s0 + $0x50] sm:$0xff] }
 0x14e   :  { %2840 = vmatpush1.bf16.msra.mxu0 %v2839_v49  ;;  %v744_v49 = vld [vmem:[%s6980_s1 + $0x1620] sm:$0xff] }
 0x14f   :  { %3352 = vmatpush1.bf16.msra.mxu1 %v3351_v50  ;;  %2842 = vmatprep.subr.bf16.mxu0 %v2841_v51  ;;  %v742_v50 = vld [vmem:[%s6980_s1 + $0x1610] sm:$0xff]  ;;  %v3373_v51 = vpack.c.bf16 %v747_v44, %v743_v43  ;;  %v2863_v57 = vpack.c.bf16 %v744_v49, %v740_v48  ;;  %v2881_v43 = vpack.c.bf16 %v785_v38, %v781_v37  ;;  %v780_v44 = vld [vmem:[%s6980_s1 + $0x1740] sm:$0xff]  ;;  %v789_v49 = vld [vmem:[%s6980_s1 + $0x1788] sm:$0xff] }
 0x150   :  { %3354 = vmatprep.subr.bf16.mxu1 %v3353_v55  ;;  %v751_v55 = vld [vmem:[%s6980_s1 + $0x1658] sm:$0xff]  ;;  %v3375_v58 = vpack.c.bf16 %v746_v52, %v742_v50  ;;  %v786_v48 = vld [vmem:[%s6980_s1 + $0x1770] sm:$0xff]  ;;  %v793_v50 = vld [vmem:[%s6980_s1 + $0x17a8] sm:$0xff] }
 0x151   :  { %v795_v52 = vld [vmem:[%s6980_s1 + $0x17b8] sm:$0xff]  ;;  %v33_v38 = vld [vmem:[%s6981_s0 + $0x68] sm:$0xff] }
 0x152   :  { %2844 = vmatpush1.bf16.msra.mxu0 %v2843_v61  ;;  %v752_v61 = vld [vmem:[%s6980_s1 + $0x1660] sm:$0xff]  ;;  %v827_v37 = vld [vmem:[%s6980_s1 + $0x18b8] sm:$0xff] }
 0x153   :  { %3356 = vmatpush1.bf16.msra.mxu1 %v3355_v62  ;;  %2846 = vmatprep.subr.bf16.mxu0 %v2845_v63  ;;  %v750_v62 = vld [vmem:[%s6980_s1 + $0x1650] sm:$0xff]  ;;  %v3377_v63 = vpack.c.bf16 %v755_v56, %v751_v55  ;;  %v2867_v5 = vpack.c.bf16 %v752_v61, %v748_v60  ;;  %v2885_v55 = vpack.c.bf16 %v793_v50, %v789_v49  ;;  %v788_v56 = vld [vmem:[%s6980_s1 + $0x1780] sm:$0xff]  ;;  %v797_v61 = vld [vmem:[%s6980_s1 + $0x17c8] sm:$0xff] }
 0x154   :  { %3358 = vmatprep.subr.bf16.mxu1 %v3357_v3  ;;  %v759_v3 = vld [vmem:[%s6980_s1 + $0x1698] sm:$0xff]  ;;  %v3379_v6 = vpack.c.bf16 %v754_v0, %v750_v62  ;;  %v794_v60 = vld [vmem:[%s6980_s1 + $0x17b0] sm:$0xff]  ;;  %v801_v62 = vld [vmem:[%s6980_s1 + $0x17e8] sm:$0xff] }
 0x155   :  { %v803_v0 = vld [vmem:[%s6980_s1 + $0x17f8] sm:$0xff] }
 0x156   :  { %2848 = vmatpush1.bf16.msra.mxu0 %v2847_v9  ;;  %v760_v9 = vld [vmem:[%s6980_s1 + $0x16a0] sm:$0xff]  ;;  %v831_v49 = vld [vmem:[%s6980_s1 + $0x18d8] sm:$0xff] }
 0x157   :  { %3360 = vmatpush1.bf16.msra.mxu1 %v3359_v10  ;;  %2850 = vmatprep.subr.bf16.mxu0 %v2849_v11  ;;  %v758_v10 = vld [vmem:[%s6980_s1 + $0x1690] sm:$0xff]  ;;  %v3381_v11 = vpack.c.bf16 %v763_v4, %v759_v3  ;;  %v2871_v17 = vpack.c.bf16 %v760_v9, %v756_v8  ;;  %v2889_v3 = vpack.c.bf16 %v801_v62, %v797_v61  ;;  %v796_v4 = vld [vmem:[%s6980_s1 + $0x17c0] sm:$0xff]  ;;  %v805_v9 = vld [vmem:[%s6980_s1 + $0x1808] sm:$0xff] }
 0x158   :  { %3362 = vmatprep.subr.bf16.mxu1 %v3361_v15  ;;  %v767_v15 = vld [vmem:[%s6980_s1 + $0x16d8] sm:$0xff]  ;;  %v3383_v18 = vpack.c.bf16 %v762_v12, %v758_v10  ;;  %v802_v8 = vld [vmem:[%s6980_s1 + $0x17f0] sm:$0xff]  ;;  %v809_v10 = vld [vmem:[%s6980_s1 + $0x1828] sm:$0xff] }
 0x159   :  { %v811_v12 = vld [vmem:[%s6980_s1 + $0x1838] sm:$0xff] }
 0x15a   :  { %2852 = vmatpush1.bf16.msra.mxu0 %v2851_v21  ;;  %v768_v21 = vld [vmem:[%s6980_s1 + $0x16e0] sm:$0xff]  ;;  %v835_v50 = vld [vmem:[%s6980_s1 + $0x18f8] sm:$0xff] }
 0x15b   :  { %3364 = vmatpush1.bf16.msra.mxu1 %v3363_v22  ;;  %2854 = vmatprep.subr.bf16.mxu0 %v2853_v23  ;;  %v766_v22 = vld [vmem:[%s6980_s1 + $0x16d0] sm:$0xff]  ;;  %v3385_v23 = vpack.c.bf16 %v771_v16, %v767_v15  ;;  %v2875_v29 = vpack.c.bf16 %v768_v21, %v764_v20  ;;  %v2893_v15 = vpack.c.bf16 %v809_v10, %v805_v9  ;;  %v804_v16 = vld [vmem:[%s6980_s1 + $0x1800] sm:$0xff]  ;;  %v813_v21 = vld [vmem:[%s6980_s1 + $0x1848] sm:$0xff] }
 0x15c   :  { %3366 = vmatprep.subr.bf16.mxu1 %v3365_v27  ;;  %v775_v27 = vld [vmem:[%s6980_s1 + $0x1718] sm:$0xff]  ;;  %v3387_v30 = vpack.c.bf16 %v770_v24, %v766_v22  ;;  %v810_v20 = vld [vmem:[%s6980_s1 + $0x1830] sm:$0xff]  ;;  %v817_v22 = vld [vmem:[%s6980_s1 + $0x1868] sm:$0xff] }
 0x15d   :  { %v819_v24 = vld [vmem:[%s6980_s1 + $0x1878] sm:$0xff] }
 0x15e   :  { %2856 = vmatpush1.bf16.msra.mxu0 %v2855_v33  ;;  %v776_v33 = vld [vmem:[%s6980_s1 + $0x1720] sm:$0xff]  ;;  %v839_v61 = vld [vmem:[%s6980_s1 + $0x1918] sm:$0xff] }
 0x15f   :  { %3368 = vmatpush1.bf16.msra.mxu1 %v3367_v34  ;;  %2858 = vmatprep.subr.bf16.mxu0 %v2857_v35  ;;  %v774_v34 = vld [vmem:[%s6980_s1 + $0x1710] sm:$0xff]  ;;  %v3389_v35 = vpack.c.bf16 %v779_v28, %v775_v27  ;;  %v2879_v41 = vpack.c.bf16 %v776_v33, %v772_v32  ;;  %v2897_v28 = vpack.c.bf16 %v817_v22, %v813_v21  ;;  %v843_v62 = vld [vmem:[%s6980_s1 + $0x1938] sm:$0xff] }
 0x160   :  { %3370 = vmatprep.subr.bf16.mxu1 %v3369_v39  ;;  %v783_v39 = vld [vmem:[%s6980_s1 + $0x1758] sm:$0xff]  ;;  %v3391_v42 = vpack.c.bf16 %v778_v36, %v774_v34  ;;  %v818_v33 = vld [vmem:[%s6980_s1 + $0x1870] sm:$0xff]  ;;  %v821_v34 = vld [vmem:[%s6980_s1 + $0x1888] sm:$0xff] }
 0x161   :  { %v823_v36 = vld [vmem:[%s6980_s1 + $0x1898] sm:$0xff] }
 0x162   :  { %2860 = vmatpush1.bf16.msra.mxu0 %v2859_v45  ;;  %v784_v45 = vld [vmem:[%s6980_s1 + $0x1760] sm:$0xff]  ;;  %v847_v9 = vld [vmem:[%s6980_s1 + $0x1958] sm:$0xff] }
 0x163   :  { %3372 = vmatpush1.bf16.msra.mxu1 %v3371_v46  ;;  %2862 = vmatprep.subr.bf16.mxu0 %v2861_v47  ;;  %v782_v46 = vld [vmem:[%s6980_s1 + $0x1750] sm:$0xff]  ;;  %v3393_v47 = vpack.c.bf16 %v787_v40, %v783_v39  ;;  %v2883_v53 = vpack.c.bf16 %v784_v45, %v780_v44  ;;  %v3413_v45 = vpack.c.bf16 %v827_v37, %v823_v36  ;;  %v851_v10 = vld [vmem:[%s6980_s1 + $0x1978] sm:$0xff] }
 0x164   :  { %3374 = vmatprep.subr.bf16.mxu1 %v3373_v51  ;;  %v791_v51 = vld [vmem:[%s6980_s1 + $0x1798] sm:$0xff]  ;;  %v3395_v54 = vpack.c.bf16 %v786_v48, %v782_v46  ;;  %v822_v44 = vld [vmem:[%s6980_s1 + $0x1890] sm:$0xff]  ;;  %v833_v48 = vld [vmem:[%s6980_s1 + $0x18e8] sm:$0xff] }
 0x165   :  { %v826_v46 = vld [vmem:[%s6980_s1 + $0x18b0] sm:$0xff]  ;;  %v855_v21 = vld [vmem:[%s6980_s1 + $0x1998] sm:$0xff] }
 0x166   :  { %2864 = vmatpush1.bf16.msra.mxu0 %v2863_v57  ;;  %v792_v57 = vld [vmem:[%s6980_s1 + $0x17a0] sm:$0xff]  ;;  %v859_v22 = vld [vmem:[%s6980_s1 + $0x19b8] sm:$0xff] }
 0x167   :  { %3376 = vmatpush1.bf16.msra.mxu1 %v3375_v58  ;;  %2866 = vmatprep.subr.bf16.mxu0 %v2865_v59  ;;  %v790_v58 = vld [vmem:[%s6980_s1 + $0x1790] sm:$0xff]  ;;  %v3397_v59 = vpack.c.bf16 %v795_v52, %v791_v51  ;;  %v2887_v1 = vpack.c.bf16 %v792_v57, %v788_v56  ;;  %v3415_v52 = vpack.c.bf16 %v826_v46, %v822_v44  ;;  %v873_v44 = vld [vmem:[%s6980_s1 + $0x1a28] sm:$0xff]  ;;  %v875_v46 = vld [vmem:[%s6980_s1 + $0x1a38] sm:$0xff] }
 0x168   :  { %3378 = vmatprep.subr.bf16.mxu1 %v3377_v63  ;;  %v799_v63 = vld [vmem:[%s6980_s1 + $0x17d8] sm:$0xff]  ;;  %v3399_v2 = vpack.c.bf16 %v794_v60, %v790_v58  ;;  %v830_v56 = vld [vmem:[%s6980_s1 + $0x18d0] sm:$0xff]  ;;  %v3417_v57 = vpack.c.bf16 %v835_v50, %v831_v49  ;;  %v841_v60 = vld [vmem:[%s6980_s1 + $0x1928] sm:$0xff] }
 0x169   :  { %v834_v58 = vld [vmem:[%s6980_s1 + $0x18f0] sm:$0xff]  ;;  %v868_v50 = vld [vmem:[%s6980_s1 + $0x1a00] sm:$0xff] }
 0x16a   :  { %2868 = vmatpush1.bf16.msra.mxu0 %v2867_v5  ;;  %v800_v5 = vld [vmem:[%s6980_s1 + $0x17e0] sm:$0xff] }
 0x16b   :  { %3380 = vmatpush1.bf16.msra.mxu1 %v3379_v6  ;;  %2870 = vmatprep.subr.bf16.mxu0 %v2869_v7  ;;  %v798_v6 = vld [vmem:[%s6980_s1 + $0x17d0] sm:$0xff]  ;;  %v3401_v7 = vpack.c.bf16 %v803_v0, %v799_v63  ;;  %v2891_v13 = vpack.c.bf16 %v800_v5, %v796_v4  ;;  %v3419_v0 = vpack.c.bf16 %v834_v58, %v830_v56  ;;  %v881_v56 = vld [vmem:[%s6980_s1 + $0x1a68] sm:$0xff]  ;;  %v883_v58 = vld [vmem:[%s6980_s1 + $0x1a78] sm:$0xff] }
 0x16c   :  { %3382 = vmatprep.subr.bf16.mxu1 %v3381_v11  ;;  %v807_v11 = vld [vmem:[%s6980_s1 + $0x1818] sm:$0xff]  ;;  %v3403_v14 = vpack.c.bf16 %v802_v8, %v798_v6  ;;  %v838_v4 = vld [vmem:[%s6980_s1 + $0x1910] sm:$0xff]  ;;  %v3421_v5 = vpack.c.bf16 %v843_v62, %v839_v61  ;;  %v849_v8 = vld [vmem:[%s6980_s1 + $0x1968] sm:$0xff] }
 0x16d   :  { %v842_v6 = vld [vmem:[%s6980_s1 + $0x1930] sm:$0xff]  ;;  %v876_v62 = vld [vmem:[%s6980_s1 + $0x1a40] sm:$0xff] }
 0x16e   :  { %2872 = vmatpush1.bf16.msra.mxu0 %v2871_v17  ;;  %v808_v17 = vld [vmem:[%s6980_s1 + $0x1820] sm:$0xff] }
 0x16f   :  { %3384 = vmatpush1.bf16.msra.mxu1 %v3383_v18  ;;  %2874 = vmatprep.subr.bf16.mxu0 %v2873_v19  ;;  %v806_v18 = vld [vmem:[%s6980_s1 + $0x1810] sm:$0xff]  ;;  %v3405_v19 = vpack.c.bf16 %v811_v12, %v807_v11  ;;  %v2895_v26 = vpack.c.bf16 %v808_v17, %v804_v16  ;;  %v3423_v12 = vpack.c.bf16 %v842_v6, %v838_v4  ;;  %v889_v4 = vld [vmem:[%s6980_s1 + $0x1aa8] sm:$0xff]  ;;  %v891_v6 = vld [vmem:[%s6980_s1 + $0x1ab8] sm:$0xff] }
 0x170   :  { %3386 = vmatprep.subr.bf16.mxu1 %v3385_v23  ;;  %v815_v23 = vld [vmem:[%s6980_s1 + $0x1858] sm:$0xff]  ;;  %v3407_v27 = vpack.c.bf16 %v810_v20, %v806_v18  ;;  %v846_v16 = vld [vmem:[%s6980_s1 + $0x1950] sm:$0xff]  ;;  %v3425_v17 = vpack.c.bf16 %v851_v10, %v847_v9  ;;  %v857_v20 = vld [vmem:[%s6980_s1 + $0x19a8] sm:$0xff] }
 0x171   :  { %v3409_v32 = vpack.c.bf16 %v819_v24, %v815_v23  ;;  %v850_v18 = vld [vmem:[%s6980_s1 + $0x1970] sm:$0xff]  ;;  %v884_v10 = vld [vmem:[%s6980_s1 + $0x1a80] sm:$0xff] }
 0x172   :  { %2876 = vmatpush1.bf16.msra.mxu0 %v2875_v29  ;;  %v812_v29 = vld [vmem:[%s6980_s1 + $0x1840] sm:$0xff]  ;;  %v3427_v24 = vpack.c.bf16 %v850_v18, %v846_v16  ;;  %v897_v16 = vld [vmem:[%s6980_s1 + $0x1ae8] sm:$0xff]  ;;  %v899_v18 = vld [vmem:[%s6980_s1 + $0x1af8] sm:$0xff] }
 0x173   :  { %3388 = vmatpush1.bf16.msra.mxu1 %v3387_v30  ;;  %2878 = vmatprep.subr.bf16.mxu0 %v2877_v31  ;;  %v816_v30 = vld [vmem:[%s6980_s1 + $0x1860] sm:$0xff]  ;;  %v814_v31 = vld [vmem:[%s6980_s1 + $0x1850] sm:$0xff] }
 0x174   :  { %3390 = vmatprep.subr.bf16.mxu1 %v3389_v35  ;;  %v825_v35 = vld [vmem:[%s6980_s1 + $0x18a8] sm:$0xff]  ;;  %v2899_v39 = vpack.c.bf16 %v816_v30, %v812_v29  ;;  %v3411_v40 = vpack.c.bf16 %v818_v33, %v814_v31  ;;  %v3429_v29 = vpack.c.bf16 %v859_v22, %v855_v21  ;;  %v858_v30 = vld [vmem:[%s6980_s1 + $0x19b0] sm:$0xff]  ;;  %v863_v33 = vld [vmem:[%s6980_s1 + $0x19d8] sm:$0xff] }
 0x175   :  { %v861_v31 = vld [vmem:[%s6980_s1 + $0x19c8] sm:$0xff]  ;;  %v892_v22 = vld [vmem:[%s6980_s1 + $0x1ac0] sm:$0xff] }
 0x176   :  { %2880 = vmatpush1.bf16.msra.mxu0 %v2879_v41  ;;  %v2901_v41 = vpack.c.bf16 %v825_v35, %v821_v34  ;;  %v867_v34 = vld [vmem:[%s6980_s1 + $0x19f8] sm:$0xff] }
 0x177   :  { %3392 = vmatpush1.bf16.msra.mxu1 %v3391_v42  ;;  %2882 = vmatprep.subr.bf16.mxu0 %v2881_v43  ;;  %v820_v42 = vld [vmem:[%s6980_s1 + $0x1880] sm:$0xff] }
 0x178   :  { %3394 = vmatprep.subr.bf16.mxu1 %v3393_v47  ;;  %v824_v43 = vld [vmem:[%s6980_s1 + $0x18a0] sm:$0xff]  ;;  %v829_v47 = vld [vmem:[%s6980_s1 + $0x18c8] sm:$0xff] }
 0x179   :  { %v2903_v51 = vpack.c.bf16 %v824_v43, %v820_v42  ;;  %v866_v42 = vld [vmem:[%s6980_s1 + $0x19f0] sm:$0xff]  ;;  %v869_v43 = vld [vmem:[%s6980_s1 + $0x1a08] sm:$0xff] }
 0x17a   :  { %2884 = vmatpush1.bf16.msra.mxu0 %v2883_v53  ;;  %v2905_v53 = vpack.c.bf16 %v833_v48, %v829_v47  ;;  %v2925_v49 = vpack.c.bf16 %v873_v44, %v869_v43 }
 0x17b   :  { %3396 = vmatpush1.bf16.msra.mxu1 %v3395_v54  ;;  %2886 = vmatprep.subr.bf16.mxu0 %v2885_v55  ;;  %v828_v54 = vld [vmem:[%s6980_s1 + $0x18c0] sm:$0xff] }
 0x17c   :  { %3398 = vmatprep.subr.bf16.mxu1 %v3397_v59  ;;  %v832_v55 = vld [vmem:[%s6980_s1 + $0x18e0] sm:$0xff]  ;;  %v837_v59 = vld [vmem:[%s6980_s1 + $0x1908] sm:$0xff] }
 0x17d   :  { %v2907_v63 = vpack.c.bf16 %v832_v55, %v828_v54  ;;  %v874_v54 = vld [vmem:[%s6980_s1 + $0x1a30] sm:$0xff]  ;;  %v877_v55 = vld [vmem:[%s6980_s1 + $0x1a48] sm:$0xff] }
 0x17e   :  { %2888 = vmatpush1.bf16.msra.mxu0 %v2887_v1  ;;  %v2909_v1 = vpack.c.bf16 %v841_v60, %v837_v59  ;;  %v2929_v61 = vpack.c.bf16 %v881_v56, %v877_v55 }
 0x17f   :  { %3400 = vmatpush1.bf16.msra.mxu1 %v3399_v2  ;;  %2890 = vmatprep.subr.bf16.mxu0 %v2889_v3  ;;  %v836_v2 = vld [vmem:[%s6980_s1 + $0x1900] sm:$0xff] }
 0x180   :  { %3402 = vmatprep.subr.bf16.mxu1 %v3401_v7  ;;  %v840_v3 = vld [vmem:[%s6980_s1 + $0x1920] sm:$0xff]  ;;  %v845_v7 = vld [vmem:[%s6980_s1 + $0x1948] sm:$0xff] }
 0x181   :  { %v2911_v11 = vpack.c.bf16 %v840_v3, %v836_v2  ;;  %v882_v2 = vld [vmem:[%s6980_s1 + $0x1a70] sm:$0xff]  ;;  %v885_v3 = vld [vmem:[%s6980_s1 + $0x1a88] sm:$0xff] }
 0x182   :  { %2892 = vmatpush1.bf16.msra.mxu0 %v2891_v13  ;;  %v2913_v13 = vpack.c.bf16 %v849_v8, %v845_v7  ;;  %v2933_v9 = vpack.c.bf16 %v889_v4, %v885_v3 }
 0x183   :  { %3404 = vmatpush1.bf16.msra.mxu1 %v3403_v14  ;;  %2894 = vmatprep.subr.bf16.mxu0 %v2893_v15  ;;  %v844_v14 = vld [vmem:[%s6980_s1 + $0x1940] sm:$0xff] }
 0x184   :  { %3406 = vmatprep.subr.bf16.mxu1 %v3405_v19  ;;  %v848_v15 = vld [vmem:[%s6980_s1 + $0x1960] sm:$0xff]  ;;  %v853_v19 = vld [vmem:[%s6980_s1 + $0x1988] sm:$0xff] }
 0x185   :  { %1502 = vmatmul.mubr.f32.vlgmr.msra.gmra.mrb[0].mxu0 %v30_v25  ;;  %v2915_v23 = vpack.c.bf16 %v848_v15, %v844_v14  ;;  %v890_v14 = vld [vmem:[%s6980_s1 + $0x1ab0] sm:$0xff]  ;;  %v893_v15 = vld [vmem:[%s6980_s1 + $0x1ac8] sm:$0xff] }
 0x186   :  { %2896 = vmatpush1.bf16.msra.mxu0 %v2895_v26  ;;  %2070 = vmatmul.mubr.f32.vlgmr.msra.gmra.mrb[0].mxu1 %v30_v25  ;;  %v2917_v25 = vpack.c.bf16 %v857_v20, %v853_v19  ;;  %v852_v26 = vld [vmem:[%s6980_s1 + $0x1980] sm:$0xff]  ;;  %v2937_v21 = vpack.c.bf16 %v897_v16, %v893_v15 }
 0x187   :  { %3408 = vmatpush1.bf16.msra.mxu1 %v3407_v27  ;;  %2898 = vmatprep.subr.bf16.mxu0 %v2897_v28  ;;  %v856_v27 = vld [vmem:[%s6980_s1 + $0x19a0] sm:$0xff]  ;;  %v854_v28 = vld [vmem:[%s6980_s1 + $0x1990] sm:$0xff] }
 0x188   :  { %3410 = vmatprep.subr.bf16.mxu1 %v3409_v32  ;;  %1572 = vmatprep.mubr.f32.mxu0 %v33_v38  ;;  %v865_v32 = vld [vmem:[%s6980_s1 + $0x19e8] sm:$0xff]  ;;  %v2919_v35 = vpack.c.bf16 %v856_v27, %v852_v26  ;;  %v3431_v36 = vpack.c.bf16 %v858_v30, %v854_v28  ;;  %v898_v26 = vld [vmem:[%s6980_s1 + $0x1af0] sm:$0xff]  ;;  %v907_v30 = vld [vmem:[%s6980_s1 + $0x1b38] sm:$0xff] }
 0x189   :  { %2140 = vmatprep.mubr.f32.mxu1 %v33_v38  ;;  %v2921_v37 = vpack.c.bf16 %v865_v32, %v861_v31  ;;  %v860_v38 = vld [vmem:[%s6980_s1 + $0x19c0] sm:$0xff]  ;;  %v901_v27 = vld [vmem:[%s6980_s1 + $0x1b08] sm:$0xff] }
 0x18a   :  { %2900 = vmatpush1.bf16.msra.mxu0 %v2899_v39  ;;  %v864_v39 = vld [vmem:[%s6980_s1 + $0x19e0] sm:$0xff]  ;;  %v905_v28 = vld [vmem:[%s6980_s1 + $0x1b28] sm:$0xff] }
 0x18b   :  { %3412 = vmatpush1.bf16.msra.mxu1 %v3411_v40  ;;  %2902 = vmatprep.subr.bf16.mxu0 %v2901_v41  ;;  %v862_v40 = vld [vmem:[%s6980_s1 + $0x19d0] sm:$0xff]  ;;  %v3433_v41 = vpack.c.bf16 %v867_v34, %v863_v33  ;;  %v2923_v47 = vpack.c.bf16 %v864_v39, %v860_v38  ;;  %v2941_v33 = vpack.c.bf16 %v905_v28, %v901_v27  ;;  %v900_v34 = vld [vmem:[%s6980_s1 + $0x1b00] sm:$0xff]  ;;  %v909_v39 = vld [vmem:[%s6980_s1 + $0x1b48] sm:$0xff] }
 0x18c   :  { %3414 = vmatprep.subr.bf16.mxu1 %v3413_v45  ;;  %v871_v45 = vld [vmem:[%s6980_s1 + $0x1a18] sm:$0xff]  ;;  %v3435_v48 = vpack.c.bf16 %v866_v42, %v862_v40  ;;  %v906_v38 = vld [vmem:[%s6980_s1 + $0x1b30] sm:$0xff]  ;;  %v913_v40 = vld [vmem:[%s6980_s1 + $0x1b68] sm:$0xff] }
 0x18d   :  { %v915_v42 = vld [vmem:[%s6980_s1 + $0x1b78] sm:$0xff]  ;;  %v32_v27 = vld [vmem:[%s6981_s0 + $0x60] sm:$0xff] }
 0x18e   :  { %2904 = vmatpush1.bf16.msra.mxu0 %v2903_v51  ;;  %v872_v51 = vld [vmem:[%s6980_s1 + $0x1a20] sm:$0xff] }
 0x18f   :  { %3416 = vmatpush1.bf16.msra.mxu1 %v3415_v52  ;;  %2906 = vmatprep.subr.bf16.mxu0 %v2905_v53  ;;  %v870_v52 = vld [vmem:[%s6980_s1 + $0x1a10] sm:$0xff]  ;;  %v3437_v53 = vpack.c.bf16 %v875_v46, %v871_v45  ;;  %v2927_v59 = vpack.c.bf16 %v872_v51, %v868_v50  ;;  %v2945_v45 = vpack.c.bf16 %v913_v40, %v909_v39  ;;  %v908_v46 = vld [vmem:[%s6980_s1 + $0x1b40] sm:$0xff]  ;;  %v917_v51 = vld [vmem:[%s6980_s1 + $0x1b88] sm:$0xff] }
 0x190   :  { %3418 = vmatprep.subr.bf16.mxu1 %v3417_v57  ;;  %v879_v57 = vld [vmem:[%s6980_s1 + $0x1a58] sm:$0xff]  ;;  %v3439_v60 = vpack.c.bf16 %v874_v54, %v870_v52  ;;  %v914_v50 = vld [vmem:[%s6980_s1 + $0x1b70] sm:$0xff]  ;;  %v921_v52 = vld [vmem:[%s6980_s1 + $0x1ba8] sm:$0xff] }
 0x191   :  { %v923_v54 = vld [vmem:[%s6980_s1 + $0x1bb8] sm:$0xff] }
 0x192   :  { %2908 = vmatpush1.bf16.msra.mxu0 %v2907_v63  ;;  %v880_v63 = vld [vmem:[%s6980_s1 + $0x1a60] sm:$0xff]  ;;  %v955_v39 = vld [vmem:[%s6980_s1 + $0x1cb8] sm:$0xff] }
 0x193   :  { %3420 = vmatpush1.bf16.msra.mxu1 %v3419_v0  ;;  %2910 = vmatprep.subr.bf16.mxu0 %v2909_v1  ;;  %v878_v0 = vld [vmem:[%s6980_s1 + $0x1a50] sm:$0xff]  ;;  %v3441_v1 = vpack.c.bf16 %v883_v58, %v879_v57  ;;  %v2931_v7 = vpack.c.bf16 %v880_v63, %v876_v62  ;;  %v2949_v57 = vpack.c.bf16 %v921_v52, %v917_v51  ;;  %v916_v58 = vld [vmem:[%s6980_s1 + $0x1b80] sm:$0xff]  ;;  %v925_v63 = vld [vmem:[%s6980_s1 + $0x1bc8] sm:$0xff] }
 0x194   :  { %3422 = vmatprep.subr.bf16.mxu1 %v3421_v5  ;;  %v887_v5 = vld [vmem:[%s6980_s1 + $0x1a98] sm:$0xff]  ;;  %v3443_v8 = vpack.c.bf16 %v882_v2, %v878_v0  ;;  %v922_v62 = vld [vmem:[%s6980_s1 + $0x1bb0] sm:$0xff]  ;;  %v929_v0 = vld [vmem:[%s6980_s1 + $0x1be8] sm:$0xff] }
 0x195   :  { %v931_v2 = vld [vmem:[%s6980_s1 + $0x1bf8] sm:$0xff] }
 0x196   :  { %2912 = vmatpush1.bf16.msra.mxu0 %v2911_v11  ;;  %v888_v11 = vld [vmem:[%s6980_s1 + $0x1aa0] sm:$0xff]  ;;  %v35_v40 = vld [vmem:[%s6981_s0 + $0x78] sm:$0xff] }
 0x197   :  { %3424 = vmatpush1.bf16.msra.mxu1 %v3423_v12  ;;  %2914 = vmatprep.subr.bf16.mxu0 %v2913_v13  ;;  %v886_v12 = vld [vmem:[%s6980_s1 + $0x1a90] sm:$0xff]  ;;  %v3445_v13 = vpack.c.bf16 %v891_v6, %v887_v5  ;;  %v2935_v19 = vpack.c.bf16 %v888_v11, %v884_v10  ;;  %v2953_v5 = vpack.c.bf16 %v929_v0, %v925_v63  ;;  %v924_v6 = vld [vmem:[%s6980_s1 + $0x1bc0] sm:$0xff]  ;;  %v933_v11 = vld [vmem:[%s6980_s1 + $0x1c08] sm:$0xff] }
 0x198   :  { %3426 = vmatprep.subr.bf16.mxu1 %v3425_v17  ;;  %v895_v17 = vld [vmem:[%s6980_s1 + $0x1ad8] sm:$0xff]  ;;  %v3447_v20 = vpack.c.bf16 %v890_v14, %v886_v12  ;;  %v930_v10 = vld [vmem:[%s6980_s1 + $0x1bf0] sm:$0xff]  ;;  %v937_v12 = vld [vmem:[%s6980_s1 + $0x1c28] sm:$0xff] }
 0x199   :  { %v939_v14 = vld [vmem:[%s6980_s1 + $0x1c38] sm:$0xff] }
 0x19a   :  { %2916 = vmatpush1.bf16.msra.mxu0 %v2915_v23  ;;  %v896_v23 = vld [vmem:[%s6980_s1 + $0x1ae0] sm:$0xff]  ;;  %v959_v51 = vld [vmem:[%s6980_s1 + $0x1cd8] sm:$0xff] }
 0x19b   :  { %3428 = vmatpush1.bf16.msra.mxu1 %v3427_v24  ;;  %2918 = vmatprep.subr.bf16.mxu0 %v2917_v25  ;;  %v894_v24 = vld [vmem:[%s6980_s1 + $0x1ad0] sm:$0xff]  ;;  %v3449_v25 = vpack.c.bf16 %v899_v18, %v895_v17  ;;  %v2939_v31 = vpack.c.bf16 %v896_v23, %v892_v22  ;;  %v2957_v17 = vpack.c.bf16 %v937_v12, %v933_v11  ;;  %v932_v18 = vld [vmem:[%s6980_s1 + $0x1c00] sm:$0xff]  ;;  %v941_v23 = vld [vmem:[%s6980_s1 + $0x1c48] sm:$0xff] }
 0x19c   :  { %3430 = vmatprep.subr.bf16.mxu1 %v3429_v29  ;;  %v903_v29 = vld [vmem:[%s6980_s1 + $0x1b18] sm:$0xff]  ;;  %v3451_v32 = vpack.c.bf16 %v898_v26, %v894_v24  ;;  %v938_v22 = vld [vmem:[%s6980_s1 + $0x1c30] sm:$0xff]  ;;  %v945_v24 = vld [vmem:[%s6980_s1 + $0x1c68] sm:$0xff] }
 0x19d   :  { %v947_v26 = vld [vmem:[%s6980_s1 + $0x1c78] sm:$0xff] }
 0x19e   :  { %2920 = vmatpush1.bf16.msra.mxu0 %v2919_v35  ;;  %v904_v35 = vld [vmem:[%s6980_s1 + $0x1b20] sm:$0xff]  ;;  %v963_v52 = vld [vmem:[%s6980_s1 + $0x1cf8] sm:$0xff] }
 0x19f   :  { %3432 = vmatpush1.bf16.msra.mxu1 %v3431_v36  ;;  %2922 = vmatprep.subr.bf16.mxu0 %v2921_v37  ;;  %v902_v36 = vld [vmem:[%s6980_s1 + $0x1b10] sm:$0xff]  ;;  %v3453_v37 = vpack.c.bf16 %v907_v30, %v903_v29  ;;  %v2943_v43 = vpack.c.bf16 %v904_v35, %v900_v34  ;;  %v2961_v30 = vpack.c.bf16 %v945_v24, %v941_v23  ;;  %v967_v63 = vld [vmem:[%s6980_s1 + $0x1d18] sm:$0xff] }
 0x1a0   :  { %3434 = vmatprep.subr.bf16.mxu1 %v3433_v41  ;;  %v911_v41 = vld [vmem:[%s6980_s1 + $0x1b58] sm:$0xff]  ;;  %v3455_v44 = vpack.c.bf16 %v906_v38, %v902_v36  ;;  %v946_v35 = vld [vmem:[%s6980_s1 + $0x1c70] sm:$0xff]  ;;  %v949_v36 = vld [vmem:[%s6980_s1 + $0x1c88] sm:$0xff] }
 0x1a1   :  { %v951_v38 = vld [vmem:[%s6980_s1 + $0x1c98] sm:$0xff] }
 0x1a2   :  { %2924 = vmatpush1.bf16.msra.mxu0 %v2923_v47  ;;  %v912_v47 = vld [vmem:[%s6980_s1 + $0x1b60] sm:$0xff]  ;;  %v971_v0 = vld [vmem:[%s6980_s1 + $0x1d38] sm:$0xff] }
 0x1a3   :  { %3436 = vmatpush1.bf16.msra.mxu1 %v3435_v48  ;;  %2926 = vmatprep.subr.bf16.mxu0 %v2925_v49  ;;  %v910_v48 = vld [vmem:[%s6980_s1 + $0x1b50] sm:$0xff]  ;;  %v3457_v49 = vpack.c.bf16 %v915_v42, %v911_v41  ;;  %v2947_v55 = vpack.c.bf16 %v912_v47, %v908_v46  ;;  %v3477_v47 = vpack.c.bf16 %v955_v39, %v951_v38  ;;  %v975_v11 = vld [vmem:[%s6980_s1 + $0x1d58] sm:$0xff] }
 0x1a4   :  { %3438 = vmatprep.subr.bf16.mxu1 %v3437_v53  ;;  %v919_v53 = vld [vmem:[%s6980_s1 + $0x1b98] sm:$0xff]  ;;  %v3459_v56 = vpack.c.bf16 %v914_v50, %v910_v48  ;;  %v950_v46 = vld [vmem:[%s6980_s1 + $0x1c90] sm:$0xff]  ;;  %v961_v50 = vld [vmem:[%s6980_s1 + $0x1ce8] sm:$0xff] }
 0x1a5   :  { %v954_v48 = vld [vmem:[%s6980_s1 + $0x1cb0] sm:$0xff]  ;;  %v979_v12 = vld [vmem:[%s6980_s1 + $0x1d78] sm:$0xff] }
 0x1a6   :  { %2928 = vmatpush1.bf16.msra.mxu0 %v2927_v59  ;;  %v920_v59 = vld [vmem:[%s6980_s1 + $0x1ba0] sm:$0xff]  ;;  %v983_v23 = vld [vmem:[%s6980_s1 + $0x1d98] sm:$0xff] }
 0x1a7   :  { %3440 = vmatpush1.bf16.msra.mxu1 %v3439_v60  ;;  %2930 = vmatprep.subr.bf16.mxu0 %v2929_v61  ;;  %v918_v60 = vld [vmem:[%s6980_s1 + $0x1b90] sm:$0xff]  ;;  %v3461_v61 = vpack.c.bf16 %v923_v54, %v919_v53  ;;  %v2951_v3 = vpack.c.bf16 %v920_v59, %v916_v58  ;;  %v3479_v54 = vpack.c.bf16 %v954_v48, %v950_v46  ;;  %v987_v24 = vld [vmem:[%s6980_s1 + $0x1db8] sm:$0xff]  ;;  %v1001_v46 = vld [vmem:[%s6980_s1 + $0x1e28] sm:$0xff] }
 0x1a8   :  { %3442 = vmatprep.subr.bf16.mxu1 %v3441_v1  ;;  %v927_v1 = vld [vmem:[%s6980_s1 + $0x1bd8] sm:$0xff]  ;;  %v3463_v4 = vpack.c.bf16 %v922_v62, %v918_v60  ;;  %v958_v58 = vld [vmem:[%s6980_s1 + $0x1cd0] sm:$0xff]  ;;  %v3481_v59 = vpack.c.bf16 %v963_v52, %v959_v51  ;;  %v969_v62 = vld [vmem:[%s6980_s1 + $0x1d28] sm:$0xff] }
 0x1a9   :  { %v962_v60 = vld [vmem:[%s6980_s1 + $0x1cf0] sm:$0xff]  ;;  %v1003_v48 = vld [vmem:[%s6980_s1 + $0x1e38] sm:$0xff]  ;;  %v996_v52 = vld [vmem:[%s6980_s1 + $0x1e00] sm:$0xff] }
 0x1aa   :  { %2932 = vmatpush1.bf16.msra.mxu0 %v2931_v7  ;;  %v928_v7 = vld [vmem:[%s6980_s1 + $0x1be0] sm:$0xff] }
 0x1ab   :  { %3444 = vmatpush1.bf16.msra.mxu1 %v3443_v8  ;;  %2934 = vmatprep.subr.bf16.mxu0 %v2933_v9  ;;  %v926_v8 = vld [vmem:[%s6980_s1 + $0x1bd0] sm:$0xff]  ;;  %v3465_v9 = vpack.c.bf16 %v931_v2, %v927_v1  ;;  %v2955_v15 = vpack.c.bf16 %v928_v7, %v924_v6  ;;  %v3483_v2 = vpack.c.bf16 %v962_v60, %v958_v58  ;;  %v1009_v58 = vld [vmem:[%s6980_s1 + $0x1e68] sm:$0xff]  ;;  %v1011_v60 = vld [vmem:[%s6980_s1 + $0x1e78] sm:$0xff] }
 0x1ac   :  { %3446 = vmatprep.subr.bf16.mxu1 %v3445_v13  ;;  %v935_v13 = vld [vmem:[%s6980_s1 + $0x1c18] sm:$0xff]  ;;  %v3467_v16 = vpack.c.bf16 %v930_v10, %v926_v8  ;;  %v966_v6 = vld [vmem:[%s6980_s1 + $0x1d10] sm:$0xff]  ;;  %v3485_v7 = vpack.c.bf16 %v971_v0, %v967_v63  ;;  %v977_v10 = vld [vmem:[%s6980_s1 + $0x1d68] sm:$0xff] }
 0x1ad   :  { %v970_v8 = vld [vmem:[%s6980_s1 + $0x1d30] sm:$0xff]  ;;  %v1004_v0 = vld [vmem:[%s6980_s1 + $0x1e40] sm:$0xff] }
 0x1ae   :  { %2936 = vmatpush1.bf16.msra.mxu0 %v2935_v19  ;;  %v936_v19 = vld [vmem:[%s6980_s1 + $0x1c20] sm:$0xff] }
 0x1af   :  { %3448 = vmatpush1.bf16.msra.mxu1 %v3447_v20  ;;  %2938 = vmatprep.subr.bf16.mxu0 %v2937_v21  ;;  %v934_v20 = vld [vmem:[%s6980_s1 + $0x1c10] sm:$0xff]  ;;  %v3469_v21 = vpack.c.bf16 %v939_v14, %v935_v13  ;;  %v2959_v28 = vpack.c.bf16 %v936_v19, %v932_v18  ;;  %v3487_v14 = vpack.c.bf16 %v970_v8, %v966_v6  ;;  %v1017_v6 = vld [vmem:[%s6980_s1 + $0x1ea8] sm:$0xff]  ;;  %v1019_v8 = vld [vmem:[%s6980_s1 + $0x1eb8] sm:$0xff] }
 0x1b0   :  { %3450 = vmatprep.subr.bf16.mxu1 %v3449_v25  ;;  %v943_v25 = vld [vmem:[%s6980_s1 + $0x1c58] sm:$0xff]  ;;  %v3471_v29 = vpack.c.bf16 %v938_v22, %v934_v20  ;;  %v974_v18 = vld [vmem:[%s6980_s1 + $0x1d50] sm:$0xff]  ;;  %v3489_v19 = vpack.c.bf16 %v979_v12, %v975_v11  ;;  %v985_v22 = vld [vmem:[%s6980_s1 + $0x1da8] sm:$0xff] }
 0x1b1   :  { %v3473_v34 = vpack.c.bf16 %v947_v26, %v943_v25  ;;  %v978_v20 = vld [vmem:[%s6980_s1 + $0x1d70] sm:$0xff]  ;;  %v1012_v12 = vld [vmem:[%s6980_s1 + $0x1e80] sm:$0xff] }
 0x1b2   :  { %2940 = vmatpush1.bf16.msra.mxu0 %v2939_v31  ;;  %v940_v31 = vld [vmem:[%s6980_s1 + $0x1c40] sm:$0xff]  ;;  %v3491_v26 = vpack.c.bf16 %v978_v20, %v974_v18  ;;  %v1025_v18 = vld [vmem:[%s6980_s1 + $0x1ee8] sm:$0xff]  ;;  %v1027_v20 = vld [vmem:[%s6980_s1 + $0x1ef8] sm:$0xff] }
 0x1b3   :  { %3452 = vmatpush1.bf16.msra.mxu1 %v3451_v32  ;;  %2942 = vmatprep.subr.bf16.mxu0 %v2941_v33  ;;  %v944_v32 = vld [vmem:[%s6980_s1 + $0x1c60] sm:$0xff]  ;;  %v942_v33 = vld [vmem:[%s6980_s1 + $0x1c50] sm:$0xff] }
 0x1b4   :  { %3454 = vmatprep.subr.bf16.mxu1 %v3453_v37  ;;  %v953_v37 = vld [vmem:[%s6980_s1 + $0x1ca8] sm:$0xff]  ;;  %v2963_v41 = vpack.c.bf16 %v944_v32, %v940_v31  ;;  %v3475_v42 = vpack.c.bf16 %v946_v35, %v942_v33  ;;  %v3493_v31 = vpack.c.bf16 %v987_v24, %v983_v23  ;;  %v986_v32 = vld [vmem:[%s6980_s1 + $0x1db0] sm:$0xff]  ;;  %v991_v35 = vld [vmem:[%s6980_s1 + $0x1dd8] sm:$0xff] }
 0x1b5   :  { %v989_v33 = vld [vmem:[%s6980_s1 + $0x1dc8] sm:$0xff]  ;;  %v1020_v24 = vld [vmem:[%s6980_s1 + $0x1ec0] sm:$0xff] }
 0x1b6   :  { %2944 = vmatpush1.bf16.msra.mxu0 %v2943_v43  ;;  %v2965_v43 = vpack.c.bf16 %v953_v37, %v949_v36  ;;  %v995_v36 = vld [vmem:[%s6980_s1 + $0x1df8] sm:$0xff] }
 0x1b7   :  { %3456 = vmatpush1.bf16.msra.mxu1 %v3455_v44  ;;  %2946 = vmatprep.subr.bf16.mxu0 %v2945_v45  ;;  %v948_v44 = vld [vmem:[%s6980_s1 + $0x1c80] sm:$0xff] }
 0x1b8   :  { %3458 = vmatprep.subr.bf16.mxu1 %v3457_v49  ;;  %v952_v45 = vld [vmem:[%s6980_s1 + $0x1ca0] sm:$0xff]  ;;  %v957_v49 = vld [vmem:[%s6980_s1 + $0x1cc8] sm:$0xff] }
 0x1b9   :  { %v2967_v53 = vpack.c.bf16 %v952_v45, %v948_v44  ;;  %v994_v44 = vld [vmem:[%s6980_s1 + $0x1df0] sm:$0xff]  ;;  %v997_v45 = vld [vmem:[%s6980_s1 + $0x1e08] sm:$0xff] }
 0x1ba   :  { %2948 = vmatpush1.bf16.msra.mxu0 %v2947_v55  ;;  %v2969_v55 = vpack.c.bf16 %v961_v50, %v957_v49  ;;  %v2989_v51 = vpack.c.bf16 %v1001_v46, %v997_v45 }
 0x1bb   :  { %3460 = vmatpush1.bf16.msra.mxu1 %v3459_v56  ;;  %2950 = vmatprep.subr.bf16.mxu0 %v2949_v57  ;;  %v956_v56 = vld [vmem:[%s6980_s1 + $0x1cc0] sm:$0xff] }
 0x1bc   :  { %3462 = vmatprep.subr.bf16.mxu1 %v3461_v61  ;;  %v960_v57 = vld [vmem:[%s6980_s1 + $0x1ce0] sm:$0xff]  ;;  %v965_v61 = vld [vmem:[%s6980_s1 + $0x1d08] sm:$0xff] }
 0x1bd   :  { %v2971_v1 = vpack.c.bf16 %v960_v57, %v956_v56  ;;  %v1002_v56 = vld [vmem:[%s6980_s1 + $0x1e30] sm:$0xff]  ;;  %v1005_v57 = vld [vmem:[%s6980_s1 + $0x1e48] sm:$0xff] }
 0x1be   :  { %2952 = vmatpush1.bf16.msra.mxu0 %v2951_v3  ;;  %v2973_v3 = vpack.c.bf16 %v969_v62, %v965_v61  ;;  %v2993_v63 = vpack.c.bf16 %v1009_v58, %v1005_v57 }
 0x1bf   :  { %3464 = vmatpush1.bf16.msra.mxu1 %v3463_v4  ;;  %2954 = vmatprep.subr.bf16.mxu0 %v2953_v5  ;;  %v964_v4 = vld [vmem:[%s6980_s1 + $0x1d00] sm:$0xff] }
 0x1c0   :  { %3466 = vmatprep.subr.bf16.mxu1 %v3465_v9  ;;  %v968_v5 = vld [vmem:[%s6980_s1 + $0x1d20] sm:$0xff]  ;;  %v973_v9 = vld [vmem:[%s6980_s1 + $0x1d48] sm:$0xff] }
 0x1c1   :  { %v2975_v13 = vpack.c.bf16 %v968_v5, %v964_v4  ;;  %v1010_v4 = vld [vmem:[%s6980_s1 + $0x1e70] sm:$0xff]  ;;  %v1013_v5 = vld [vmem:[%s6980_s1 + $0x1e88] sm:$0xff] }
 0x1c2   :  { %2956 = vmatpush1.bf16.msra.mxu0 %v2955_v15  ;;  %v2977_v15 = vpack.c.bf16 %v977_v10, %v973_v9  ;;  %v2997_v11 = vpack.c.bf16 %v1017_v6, %v1013_v5 }
 0x1c3   :  { %3468 = vmatpush1.bf16.msra.mxu1 %v3467_v16  ;;  %2958 = vmatprep.subr.bf16.mxu0 %v2957_v17  ;;  %v972_v16 = vld [vmem:[%s6980_s1 + $0x1d40] sm:$0xff] }
 0x1c4   :  { %3470 = vmatprep.subr.bf16.mxu1 %v3469_v21  ;;  %v976_v17 = vld [vmem:[%s6980_s1 + $0x1d60] sm:$0xff]  ;;  %v981_v21 = vld [vmem:[%s6980_s1 + $0x1d88] sm:$0xff] }
 0x1c5   :  { %1573 = vmatmul.mubr.f32.vlgmr.msra.gmra.mrb[0].mxu0 %v32_v27  ;;  %v2979_v25 = vpack.c.bf16 %v976_v17, %v972_v16  ;;  %v1018_v16 = vld [vmem:[%s6980_s1 + $0x1eb0] sm:$0xff]  ;;  %v1021_v17 = vld [vmem:[%s6980_s1 + $0x1ec8] sm:$0xff] }
 0x1c6   :  { %2960 = vmatpush1.bf16.msra.mxu0 %v2959_v28  ;;  %2141 = vmatmul.mubr.f32.vlgmr.msra.gmra.mrb[0].mxu1 %v32_v27  ;;  %v2981_v27 = vpack.c.bf16 %v985_v22, %v981_v21  ;;  %v980_v28 = vld [vmem:[%s6980_s1 + $0x1d80] sm:$0xff]  ;;  %v3001_v23 = vpack.c.bf16 %v1025_v18, %v1021_v17 }
 0x1c7   :  { %3472 = vmatpush1.bf16.msra.mxu1 %v3471_v29  ;;  %2962 = vmatprep.subr.bf16.mxu0 %v2961_v30  ;;  %v984_v29 = vld [vmem:[%s6980_s1 + $0x1da0] sm:$0xff]  ;;  %v982_v30 = vld [vmem:[%s6980_s1 + $0x1d90] sm:$0xff] }
 0x1c8   :  { %3474 = vmatprep.subr.bf16.mxu1 %v3473_v34  ;;  %1643 = vmatprep.mubr.f32.mxu0 %v35_v40  ;;  %v993_v34 = vld [vmem:[%s6980_s1 + $0x1de8] sm:$0xff]  ;;  %v2983_v37 = vpack.c.bf16 %v984_v29, %v980_v28  ;;  %v3495_v38 = vpack.c.bf16 %v986_v32, %v982_v30  ;;  %v1026_v28 = vld [vmem:[%s6980_s1 + $0x1ef0] sm:$0xff]  ;;  %v1035_v32 = vld [vmem:[%s6980_s1 + $0x1f38] sm:$0xff] }
 0x1c9   :  { %2211 = vmatprep.mubr.f32.mxu1 %v35_v40  ;;  %v2985_v39 = vpack.c.bf16 %v993_v34, %v989_v33  ;;  %v988_v40 = vld [vmem:[%s6980_s1 + $0x1dc0] sm:$0xff]  ;;  %v1029_v29 = vld [vmem:[%s6980_s1 + $0x1f08] sm:$0xff] }
 0x1ca   :  { %2964 = vmatpush1.bf16.msra.mxu0 %v2963_v41  ;;  %v992_v41 = vld [vmem:[%s6980_s1 + $0x1de0] sm:$0xff]  ;;  %v1033_v30 = vld [vmem:[%s6980_s1 + $0x1f28] sm:$0xff] }
 0x1cb   :  { %3476 = vmatpush1.bf16.msra.mxu1 %v3475_v42  ;;  %2966 = vmatprep.subr.bf16.mxu0 %v2965_v43  ;;  %v990_v42 = vld [vmem:[%s6980_s1 + $0x1dd0] sm:$0xff]  ;;  %v3497_v43 = vpack.c.bf16 %v995_v36, %v991_v35  ;;  %v2987_v49 = vpack.c.bf16 %v992_v41, %v988_v40  ;;  %v3005_v35 = vpack.c.bf16 %v1033_v30, %v1029_v29  ;;  %v1028_v36 = vld [vmem:[%s6980_s1 + $0x1f00] sm:$0xff]  ;;  %v1037_v41 = vld [vmem:[%s6980_s1 + $0x1f48] sm:$0xff] }
 0x1cc   :  { %3478 = vmatprep.subr.bf16.mxu1 %v3477_v47  ;;  %v999_v47 = vld [vmem:[%s6980_s1 + $0x1e18] sm:$0xff]  ;;  %v3499_v50 = vpack.c.bf16 %v994_v44, %v990_v42  ;;  %v1034_v40 = vld [vmem:[%s6980_s1 + $0x1f30] sm:$0xff]  ;;  %v1041_v42 = vld [vmem:[%s6980_s1 + $0x1f68] sm:$0xff] }
 0x1cd   :  { %v1043_v44 = vld [vmem:[%s6980_s1 + $0x1f78] sm:$0xff]  ;;  %v34_v29 = vld [vmem:[%s6981_s0 + $0x70] sm:$0xff] }
 0x1ce   :  { %2968 = vmatpush1.bf16.msra.mxu0 %v2967_v53  ;;  %v1000_v53 = vld [vmem:[%s6980_s1 + $0x1e20] sm:$0xff] }
 0x1cf   :  { %3480 = vmatpush1.bf16.msra.mxu1 %v3479_v54  ;;  %2970 = vmatprep.subr.bf16.mxu0 %v2969_v55  ;;  %v998_v54 = vld [vmem:[%s6980_s1 + $0x1e10] sm:$0xff]  ;;  %v3501_v55 = vpack.c.bf16 %v1003_v48, %v999_v47  ;;  %v2991_v61 = vpack.c.bf16 %v1000_v53, %v996_v52  ;;  %v3009_v47 = vpack.c.bf16 %v1041_v42, %v1037_v41  ;;  %v1036_v48 = vld [vmem:[%s6980_s1 + $0x1f40] sm:$0xff]  ;;  %v1045_v53 = vld [vmem:[%s6980_s1 + $0x1f88] sm:$0xff] }
 0x1d0   :  { %3482 = vmatprep.subr.bf16.mxu1 %v3481_v59  ;;  %v1007_v59 = vld [vmem:[%s6980_s1 + $0x1e58] sm:$0xff]  ;;  %v3503_v62 = vpack.c.bf16 %v1002_v56, %v998_v54  ;;  %v1042_v52 = vld [vmem:[%s6980_s1 + $0x1f70] sm:$0xff]  ;;  %v1049_v54 = vld [vmem:[%s6980_s1 + $0x1fa8] sm:$0xff] }
 0x1d1   :  { %v1051_v56 = vld [vmem:[%s6980_s1 + $0x1fb8] sm:$0xff]  ;;  %v2275_v41 = vld [vmem:[%s6982_s3 + $0x1a8] sm:$0xff] }
 0x1d2   :  { %2972 = vmatpush1.bf16.msra.mxu0 %v2971_v1  ;;  %v1008_v1 = vld [vmem:[%s6980_s1 + $0x1e60] sm:$0xff] }
 0x1d3   :  { %3484 = vmatpush1.bf16.msra.mxu1 %v3483_v2  ;;  %2974 = vmatprep.subr.bf16.mxu0 %v2973_v3  ;;  %v1006_v2 = vld [vmem:[%s6980_s1 + $0x1e50] sm:$0xff]  ;;  %v3505_v3 = vpack.c.bf16 %v1011_v60, %v1007_v59  ;;  %v2995_v9 = vpack.c.bf16 %v1008_v1, %v1004_v0  ;;  %v3013_v59 = vpack.c.bf16 %v1049_v54, %v1045_v53  ;;  %v1044_v60 = vld [vmem:[%s6980_s1 + $0x1f80] sm:$0xff]  ;;  %v1053_v1 = vld [vmem:[%s6980_s1 + $0x1fc8] sm:$0xff] }
 0x1d4   :  { %3486 = vmatprep.subr.bf16.mxu1 %v3485_v7  ;;  %v1015_v7 = vld [vmem:[%s6980_s1 + $0x1e98] sm:$0xff]  ;;  %v3507_v10 = vpack.c.bf16 %v1010_v4, %v1006_v2  ;;  %v1050_v0 = vld [vmem:[%s6980_s1 + $0x1fb0] sm:$0xff]  ;;  %v1057_v2 = vld [vmem:[%s6980_s1 + $0x1fe8] sm:$0xff] }
 0x1d5   :  { %v1059_v4 = vld [vmem:[%s6980_s1 + $0x1ff8] sm:$0xff] }
 0x1d6   :  { %2976 = vmatpush1.bf16.msra.mxu0 %v2975_v13  ;;  %v1016_v13 = vld [vmem:[%s6980_s1 + $0x1ea0] sm:$0xff]  ;;  %v2277_v53 = vld [vmem:[%s6982_s3 + $0x1b8] sm:$0xff] }
 0x1d7   :  { %3488 = vmatpush1.bf16.msra.mxu1 %v3487_v14  ;;  %2978 = vmatprep.subr.bf16.mxu0 %v2977_v15  ;;  %v1014_v14 = vld [vmem:[%s6980_s1 + $0x1e90] sm:$0xff]  ;;  %v3509_v15 = vpack.c.bf16 %v1019_v8, %v1015_v7  ;;  %v2999_v21 = vpack.c.bf16 %v1016_v13, %v1012_v12  ;;  %v3017_v7 = vpack.c.bf16 %v1057_v2, %v1053_v1  ;;  %v1052_v8 = vld [vmem:[%s6980_s1 + $0x1fc0] sm:$0xff]  ;;  %v2279_v1 = vld [vmem:[%s6982_s3 + $0x1c8] sm:$0xff] }
 0x1d8   :  { %3490 = vmatprep.subr.bf16.mxu1 %v3489_v19  ;;  %v1023_v19 = vld [vmem:[%s6980_s1 + $0x1ed8] sm:$0xff]  ;;  %v3511_v22 = vpack.c.bf16 %v1018_v16, %v1014_v14  ;;  %v1058_v12 = vld [vmem:[%s6980_s1 + $0x1ff0] sm:$0xff]  ;;  %v2238_v13 = vld [vmem:[%s6982_s3 + $0x80] sm:$0xff] }
 0x1d9   :  { %v2239_v14 = vld [vmem:[%s6982_s3 + $0x88] sm:$0xff] }
 0x1da   :  { %2980 = vmatpush1.bf16.msra.mxu0 %v2979_v25  ;;  %v1024_v25 = vld [vmem:[%s6980_s1 + $0x1ee0] sm:$0xff]  ;;  %v2271_v16 = vld [vmem:[%s6982_s3 + $0x188] sm:$0xff] }
 0x1db   :  { %3492 = vmatpush1.bf16.msra.mxu1 %v3491_v26  ;;  %2982 = vmatprep.subr.bf16.mxu0 %v2981_v27  ;;  %v1022_v26 = vld [vmem:[%s6980_s1 + $0x1ed0] sm:$0xff]  ;;  %v3513_v27 = vpack.c.bf16 %v1027_v20, %v1023_v19  ;;  %v3003_v33 = vpack.c.bf16 %v1024_v25, %v1020_v24  ;;  %v3533_v19 = vpack.c.bf16 %v2239_v14, %v2238_v13  ;;  %v2222_v20 = vld [vmem:[%s6982_s3] sm:$0xff]  ;;  %v2255_v24 = vld [vmem:[%s6982_s3 + $0x108] sm:$0xff] }
 0x1dc   :  { %3494 = vmatprep.subr.bf16.mxu1 %v3493_v31  ;;  %v1031_v31 = vld [vmem:[%s6980_s1 + $0x1f18] sm:$0xff]  ;;  %v3515_v34 = vpack.c.bf16 %v1026_v28, %v1022_v26  ;;  %v2240_v25 = vld [vmem:[%s6982_s3 + $0x90] sm:$0xff] }
 0x1dd   :  { %v2241_v26 = vld [vmem:[%s6982_s3 + $0x98] sm:$0xff] }
 0x1de   :  { %2984 = vmatpush1.bf16.msra.mxu0 %v2983_v37  ;;  %v1032_v37 = vld [vmem:[%s6980_s1 + $0x1f20] sm:$0xff]  ;;  %v2273_v28 = vld [vmem:[%s6982_s3 + $0x198] sm:$0xff] }
 0x1df   :  { %3496 = vmatpush1.bf16.msra.mxu1 %v3495_v38  ;;  %2986 = vmatprep.subr.bf16.mxu0 %v2985_v39  ;;  %v1030_v38 = vld [vmem:[%s6980_s1 + $0x1f10] sm:$0xff]  ;;  %v3517_v39 = vpack.c.bf16 %v1035_v32, %v1031_v31  ;;  %v3007_v45 = vpack.c.bf16 %v1032_v37, %v1028_v36  ;;  %v3537_v32 = vpack.c.bf16 %v2241_v26, %v2240_v25  ;;  %v2257_v37 = vld [vmem:[%s6982_s3 + $0x118] sm:$0xff]  ;;  %v2283_v25 = vld [vmem:[%s6982_s3 + $0x1e8] sm:$0xff] }
 0x1e0   :  { %3498 = vmatprep.subr.bf16.mxu1 %v3497_v43  ;;  %v1039_v43 = vld [vmem:[%s6980_s1 + $0x1f58] sm:$0xff]  ;;  %v3519_v46 = vpack.c.bf16 %v1034_v40, %v1030_v38  ;;  %v2242_v38 = vld [vmem:[%s6982_s3 + $0xa0] sm:$0xff] }
 0x1e1   :  { %v2274_v40 = vld [vmem:[%s6982_s3 + $0x1a0] sm:$0xff]  ;;  %v2281_v13 = vld [vmem:[%s6982_s3 + $0x1d8] sm:$0xff] }
 0x1e2   :  { %2988 = vmatpush1.bf16.msra.mxu0 %v2987_v49  ;;  %v1040_v49 = vld [vmem:[%s6980_s1 + $0x1f60] sm:$0xff] }
 0x1e3   :  { %3500 = vmatpush1.bf16.msra.mxu1 %v3499_v50  ;;  %2990 = vmatprep.subr.bf16.mxu0 %v2989_v51  ;;  %v1038_v50 = vld [vmem:[%s6980_s1 + $0x1f50] sm:$0xff]  ;;  %v3521_v51 = vpack.c.bf16 %v1043_v44, %v1039_v43  ;;  %v3011_v57 = vpack.c.bf16 %v1040_v49, %v1036_v48  ;;  %v3573_v48 = vpack.c.bf16 %v2275_v41, %v2274_v40  ;;  %v2259_v49 = vld [vmem:[%s6982_s3 + $0x128] sm:$0xff]  ;;  %v2285_v40 = vld [vmem:[%s6982_s3 + $0x1f8] sm:$0xff] }
 0x1e4   :  { %3502 = vmatprep.subr.bf16.mxu1 %v3501_v55  ;;  %v1047_v55 = vld [vmem:[%s6980_s1 + $0x1f98] sm:$0xff]  ;;  %v3523_v58 = vpack.c.bf16 %v1042_v52, %v1038_v50  ;;  %v2244_v50 = vld [vmem:[%s6982_s3 + $0xb0] sm:$0xff] }
 0x1e5   :  { %v2276_v52 = vld [vmem:[%s6982_s3 + $0x1b0] sm:$0xff] }
 0x1e6   :  { %2992 = vmatpush1.bf16.msra.mxu0 %v2991_v61  ;;  %v1048_v61 = vld [vmem:[%s6980_s1 + $0x1fa0] sm:$0xff]  ;;  %v2236_v41 = vld [vmem:[%s6982_s3 + $0x70] sm:$0xff] }
 0x1e7   :  { %3504 = vmatpush1.bf16.msra.mxu1 %v3503_v62  ;;  %2994 = vmatprep.subr.bf16.mxu0 %v2993_v63  ;;  %v1046_v62 = vld [vmem:[%s6980_s1 + $0x1f90] sm:$0xff]  ;;  %v3525_v63 = vpack.c.bf16 %v1051_v56, %v1047_v55  ;;  %v3015_v5 = vpack.c.bf16 %v1048_v61, %v1044_v60  ;;  %v3577_v60 = vpack.c.bf16 %v2277_v53, %v2276_v52  ;;  %v2261_v61 = vld [vmem:[%s6982_s3 + $0x138] sm:$0xff] }
 0x1e8   :  { %3506 = vmatprep.subr.bf16.mxu1 %v3505_v3  ;;  %v1055_v3 = vld [vmem:[%s6980_s1 + $0x1fd8] sm:$0xff]  ;;  %v3527_v6 = vpack.c.bf16 %v1050_v0, %v1046_v62  ;;  %v2246_v62 = vld [vmem:[%s6982_s3 + $0xc0] sm:$0xff] }
 0x1e9   :  { %v2278_v0 = vld [vmem:[%s6982_s3 + $0x1c0] sm:$0xff] }
 0x1ea   :  { %2996 = vmatpush1.bf16.msra.mxu0 %v2995_v9  ;;  %v1056_v9 = vld [vmem:[%s6980_s1 + $0x1fe0] sm:$0xff] }
 0x1eb   :  { %3508 = vmatpush1.bf16.msra.mxu1 %v3507_v10  ;;  %2998 = vmatprep.subr.bf16.mxu0 %v2997_v11  ;;  %v1054_v10 = vld [vmem:[%s6980_s1 + $0x1fd0] sm:$0xff]  ;;  %v3529_v11 = vpack.c.bf16 %v1059_v4, %v1055_v3  ;;  %v3019_v17 = vpack.c.bf16 %v1056_v9, %v1052_v8  ;;  %v3581_v8 = vpack.c.bf16 %v2279_v1, %v2278_v0  ;;  %v2263_v9 = vld [vmem:[%s6982_s3 + $0x148] sm:$0xff] }
 0x1ec   :  { %3510 = vmatprep.subr.bf16.mxu1 %v3509_v15  ;;  %v2270_v15 = vld [vmem:[%s6982_s3 + $0x180] sm:$0xff]  ;;  %v3531_v18 = vpack.c.bf16 %v1058_v12, %v1054_v10  ;;  %v2248_v10 = vld [vmem:[%s6982_s3 + $0xd0] sm:$0xff] }
 0x1ed   :  { %v2280_v12 = vld [vmem:[%s6982_s3 + $0x1d0] sm:$0xff] }
 0x1ee   :  { %3000 = vmatpush1.bf16.msra.mxu0 %v2999_v21  ;;  %v2223_v21 = vld [vmem:[%s6982_s3 + $0x8] sm:$0xff] }
 0x1ef   :  { %3512 = vmatpush1.bf16.msra.mxu1 %v3511_v22  ;;  %3002 = vmatprep.subr.bf16.mxu0 %v3001_v23  ;;  %v2254_v22 = vld [vmem:[%s6982_s3 + $0x100] sm:$0xff]  ;;  %v3565_v23 = vpack.c.bf16 %v2271_v16, %v2270_v15  ;;  %v3535_v30 = vpack.c.bf16 %v2223_v21, %v2222_v20  ;;  %v3585_v20 = vpack.c.bf16 %v2281_v13, %v2280_v12  ;;  %v2265_v21 = vld [vmem:[%s6982_s3 + $0x158] sm:$0xff] }
 0x1f0   :  { %3514 = vmatprep.subr.bf16.mxu1 %v3513_v27  ;;  %v2272_v27 = vld [vmem:[%s6982_s3 + $0x190] sm:$0xff]  ;;  %v3567_v31 = vpack.c.bf16 %v2255_v24, %v2254_v22  ;;  %v2250_v22 = vld [vmem:[%s6982_s3 + $0xe0] sm:$0xff] }
 0x1f1   :  { %v3569_v36 = vpack.c.bf16 %v2273_v28, %v2272_v27  ;;  %v2282_v24 = vld [vmem:[%s6982_s3 + $0x1e0] sm:$0xff] }
 0x1f2   :  { %3004 = vmatpush1.bf16.msra.mxu0 %v3003_v33  ;;  %v2224_v33 = vld [vmem:[%s6982_s3 + $0x10] sm:$0xff] }
 0x1f3   :  { %3516 = vmatpush1.bf16.msra.mxu1 %v3515_v34  ;;  %3006 = vmatprep.subr.bf16.mxu0 %v3005_v35  ;;  %v2225_v34 = vld [vmem:[%s6982_s3 + $0x18] sm:$0xff]  ;;  %v2256_v35 = vld [vmem:[%s6982_s3 + $0x110] sm:$0xff] }
 0x1f4   :  { %3518 = vmatprep.subr.bf16.mxu1 %v3517_v39  ;;  %v2243_v39 = vld [vmem:[%s6982_s3 + $0xa8] sm:$0xff]  ;;  %v3539_v42 = vpack.c.bf16 %v2225_v34, %v2224_v33  ;;  %v3571_v43 = vpack.c.bf16 %v2257_v37, %v2256_v35  ;;  %v2253_v37 = vld [vmem:[%s6982_s3 + $0xf8] sm:$0xff] }
 0x1f5   :  { %v3541_v44 = vpack.c.bf16 %v2243_v39, %v2242_v38  ;;  %v2267_v34 = vld [vmem:[%s6982_s3 + $0x168] sm:$0xff]  ;;  %v2284_v38 = vld [vmem:[%s6982_s3 + $0x1f0] sm:$0xff] }
 0x1f6   :  { %3008 = vmatpush1.bf16.msra.mxu0 %v3007_v45  ;;  %v2226_v45 = vld [vmem:[%s6982_s3 + $0x20] sm:$0xff] }
 0x1f7   :  { %3520 = vmatpush1.bf16.msra.mxu1 %v3519_v46  ;;  %3010 = vmatprep.subr.bf16.mxu0 %v3009_v47  ;;  %v2227_v46 = vld [vmem:[%s6982_s3 + $0x28] sm:$0xff]  ;;  %v2258_v47 = vld [vmem:[%s6982_s3 + $0x120] sm:$0xff] }
 0x1f8   :  { %3522 = vmatprep.subr.bf16.mxu1 %v3521_v51  ;;  %v2245_v51 = vld [vmem:[%s6982_s3 + $0xb8] sm:$0xff]  ;;  %v3543_v54 = vpack.c.bf16 %v2227_v46, %v2226_v45  ;;  %v3575_v55 = vpack.c.bf16 %v2259_v49, %v2258_v47  ;;  %v2268_v45 = vld [vmem:[%s6982_s3 + $0x170] sm:$0xff] }
 0x1f9   :  { %v3545_v56 = vpack.c.bf16 %v2245_v51, %v2244_v50  ;;  %v2269_v46 = vld [vmem:[%s6982_s3 + $0x178] sm:$0xff]  ;;  %v1060_v51 = vld [vmem:[%s6983_s2] sm:$0xf] }
 0x1fa   :  { %3012 = vmatpush1.bf16.msra.mxu0 %v3011_v57  ;;  %v2228_v57 = vld [vmem:[%s6982_s3 + $0x30] sm:$0xff]  ;;  %v3595_v47 = vpack.c.bf16 %v2269_v46, %v2268_v45 }
 0x1fb   :  { %3524 = vmatpush1.bf16.msra.mxu1 %v3523_v58  ;;  %3014 = vmatprep.subr.bf16.mxu0 %v3013_v59  ;;  %v2229_v58 = vld [vmem:[%s6982_s3 + $0x38] sm:$0xff]  ;;  %v2260_v59 = vld [vmem:[%s6982_s3 + $0x130] sm:$0xff] }
 0x1fc   :  { %3526 = vmatprep.subr.bf16.mxu1 %v3525_v63  ;;  %v2247_v63 = vld [vmem:[%s6982_s3 + $0xc8] sm:$0xff]  ;;  %v3547_v2 = vpack.c.bf16 %v2229_v58, %v2228_v57  ;;  %v3579_v3 = vpack.c.bf16 %v2261_v61, %v2260_v59 }
 0x1fd   :  { %v3549_v4 = vpack.c.bf16 %v2247_v63, %v2246_v62 }
 0x1fe   :  { %3016 = vmatpush1.bf16.msra.mxu0 %v3015_v5  ;;  %v2230_v5 = vld [vmem:[%s6982_s3 + $0x40] sm:$0xff] }
 0x1ff   :  { %3528 = vmatpush1.bf16.msra.mxu1 %v3527_v6  ;;  %3018 = vmatprep.subr.bf16.mxu0 %v3017_v7  ;;  %v2231_v6 = vld [vmem:[%s6982_s3 + $0x48] sm:$0xff]  ;;  %v2262_v7 = vld [vmem:[%s6982_s3 + $0x140] sm:$0xff] }
 0x200   :  { %3530 = vmatprep.subr.bf16.mxu1 %v3529_v11  ;;  %v2249_v11 = vld [vmem:[%s6982_s3 + $0xd8] sm:$0xff]  ;;  %v3551_v14 = vpack.c.bf16 %v2231_v6, %v2230_v5  ;;  %v3583_v15 = vpack.c.bf16 %v2263_v9, %v2262_v7  ;;  %v2438_v9 = vld [vmem:[%s6984_s4] ss:$0 sm:$0xff] }
 0x201   :  { %v3553_v16 = vpack.c.bf16 %v2249_v11, %v2248_v10 }
 0x202   :  { %3020 = vmatpush1.bf16.msra.mxu0 %v3019_v17  ;;  %v2232_v17 = vld [vmem:[%s6982_s3 + $0x50] sm:$0xff] }
 0x203   :  { %3532 = vmatpush1.bf16.msra.mxu1 %v3531_v18  ;;  %3534 = vmatprep.subr.bf16.mxu0 %v3533_v19  ;;  %v2233_v18 = vld [vmem:[%s6982_s3 + $0x58] sm:$0xff]  ;;  %v2264_v19 = vld [vmem:[%s6982_s3 + $0x150] sm:$0xff] }
 0x204   :  { %3566 = vmatprep.subr.bf16.mxu1 %v3565_v23  ;;  %v2251_v23 = vld [vmem:[%s6982_s3 + $0xe8] sm:$0xff]  ;;  %v3555_v26 = vpack.c.bf16 %v2233_v18, %v2232_v17  ;;  %v3587_v27 = vpack.c.bf16 %v2265_v21, %v2264_v19 }
 0x205   :  { %1644 = vmatmul.mubr.f32.vlgmr.msra.gmra.mrb[0].mxu0 %v34_v29  ;;  %v3557_v28 = vpack.c.bf16 %v2251_v23, %v2250_v22 }
 0x206   :  { %2212 = vmatmul.mubr.f32.vlgmr.msra.gmra.mrb[0].mxu1 %v34_v29  ;;  %3536 = vmatpush3.bf16.msra.mxu0 %v3535_v30  ;;  %v3589_v29 = vpack.c.bf16 %v2283_v25, %v2282_v24  ;;  %v2234_v30 = vld [vmem:[%s6982_s3 + $0x60] sm:$0xff] }
 0x207   :  { %3568 = vmatpush3.bf16.msra.mxu1 %v3567_v31  ;;  %3538 = vmatprep.subr.bf16.mxu0 %v3537_v32  ;;  %v2235_v31 = vld [vmem:[%s6982_s3 + $0x68] sm:$0xff]  ;;  %v2266_v32 = vld [vmem:[%s6982_s3 + $0x160] sm:$0xff] }
 0x208   :  { %3570 = vmatprep.subr.bf16.mxu1 %v3569_v36  ;;  %v3559_v33 = vpack.c.bf16 %v2235_v31, %v2234_v30  ;;  %v3591_v35 = vpack.c.bf16 %v2267_v34, %v2266_v32  ;;  %v2252_v36 = vld [vmem:[%s6982_s3 + $0xf0] sm:$0xff] }
 0x209   :  { %v3561_v39 = vpack.c.bf16 %v2253_v37, %v2252_v36 }
 0x20a   :  { %3540 = vmatpush3.bf16.msra.mxu0 %v3539_v42  ;;  %v2237_v42 = vld [vmem:[%s6982_s3 + $0x78] sm:$0xff] }
 0x20b   :  { %3572 = vmatpush3.bf16.msra.mxu1 %v3571_v43  ;;  %3542 = vmatprep.subr.bf16.mxu0 %v3541_v44  ;;  %v3593_v43 = vpack.c.bf16 %v2285_v40, %v2284_v38  ;;  %v3563_v44 = vpack.c.bf16 %v2237_v42, %v2236_v41 }
 0x20c   :  { %3574 = vmatprep.subr.bf16.mxu1 %v3573_v48  ;;  %v1062_v48 = vlaneseq }
 0x20e   :  { %3544 = vmatpush3.bf16.msra.mxu0 %v3543_v54  ;;  %v1063_v49 = vshrl.u32 %v1062_v48, 7 }
 0x20f   :  { %3576 = vmatpush3.bf16.msra.mxu1 %v3575_v55  ;;  %3546 = vmatprep.subr.bf16.mxu0 %v3545_v56 }
 0x210   :  { %3578 = vmatprep.subr.bf16.mxu1 %v3577_v60  ;;  %v1064_v50 = vsub.s32 0, %v1063_v49  ;;  %v1072_v52 = vsub.s32 2, %v1063_v49  ;;  %v1068_v53 = vsub.s32 1, %v1063_v49  ;;  %v1076_v54 = vsub.s32 3, %v1063_v49 }
 0x212   :  { %3548 = vmatpush3.bf16.msra.mxu0 %v3547_v2  ;;  %v1065_v55 = vrot.slane %v1060_v51, %v1064_v50  ;;  %v1073_v56 = vrot.slane %v1060_v51, %v1072_v52  ;;  %v1069_v57 = vrot.slane %v1060_v51, %v1068_v53  ;;  %v1077_v58 = vrot.slane %v1060_v51, %v1076_v54 }
 0x213   :  { %3580 = vmatpush3.bf16.msra.mxu1 %v3579_v3  ;;  %3550 = vmatprep.subr.bf16.mxu0 %v3549_v4 }
 0x214   :  { %3582 = vmatprep.subr.bf16.mxu1 %v3581_v8 }
 0x216   :  { %3552 = vmatpush3.bf16.msra.mxu0 %v3551_v14 }
 0x217   :  { %3584 = vmatpush3.bf16.msra.mxu1 %v3583_v15  ;;  %3554 = vmatprep.subr.bf16.mxu0 %v3553_v16 }
 0x218   :  { %3586 = vmatprep.subr.bf16.mxu1 %v3585_v20 }
 0x21a   :  { %3556 = vmatpush3.bf16.msra.mxu0 %v3555_v26 }
 0x21b   :  { %3588 = vmatpush3.bf16.msra.mxu1 %v3587_v27  ;;  %3558 = vmatprep.subr.bf16.mxu0 %v3557_v28 }
 0x21c   :  { %3590 = vmatprep.subr.bf16.mxu1 %v3589_v29 }
 0x21e   :  { %3560 = vmatpush3.bf16.msra.mxu0 %v3559_v33 }
 0x21f   :  { %3592 = vmatpush3.bf16.msra.mxu1 %v3591_v35  ;;  %3562 = vmatprep.subr.bf16.mxu0 %v3561_v39 }
 0x220   :  { %3594 = vmatprep.subr.bf16.mxu1 %v3593_v43 }
 0x222   :  { %3564 = vmatpush3.bf16.msra.mxu0 %v3563_v44 }
 0x223   :  { %3596 = vmatpush3.bf16.msra.mxu1 %v3595_v47 }
 0x2d8   :  { %v1645_v59 = vpop.f32.mrb[0].mxu0 }
 0x2d9   :  { %v3597_v60 = vadd.f32 %v1645_v59, %v1065_v55  ;;  %v2213_v61 = vpop.f32.mrb[0].mxu1  ;;  %v1647_v62 = vpop.f32.mrb[1].mxu0 }
 0x2da   :  { %v3599_v63 = vadd.f32 %v2213_v61, %v1073_v56  ;;  %v3598_v0 = vadd.f32 %v1647_v62, %v1069_v57  ;;  %v2215_v1 = vpop.f32.mrb[1].mxu1 }
 0x2db   :  { %v3600_v2 = vadd.f32 %v2215_v1, %v1077_v58  ;;  %v2218_v4 = vmax.f32 %v3597_v60, 0.0 }
 0x2dc   :  { %v2219_v3 = vmax.f32 %v3598_v0, 0.0  ;;  %v2220_v6 = vmax.f32 %v3599_v63, 0.0 }
 0x2dd   :  { %v2221_v5 = vmax.f32 %v3600_v2, 0.0 }
 0x2de   :  { %2357 = vmatprep.mubr.f32.mxu0 %v2219_v3 }
 0x2df   :  { %2427 = vmatprep.mubr.f32.mxu1 %v2221_v5  ;;  %2358 = vmatmul.mubr.f32.vlgmr.msra.gmra.mrb[2].mxu0 %v2218_v4 }
 0x2e0   :  { %2428 = vmatmul.mubr.f32.vlgmr.msra.gmra.mrb[2].mxu1 %v2220_v6 }
 0x3b2   :  { %v2471_v7 = vpop.f32.mrb[2].mxu0 }
 0x3b3   :  { %v2506_v8 = vpop.f32.mrb[2].mxu1  ;;  %v2472_v10 = vpop.f32.mrb[3].mxu0 }
 0x3b4   :  { %v2473_v11 = vadd.f32 %v2472_v10, %v2471_v7  ;;  %v2507_v12 = vpop.f32.mrb[3].mxu1 }
 0x3b5   :  { %v2508_v13 = vadd.f32 %v2507_v12, %v2506_v8 }
 0x3b6   :  { %v2360_v14 = vadd.f32 %v2473_v11, %v2438_v9 }
 0x3b8   :  { %v2430_v15 = vadd.f32 %v2508_v13, %v2360_v14 }
 0x3ba   :  { %2433 = vst [vmem:[%s6985_s5] sm:$0xff] %v2430_v15 }

</bundles_post_ra>
